<compile_context>
chip_gen: v5e
topology: v5e:2x2
jax: 0.10.0
libtpu: 0.0.40
codegen_flags: <defaults>
</compile_context>

<pallas_src>
import jax
import jax.numpy as jnp
import numpy as np
from jax.experimental import pallas as pl
from jax.experimental.pallas import tpu as pltpu


DP = 128          # lane-padded node-feature width (real width D = 3*H <= 96)
X0_COL = DP - 2   # pad lane carrying pose x-coordinate inside the input slab
X1_COL = DP - 1   # pad lane carrying pose y-coordinate


def _round_up(x, m):
    return -(-x // m) * m


# --------------------------- host-side edge packing ------------------------ #

def _per_batch_edge_onehots(edge_index, B, T, K, K_pad):
    """Group edges by batch element and build (B, E_pad, N_p) one-hot
    gather/scatter matrices over *padded* local node ids (t*K_pad + j).
    Padded edge rows are all-zero (they gather zeros and scatter nothing)."""
    src = np.asarray(edge_index[0])
    dst = np.asarray(edge_index[1])
    nodes_per_batch = T * K
    b_src = src // nodes_per_batch
    b_dst = dst // nodes_per_batch
    assert np.all(b_src == b_dst), "edges must not cross batch elements"
    counts = np.bincount(b_src, minlength=B) if src.size else np.zeros(B, np.int64)
    e_max = int(counts.max()) if counts.size else 0
    E_pad = max(128, _round_up(max(e_max, 1), 128))   # lane/sublane aligned
    N_p = T * K_pad
    gsrc = np.zeros((B, E_pad, N_p), np.float32)
    gdst = np.zeros((B, E_pad, N_p), np.float32)
    fill = np.zeros(B, np.int64)
    for s, d, b in zip(src, dst, b_src):
        e = fill[b]
        fill[b] += 1
        t_s, j_s = (s % nodes_per_batch) // K, s % K
        t_d, j_d = (d % nodes_per_batch) // K, d % K
        gsrc[b, e, t_s * K_pad + j_s] = 1.0
        gdst[b, e, t_d * K_pad + j_d] = 1.0
    return gsrc, gdst


# ------------------------------ model params ------------------------------- #

def init_params(key, input_dim=2, visual_dim=2, hidden_dim=32, output_dim=2,
                num_joints=17, num_layers=4):
    D = hidden_dim * 3
    n_layers = num_layers // 2
    keys = iter(jax.random.split(key, 64))

    def mat(kin, kout, scale=0.1):
        return jax.random.normal(next(keys), (kin, kout), jnp.float32) * scale

    params = {
        "num_joints": num_joints,
        "hidden_dim": hidden_dim,
        "node_in_dim": D,
        "wvis": mat(visual_dim, hidden_dim), "bvis": mat(1, hidden_dim),
        "wpos": mat(input_dim, hidden_dim), "bpos": mat(1, hidden_dim),
        "emb": mat(num_joints, hidden_dim),
        "wp1": mat(D, hidden_dim), "bp1": mat(1, hidden_dim),
        "wp2": mat(hidden_dim, output_dim), "bp2": mat(1, output_dim),
        "spatial_layers": [], "temporal_layers": [],
    }
    for name in ("spatial_layers", "temporal_layers"):
        for _ in range(n_layers):
            params[name].append({
                "wq": mat(D, D), "wk": mat(D, D), "wv": mat(D, D),
                "w1x": mat(D, D), "w1a": mat(D, D), "b1": mat(1, D),
                "w2": mat(D, D), "b2": mat(1, D),
            })
    return params


# ------------------------------ fused forward ------------------------------- #

def pose_dynamics_gnn_forward(params, pose_sequence, spatial_edge_index,
                              temporal_edge_index, joint_types):
    B, T, K, _ = pose_sequence.shape
    H = params["hidden_dim"]
    D = params["node_in_dim"]                 # 3*H real feature width
    assert D <= X0_COL, "feature width + pose lanes must fit in 128"
    n_pairs = len(params["spatial_layers"])
    L = 2 * n_pairs
    OUT = params["wp2"].shape[1]

    # --- node padding: pad joints per frame so the node axis is lane-dense ---
    K_pad = _round_up(K, 8)
    bump = 0
    while (T * K_pad) % 128 != 0 and bump < 16:   # prefer N_p % 128 == 0
        K_pad += 8
        bump += 1
    N_p = T * K_pad
    last_start = (T - 1) * K_pad

    # --- per-batch edge gather/scatter one-hots (spatial | temporal packed) ---
    gsrc_s, gdst_s = _per_batch_edge_onehots(spatial_edge_index, B, T, K, K_pad)
    gsrc_t, gdst_t = _per_batch_edge_onehots(temporal_edge_index, B, T, K, K_pad)
    E_s, E_t = gsrc_s.shape[1], gsrc_t.shape[1]
    E_all = E_s + E_t
    gsrc_np = np.concatenate([gsrc_s, gsrc_t], axis=1)            # (B, E_all, N_p)
    gdst_np = np.concatenate([gdst_s, gdst_t], axis=1)
    gsrc_all = jnp.asarray(gsrc_np, jnp.bfloat16)
    gdst_all = jnp.asarray(gdst_np, jnp.bfloat16)
    gdstT_all = jnp.asarray(np.transpose(gdst_np, (0, 2, 1)), jnp.bfloat16)
    # TODO(synk): for long sequences (N_p >~ 512) the dense one-hots grow as
    # O(E*N_p); tile the edge axis or switch to scalar-prefetched index gather.

    # -------------------------- pack / pad weights -------------------------- #
    def pad2(w, r, c, dtype=jnp.float32):
        return (jnp.zeros((r, c), jnp.float32)
                .at[:w.shape[0], :w.shape[1]].set(w).astype(dtype))

    # Encoder as column-blocked [vis | pos | 0...] outer-product weights (VPU).
    ew0 = (jnp.zeros((1, DP), jnp.float32)
           .at[0, 0:H].set(params["wvis"][0]).at[0, H:2 * H].set(params["wpos"][0]))
    ew1 = (jnp.zeros((1, DP), jnp.float32)
           .at[0, 0:H].set(params["wvis"][1]).at[0, H:2 * H].set(params["wpos"][1]))
    eb = (jnp.zeros((1, DP), jnp.float32)
          .at[:, 0:H].set(params["bvis"]).at[:, H:2 * H].set(params["bpos"]))

    # Input slab: joint-type embedding (cols [2H:3H)) + pose coords parked in
    # the two top pad lanes -> one lane-dense f32 transfer per batch element.
    ft = params["emb"][joint_types]                              # (B, K, H)
    ft = jnp.broadcast_to(ft[:, None], (B, T, K, H))
    slab = jnp.zeros((B, T, K_pad, DP), jnp.float32)
    slab = slab.at[:, :, :K, 2 * H:3 * H].set(ft)
    slab = slab.at[:, :, :K, X0_COL].set(pose_sequence[..., 0].astype(jnp.float32))
    slab = slab.at[:, :, :K, X1_COL].set(pose_sequence[..., 1].astype(jnp.float32))
    slab = slab.reshape(B, N_p, DP)

    # Attention layers, interleaved spatial/temporal, stacked along axis 0.
    layer_seq = []
    for sp, tp in zip(params["spatial_layers"], params["temporal_layers"]):
        layer_seq += [sp, tp]

    def pack_proj(lp):
        # fused [q | k | v | x-branch-of-update-MLP] projection, bf16 operand
        w = jnp.zeros((DP, 4 * DP), jnp.float32)
        w = w.at[:D, 0 * DP:0 * DP + D].set(lp["wq"])
        w = w.at[:D, 1 * DP:1 * DP + D].set(lp["wk"])
        w = w.at[:D, 2 * DP:2 * DP + D].set(lp["wv"])
        w = w.at[:D, 3 * DP:3 * DP + D].set(lp["w1x"])
        return w.astype(jnp.bfloat16)

    wproj = jnp.stack([pack_proj(lp) for lp in layer_seq])               # (L,DP,4DP)
    w1a = jnp.stack([pad2(lp["w1a"], DP, DP, jnp.bfloat16) for lp in layer_seq])
    b1 = jnp.stack([pad2(lp["b1"], 1, DP) for lp in layer_seq])
    w2 = jnp.stack([pad2(lp["w2"], DP, DP, jnp.bfloat16) for lp in layer_seq])
    b2 = jnp.stack([pad2(lp["b2"], 1, DP) for lp in layer_seq])

    wp1 = pad2(params["wp1"], DP, DP, jnp.bfloat16)
    bp1 = pad2(params["bp1"], 1, DP)
    wp2 = pad2(params["wp2"], DP, DP, jnp.bfloat16)
    bp2 = pad2(params["bp2"], 1, DP)

    # ------------------------------ fused kernel ---------------------------- #
    def kernel(slab_ref, gsrc_ref, gdst_ref, gdstT_ref,
               ew0_ref, ew1_ref, eb_ref,
               wproj_ref, w1a_ref, b1_ref, w2_ref, b2_ref,
               wp1_ref, bp1_ref, wp2_ref, bp2_ref,
               out_ref):
        slab_v = slab_ref[...]                                   # (N_p, DP) f32
        x0 = slab_v[:, X0_COL:X0_COL + 1]
        x1 = slab_v[:, X1_COL:X1_COL + 1]
        # encoder: relu(x0*W0 + x1*W1 + b) fills cols [0:2H); type embedding
        # (cols [2H:3H)) added post-relu; lanes >= D stay exactly zero.
        enc = jnp.maximum(x0 * ew0_ref[...] + x1 * ew1_ref[...] + eb_ref[...], 0.0)
        lane = jax.lax.broadcasted_iota(jnp.int32, (1, DP), 1)
        nf = enc + jnp.where(lane < D, slab_v, 0.0)              # (N_p, DP) f32

        def attn_layer(l, e_off, e_len, xl):
            gsrc = gsrc_ref[pl.ds(e_off, e_len), :]              # (E, N_p) bf16
            gdst = gdst_ref[pl.ds(e_off, e_len), :]              # (E, N_p) bf16
            gdstT = gdstT_ref[:, pl.ds(e_off, e_len)]            # (N_p, E) bf16
            xb = xl.astype(jnp.bfloat16)
            # fused q|k|v|x-mlp projection: one (128, 512) bf16 matmul, f32 acc
            proj = jnp.dot(xb, wproj_ref[l], preferred_element_type=jnp.float32)
            qkv_b = proj[:, :3 * DP].astype(jnp.bfloat16)
            # gather q at edge destinations, k|v at edge sources (one-hot matmuls)
            q_i = jnp.dot(gdst, qkv_b[:, :DP], preferred_element_type=jnp.float32)
            kv_j = jnp.dot(gsrc, qkv_b[:, DP:], preferred_element_type=jnp.float32)
            k_j = kv_j[:, :DP]
            v_j = kv_j[:, DP:]
            score = jnp.sum(q_i * k_j, axis=-1, keepdims=True)   # (E, 1), VPU/XLU
            alpha = jnp.where(score > 0, score, 0.01 * score)    # leaky_relu(0.01)
            msg = (v_j * alpha).astype(jnp.bfloat16)             # (E, DP)
            # scatter-add over destinations in natural (M,K)x(K,N) orientation
            agg = jnp.dot(gdstT, msg, preferred_element_type=jnp.float32)
            h = jnp.maximum(
                proj[:, 3 * DP:]
                + jnp.dot(agg.astype(jnp.bfloat16), w1a_ref[l],
                          preferred_element_type=jnp.float32)
                + b1_ref[l], 0.0)
            return (jnp.dot(h.astype(jnp.bfloat16), w2_ref[l],
                            preferred_element_type=jnp.float32)
                    + b2_ref[l] + xl)                            # residual in f32

        # static unroll; node features carried as a register value across layers.
        # TODO(synk): if L grows, move the layer index to an "arbitrary" grid
        # axis (index stacked weights by l in their BlockSpecs) with nf kept in
        # a VMEM scratch, instead of keeping all layers' weights resident.
        for i in range(n_pairs):
            nf = attn_layer(2 * i, 0, E_s, nf)                   # spatial
            nf = attn_layer(2 * i + 1, E_s, E_t, nf)             # temporal

        # prediction head on the (sublane-aligned) last-frame rows
        last = nf[last_start:last_start + K_pad, :].astype(jnp.bfloat16)
        hh = jnp.maximum(
            jnp.dot(last, wp1_ref[...], preferred_element_type=jnp.float32)
            + bp1_ref[...], 0.0)
        out_ref[...] = (jnp.dot(hh.astype(jnp.bfloat16), wp2_ref[...],
                                preferred_element_type=jnp.float32)
                        + bp2_ref[...])

    def per_batch(shape):
        return pl.BlockSpec((None,) + shape, lambda b: (b,) + (0,) * len(shape))

    def shared(shape):
        return pl.BlockSpec(shape, lambda b: (0,) * len(shape))

    in_specs = [
        per_batch((N_p, DP)),
        per_batch((E_all, N_p)), per_batch((E_all, N_p)), per_batch((N_p, E_all)),
        shared((1, DP)), shared((1, DP)), shared((1, DP)),
        shared((L, DP, 4 * DP)), shared((L, DP, DP)), shared((L, 1, DP)),
        shared((L, DP, DP)), shared((L, 1, DP)),
        shared((DP, DP)), shared((1, DP)), shared((DP, DP)), shared((1, DP)),
    ]

    out_slab = pl.pallas_call(
        kernel,
        out_shape=jax.ShapeDtypeStruct((B, K_pad, DP), jnp.float32),
        grid=(B,),
        in_specs=in_specs,
        out_specs=pl.BlockSpec((None, K_pad, DP), lambda b: (b, 0, 0)),
        compiler_params=pltpu.CompilerParams(
            dimension_semantics=("parallel",)),
    )(slab, gsrc_all, gdst_all, gdstT_all,
      ew0, ew1, eb, wproj, w1a, b1, w2, b2, wp1, bp1, wp2, bp2)

    return out_slab[:, :K, :OUT]


# --------------------------- pure-JAX reference ----------------------------- #

def _attention_layer_ref(x, edge_index, lp):
    src, dst = edge_index[0], edge_index[1]
    q = x @ lp["wq"]
    k = x @ lp["wk"]
    v = x @ lp["wv"]
    score = jnp.sum(q[dst] * k[src], axis=-1, keepdims=True)
    alpha = jnp.where(score > 0, score, 0.01 * score)
    msg = v[src] * alpha
    agg = jax.ops.segment_sum(msg, dst, num_segments=x.shape[0])
    h = jnp.maximum(x @ lp["w1x"] + agg @ lp["w1a"] + lp["b1"], 0.0)
    return h @ lp["w2"] + lp["b2"] + x


def reference_forward(params, pose_sequence, spatial_ei, temporal_ei, joint_types):
    B, T, K, _ = pose_sequence.shape
    N = B * T * K
    x = pose_sequence.reshape(N, -1).astype(jnp.float32)
    jt = jnp.broadcast_to(joint_types[:, None, :], (B, T, K)).reshape(N)
    fvis = jnp.maximum(x @ params["wvis"] + params["bvis"], 0.0)
    fpos = jnp.maximum(x @ params["wpos"] + params["bpos"], 0.0)
    ftype = params["emb"][jt]
    nf = jnp.concatenate([fvis, fpos, ftype], axis=-1)
    for sp, tp in zip(params["spatial_layers"], params["temporal_layers"]):
        nf = _attention_layer_ref(nf, spatial_ei, sp)
        nf = _attention_layer_ref(nf, temporal_ei, tp)
    nf = nf.reshape(B, T, K, -1)
    last = nf[:, -1]
    h = jnp.maximum(last @ params["wp1"] + params["bp1"], 0.0)
    return h @ params["wp2"] + params["bp2"]


# ---------------------------------- main ------------------------------------ #

def build_edges(B, T, K):
    """Chain spatial edges within a frame, bidirectional temporal edges per joint."""
    def nid(b, t, j):
        return (b * T + t) * K + j
    sp_src, sp_dst, tm_src, tm_dst = [], [], [], []
    for b in range(B):
        for t in range(T):
            for j in range(K - 1):
                a, c = nid(b, t, j), nid(b, t, j + 1)
                sp_src += [a, c]
                sp_dst += [c, a]
        for j in range(K):
            for t in range(T - 1):
                a, c = nid(b, t, j), nid(b, t + 1, j)
                tm_src += [a, c]
                tm_dst += [c, a]
    spatial = jnp.array([sp_src, sp_dst], dtype=jnp.int32)
    temporal = jnp.array([tm_src, tm_dst], dtype=jnp.int32)
    return spatial, temporal


if __name__ == "__main__":
    B, T, K, H = 2, 4, 17, 32  # batch, history frames, joints, hidden_dim

    key = jax.random.PRNGKey(0)
    pose_sequence = jax.random.normal(key, (B, T, K, 2), jnp.float32)
    joint_types = jnp.broadcast_to(jnp.arange(K, dtype=jnp.int32), (B, K))
    spatial_ei, temporal_ei = build_edges(B, T, K)

    params = init_params(jax.random.PRNGKey(42), input_dim=2, visual_dim=2,
                         hidden_dim=H, output_dim=2, num_joints=K, num_layers=4)

    pred = pose_dynamics_gnn_forward(params, pose_sequence, spatial_ei,
                                     temporal_ei, joint_types)
    pred = jax.block_until_ready(pred)

    ref = jax.block_until_ready(
        reference_forward(params, pose_sequence, spatial_ei, temporal_ei,
                          joint_types))

    assert pred.shape == (B, K, 2), pred.shape
    max_err = float(jnp.max(jnp.abs(pred - ref)))
    assert jnp.allclose(pred, ref, atol=3e-2, rtol=3e-2), f"max abs err {max_err}"
    print("KERNEL_OK")
</pallas_src>

<mosaic_0001>
module attributes {stable_mosaic.version = 11 : i64} {
  func.func @kernel(%arg0: i32, %arg1: memref<1x128x128xf32, #tpu.memory_space<vmem>>, %arg2: memref<1x256x128xbf16, #tpu.memory_space<vmem>>, %arg3: memref<1x256x128xbf16, #tpu.memory_space<vmem>>, %arg4: memref<1x128x256xbf16, #tpu.memory_space<vmem>>, %arg5: memref<1x128xf32, #tpu.memory_space<vmem>>, %arg6: memref<1x128xf32, #tpu.memory_space<vmem>>, %arg7: memref<1x128xf32, #tpu.memory_space<vmem>>, %arg8: memref<4x128x512xbf16, #tpu.memory_space<vmem>>, %arg9: memref<4x128x128xbf16, #tpu.memory_space<vmem>>, %arg10: memref<4x1x128xf32, #tpu.memory_space<vmem>>, %arg11: memref<4x128x128xbf16, #tpu.memory_space<vmem>>, %arg12: memref<4x1x128xf32, #tpu.memory_space<vmem>>, %arg13: memref<128x128xbf16, #tpu.memory_space<vmem>>, %arg14: memref<1x128xf32, #tpu.memory_space<vmem>>, %arg15: memref<128x128xbf16, #tpu.memory_space<vmem>>, %arg16: memref<1x128xf32, #tpu.memory_space<vmem>>, %arg17: memref<1x32x128xf32, #tpu.memory_space<vmem>>) attributes {dimension_semantics = [#tpu.dimension_semantics<parallel>], iteration_bounds = array<i64: 2>, scalar_prefetch = 0 : i64, scratch_operands = 0 : i64, tpu.core_type = #tpu.core_type<tc>, window_params = [{transform_indices = @transform_0, window_bounds = array<i64: 1, 128, 128>}, {transform_indices = @transform_1, window_bounds = array<i64: 1, 256, 128>}, {transform_indices = @transform_2, window_bounds = array<i64: 1, 256, 128>}, {transform_indices = @transform_3, window_bounds = array<i64: 1, 128, 256>}, {pipeline_mode = #tpu.pipeline_mode<synchronous>, transform_indices = @transform_4, window_bounds = array<i64: 1, 128>}, {pipeline_mode = #tpu.pipeline_mode<synchronous>, transform_indices = @transform_5, window_bounds = array<i64: 1, 128>}, {pipeline_mode = #tpu.pipeline_mode<synchronous>, transform_indices = @transform_6, window_bounds = array<i64: 1, 128>}, {pipeline_mode = #tpu.pipeline_mode<synchronous>, transform_indices = @transform_7, window_bounds = array<i64: 4, 128, 512>}, {pipeline_mode = #tpu.pipeline_mode<synchronous>, transform_indices = @transform_8, window_bounds = array<i64: 4, 128, 128>}, {pipeline_mode = #tpu.pipeline_mode<synchronous>, transform_indices = @transform_9, window_bounds = array<i64: 4, 1, 128>}, {pipeline_mode = #tpu.pipeline_mode<synchronous>, transform_indices = @transform_10, window_bounds = array<i64: 4, 128, 128>}, {pipeline_mode = #tpu.pipeline_mode<synchronous>, transform_indices = @transform_11, window_bounds = array<i64: 4, 1, 128>}, {pipeline_mode = #tpu.pipeline_mode<synchronous>, transform_indices = @transform_12, window_bounds = array<i64: 128, 128>}, {pipeline_mode = #tpu.pipeline_mode<synchronous>, transform_indices = @transform_13, window_bounds = array<i64: 1, 128>}, {pipeline_mode = #tpu.pipeline_mode<synchronous>, transform_indices = @transform_14, window_bounds = array<i64: 128, 128>}, {pipeline_mode = #tpu.pipeline_mode<synchronous>, transform_indices = @transform_15, window_bounds = array<i64: 1, 128>}, {transform_indices = @transform_16, window_bounds = array<i64: 1, 32, 128>}]} {
    %c0 = arith.constant 0 : index
    %c0_0 = arith.constant 0 : index
    %c0_1 = arith.constant 0 : index
    %0 = vector.load %arg1[%c0, %c0_0, %c0_1] : memref<1x128x128xf32, #tpu.memory_space<vmem>>, vector<1x128x128xf32>
    %1 = vector.shape_cast %0 : vector<1x128x128xf32> to vector<128x128xf32>
    %2 = vector.extract_strided_slice %1 {offsets = [0, 126], sizes = [128, 1], strides = [1, 1]} : vector<128x128xf32> to vector<128x1xf32>
    %3 = vector.extract_strided_slice %1 {offsets = [0, 127], sizes = [128, 1], strides = [1, 1]} : vector<128x128xf32> to vector<128x1xf32>
    %c0_2 = arith.constant 0 : index
    %c0_3 = arith.constant 0 : index
    %4 = vector.load %arg5[%c0_2, %c0_3] : memref<1x128xf32, #tpu.memory_space<vmem>>, vector<1x128xf32>
    %5 = vector.broadcast %2 : vector<128x1xf32> to vector<128x128xf32>
    %6 = vector.broadcast %4 : vector<1x128xf32> to vector<128x128xf32>
    %7 = arith.mulf %5, %6 : vector<128x128xf32>
    %c0_4 = arith.constant 0 : index
    %c0_5 = arith.constant 0 : index
    %8 = vector.load %arg6[%c0_4, %c0_5] : memref<1x128xf32, #tpu.memory_space<vmem>>, vector<1x128xf32>
    %9 = vector.broadcast %3 : vector<128x1xf32> to vector<128x128xf32>
    %10 = vector.broadcast %8 : vector<1x128xf32> to vector<128x128xf32>
    %11 = arith.mulf %9, %10 : vector<128x128xf32>
    %12 = arith.addf %7, %11 : vector<128x128xf32>
    %c0_6 = arith.constant 0 : index
    %c0_7 = arith.constant 0 : index
    %13 = vector.load %arg7[%c0_6, %c0_7] : memref<1x128xf32, #tpu.memory_space<vmem>>, vector<1x128xf32>
    %14 = vector.broadcast %13 : vector<1x128xf32> to vector<128x128xf32>
    %15 = arith.addf %12, %14 : vector<128x128xf32>
    %cst = arith.constant 0.000000e+00 : f32
    %16 = vector.broadcast %cst : f32 to vector<128x128xf32>
    %17 = arith.maximumf %15, %16 : vector<128x128xf32>
    %18 = tpu.iota {dimensions = array<i32: 1>} : vector<1x128xi32>
    %c96_i32 = arith.constant 96 : i32
    %19 = vector.broadcast %c96_i32 : i32 to vector<1x128xi32>
    %20 = arith.cmpi slt, %18, %19 : vector<1x128xi32>
    %cst_8 = arith.constant 0.000000e+00 : f32
    %21 = vector.shape_cast %20 : vector<1x128xi1> to vector<1x128xi1>
    %22 = vector.broadcast %21 : vector<1x128xi1> to vector<128x128xi1>
    %23 = vector.broadcast %cst_8 : f32 to vector<128x128xf32>
    %24 = arith.select %22, %1, %23 : vector<128x128xi1>, vector<128x128xf32>
    %25 = arith.addf %17, %24 : vector<128x128xf32>
    %c0_9 = arith.constant 0 : index
    %c0_10 = arith.constant 0 : index
    %c0_11 = arith.constant 0 : index
    %26 = vector.load %arg2[%c0_9, %c0_10, %c0_11] : memref<1x256x128xbf16, #tpu.memory_space<vmem>>, vector<1x128x128xbf16>
    %27 = vector.shape_cast %26 : vector<1x128x128xbf16> to vector<128x128xbf16>
    %c0_12 = arith.constant 0 : index
    %c0_13 = arith.constant 0 : index
    %c0_14 = arith.constant 0 : index
    %28 = vector.load %arg3[%c0_12, %c0_13, %c0_14] : memref<1x256x128xbf16, #tpu.memory_space<vmem>>, vector<1x128x128xbf16>
    %29 = vector.shape_cast %28 : vector<1x128x128xbf16> to vector<128x128xbf16>
    %c0_15 = arith.constant 0 : index
    %c0_16 = arith.constant 0 : index
    %c0_17 = arith.constant 0 : index
    %30 = vector.load %arg4[%c0_15, %c0_16, %c0_17] : memref<1x128x256xbf16, #tpu.memory_space<vmem>>, vector<1x128x128xbf16>
    %31 = vector.shape_cast %30 : vector<1x128x128xbf16> to vector<128x128xbf16>
    %32 = arith.truncf %25 : vector<128x128xf32> to vector<128x128xbf16>
    %c0_18 = arith.constant 0 : index
    %c0_19 = arith.constant 0 : index
    %c0_20 = arith.constant 0 : index
    %33 = vector.load %arg8[%c0_18, %c0_19, %c0_20] : memref<4x128x512xbf16, #tpu.memory_space<vmem>>, vector<1x128x512xbf16>
    %34 = vector.shape_cast %33 : vector<1x128x512xbf16> to vector<128x512xbf16>
    %cst_21 = arith.constant dense<0.000000e+00> : vector<128x512xf32>
    %35 = tpu.matmul %32, %34, %cst_21 {dimension_numbers = #tpu.dot_dimension_numbers<[1], [0], [0], [1], [0, 0, 1, 1], [], []>} : vector<128x128xbf16>, vector<128x512xbf16>, vector<128x512xf32> -> vector<128x512xf32>
    %36 = vector.extract_strided_slice %35 {offsets = [0, 0], sizes = [128, 384], strides = [1, 1]} : vector<128x512xf32> to vector<128x384xf32>
    %37 = arith.truncf %36 : vector<128x384xf32> to vector<128x384xbf16>
    %38 = vector.extract_strided_slice %37 {offsets = [0, 0], sizes = [128, 128], strides = [1, 1]} : vector<128x384xbf16> to vector<128x128xbf16>
    %cst_22 = arith.constant dense<0.000000e+00> : vector<128x128xf32>
    %39 = tpu.matmul %29, %38, %cst_22 {dimension_numbers = #tpu.dot_dimension_numbers<[1], [0], [0], [1], [0, 0, 1, 1], [], []>} : vector<128x128xbf16>, vector<128x128xbf16>, vector<128x128xf32> -> vector<128x128xf32>
    %40 = vector.extract_strided_slice %37 {offsets = [0, 128], sizes = [128, 256], strides = [1, 1]} : vector<128x384xbf16> to vector<128x256xbf16>
    %cst_23 = arith.constant dense<0.000000e+00> : vector<128x256xf32>
    %41 = tpu.matmul %27, %40, %cst_23 {dimension_numbers = #tpu.dot_dimension_numbers<[1], [0], [0], [1], [0, 0, 1, 1], [], []>} : vector<128x128xbf16>, vector<128x256xbf16>, vector<128x256xf32> -> vector<128x256xf32>
    %42 = vector.extract_strided_slice %41 {offsets = [0, 0], sizes = [128, 128], strides = [1, 1]} : vector<128x256xf32> to vector<128x128xf32>
    %43 = vector.extract_strided_slice %41 {offsets = [0, 128], sizes = [128, 128], strides = [1, 1]} : vector<128x256xf32> to vector<128x128xf32>
    %44 = arith.mulf %39, %42 : vector<128x128xf32>
    %cst_24 = arith.constant dense<0.000000e+00> : vector<128xf32>
    %45 = vector.multi_reduction <add>, %44, %cst_24 [1] : vector<128x128xf32> to vector<128xf32>
    %46 = vector.shape_cast %45 : vector<128xf32> to vector<128x1xf32>
    %cst_25 = arith.constant 0.000000e+00 : f32
    %47 = vector.broadcast %cst_25 : f32 to vector<128x1xf32>
    %48 = arith.cmpf ogt, %46, %47 : vector<128x1xf32>
    %cst_26 = arith.constant 0.00999999977 : f32
    %49 = vector.broadcast %cst_26 : f32 to vector<128x1xf32>
    %50 = arith.mulf %49, %46 : vector<128x1xf32>
    %51 = arith.select %48, %46, %50 : vector<128x1xi1>, vector<128x1xf32>
    %52 = vector.broadcast %51 : vector<128x1xf32> to vector<128x128xf32>
    %53 = arith.mulf %43, %52 : vector<128x128xf32>
    %54 = arith.truncf %53 : vector<128x128xf32> to vector<128x128xbf16>
    %cst_27 = arith.constant dense<0.000000e+00> : vector<128x128xf32>
    %55 = tpu.matmul %31, %54, %cst_27 {dimension_numbers = #tpu.dot_dimension_numbers<[1], [0], [0], [1], [0, 0, 1, 1], [], []>} : vector<128x128xbf16>, vector<128x128xbf16>, vector<128x128xf32> -> vector<128x128xf32>
    %56 = vector.extract_strided_slice %35 {offsets = [0, 384], sizes = [128, 128], strides = [1, 1]} : vector<128x512xf32> to vector<128x128xf32>
    %57 = arith.truncf %55 : vector<128x128xf32> to vector<128x128xbf16>
    %c0_28 = arith.constant 0 : index
    %c0_29 = arith.constant 0 : index
    %c0_30 = arith.constant 0 : index
    %58 = vector.load %arg9[%c0_28, %c0_29, %c0_30] : memref<4x128x128xbf16, #tpu.memory_space<vmem>>, vector<1x128x128xbf16>
    %59 = vector.shape_cast %58 : vector<1x128x128xbf16> to vector<128x128xbf16>
    %cst_31 = arith.constant dense<0.000000e+00> : vector<128x128xf32>
    %60 = tpu.matmul %57, %59, %cst_31 {dimension_numbers = #tpu.dot_dimension_numbers<[1], [0], [0], [1], [0, 0, 1, 1], [], []>} : vector<128x128xbf16>, vector<128x128xbf16>, vector<128x128xf32> -> vector<128x128xf32>
    %61 = arith.addf %56, %60 : vector<128x128xf32>
    %c0_32 = arith.constant 0 : index
    %c0_33 = arith.constant 0 : index
    %c0_34 = arith.constant 0 : index
    %62 = vector.load %arg10[%c0_32, %c0_33, %c0_34] : memref<4x1x128xf32, #tpu.memory_space<vmem>>, vector<1x1x128xf32>
    %63 = vector.shape_cast %62 : vector<1x1x128xf32> to vector<1x128xf32>
    %64 = vector.broadcast %63 : vector<1x128xf32> to vector<128x128xf32>
    %65 = arith.addf %61, %64 : vector<128x128xf32>
    %cst_35 = arith.constant 0.000000e+00 : f32
    %66 = vector.broadcast %cst_35 : f32 to vector<128x128xf32>
    %67 = arith.maximumf %65, %66 : vector<128x128xf32>
    %68 = arith.truncf %67 : vector<128x128xf32> to vector<128x128xbf16>
    %c0_36 = arith.constant 0 : index
    %c0_37 = arith.constant 0 : index
    %c0_38 = arith.constant 0 : index
    %69 = vector.load %arg11[%c0_36, %c0_37, %c0_38] : memref<4x128x128xbf16, #tpu.memory_space<vmem>>, vector<1x128x128xbf16>
    %70 = vector.shape_cast %69 : vector<1x128x128xbf16> to vector<128x128xbf16>
    %cst_39 = arith.constant dense<0.000000e+00> : vector<128x128xf32>
    %71 = tpu.matmul %68, %70, %cst_39 {dimension_numbers = #tpu.dot_dimension_numbers<[1], [0], [0], [1], [0, 0, 1, 1], [], []>} : vector<128x128xbf16>, vector<128x128xbf16>, vector<128x128xf32> -> vector<128x128xf32>
    %c0_40 = arith.constant 0 : index
    %c0_41 = arith.constant 0 : index
    %c0_42 = arith.constant 0 : index
    %72 = vector.load %arg12[%c0_40, %c0_41, %c0_42] : memref<4x1x128xf32, #tpu.memory_space<vmem>>, vector<1x1x128xf32>
    %73 = vector.shape_cast %72 : vector<1x1x128xf32> to vector<1x128xf32>
    %74 = vector.broadcast %73 : vector<1x128xf32> to vector<128x128xf32>
    %75 = arith.addf %71, %74 : vector<128x128xf32>
    %76 = arith.addf %75, %25 : vector<128x128xf32>
    %c0_43 = arith.constant 0 : index
    %c128 = arith.constant 128 : index
    %c0_44 = arith.constant 0 : index
    %77 = vector.load %arg2[%c0_43, %c128, %c0_44] : memref<1x256x128xbf16, #tpu.memory_space<vmem>>, vector<1x128x128xbf16>
    %78 = vector.shape_cast %77 : vector<1x128x128xbf16> to vector<128x128xbf16>
    %c0_45 = arith.constant 0 : index
    %c128_46 = arith.constant 128 : index
    %c0_47 = arith.constant 0 : index
    %79 = vector.load %arg3[%c0_45, %c128_46, %c0_47] : memref<1x256x128xbf16, #tpu.memory_space<vmem>>, vector<1x128x128xbf16>
    %80 = vector.shape_cast %79 : vector<1x128x128xbf16> to vector<128x128xbf16>
    %c0_48 = arith.constant 0 : index
    %c0_49 = arith.constant 0 : index
    %c128_50 = arith.constant 128 : index
    %81 = vector.load %arg4[%c0_48, %c0_49, %c128_50] : memref<1x128x256xbf16, #tpu.memory_space<vmem>>, vector<1x128x128xbf16>
    %82 = vector.shape_cast %81 : vector<1x128x128xbf16> to vector<128x128xbf16>
    %83 = arith.truncf %76 : vector<128x128xf32> to vector<128x128xbf16>
    %c1 = arith.constant 1 : index
    %c0_51 = arith.constant 0 : index
    %c0_52 = arith.constant 0 : index
    %84 = vector.load %arg8[%c1, %c0_51, %c0_52] : memref<4x128x512xbf16, #tpu.memory_space<vmem>>, vector<1x128x512xbf16>
    %85 = vector.shape_cast %84 : vector<1x128x512xbf16> to vector<128x512xbf16>
    %cst_53 = arith.constant dense<0.000000e+00> : vector<128x512xf32>
    %86 = tpu.matmul %83, %85, %cst_53 {dimension_numbers = #tpu.dot_dimension_numbers<[1], [0], [0], [1], [0, 0, 1, 1], [], []>} : vector<128x128xbf16>, vector<128x512xbf16>, vector<128x512xf32> -> vector<128x512xf32>
    %87 = vector.extract_strided_slice %86 {offsets = [0, 0], sizes = [128, 384], strides = [1, 1]} : vector<128x512xf32> to vector<128x384xf32>
    %88 = arith.truncf %87 : vector<128x384xf32> to vector<128x384xbf16>
    %89 = vector.extract_strided_slice %88 {offsets = [0, 0], sizes = [128, 128], strides = [1, 1]} : vector<128x384xbf16> to vector<128x128xbf16>
    %cst_54 = arith.constant dense<0.000000e+00> : vector<128x128xf32>
    %90 = tpu.matmul %80, %89, %cst_54 {dimension_numbers = #tpu.dot_dimension_numbers<[1], [0], [0], [1], [0, 0, 1, 1], [], []>} : vector<128x128xbf16>, vector<128x128xbf16>, vector<128x128xf32> -> vector<128x128xf32>
    %91 = vector.extract_strided_slice %88 {offsets = [0, 128], sizes = [128, 256], strides = [1, 1]} : vector<128x384xbf16> to vector<128x256xbf16>
    %cst_55 = arith.constant dense<0.000000e+00> : vector<128x256xf32>
    %92 = tpu.matmul %78, %91, %cst_55 {dimension_numbers = #tpu.dot_dimension_numbers<[1], [0], [0], [1], [0, 0, 1, 1], [], []>} : vector<128x128xbf16>, vector<128x256xbf16>, vector<128x256xf32> -> vector<128x256xf32>
    %93 = vector.extract_strided_slice %92 {offsets = [0, 0], sizes = [128, 128], strides = [1, 1]} : vector<128x256xf32> to vector<128x128xf32>
    %94 = vector.extract_strided_slice %92 {offsets = [0, 128], sizes = [128, 128], strides = [1, 1]} : vector<128x256xf32> to vector<128x128xf32>
    %95 = arith.mulf %90, %93 : vector<128x128xf32>
    %cst_56 = arith.constant dense<0.000000e+00> : vector<128xf32>
    %96 = vector.multi_reduction <add>, %95, %cst_56 [1] : vector<128x128xf32> to vector<128xf32>
    %97 = vector.shape_cast %96 : vector<128xf32> to vector<128x1xf32>
    %cst_57 = arith.constant 0.000000e+00 : f32
    %98 = vector.broadcast %cst_57 : f32 to vector<128x1xf32>
    %99 = arith.cmpf ogt, %97, %98 : vector<128x1xf32>
    %cst_58 = arith.constant 0.00999999977 : f32
    %100 = vector.broadcast %cst_58 : f32 to vector<128x1xf32>
    %101 = arith.mulf %100, %97 : vector<128x1xf32>
    %102 = arith.select %99, %97, %101 : vector<128x1xi1>, vector<128x1xf32>
    %103 = vector.broadcast %102 : vector<128x1xf32> to vector<128x128xf32>
    %104 = arith.mulf %94, %103 : vector<128x128xf32>
    %105 = arith.truncf %104 : vector<128x128xf32> to vector<128x128xbf16>
    %cst_59 = arith.constant dense<0.000000e+00> : vector<128x128xf32>
    %106 = tpu.matmul %82, %105, %cst_59 {dimension_numbers = #tpu.dot_dimension_numbers<[1], [0], [0], [1], [0, 0, 1, 1], [], []>} : vector<128x128xbf16>, vector<128x128xbf16>, vector<128x128xf32> -> vector<128x128xf32>
    %107 = vector.extract_strided_slice %86 {offsets = [0, 384], sizes = [128, 128], strides = [1, 1]} : vector<128x512xf32> to vector<128x128xf32>
    %108 = arith.truncf %106 : vector<128x128xf32> to vector<128x128xbf16>
    %c1_60 = arith.constant 1 : index
    %c0_61 = arith.constant 0 : index
    %c0_62 = arith.constant 0 : index
    %109 = vector.load %arg9[%c1_60, %c0_61, %c0_62] : memref<4x128x128xbf16, #tpu.memory_space<vmem>>, vector<1x128x128xbf16>
    %110 = vector.shape_cast %109 : vector<1x128x128xbf16> to vector<128x128xbf16>
    %cst_63 = arith.constant dense<0.000000e+00> : vector<128x128xf32>
    %111 = tpu.matmul %108, %110, %cst_63 {dimension_numbers = #tpu.dot_dimension_numbers<[1], [0], [0], [1], [0, 0, 1, 1], [], []>} : vector<128x128xbf16>, vector<128x128xbf16>, vector<128x128xf32> -> vector<128x128xf32>
    %112 = arith.addf %107, %111 : vector<128x128xf32>
    %c1_64 = arith.constant 1 : index
    %c0_65 = arith.constant 0 : index
    %c0_66 = arith.constant 0 : index
    %113 = vector.load %arg10[%c1_64, %c0_65, %c0_66] : memref<4x1x128xf32, #tpu.memory_space<vmem>>, vector<1x1x128xf32>
    %114 = vector.shape_cast %113 : vector<1x1x128xf32> to vector<1x128xf32>
    %115 = vector.broadcast %114 : vector<1x128xf32> to vector<128x128xf32>
    %116 = arith.addf %112, %115 : vector<128x128xf32>
    %cst_67 = arith.constant 0.000000e+00 : f32
    %117 = vector.broadcast %cst_67 : f32 to vector<128x128xf32>
    %118 = arith.maximumf %116, %117 : vector<128x128xf32>
    %119 = arith.truncf %118 : vector<128x128xf32> to vector<128x128xbf16>
    %c1_68 = arith.constant 1 : index
    %c0_69 = arith.constant 0 : index
    %c0_70 = arith.constant 0 : index
    %120 = vector.load %arg11[%c1_68, %c0_69, %c0_70] : memref<4x128x128xbf16, #tpu.memory_space<vmem>>, vector<1x128x128xbf16>
    %121 = vector.shape_cast %120 : vector<1x128x128xbf16> to vector<128x128xbf16>
    %cst_71 = arith.constant dense<0.000000e+00> : vector<128x128xf32>
    %122 = tpu.matmul %119, %121, %cst_71 {dimension_numbers = #tpu.dot_dimension_numbers<[1], [0], [0], [1], [0, 0, 1, 1], [], []>} : vector<128x128xbf16>, vector<128x128xbf16>, vector<128x128xf32> -> vector<128x128xf32>
    %c1_72 = arith.constant 1 : index
    %c0_73 = arith.constant 0 : index
    %c0_74 = arith.constant 0 : index
    %123 = vector.load %arg12[%c1_72, %c0_73, %c0_74] : memref<4x1x128xf32, #tpu.memory_space<vmem>>, vector<1x1x128xf32>
    %124 = vector.shape_cast %123 : vector<1x1x128xf32> to vector<1x128xf32>
    %125 = vector.broadcast %124 : vector<1x128xf32> to vector<128x128xf32>
    %126 = arith.addf %122, %125 : vector<128x128xf32>
    %127 = arith.addf %126, %76 : vector<128x128xf32>
    %c0_75 = arith.constant 0 : index
    %c0_76 = arith.constant 0 : index
    %c0_77 = arith.constant 0 : index
    %128 = vector.load %arg2[%c0_75, %c0_76, %c0_77] : memref<1x256x128xbf16, #tpu.memory_space<vmem>>, vector<1x128x128xbf16>
    %129 = vector.shape_cast %128 : vector<1x128x128xbf16> to vector<128x128xbf16>
    %c0_78 = arith.constant 0 : index
    %c0_79 = arith.constant 0 : index
    %c0_80 = arith.constant 0 : index
    %130 = vector.load %arg3[%c0_78, %c0_79, %c0_80] : memref<1x256x128xbf16, #tpu.memory_space<vmem>>, vector<1x128x128xbf16>
    %131 = vector.shape_cast %130 : vector<1x128x128xbf16> to vector<128x128xbf16>
    %c0_81 = arith.constant 0 : index
    %c0_82 = arith.constant 0 : index
    %c0_83 = arith.constant 0 : index
    %132 = vector.load %arg4[%c0_81, %c0_82, %c0_83] : memref<1x128x256xbf16, #tpu.memory_space<vmem>>, vector<1x128x128xbf16>
    %133 = vector.shape_cast %132 : vector<1x128x128xbf16> to vector<128x128xbf16>
    %134 = arith.truncf %127 : vector<128x128xf32> to vector<128x128xbf16>
    %c2 = arith.constant 2 : index
    %c0_84 = arith.constant 0 : index
    %c0_85 = arith.constant 0 : index
    %135 = vector.load %arg8[%c2, %c0_84, %c0_85] : memref<4x128x512xbf16, #tpu.memory_space<vmem>>, vector<1x128x512xbf16>
    %136 = vector.shape_cast %135 : vector<1x128x512xbf16> to vector<128x512xbf16>
    %cst_86 = arith.constant dense<0.000000e+00> : vector<128x512xf32>
    %137 = tpu.matmul %134, %136, %cst_86 {dimension_numbers = #tpu.dot_dimension_numbers<[1], [0], [0], [1], [0, 0, 1, 1], [], []>} : vector<128x128xbf16>, vector<128x512xbf16>, vector<128x512xf32> -> vector<128x512xf32>
    %138 = vector.extract_strided_slice %137 {offsets = [0, 0], sizes = [128, 384], strides = [1, 1]} : vector<128x512xf32> to vector<128x384xf32>
    %139 = arith.truncf %138 : vector<128x384xf32> to vector<128x384xbf16>
    %140 = vector.extract_strided_slice %139 {offsets = [0, 0], sizes = [128, 128], strides = [1, 1]} : vector<128x384xbf16> to vector<128x128xbf16>
    %cst_87 = arith.constant dense<0.000000e+00> : vector<128x128xf32>
    %141 = tpu.matmul %131, %140, %cst_87 {dimension_numbers = #tpu.dot_dimension_numbers<[1], [0], [0], [1], [0, 0, 1, 1], [], []>} : vector<128x128xbf16>, vector<128x128xbf16>, vector<128x128xf32> -> vector<128x128xf32>
    %142 = vector.extract_strided_slice %139 {offsets = [0, 128], sizes = [128, 256], strides = [1, 1]} : vector<128x384xbf16> to vector<128x256xbf16>
    %cst_88 = arith.constant dense<0.000000e+00> : vector<128x256xf32>
    %143 = tpu.matmul %129, %142, %cst_88 {dimension_numbers = #tpu.dot_dimension_numbers<[1], [0], [0], [1], [0, 0, 1, 1], [], []>} : vector<128x128xbf16>, vector<128x256xbf16>, vector<128x256xf32> -> vector<128x256xf32>
    %144 = vector.extract_strided_slice %143 {offsets = [0, 0], sizes = [128, 128], strides = [1, 1]} : vector<128x256xf32> to vector<128x128xf32>
    %145 = vector.extract_strided_slice %143 {offsets = [0, 128], sizes = [128, 128], strides = [1, 1]} : vector<128x256xf32> to vector<128x128xf32>
    %146 = arith.mulf %141, %144 : vector<128x128xf32>
    %cst_89 = arith.constant dense<0.000000e+00> : vector<128xf32>
    %147 = vector.multi_reduction <add>, %146, %cst_89 [1] : vector<128x128xf32> to vector<128xf32>
    %148 = vector.shape_cast %147 : vector<128xf32> to vector<128x1xf32>
    %cst_90 = arith.constant 0.000000e+00 : f32
    %149 = vector.broadcast %cst_90 : f32 to vector<128x1xf32>
    %150 = arith.cmpf ogt, %148, %149 : vector<128x1xf32>
    %cst_91 = arith.constant 0.00999999977 : f32
    %151 = vector.broadcast %cst_91 : f32 to vector<128x1xf32>
    %152 = arith.mulf %151, %148 : vector<128x1xf32>
    %153 = arith.select %150, %148, %152 : vector<128x1xi1>, vector<128x1xf32>
    %154 = vector.broadcast %153 : vector<128x1xf32> to vector<128x128xf32>
    %155 = arith.mulf %145, %154 : vector<128x128xf32>
    %156 = arith.truncf %155 : vector<128x128xf32> to vector<128x128xbf16>
    %cst_92 = arith.constant dense<0.000000e+00> : vector<128x128xf32>
    %157 = tpu.matmul %133, %156, %cst_92 {dimension_numbers = #tpu.dot_dimension_numbers<[1], [0], [0], [1], [0, 0, 1, 1], [], []>} : vector<128x128xbf16>, vector<128x128xbf16>, vector<128x128xf32> -> vector<128x128xf32>
    %158 = vector.extract_strided_slice %137 {offsets = [0, 384], sizes = [128, 128], strides = [1, 1]} : vector<128x512xf32> to vector<128x128xf32>
    %159 = arith.truncf %157 : vector<128x128xf32> to vector<128x128xbf16>
    %c2_93 = arith.constant 2 : index
    %c0_94 = arith.constant 0 : index
    %c0_95 = arith.constant 0 : index
    %160 = vector.load %arg9[%c2_93, %c0_94, %c0_95] : memref<4x128x128xbf16, #tpu.memory_space<vmem>>, vector<1x128x128xbf16>
    %161 = vector.shape_cast %160 : vector<1x128x128xbf16> to vector<128x128xbf16>
    %cst_96 = arith.constant dense<0.000000e+00> : vector<128x128xf32>
    %162 = tpu.matmul %159, %161, %cst_96 {dimension_numbers = #tpu.dot_dimension_numbers<[1], [0], [0], [1], [0, 0, 1, 1], [], []>} : vector<128x128xbf16>, vector<128x128xbf16>, vector<128x128xf32> -> vector<128x128xf32>
    %163 = arith.addf %158, %162 : vector<128x128xf32>
    %c2_97 = arith.constant 2 : index
    %c0_98 = arith.constant 0 : index
    %c0_99 = arith.constant 0 : index
    %164 = vector.load %arg10[%c2_97, %c0_98, %c0_99] : memref<4x1x128xf32, #tpu.memory_space<vmem>>, vector<1x1x128xf32>
    %165 = vector.shape_cast %164 : vector<1x1x128xf32> to vector<1x128xf32>
    %166 = vector.broadcast %165 : vector<1x128xf32> to vector<128x128xf32>
    %167 = arith.addf %163, %166 : vector<128x128xf32>
    %cst_100 = arith.constant 0.000000e+00 : f32
    %168 = vector.broadcast %cst_100 : f32 to vector<128x128xf32>
    %169 = arith.maximumf %167, %168 : vector<128x128xf32>
    %170 = arith.truncf %169 : vector<128x128xf32> to vector<128x128xbf16>
    %c2_101 = arith.constant 2 : index
    %c0_102 = arith.constant 0 : index
    %c0_103 = arith.constant 0 : index
    %171 = vector.load %arg11[%c2_101, %c0_102, %c0_103] : memref<4x128x128xbf16, #tpu.memory_space<vmem>>, vector<1x128x128xbf16>
    %172 = vector.shape_cast %171 : vector<1x128x128xbf16> to vector<128x128xbf16>
    %cst_104 = arith.constant dense<0.000000e+00> : vector<128x128xf32>
    %173 = tpu.matmul %170, %172, %cst_104 {dimension_numbers = #tpu.dot_dimension_numbers<[1], [0], [0], [1], [0, 0, 1, 1], [], []>} : vector<128x128xbf16>, vector<128x128xbf16>, vector<128x128xf32> -> vector<128x128xf32>
    %c2_105 = arith.constant 2 : index
    %c0_106 = arith.constant 0 : index
    %c0_107 = arith.constant 0 : index
    %174 = vector.load %arg12[%c2_105, %c0_106, %c0_107] : memref<4x1x128xf32, #tpu.memory_space<vmem>>, vector<1x1x128xf32>
    %175 = vector.shape_cast %174 : vector<1x1x128xf32> to vector<1x128xf32>
    %176 = vector.broadcast %175 : vector<1x128xf32> to vector<128x128xf32>
    %177 = arith.addf %173, %176 : vector<128x128xf32>
    %178 = arith.addf %177, %127 : vector<128x128xf32>
    %c0_108 = arith.constant 0 : index
    %c128_109 = arith.constant 128 : index
    %c0_110 = arith.constant 0 : index
    %179 = vector.load %arg2[%c0_108, %c128_109, %c0_110] : memref<1x256x128xbf16, #tpu.memory_space<vmem>>, vector<1x128x128xbf16>
    %180 = vector.shape_cast %179 : vector<1x128x128xbf16> to vector<128x128xbf16>
    %c0_111 = arith.constant 0 : index
    %c128_112 = arith.constant 128 : index
    %c0_113 = arith.constant 0 : index
    %181 = vector.load %arg3[%c0_111, %c128_112, %c0_113] : memref<1x256x128xbf16, #tpu.memory_space<vmem>>, vector<1x128x128xbf16>
    %182 = vector.shape_cast %181 : vector<1x128x128xbf16> to vector<128x128xbf16>
    %c0_114 = arith.constant 0 : index
    %c0_115 = arith.constant 0 : index
    %c128_116 = arith.constant 128 : index
    %183 = vector.load %arg4[%c0_114, %c0_115, %c128_116] : memref<1x128x256xbf16, #tpu.memory_space<vmem>>, vector<1x128x128xbf16>
    %184 = vector.shape_cast %183 : vector<1x128x128xbf16> to vector<128x128xbf16>
    %185 = arith.truncf %178 : vector<128x128xf32> to vector<128x128xbf16>
    %c3 = arith.constant 3 : index
    %c0_117 = arith.constant 0 : index
    %c0_118 = arith.constant 0 : index
    %186 = vector.load %arg8[%c3, %c0_117, %c0_118] : memref<4x128x512xbf16, #tpu.memory_space<vmem>>, vector<1x128x512xbf16>
    %187 = vector.shape_cast %186 : vector<1x128x512xbf16> to vector<128x512xbf16>
    %cst_119 = arith.constant dense<0.000000e+00> : vector<128x512xf32>
    %188 = tpu.matmul %185, %187, %cst_119 {dimension_numbers = #tpu.dot_dimension_numbers<[1], [0], [0], [1], [0, 0, 1, 1], [], []>} : vector<128x128xbf16>, vector<128x512xbf16>, vector<128x512xf32> -> vector<128x512xf32>
    %189 = vector.extract_strided_slice %188 {offsets = [0, 0], sizes = [128, 384], strides = [1, 1]} : vector<128x512xf32> to vector<128x384xf32>
    %190 = arith.truncf %189 : vector<128x384xf32> to vector<128x384xbf16>
    %191 = vector.extract_strided_slice %190 {offsets = [0, 0], sizes = [128, 128], strides = [1, 1]} : vector<128x384xbf16> to vector<128x128xbf16>
    %cst_120 = arith.constant dense<0.000000e+00> : vector<128x128xf32>
    %192 = tpu.matmul %182, %191, %cst_120 {dimension_numbers = #tpu.dot_dimension_numbers<[1], [0], [0], [1], [0, 0, 1, 1], [], []>} : vector<128x128xbf16>, vector<128x128xbf16>, vector<128x128xf32> -> vector<128x128xf32>
    %193 = vector.extract_strided_slice %190 {offsets = [0, 128], sizes = [128, 256], strides = [1, 1]} : vector<128x384xbf16> to vector<128x256xbf16>
    %cst_121 = arith.constant dense<0.000000e+00> : vector<128x256xf32>
    %194 = tpu.matmul %180, %193, %cst_121 {dimension_numbers = #tpu.dot_dimension_numbers<[1], [0], [0], [1], [0, 0, 1, 1], [], []>} : vector<128x128xbf16>, vector<128x256xbf16>, vector<128x256xf32> -> vector<128x256xf32>
    %195 = vector.extract_strided_slice %194 {offsets = [0, 0], sizes = [128, 128], strides = [1, 1]} : vector<128x256xf32> to vector<128x128xf32>
    %196 = vector.extract_strided_slice %194 {offsets = [0, 128], sizes = [128, 128], strides = [1, 1]} : vector<128x256xf32> to vector<128x128xf32>
    %197 = arith.mulf %192, %195 : vector<128x128xf32>
    %cst_122 = arith.constant dense<0.000000e+00> : vector<128xf32>
    %198 = vector.multi_reduction <add>, %197, %cst_122 [1] : vector<128x128xf32> to vector<128xf32>
    %199 = vector.shape_cast %198 : vector<128xf32> to vector<128x1xf32>
    %cst_123 = arith.constant 0.000000e+00 : f32
    %200 = vector.broadcast %cst_123 : f32 to vector<128x1xf32>
    %201 = arith.cmpf ogt, %199, %200 : vector<128x1xf32>
    %cst_124 = arith.constant 0.00999999977 : f32
    %202 = vector.broadcast %cst_124 : f32 to vector<128x1xf32>
    %203 = arith.mulf %202, %199 : vector<128x1xf32>
    %204 = arith.select %201, %199, %203 : vector<128x1xi1>, vector<128x1xf32>
    %205 = vector.broadcast %204 : vector<128x1xf32> to vector<128x128xf32>
    %206 = arith.mulf %196, %205 : vector<128x128xf32>
    %207 = arith.truncf %206 : vector<128x128xf32> to vector<128x128xbf16>
    %cst_125 = arith.constant dense<0.000000e+00> : vector<128x128xf32>
    %208 = tpu.matmul %184, %207, %cst_125 {dimension_numbers = #tpu.dot_dimension_numbers<[1], [0], [0], [1], [0, 0, 1, 1], [], []>} : vector<128x128xbf16>, vector<128x128xbf16>, vector<128x128xf32> -> vector<128x128xf32>
    %209 = vector.extract_strided_slice %188 {offsets = [0, 384], sizes = [128, 128], strides = [1, 1]} : vector<128x512xf32> to vector<128x128xf32>
    %210 = arith.truncf %208 : vector<128x128xf32> to vector<128x128xbf16>
    %c3_126 = arith.constant 3 : index
    %c0_127 = arith.constant 0 : index
    %c0_128 = arith.constant 0 : index
    %211 = vector.load %arg9[%c3_126, %c0_127, %c0_128] : memref<4x128x128xbf16, #tpu.memory_space<vmem>>, vector<1x128x128xbf16>
    %212 = vector.shape_cast %211 : vector<1x128x128xbf16> to vector<128x128xbf16>
    %cst_129 = arith.constant dense<0.000000e+00> : vector<128x128xf32>
    %213 = tpu.matmul %210, %212, %cst_129 {dimension_numbers = #tpu.dot_dimension_numbers<[1], [0], [0], [1], [0, 0, 1, 1], [], []>} : vector<128x128xbf16>, vector<128x128xbf16>, vector<128x128xf32> -> vector<128x128xf32>
    %214 = arith.addf %209, %213 : vector<128x128xf32>
    %c3_130 = arith.constant 3 : index
    %c0_131 = arith.constant 0 : index
    %c0_132 = arith.constant 0 : index
    %215 = vector.load %arg10[%c3_130, %c0_131, %c0_132] : memref<4x1x128xf32, #tpu.memory_space<vmem>>, vector<1x1x128xf32>
    %216 = vector.shape_cast %215 : vector<1x1x128xf32> to vector<1x128xf32>
    %217 = vector.broadcast %216 : vector<1x128xf32> to vector<128x128xf32>
    %218 = arith.addf %214, %217 : vector<128x128xf32>
    %cst_133 = arith.constant 0.000000e+00 : f32
    %219 = vector.broadcast %cst_133 : f32 to vector<128x128xf32>
    %220 = arith.maximumf %218, %219 : vector<128x128xf32>
    %221 = arith.truncf %220 : vector<128x128xf32> to vector<128x128xbf16>
    %c3_134 = arith.constant 3 : index
    %c0_135 = arith.constant 0 : index
    %c0_136 = arith.constant 0 : index
    %222 = vector.load %arg11[%c3_134, %c0_135, %c0_136] : memref<4x128x128xbf16, #tpu.memory_space<vmem>>, vector<1x128x128xbf16>
    %223 = vector.shape_cast %222 : vector<1x128x128xbf16> to vector<128x128xbf16>
    %cst_137 = arith.constant dense<0.000000e+00> : vector<128x128xf32>
    %224 = tpu.matmul %221, %223, %cst_137 {dimension_numbers = #tpu.dot_dimension_numbers<[1], [0], [0], [1], [0, 0, 1, 1], [], []>} : vector<128x128xbf16>, vector<128x128xbf16>, vector<128x128xf32> -> vector<128x128xf32>
    %c3_138 = arith.constant 3 : index
    %c0_139 = arith.constant 0 : index
    %c0_140 = arith.constant 0 : index
    %225 = vector.load %arg12[%c3_138, %c0_139, %c0_140] : memref<4x1x128xf32, #tpu.memory_space<vmem>>, vector<1x1x128xf32>
    %226 = vector.shape_cast %225 : vector<1x1x128xf32> to vector<1x128xf32>
    %227 = vector.broadcast %226 : vector<1x128xf32> to vector<128x128xf32>
    %228 = arith.addf %224, %227 : vector<128x128xf32>
    %229 = arith.addf %228, %178 : vector<128x128xf32>
    %230 = vector.extract_strided_slice %229 {offsets = [96, 0], sizes = [32, 128], strides = [1, 1]} : vector<128x128xf32> to vector<32x128xf32>
    %231 = arith.truncf %230 : vector<32x128xf32> to vector<32x128xbf16>
    %c0_141 = arith.constant 0 : index
    %c0_142 = arith.constant 0 : index
    %232 = vector.load %arg13[%c0_141, %c0_142] : memref<128x128xbf16, #tpu.memory_space<vmem>>, vector<128x128xbf16>
    %cst_143 = arith.constant dense<0.000000e+00> : vector<32x128xf32>
    %233 = tpu.matmul %231, %232, %cst_143 {dimension_numbers = #tpu.dot_dimension_numbers<[1], [0], [0], [1], [0, 0, 1, 1], [], []>} : vector<32x128xbf16>, vector<128x128xbf16>, vector<32x128xf32> -> vector<32x128xf32>
    %c0_144 = arith.constant 0 : index
    %c0_145 = arith.constant 0 : index
    %234 = vector.load %arg14[%c0_144, %c0_145] : memref<1x128xf32, #tpu.memory_space<vmem>>, vector<1x128xf32>
    %235 = vector.broadcast %234 : vector<1x128xf32> to vector<32x128xf32>
    %236 = arith.addf %233, %235 : vector<32x128xf32>
    %cst_146 = arith.constant 0.000000e+00 : f32
    %237 = vector.broadcast %cst_146 : f32 to vector<32x128xf32>
    %238 = arith.maximumf %236, %237 : vector<32x128xf32>
    %239 = arith.truncf %238 : vector<32x128xf32> to vector<32x128xbf16>
    %c0_147 = arith.constant 0 : index
    %c0_148 = arith.constant 0 : index
    %240 = vector.load %arg15[%c0_147, %c0_148] : memref<128x128xbf16, #tpu.memory_space<vmem>>, vector<128x128xbf16>
    %cst_149 = arith.constant dense<0.000000e+00> : vector<32x128xf32>
    %241 = tpu.matmul %239, %240, %cst_149 {dimension_numbers = #tpu.dot_dimension_numbers<[1], [0], [0], [1], [0, 0, 1, 1], [], []>} : vector<32x128xbf16>, vector<128x128xbf16>, vector<32x128xf32> -> vector<32x128xf32>
    %c0_150 = arith.constant 0 : index
    %c0_151 = arith.constant 0 : index
    %242 = vector.load %arg16[%c0_150, %c0_151] : memref<1x128xf32, #tpu.memory_space<vmem>>, vector<1x128xf32>
    %243 = vector.broadcast %242 : vector<1x128xf32> to vector<32x128xf32>
    %244 = arith.addf %241, %243 : vector<32x128xf32>
    %c0_152 = arith.constant 0 : index
    %c0_153 = arith.constant 0 : index
    %c0_154 = arith.constant 0 : index
    %245 = vector.load %arg17[%c0_152, %c0_153, %c0_154] : memref<1x32x128xf32, #tpu.memory_space<vmem>>, vector<1x32x128xf32>
    %246 = vector.shape_cast %245 : vector<1x32x128xf32> to vector<32x128xf32>
    %247 = vector.shape_cast %244 : vector<32x128xf32> to vector<1x32x128xf32>
    tpu.vector_store %arg17[%c0_152, %c0_153, %c0_154], %247 {strides = array<i32>} : memref<1x32x128xf32, #tpu.memory_space<vmem>>, vector<1x32x128xf32>,
    return
  }
  func.func @transform_0(%arg0: i32) -> (i32, i32, i32) {
    %c0_i32 = arith.constant 0 : i32
    %c0_i32_0 = arith.constant 0 : i32
    %c0_i32_1 = arith.constant 0 : i32
    return %arg0, %c0_i32, %c0_i32_0 : i32, i32, i32
  }
  func.func @transform_1(%arg0: i32) -> (i32, i32, i32) {
    %c0_i32 = arith.constant 0 : i32
    %c0_i32_0 = arith.constant 0 : i32
    %c0_i32_1 = arith.constant 0 : i32
    return %arg0, %c0_i32, %c0_i32_0 : i32, i32, i32
  }
  func.func @transform_2(%arg0: i32) -> (i32, i32, i32) {
    %c0_i32 = arith.constant 0 : i32
    %c0_i32_0 = arith.constant 0 : i32
    %c0_i32_1 = arith.constant 0 : i32
    return %arg0, %c0_i32, %c0_i32_0 : i32, i32, i32
  }
  func.func @transform_3(%arg0: i32) -> (i32, i32, i32) {
    %c0_i32 = arith.constant 0 : i32
    %c0_i32_0 = arith.constant 0 : i32
    %c0_i32_1 = arith.constant 0 : i32
    return %arg0, %c0_i32, %c0_i32_0 : i32, i32, i32
  }
  func.func @transform_4(%arg0: i32) -> (i32, i32) {
    %c0_i32 = arith.constant 0 : i32
    %c0_i32_0 = arith.constant 0 : i32
    %c0_i32_1 = arith.constant 0 : i32
    return %c0_i32, %c0_i32_0 : i32, i32
  }
  func.func @transform_5(%arg0: i32) -> (i32, i32) {
    %c0_i32 = arith.constant 0 : i32
    %c0_i32_0 = arith.constant 0 : i32
    %c0_i32_1 = arith.constant 0 : i32
    return %c0_i32, %c0_i32_0 : i32, i32
  }
  func.func @transform_6(%arg0: i32) -> (i32, i32) {
    %c0_i32 = arith.constant 0 : i32
    %c0_i32_0 = arith.constant 0 : i32
    %c0_i32_1 = arith.constant 0 : i32
    return %c0_i32, %c0_i32_0 : i32, i32
  }
  func.func @transform_7(%arg0: i32) -> (i32, i32, i32) {
    %c0_i32 = arith.constant 0 : i32
    %c0_i32_0 = arith.constant 0 : i32
    %c0_i32_1 = arith.constant 0 : i32
    %c0_i32_2 = arith.constant 0 : i32
    return %c0_i32, %c0_i32_0, %c0_i32_1 : i32, i32, i32
  }
  func.func @transform_8(%arg0: i32) -> (i32, i32, i32) {
    %c0_i32 = arith.constant 0 : i32
    %c0_i32_0 = arith.constant 0 : i32
    %c0_i32_1 = arith.constant 0 : i32
    %c0_i32_2 = arith.constant 0 : i32
    return %c0_i32, %c0_i32_0, %c0_i32_1 : i32, i32, i32
  }
  func.func @transform_9(%arg0: i32) -> (i32, i32, i32) {
    %c0_i32 = arith.constant 0 : i32
    %c0_i32_0 = arith.constant 0 : i32
    %c0_i32_1 = arith.constant 0 : i32
    %c0_i32_2 = arith.constant 0 : i32
    return %c0_i32, %c0_i32_0, %c0_i32_1 : i32, i32, i32
  }
  func.func @transform_10(%arg0: i32) -> (i32, i32, i32) {
    %c0_i32 = arith.constant 0 : i32
    %c0_i32_0 = arith.constant 0 : i32
    %c0_i32_1 = arith.constant 0 : i32
    %c0_i32_2 = arith.constant 0 : i32
    return %c0_i32, %c0_i32_0, %c0_i32_1 : i32, i32, i32
  }
  func.func @transform_11(%arg0: i32) -> (i32, i32, i32) {
    %c0_i32 = arith.constant 0 : i32
    %c0_i32_0 = arith.constant 0 : i32
    %c0_i32_1 = arith.constant 0 : i32
    %c0_i32_2 = arith.constant 0 : i32
    return %c0_i32, %c0_i32_0, %c0_i32_1 : i32, i32, i32
  }
  func.func @transform_12(%arg0: i32) -> (i32, i32) {
    %c0_i32 = arith.constant 0 : i32
    %c0_i32_0 = arith.constant 0 : i32
    %c0_i32_1 = arith.constant 0 : i32
    return %c0_i32, %c0_i32_0 : i32, i32
  }
  func.func @transform_13(%arg0: i32) -> (i32, i32) {
    %c0_i32 = arith.constant 0 : i32
    %c0_i32_0 = arith.constant 0 : i32
    %c0_i32_1 = arith.constant 0 : i32
    return %c0_i32, %c0_i32_0 : i32, i32
  }
  func.func @transform_14(%arg0: i32) -> (i32, i32) {
    %c0_i32 = arith.constant 0 : i32
    %c0_i32_0 = arith.constant 0 : i32
    %c0_i32_1 = arith.constant 0 : i32
    return %c0_i32, %c0_i32_0 : i32, i32
  }
  func.func @transform_15(%arg0: i32) -> (i32, i32) {
    %c0_i32 = arith.constant 0 : i32
    %c0_i32_0 = arith.constant 0 : i32
    %c0_i32_1 = arith.constant 0 : i32
    return %c0_i32, %c0_i32_0 : i32, i32
  }
  func.func @transform_16(%arg0: i32) -> (i32, i32, i32) {
    %c0_i32 = arith.constant 0 : i32
    %c0_i32_0 = arith.constant 0 : i32
    %c0_i32_1 = arith.constant 0 : i32
    return %arg0, %c0_i32, %c0_i32_0 : i32, i32, i32
  }
}

</mosaic_0001>

<bundles_post_ra>
// kernel: tpu_custom_call.1
= control target key start
LH: loop header
LB: loop body
LE: loop exit
PB: predicated region body
PF: predicated region fallthrough
CT: control target
= control target key end

     0   :  { %s10408_s0 = inlined_call_operand.hbm [shape: f32[2,128,128], index: 0, kind: input, shape index: {}]   ;;  %s10409_s1 = inlined_call_operand.hbm [shape: bf16[2,256,128], index: 1, kind: input, shape index: {}]   ;;  %s10410_s2 = inlined_call_operand.hbm [shape: bf16[2,256,128], index: 2, kind: input, shape index: {}]   ;;  %s10411_s3 = inlined_call_operand.hbm [shape: bf16[2,128,256], index: 3, kind: input, shape index: {}]   ;;  %s10412_s4 = inlined_call_operand.hbm [shape: f32[1,128], index: 4, kind: input, shape index: {}]   ;;  %s10413_s5 = inlined_call_operand.hbm [shape: f32[1,128], index: 5, kind: input, shape index: {}]   ;;  %s10414_s6 = inlined_call_operand.hbm [shape: f32[1,128], index: 6, kind: input, shape index: {}]   ;;  %s10415_s7 = inlined_call_operand.hbm [shape: bf16[4,128,512], index: 7, kind: input, shape index: {}]   ;;  %s10416_s8 = inlined_call_operand.hbm [shape: bf16[4,128,128], index: 8, kind: input, shape index: {}]   ;;  %s10417_s9 = inlined_call_operand.vmem [shape: f32[4,1,128], index: 9, kind: input, shape index: {}]   ;;  %s10418_s10 = inlined_call_operand.hbm [shape: bf16[4,128,128], index: 10, kind: input, shape index: {}]   ;;  %s10419_s11 = inlined_call_operand.vmem [shape: f32[4,1,128], index: 11, kind: input, shape index: {}]   ;;  %s10420_s12 = inlined_call_operand.hbm [shape: bf16[128,128], index: 12, kind: input, shape index: {}]   ;;  %s10421_s13 = inlined_call_operand.vmem [shape: f32[1,128], index: 13, kind: input, shape index: {}]   ;;  %s10422_s14 = inlined_call_operand.hbm [shape: bf16[128,128], index: 14, kind: input, shape index: {}]   ;;  %s10423_s15 = inlined_call_operand.vmem [shape: f32[1,128], index: 15, kind: input, shape index: {}]   ;;  %s10424_s16 = inlined_call_operand.hbm [shape: f32[2,32,128], index: 16, kind: output, shape index: {}]  }
   0x1   :  { %10493 = sst [smem:[#allocation65_spill]] %s10408_s0 }
   0x2   :  { %10494 = sst [smem:[#allocation66_spill]] %s10409_s1 }
   0x3   :  { %10495 = sst [smem:[#allocation67_spill]] %s10412_s4 }
   0x4   :  { %10496 = sst [smem:[#allocation68_spill]] %s10413_s5 }
   0x5   :  { %10497 = sst [smem:[#allocation69_spill]] %s10414_s6 }
   0x6   :  { %10498 = sst [smem:[#allocation70_spill]] %s10415_s7 }
   0x7   :  { %10499 = sst [smem:[#allocation71_spill]] %s10416_s8 }
   0x8   :  { %10500 = sst [smem:[#allocation72_spill]] %s10417_s9 }
   0x9   :  { %10501 = sst [smem:[#allocation73_spill]] %s10418_s10 }
   0xa   :  { %10502 = sst [smem:[#allocation74_spill]] %s10419_s11 }
   0xb   :  { %10503 = sst [smem:[#allocation75_spill]] %s10421_s13 }
   0xc   :  { %10504 = sst [smem:[#allocation76_spill]] %s10423_s15 }
   0xd   :  { %10505 = sst [smem:[#allocation77_spill]] %s10424_s16 }
   0xe   :  { %21 = vsyncpa [#allocation3], 0 }
   0xf   :  { %23 = vsyncpa [#allocation3 + $0x1], 0 }
  0x10   :  { %24 = vsyncpa [#allocation6], 0 }
  0x11   :  { %26 = vsyncpa [#allocation6 + $0x1], 0 }
  0x12   :  { %27 = vsyncpa [#allocation9], 0 }
  0x13   :  { %29 = vsyncpa [#allocation9 + $0x1], 0 }
  0x14   :  { %30 = vsyncpa [#allocation12], 0 }
  0x15   :  { %31 = vsyncpa [#allocation15], 0 }
  0x16   :  { %32 = vsyncpa [#allocation18], 0 }
  0x17   :  { %33 = vsyncpa [#allocation21], 0 }
  0x18   :  { %34 = vsyncpa [#allocation4], 0 }
  0x19   :  { %36 = vsyncpa [#allocation4 + $0x1], 0  ;;  %s8739_s21 = smov 0   ;;  %s8741_s22 = smov 0  }
  0x1a   :  { %s8743_s23 = smov 0   ;;  %s8745_s24 = smov 0  }
  0x1b LB: > { %10506 = sst [smem:[#allocation32_spill]] %s8622_s21  ;;  %s8763_s28 = sadd.s32 4294967295, %s8634_s24   ;;  %s8634_s24 = sphi %s8745_s24, %s10648_s24   ;;  %s8630_s23 = sphi %s8743_s23, %s10652_s23   ;;  %s8626_s22 = sphi %s8741_s22, %s10651_s22   ;;  %s8622_s21 = sphi %s8739_s21, %s10650_s21  }
  0x1c   : > { %s10507_s4 = sld [smem:[#allocation67_spill]]  ;;  %p6617_p0 = scmp.ge.s32.totalorder %s8634_s24, 1 }
  0x1d   : > { %p10438_p1 = scmp.eq.s32.totalorder %s8763_s28, 0  ;;  %p429_p2 = scmp.lt.s32.totalorder %s8634_s24, 3 }
  0x1e   : > { %s8636_s30 = smov [#allocation10]   ;;  %s10509_s5 = sld [smem:[#allocation68_spill]] }
  0x1f   : > { %p8768_p3 = pnand %p6617_p0, %p429_p2  ;;  %s443_s0 = sshll.u32 %s8636_s30, 4  ;;  %s444_s0 = int_to_ptr.vmem [resolvable:$true] %s443_s0 }
  0x20   : > { %s8637_s25 = smov [#allocation11]   ;;  %s10511_s7 = sld [smem:[#allocation70_spill]] }
  0x21   : > { %p8007_p5 = pneg %p8768_p3  ;;  %s455_s26 = sshll.u32 %s8637_s25, 4  ;;  %s456_s26 = int_to_ptr.vmem [resolvable:$true] %s455_s26 }
  0x22   : > { %s441_s27 = sshll.u32 %s10507_s4, 4  ;;  %s8638_s17 = smov [#allocation14]   ;;  %s442_s27 = int_to_ptr.hbm [resolvable:$true] %s441_s27 }
  0x23   : > { %p8780_p6 = pnand %p8007_p5, %p10438_p1  ;;  %s478_s18 = sshll.u32 %s8638_s17, 4  ;;  %s479_s18 = int_to_ptr.vmem [resolvable:$true] %s478_s18 }
  0x24   : > { %s453_s19 = sshll.u32 %s10509_s5, 4  ;;  %s8639_s5 = smov 256   ;;  %s454_s19 = int_to_ptr.hbm [resolvable:$true] %s453_s19 }
  0x25   : > { %8010 = dma.hbm_to_vmem [thread:$0]  (!%p8780_p6), %s442_s27, 16, %s444_s0, [#allocation9]  }
  0x26   : > { %s476_s16 = sshll.u32 %s10511_s7, 4  ;;  %s8640_s25 = smov 16   ;;  %s477_s16 = int_to_ptr.hbm [resolvable:$true] %s476_s16 }
  0x27   : > { %8013 = dma.hbm_to_vmem [thread:$0]  (!%p8780_p6), %s454_s19, 16, %s456_s26, [#allocation12]  }
  0x28   : > { %8019 = dma.hbm_to_vmem [thread:$0]  (!%p8780_p6), %s477_s16, 16384, %s479_s18, [#allocation15], %s8639_s5, %s8639_s5, %s8640_s25  }
  0x29   : > { %s10512_s10 = sld [smem:[#allocation73_spill]]  ;;  %s8641_s0 = smov [#allocation17]  }
  0x2a   : > { %s509_s19 = sshll.u32 %s8641_s0, 4  ;;  %s10427_s26 = smov 64   ;;  %s510_s19 = int_to_ptr.vmem [resolvable:$true] %s509_s19 }
  0x2b   : > { %s10429_s17 = smov 4   ;;  %s6616_s5 = sadd.s32 4294967294, %s8634_s24  }
  0x2c   : > { %s8803_s16 = sadd.s32 1, %s8634_s24   ;;  %s49_s25 = sadd.s32 1, %s8630_s23 }
  0x2d   : > { %10513 = sst [smem:[#allocation33_spill]] %s8803_s16  ;;  %s46_s18 = ssub.s32 %s8634_s24, %s8803_s16 }
  0x2e   : > { %p47_p7 = scmp.eq.s32.totalorder %s46_s18, 0  ;;  %p56_p8 = scmp.ne.s32.totalorder %s8630_s23, %s8626_s22 }
  0x2f   : > { %s507_s27 = sshll.u32 %s10512_s10, 4  ;;  %p57_p9 = scmp.eq.s32.totalorder %s8634_s24, 0  ;;  %s508_s27 = int_to_ptr.hbm [resolvable:$true] %s507_s27 }
  0x30   : > { %8025 = dma.hbm_to_vmem [thread:$0]  (!%p8780_p6), %s508_s27, 4096, %s510_s19, [#allocation18], %s10427_s26, %s10427_s26, %s10429_s17  }
  0x31   : > { %p62_p10 = scmp.ne.s32.totalorder %s8626_s22, %s8622_s21  ;;  %p58_p11 = por %p57_p9, %p56_p8 }
  0x32   : > { %s8814_s4 = scalar_select %p47_p7, %s8630_s23, %s49_s25  }
  0x33   : > { %p8818_p12 = por %p10438_p1, %p62_p10  ;;  %p416_p13 = scmp.eq.s32.totalorder %s8763_s28, 1 }
  0x34   : > { %10514 = sst [smem:[#allocation34_spill]] %s8814_s4  ;;  %p422_p0 = scmp.eq.s32.totalorder %s6616_s5, 1 }
  0x35   : > { %p8057_p2 = scmp.lt.s32.totalorder %s8634_s24, 2  ;;  %s10434_s27 = sand.u32 1, %s8630_s23  }
  0x36   : > { %p8825_p5 = por %p416_p13, %p56_p8  ;;  %p8829_p4 = por %p422_p0, %p62_p10 }
  0x37   : > { %s8835_s18 = sshll.u32 %s10434_s27, 7  ;;  %s8838_s25 = sshll.u32 %s8634_s24, 7 }
  0x38   : > { %s10516_s0 = scalar_select %p8825_p5, 1, 0 }
  0x39   : > { %s10518_s19 = scalar_select %p8829_p4, 1, 0 }
  0x3a   : > { %10517 = sst [smem:[#allocation35_spill]] %s10516_s0  ;;  %p8840_p7 = pnand %p8057_p2, %p58_p11 }
  0x3b   : > { %10519 = sst [smem:[#allocation36_spill]] %s10518_s19  ;;  %s10439_s5 = sand.u32 1, %s8634_s24  }
  0x3c   : > { %s10521_s1 = sld [smem:[#allocation66_spill]]  ;;  %s586_s16 = scalar_lea.vmem [#allocation5], %s8835_s18 }
  0x3d   : > { %s594_s19 = sshll.u32 %s586_s16, 4  ;;  %s8852_s27 = scalar_lea.sflag [#allocation6], %s10439_s5  ;;  %s595_s19 = int_to_ptr.vmem [resolvable:$true] %s594_s19 }
  0x3e   : > { %p8304_p9 = pneg %p8840_p7 }
  0x42   : > { %s591_s10 = scalar_lea.hbm %s10521_s1, %s8838_s25 }
  0x43   : > { %s592_s4 = sshll.u32 %s591_s10, 4  ;;  %s8307_s10 = scalar_lea.hbm %s10521_s1, 256  ;;  %s593_s4 = int_to_ptr.hbm [resolvable:$true] %s592_s4 }
  0x44   : > { %s8300_s21 = sshra.s32 %s593_s4, 4  ;;  %s8301_s21 = int_to_ptr.hbm [resolvable:$true] %s8300_s21 }
  0x45   : > { %s8302_s0 = scalar_lea.hbm %s8301_s21, 128  ;;  %p8308_p13 = scmp.lt.s32.totalorder %s8301_s21, %s10521_s1 }
  0x46   : > { %p8303_p8 = scmp.ne.s32.totalorder %s8301_s21, %s8302_s0  ;;  %p8309_p0 = scmp.lt.s32.totalorder %s8307_s10, %s8302_s0 }
  0x48   : > { %p8305_p10 = pnand %p8304_p9, %p8303_p8  ;;  %p8310_p2 = por %p8309_p0, %p8308_p13 }
  0x4a   : > { %p8306_p11 = pneg %p8305_p10 }
  0x4c   : > { %p8311_p1 = pnand %p8310_p2, %p8306_p11 }
  0x4e   : > { %8314 = shalt.err (!%p8311_p1)
}
  0x4f   : > { %s10522_s5 = smov 4   ;;  %s10523_s13 = smov 64  }
  0x50   : > { %8038 = dma.hbm_to_vmem [thread:$0]  (!%p8840_p7), %s593_s4, 2048, %s595_s19, %s8852_s27, %s10523_s13, %s10523_s13, %s10522_s5  }
  0x51   : > { %s10524_s6 = sld [smem:[#allocation69_spill]]  ;;  %s8644_s15 = smov [#allocation13]  }
  0x52   : > { %s467_s21 = sshll.u32 %s8644_s15, 4  ;;  %s10525_s8 = sld [smem:[#allocation71_spill]]  ;;  %s468_s21 = int_to_ptr.vmem [resolvable:$true] %s467_s21 }
  0x53   : > { %s524_s4 = sshll.u32 %s10420_s12, 4  ;;  %s8645_s11 = smov [#allocation16]   ;;  %s525_s4 = int_to_ptr.hbm [resolvable:$true] %s524_s4 }
  0x54   : > { %s492_s19 = sshll.u32 %s8645_s11, 4  ;;  %s8646_s7 = smov [#allocation19]   ;;  %s493_s19 = int_to_ptr.vmem [resolvable:$true] %s492_s19 }
  0x55   : > { %s526_s15 = sshll.u32 %s8646_s7, 4  ;;  %s541_s1 = sshll.u32 %s10422_s14, 4  ;;  %s527_s15 = int_to_ptr.vmem [resolvable:$true] %s526_s15  ;;  %s542_s1 = int_to_ptr.hbm [resolvable:$true] %s541_s1 }
  0x56   : > { %8028 = dma.hbm_to_vmem [thread:$0]  (!%p8780_p6), %s525_s4, 1024, %s527_s15, [#allocation18], %s10523_s13, %s10523_s13, %s10522_s5  }
  0x57   : > { %s465_s17 = sshll.u32 %s10524_s6, 4  ;;  %s8647_s9 = smov [#allocation20]   ;;  %s466_s17 = int_to_ptr.hbm [resolvable:$true] %s465_s17 }
  0x58   : > { %s490_s16 = sshll.u32 %s10525_s8, 4  ;;  %s543_s0 = sshll.u32 %s8647_s9, 4  ;;  %s491_s16 = int_to_ptr.hbm [resolvable:$true] %s490_s16  ;;  %s544_s0 = int_to_ptr.vmem [resolvable:$true] %s543_s0 }
  0x59   : > { %8016 = dma.hbm_to_vmem [thread:$0]  (!%p8780_p6), %s466_s17, 16, %s468_s21, [#allocation12]  }
  0x5a   : > { %8022 = dma.hbm_to_vmem [thread:$0]  (!%p8780_p6), %s491_s16, 4096, %s493_s19, [#allocation15], %s10523_s13, %s10523_s13, %s10522_s5  }
  0x5b   : > { %s10526_s11 = sld [smem:[#allocation65_spill]]  ;;  %s564_s17 = scalar_lea.vmem [#allocation2], %s8835_s18 }
  0x5c   : > { %8031 = dma.hbm_to_vmem [thread:$0]  (!%p8780_p6), %s542_s1, 1024, %s544_s0, [#allocation21], %s10523_s13, %s10523_s13, %s10522_s5  }
  0x5d   : > { %s572_s21 = sshll.u32 %s564_s17, 4  ;;  %s10527_s6 = sand.u32 1, %s8630_s23   ;;  %s573_s21 = int_to_ptr.vmem [resolvable:$true] %s572_s21 }
  0x5e   : > { %s561_s4 = scalar_lea.sflag [#allocation3], %s10527_s6 }
  0x61   : > { %s569_s19 = scalar_lea.hbm %s10526_s11, %s8838_s25  ;;  %s8457_s16 = scalar_lea.hbm %s10526_s11, 256 }
  0x62   : > { %s570_s7 = sshll.u32 %s569_s19, 4  ;;  %s571_s7 = int_to_ptr.hbm [resolvable:$true] %s570_s7 }
  0x63   : > { %s8450_s15 = sshra.s32 %s571_s7, 4  ;;  %s8451_s15 = int_to_ptr.hbm [resolvable:$true] %s8450_s15 }
  0x64   : > { %s8452_s9 = scalar_lea.hbm %s8451_s15, 128  ;;  %p8458_p6 = scmp.lt.s32.totalorder %s8451_s15, %s10526_s11 }
  0x65   : > { %p8453_p1 = scmp.ne.s32.totalorder %s8451_s15, %s8452_s9  ;;  %p8459_p11 = scmp.lt.s32.totalorder %s8457_s16, %s8452_s9 }
  0x67   : > { %p8455_p8 = pnand %p8453_p1, %p8304_p9  ;;  %p8460_p13 = por %p8459_p11, %p8458_p6 }
  0x69   : > { %p8456_p10 = pneg %p8455_p8 }
  0x6b   : > { %p8461_p0 = pnand %p8460_p13, %p8456_p10 }
  0x6d   : > { %8464 = shalt.err (!%p8461_p0)
}
  0x6e   : > { %s8648_s6 = smov 128   ;;  %s8649_s19 = smov 8  }
  0x6f   : > { %8035 = dma.hbm_to_vmem [thread:$0]  (!%p8840_p7), %s571_s7, 2048, %s573_s21, %s561_s4, %s8648_s6, %s8648_s6, %s8649_s19  }
  0x70   : > { %s613_s10 = scalar_lea.hbm %s10410_s2, %s8838_s25  ;;  %s608_s9 = scalar_lea.vmem [#allocation7], %s8835_s18 }
  0x71   : > { %s614_s15 = sshll.u32 %s613_s10, 4  ;;  %s616_s16 = sshll.u32 %s608_s9, 4  ;;  %s615_s15 = int_to_ptr.hbm [resolvable:$true] %s614_s15  ;;  %s617_s16 = int_to_ptr.vmem [resolvable:$true] %s616_s16 }
  0x72   : > { %s8480_s1 = sshra.s32 %s615_s15, 4  ;;  %s8487_s7 = scalar_lea.hbm %s10410_s2, 256  ;;  %s8481_s1 = int_to_ptr.hbm [resolvable:$true] %s8480_s1 }
  0x73   : > { %s8482_s0 = scalar_lea.hbm %s8481_s1, 128  ;;  %p8488_p10 = scmp.lt.s32.totalorder %s8481_s1, %s10410_s2 }
  0x74   : > { %p8483_p2 = scmp.ne.s32.totalorder %s8481_s1, %s8482_s0  ;;  %p8489_p6 = scmp.lt.s32.totalorder %s8487_s7, %s8482_s0 }
  0x76   : > { %p8485_p1 = pnand %p8483_p2, %p8304_p9  ;;  %p8490_p11 = por %p8489_p6, %p8488_p10 }
  0x78   : > { %p8486_p8 = pneg %p8485_p1 }
  0x7a   : > { %p8491_p13 = pnand %p8490_p11, %p8486_p8 }
  0x7c   : > { %8494 = shalt.err (!%p8491_p13)
}
  0x7d   : > { %8041 = dma.hbm_to_vmem [thread:$0]  (!%p8840_p7), %s615_s15, 2048, %s617_s16, %s8852_s27, %s10523_s13, %s10523_s13, %s10522_s5  }
  0x7e   : > { %s635_s17 = scalar_lea.hbm %s10411_s3, %s8838_s25  ;;  %s630_s10 = scalar_lea.vmem [#allocation8], %s8835_s18 }
  0x7f   : > { %s636_s20 = sshll.u32 %s635_s17, 4  ;;  %s638_s9 = sshll.u32 %s630_s10, 4  ;;  %s637_s20 = int_to_ptr.hbm [resolvable:$true] %s636_s20  ;;  %s639_s9 = int_to_ptr.vmem [resolvable:$true] %s638_s9 }
  0x80   : > { %s10528_s1 = sand.u32 1, %s8634_s24   ;;  %s8510_s7 = sshra.s32 %s637_s20, 4  ;;  %s8511_s7 = int_to_ptr.hbm [resolvable:$true] %s8510_s7 }
  0x81   : > { %s627_s0 = scalar_lea.sflag [#allocation9], %s10528_s1  ;;  %s8512_s21 = scalar_lea.hbm %s8511_s7, 128 }
  0x82   : > { %p8513_p0 = scmp.ne.s32.totalorder %s8511_s7, %s8512_s21  ;;  %s8517_s5 = scalar_lea.hbm %s10411_s3, 256 }
  0x83   : > { %p8518_p8 = scmp.lt.s32.totalorder %s8511_s7, %s10411_s3  ;;  %p8519_p10 = scmp.lt.s32.totalorder %s8517_s5, %s8512_s21 }
  0x84   : > { %p8515_p2 = pnand %p8513_p0, %p8304_p9 }
  0x85   : > { %p8520_p6 = por %p8519_p10, %p8518_p8 }
  0x86   : > { %p8516_p1 = pneg %p8515_p2 }
  0x88   : > { %p8521_p11 = pnand %p8520_p6, %p8516_p1 }
  0x8a   : > { %8524 = shalt.err (!%p8521_p11)
}
  0x8b   : > { %8044 = dma.hbm_to_vmem [thread:$0]  (!%p8840_p7), %s637_s20, 2048, %s639_s9, %s627_s0, %s8648_s6, %s8648_s6, %s8649_s19  }
  0x8c   : > { %650 = sbr.rel (%p8768_p3) target bundleno = 5194 (0x144a), region = 84 }
  0x91   : > { %s8965_s18 = sand.u32 1, %s8626_s22  }
  0x92   : > { %s6640_s16 = sshll.u32 %s8965_s18, 7  ;;  %s653_s4 = scalar_lea.sflag [#allocation3], %s8965_s18 }
  0x93   : > { %s8969_s8 = scalar_lea.vmem [#allocation2], %s6640_s16 }
  0x94   : > { %8585 = dma.done.wait (%p8818_p12), %s653_s4, 2048  }
  0x95   : > { %8587 = vsyncadd (%p8818_p12), %s653_s4, 4294965248  ;;  %s662_s26 = sand.u32 1, %s8763_s28   ;;  %s8976_s6 = scalar_lea.vmem [#allocation5], %s6640_s16 }
  0x96   : > { %s663_s29 = scalar_lea.sflag [#allocation6], %s662_s26 }
  0x97   : > { %8589 = dma.done.wait (%p8818_p12), %s663_s29, 4096  }
  0x98   : > { %8591 = vsyncadd (%p8818_p12), %s663_s29, 4294963200  ;;  %s8982_s19 = scalar_lea.vmem [#allocation7], %s6640_s16  ;;  %s683_s11 = scalar_lea.sflag [#allocation9], %s662_s26 }
  0x99   : > { %s8984_s17 = scalar_lea.vmem [#allocation8], %s6640_s16 }
  0x9a   : > { %8593 = dma.done.wait (%p8818_p12), %s683_s11, 2048  }
  0x9b   : > { %8595 = vsyncadd (%p8818_p12), %s683_s11, 4294965248  ;;  %p10529_p3 = scmp.eq.s32.totalorder %s8763_s28, 0 }
  0x9d   : > { %8597 = dma.done.wait (%p10529_p3), [#allocation9], 16   ;;  %p10530_p7 = pmov %p10529_p3 }
  0x9e   : > { %p10531_p9 = pmov %p10529_p3 }
  0x9f   : > { %8599 = vsyncadd (%p10530_p7), [#allocation9], 4294967280 }
  0xa0   : > { %8601 = dma.done.wait (%p10531_p9), [#allocation12], 32   ;;  %p10532_p13 = pmov %p10529_p3 }
  0xa1   : > { %p10533_p0 = pmov %p10529_p3 }
  0xa2   : > { %8603 = vsyncadd (%p10532_p13), [#allocation12], 4294967264 }
  0xa3   : > { %8605 = dma.done.wait (%p10533_p0), [#allocation15], 20480   ;;  %p10534_p2 = pmov %p10533_p0 }
  0xa4   : > { %p10535_p12 = pmov %p10533_p0 }
  0xa5   : > { %8607 = vsyncadd (%p10534_p2), [#allocation15], 4294946816 }
  0xa6   : > { %8609 = dma.done.wait (%p10535_p12), [#allocation18], 5120   ;;  %p10536_p1 = pmov %p10533_p0 }
  0xa7   : > { %p10537_p8 = pmov %p10533_p0 }
  0xa8   : > { %8611 = vsyncadd (%p10536_p1), [#allocation18], 4294962176 }
  0xa9   : > { %8613 = dma.done.wait (%p10537_p8), [#allocation21], 1024   ;;  %p10538_p10 = pmov %p10533_p0 }
  0xaa   : > { %v8650_v0 = vmov 127   ;;  %v8651_v1 = vmov 126   ;;  %v9014_v2 = vld [vmem:[%s8969_s8] sm:$0xff]  ;;  %v9017_v3 = vld [vmem:[%s8969_s8 + $0x10] sm:$0xff]  ;;  %v1043_v4 = vlaneseq  ;;  %v9023_v5 = vld [vmem:[%s8969_s8 + $0x8] sm:$0xff]  ;;  %s10558_s10 = sld [smem:[#allocation72_spill]] }
  0xab   : > { %8615 = vsyncadd (%p10538_p10), [#allocation21], 4294966272  ;;  %8118 = vset.pattern.permute.xlu1 %v8650_v0  ;;  %8117 = vset.pattern.permute.xlu0 %v8651_v1  ;;  %v9030_v7 = vld [vmem:[%s8969_s8 + $0x18] sm:$0xff]  ;;  %v799_v8 = vld [vmem:[%s8969_s8 + $0x40] sm:$0xff]  ;;  %s10559_s0 = sld [smem:[#allocation74_spill]]  ;;  %s7948_s7 = sshll.u32 %s8763_s28, 5 }
  0xac   : > { %8119 = vset.pattern.permute.xlu2 %v8651_v1  ;;  %909 = vperm.xlu1 %8118, %v9014_v2   ;;  %v9025_v6 = vand.u32 127, %v1043_v4  ;;  %v9040_v10 = vld [vmem:[%s8969_s8 + $0x20] sm:$0xff]  ;;  %v800_v11 = vld [vmem:[%s8969_s8 + $0x48] sm:$0xff]  ;;  %v801_v14 = vld [vmem:[%s8969_s8 + $0x50] sm:$0xff]  ;;  %s10641_s11 = sld [smem:[#allocation75_spill]]  ;;  %s6386_s4 = scalar_lea.sflag [#allocation4], %s8965_s18 }
  0xad   : > { %810 = vperm.xlu0 %8117, %v9014_v2   ;;  %820 = vperm.xlu2 %8119, %v9017_v3   ;;  %v9052_v13 = vld [vmem:[%s8969_s8 + $0x28] sm:$0xff]  ;;  %v9065_v16 = vld [vmem:[%s8969_s8 + $0x30] sm:$0xff]  ;;  %v9070_v17 = vld [vmem:[%s8969_s8 + $0x38] sm:$0xff]  ;;  %s10642_s9 = sld [smem:[#allocation76_spill]] }
  0xae   : > { %vm1045_vm0 = vcmp.lt.s32.totalorder %v9025_v6, 96  ;;  %v802_v18 = vld [vmem:[%s8969_s8 + $0x58] sm:$0xff]  ;;  %v9083_v20 = vld [vmem:[%s8969_s8 + $0x68] sm:$0xff]  ;;  %v9091_v22 = vld [vmem:[%s8969_s8 + $0x70] sm:$0xff]  ;;  %s10644_s5 = sld [smem:[#allocation77_spill]] }
  0xaf   : > { %v9037_v9 = vsel %vm1045_vm0, %v799_v8, 0.0  ;;  %v9049_v12 = vsel %vm1045_vm0, %v800_v11, 0.0  ;;  %v9062_v15 = vsel %vm1045_vm0, %v801_v14, 0.0  ;;  %v9077_v19 = vsel %vm1045_vm0, %v802_v18, 0.0  ;;  %v9104_v24 = vld [vmem:[%s8969_s8 + $0x78] sm:$0xff]  ;;  %v803_v26 = vld [vmem:[%s8969_s8 + $0x60] sm:$0xff] }
  0xb0   : > { %v9088_v21 = vsel %vm1045_vm0, %v9083_v20, 0.0  ;;  %v9096_v23 = vsel %vm1045_vm0, %v9091_v22, 0.0  ;;  %v9109_v25 = vsel %vm1045_vm0, %v9104_v24, 0.0  ;;  %v6767_v27 = vld [vmem:[#allocation14 + $0xe0] sm:$0xf]  ;;  %v9114_v29 = vsel %vm1045_vm0, %v803_v26, 0.0 }
  0xb1   : > { %v7746_v28 = vld [vmem:[#allocation14 + $0xec] sm:$0xf0]  ;;  %v7744_v31 = vld [vmem:[#allocation14 + $0xe4] sm:$0xf]  ;;  %v6769_v32 = vld [vmem:[#allocation14 + $0xf0] sm:$0xf0] }
  0xb2   : > { %v6768_v30 = vor.u32 %v7746_v28, %v6767_v27  ;;  %v6772_v33 = vor.u32 %v7744_v31, %v6769_v32  ;;  %v6775_v34 = vld [vmem:[#allocation14 + $0xe8] sm:$0xf]  ;;  %v7747_v35 = vld [vmem:[#allocation14 + $0xf4] sm:$0xf0]  ;;  %v7745_v36 = vld [vmem:[#allocation14 + $0xec] sm:$0xf] }
  0xb3   : > { %v6776_v37 = vor.u32 %v7747_v35, %v6775_v34  ;;  %v6777_v38 = vld [vmem:[#allocation14 + $0xf8] sm:$0xf0]  ;;  %v6751_v39 = vld [vmem:[#allocation14 + $0xc0] sm:$0xf]  ;;  %v7742_v41 = vld [vmem:[#allocation14 + $0xcc] sm:$0xf0] }
  0xb4   : > { %913 = vperm.xlu1 %8118, %v9023_v5   ;;  %1328 = vmatpush.bf16.msra.mxu0 %v6768_v30  ;;  %v6780_v40 = vor.u32 %v7745_v36, %v6777_v38  ;;  %v7740_v42 = vld [vmem:[#allocation14 + $0xc4] sm:$0xf]  ;;  %v6753_v43 = vld [vmem:[#allocation14 + $0xd0] sm:$0xf0]  ;;  %v6752_v44 = vor.u32 %v7742_v41, %v6751_v39  ;;  %v6759_v46 = vld [vmem:[#allocation14 + $0xc8] sm:$0xf]  ;;  %s6397_s25 = scalar_lea.hbm %s10644_s5, %s7948_s7 }
  0xb5   : > { %815 = vperm.xlu0 %8117, %v9023_v5   ;;  %825 = vperm.xlu2 %8119, %v9030_v7   ;;  %v6756_v45 = vor.u32 %v7740_v42, %v6753_v43  ;;  %v7743_v47 = vld [vmem:[#allocation14 + $0xd4] sm:$0xf0]  ;;  %v7741_v48 = vld [vmem:[#allocation14 + $0xcc] sm:$0xf]  ;;  %v6761_v50 = vld [vmem:[#allocation14 + $0xd8] sm:$0xf0] }
  0xb6   : > { %1377 = vmatpush.bf16.msra.mxu1 %v6772_v33  ;;  %1426 = vmatpush.bf16.msra.mxu2 %v6776_v37  ;;  %v6760_v49 = vor.u32 %v7743_v47, %v6759_v46  ;;  %v6735_v51 = vld [vmem:[#allocation14 + $0xa0] sm:$0xf]  ;;  %v7738_v52 = vld [vmem:[#allocation14 + $0xac] sm:$0xf0]  ;;  %v6764_v53 = vor.u32 %v7741_v48, %v6761_v50  ;;  %v7736_v55 = vld [vmem:[#allocation14 + $0xa4] sm:$0xf] }
  0xb7   : > { %1475 = vmatpush.bf16.msra.mxu3 %v6780_v40  ;;  %v6736_v54 = vor.u32 %v7738_v52, %v6735_v51  ;;  %v6737_v56 = vld [vmem:[#allocation14 + $0xb0] sm:$0xf0]  ;;  %v6743_v57 = vld [vmem:[#allocation14 + $0xa8] sm:$0xf]  ;;  %v7739_v59 = vld [vmem:[#allocation14 + $0xb4] sm:$0xf0] }
  0xb8   : > { %1329 = vmatpush.bf16.msra.mxu0 %v6752_v44  ;;  %v6740_v58 = vor.u32 %v7736_v55, %v6737_v56  ;;  %v7737_v60 = vld [vmem:[#allocation14 + $0xac] sm:$0xf]  ;;  %v6745_v61 = vld [vmem:[#allocation14 + $0xb8] sm:$0xf0]  ;;  %v6744_v62 = vor.u32 %v7739_v59, %v6743_v57  ;;  %v6719_v4 = vld [vmem:[#allocation14 + $0x80] sm:$0xf] }
  0xb9   : > { %v6748_v63 = vor.u32 %v7737_v60, %v6745_v61  ;;  %v6727_v27 = vld [vmem:[#allocation14 + $0x88] sm:$0xf]  ;;  %v7735_v28 = vld [vmem:[#allocation14 + $0x94] sm:$0xf0]  ;;  %v7733_v32 = vld [vmem:[#allocation14 + $0x8c] sm:$0xf] }
  0xba   : > { %1378 = vmatpush.bf16.msra.mxu1 %v6756_v45  ;;  %1427 = vmatpush.bf16.msra.mxu2 %v6760_v49  ;;  %v6728_v31 = vor.u32 %v7735_v28, %v6727_v27  ;;  %v6729_v33 = vld [vmem:[#allocation14 + $0x98] sm:$0xf0]  ;;  %v7730_v35 = vld [vmem:[#allocation14 + $0x6c] sm:$0xf0]  ;;  %v7728_v36 = vld [vmem:[#allocation14 + $0x64] sm:$0xf] }
  0xbb   : > { %1476 = vmatpush.bf16.msra.mxu3 %v6764_v53  ;;  %v6732_v34 = vor.u32 %v7733_v32, %v6729_v33  ;;  %v6705_v37 = vld [vmem:[#allocation14 + $0x70] sm:$0xf0]  ;;  %v6711_v38 = vld [vmem:[#allocation14 + $0x68] sm:$0xf]  ;;  %v7731_v39 = vld [vmem:[#allocation14 + $0x74] sm:$0xf0] }
  0xbc   : > { %921 = vperm.xlu1 %8118, %v9030_v7   ;;  %1330 = vmatpush.bf16.msra.mxu0 %v6736_v54  ;;  %v6708_v40 = vor.u32 %v7728_v36, %v6705_v37  ;;  %v6712_v41 = vor.u32 %v7731_v39, %v6711_v38  ;;  %v7729_v42 = vld [vmem:[#allocation14 + $0x6c] sm:$0xf]  ;;  %v6713_v43 = vld [vmem:[#allocation14 + $0x78] sm:$0xf0]  ;;  %v6687_v44 = vld [vmem:[#allocation14 + $0x40] sm:$0xf] }
  0xbd   : > { %8120 = vset.pattern.permute.xlu0 %v8650_v0  ;;  %830 = vperm.xlu2 %8119, %v9040_v10   ;;  %v7726_v45 = vld [vmem:[#allocation14 + $0x4c] sm:$0xf0]  ;;  %v7724_v46 = vld [vmem:[#allocation14 + $0x44] sm:$0xf]  ;;  %v6689_v48 = vld [vmem:[#allocation14 + $0x50] sm:$0xf0] }
  0xbe   : > { %917 = vperm.xlu0 %8120, %v9017_v3   ;;  %1379 = vmatpush.bf16.msra.mxu1 %v6740_v58  ;;  %v6688_v47 = vor.u32 %v7726_v45, %v6687_v44  ;;  %v6695_v49 = vld [vmem:[#allocation14 + $0x48] sm:$0xf]  ;;  %v7727_v50 = vld [vmem:[#allocation14 + $0x54] sm:$0xf0]  ;;  %v6692_v51 = vor.u32 %v7724_v46, %v6689_v48  ;;  %v7725_v52 = vld [vmem:[#allocation14 + $0x4c] sm:$0xf] }
  0xbf   : > { %1428 = vmatpush.bf16.msra.mxu2 %v6744_v62  ;;  %1477 = vmatpush.bf16.msra.mxu3 %v6748_v63  ;;  %v6697_v53 = vld [vmem:[#allocation14 + $0x58] sm:$0xf0]  ;;  %v6671_v55 = vld [vmem:[#allocation14 + $0x20] sm:$0xf]  ;;  %v7722_v56 = vld [vmem:[#allocation14 + $0x2c] sm:$0xf0] }
  0xc0   : > { %v6700_v54 = vor.u32 %v7725_v52, %v6697_v53  ;;  %v7720_v57 = vld [vmem:[#allocation14 + $0x24] sm:$0xf]  ;;  %v6672_v58 = vor.u32 %v7722_v56, %v6671_v55  ;;  %v6673_v59 = vld [vmem:[#allocation14 + $0x30] sm:$0xf0]  ;;  %v6679_v60 = vld [vmem:[#allocation14 + $0x28] sm:$0xf] }
  0xc1   : > { %v7723_v61 = vld [vmem:[#allocation14 + $0x34] sm:$0xf0]  ;;  %v6676_v62 = vor.u32 %v7720_v57, %v6673_v59  ;;  %v6657_v28 = vld [vmem:[#allocation14 + $0x10] sm:$0xf0]  ;;  %v7717_v33 = vld [vmem:[#allocation14 + $0xc] sm:$0xf] }
  0xc2   : > { %v6680_v63 = vor.u32 %v7723_v61, %v6679_v60  ;;  %v9128_v36 = vld [vmem:[#allocation11] ss:$0 sm:$0xff]  ;;  %s6400_s16 = sshll.u32 %s6397_s25, 4  ;;  %s6401_s16 = int_to_ptr.hbm [resolvable:$true] %s6400_s16 }
  0xc3   : > { %1429 = vmatpush.bf16.msra.mxu2 %v6728_v31  ;;  %1478 = vmatpush.bf16.msra.mxu3 %v6732_v34  ;;  %v6665_v34 = vld [vmem:[#allocation14 + $0x18] sm:$0xf0]  ;;  %s8554_s8 = sshra.s32 %s6401_s16, 4  ;;  %s8555_s8 = int_to_ptr.hbm [resolvable:$true] %s8554_s8 }
  0xc4   : > { %8121 = vset.pattern.permute.xlu1 %v8651_v1  ;;  %s8556_s26 = scalar_lea.hbm %s8555_s8, 32  ;;  %p8561_p7 = scmp.lt.s32.totalorder %s8555_s8, %s10644_s5 }
  0xc5   : > { %835 = vperm.xlu1 %8121, %v9052_v13   ;;  %8122 = vset.pattern.permute.xlu2 %v8650_v0  ;;  %p8557_p6 = scmp.ne.s32.totalorder %s8555_s8, %s8556_s26 }
  0xc6   : > { %929 = vperm.xlu0 %8120, %v9052_v13   ;;  %925 = vperm.xlu2 %8122, %v9040_v10  }
  0xc7   : > { %1430 = vmatpush.bf16.msra.mxu2 %v6712_v41  ;;  %v9132_v41 = vld [vmem:[#allocation13] ss:$0 sm:$0xff]  ;;  %p8558_p11 = pnand %p8557_p6, %p8825_p5 }
  0xc9   : > { %p8559_p3 = pneg %p8558_p11 }
  0xcd   : > { %840 = vperm.xlu1 %8121, %v9065_v16  }
  0xce   : > { %933 = vperm.xlu0 %8120, %v9065_v16   ;;  %8123 = vset.pattern.permute.xlu2 %v8651_v1 }
  0xcf   : > { %845 = vperm.xlu2 %8123, %v9070_v17  }
  0xd5   : > { %8124 = vset.pattern.permute.xlu1 %v8650_v0 }
  0xd6   : > { %8125 = vset.pattern.permute.xlu0 %v8651_v1  ;;  %937 = vperm.xlu1 %8124, %v9070_v17  }
  0xd7   : > { %855 = vperm.xlu0 %8125, %v800_v11   ;;  %850 = vperm.xlu2 %8123, %v799_v8  }
  0xde   : > { %941 = vperm.xlu1 %8124, %v799_v8   ;;  %v7734_v8 = vld [vmem:[#allocation14 + $0x8c] sm:$0xf0] }
  0xdf   : > { %8129 = vset.pattern.permute.xlu0 %v8650_v0  ;;  %8126 = vset.pattern.permute.xlu2 %v8650_v0 }
  0xe0   : > { %949 = vperm.xlu0 %8129, %v801_v14   ;;  %945 = vperm.xlu2 %8126, %v800_v11   ;;  %v7732_v11 = vld [vmem:[#allocation14 + $0x84] sm:$0xf] }
  0xe6   : > { %8127 = vset.pattern.permute.xlu1 %v8651_v1 }
  0xe7   : > { %860 = vperm.xlu1 %8127, %v801_v14   ;;  %v6720_v14 = vor.u32 %v7734_v8, %v6719_v4  ;;  %v7721_v4 = vld [vmem:[#allocation14 + $0x2c] sm:$0xf]  ;;  %v6681_v8 = vld [vmem:[#allocation14 + $0x38] sm:$0xf0] }
  0xe8   : > { %961 = vperm.xlu0 %8129, %v9083_v20   ;;  %8128 = vset.pattern.permute.xlu2 %v8651_v1 }
  0xe9   : > { %865 = vperm.xlu2 %8128, %v802_v18   ;;  %1331 = vmatpush.bf16.msra.mxu0 %v6720_v14  ;;  %v7718_v14 = vld [vmem:[#allocation14 + $0xc] sm:$0xf0] }
  0xef   : > { %8130 = vset.pattern.permute.xlu1 %v8650_v0 }
  0xf0   : > { %965 = vperm.xlu0 %8129, %v9091_v22   ;;  %953 = vperm.xlu1 %8130, %v802_v18   ;;  %v6721_v18 = vld [vmem:[#allocation14 + $0x90] sm:$0xf0] }
  0xf1   : > { %870 = vperm.xlu2 %8128, %v803_v26   ;;  %v6724_v30 = vor.u32 %v7732_v11, %v6721_v18  ;;  %v6684_v11 = vor.u32 %v7721_v4, %v6681_v8  ;;  %v7716_v18 = vld [vmem:[#allocation14 + $0x4] sm:$0xf] }
  0xf2   : > { %v6660_v31 = vor.u32 %v7716_v18, %v6657_v28  ;;  %v1051_v18 = vsel %vm1045_vm0, %v9030_v7, 0.0 }
  0xf3   : > { %1380 = vmatpush.bf16.msra.mxu1 %v6724_v30  ;;  %v7719_v30 = vld [vmem:[#allocation14 + $0x14] sm:$0xf0] }
  0xf7   : > { %1381 = vmatpush.bf16.msra.mxu1 %v6708_v40 }
  0xf8   : > { %8131 = vset.pattern.permute.xlu1 %v8651_v1 }
  0xf9   : > { %875 = vperm.xlu1 %8131, %v9083_v20   ;;  %8132 = vset.pattern.permute.xlu2 %v8650_v0  ;;  %v6703_v20 = vld [vmem:[#allocation14 + $0x60] sm:$0xf] }
  0xfa   : > { %957 = vperm.xlu2 %8132, %v803_v26   ;;  %v6704_v26 = vor.u32 %v7730_v35, %v6703_v20  ;;  %v6668_v20 = vor.u32 %v7717_v33, %v6665_v34  ;;  %v9126_v35 = vld [vmem:[#allocation10] ss:$0 sm:$0xff] }
  0xfb   : > { %1382 = vmatpush.bf16.msra.mxu1 %v6692_v51  ;;  %v1048_v51 = vsel %vm1045_vm0, %v9014_v2, 0.0 }
  0xfc   : > { %1332 = vmatpush.bf16.msra.mxu0 %v6704_v26 }
  0xff   : > { %1383 = vmatpush.bf16.msra.mxu1 %v6676_v62 }
 0x100   : > { %1333 = vmatpush.bf16.msra.mxu0 %v6688_v47 }
 0x101   : > { %880 = vperm.xlu1 %8131, %v9091_v22   ;;  %v6716_v22 = vor.u32 %v7729_v42, %v6713_v43 }
 0x102   : > { %8133 = vset.pattern.permute.xlu2 %v8651_v1  ;;  %v6696_v1 = vor.u32 %v7727_v50, %v6695_v49 }
 0x103   : > { %885 = vperm.xlu2 %8133, %v9104_v24   ;;  %1479 = vmatpush.bf16.msra.mxu3 %v6716_v22 }
 0x104   : > { %1431 = vmatpush.bf16.msra.mxu2 %v6696_v1  ;;  %1334 = vmatpush.bf16.msra.mxu0 %v6672_v58  ;;  %v1049_v1 = vsel %vm1045_vm0, %v9023_v5, 0.0 }
 0x105   : > { %1384 = vmatpush.bf16.msra.mxu1 %v6660_v31 }
 0x107   : > { %1480 = vmatpush.bf16.msra.mxu3 %v6700_v54  ;;  %v821_v26 = vpop.permute.xlu2 %820 }
 0x108   : > { %1432 = vmatpush.bf16.msra.mxu2 %v6680_v63  ;;  %v893_v59 = vmul.f32 %v9126_v35, %v821_v26 }
 0x109   : > { %8134 = vset.pattern.permute.xlu1 %v8650_v0  ;;  %v6655_v0 = vld [vmem:[#allocation14] sm:$0xf] }
 0x10a   : > { %969 = vperm.xlu1 %8134, %v9104_v24   ;;  %v6656_v27 = vor.u32 %v7718_v14, %v6655_v0  ;;  %v6663_v24 = vld [vmem:[#allocation14 + $0x8] sm:$0xf]  ;;  %v1050_v14 = vsel %vm1045_vm0, %v9017_v3, 0.0 }
 0x10b   : > { %1481 = vmatpush.bf16.msra.mxu3 %v6684_v11  ;;  %v6664_v32 = vor.u32 %v7719_v30, %v6663_v24 }
 0x10c   : > { %1335 = vmatpush.bf16.msra.mxu0 %v6656_v27 }
 0x10d   : > { %1433 = vmatpush.bf16.msra.mxu2 %v6664_v32 }
 0x10f   : > { %1482 = vmatpush.bf16.msra.mxu3 %v6668_v20  ;;  %v826_v47 = vpop.permute.xlu2 %825 }
 0x110   : > { %v894_v52 = vmul.f32 %v9126_v35, %v826_v47 }
 0x117   : > { %v831_v5 = vpop.permute.xlu2 %830 }
 0x118   : > { %v895_v33 = vmul.f32 %v9126_v35, %v831_v5  ;;  %v1054_v5 = vsel %vm1045_vm0, %v9065_v16, 0.0 }
 0x11e   : > { %v910_v37 = vpop.permute.xlu1 %909 }
 0x11f   : > { %v811_v38 = vpop.permute.xlu0 %810  ;;  %v975_v39 = vmul.f32 %v9128_v36, %v910_v37 }
 0x120   : > { %v891_v40 = vmul.f32 %v9126_v35, %v811_v38  ;;  %v926_v28 = vpop.permute.xlu2 %925 }
 0x121   : > { %v979_v34 = vmul.f32 %v9128_v36, %v926_v28 }
 0x122   : > { %v991_v42 = vadd.f32 %v975_v39, %v891_v40 }
 0x123   : > { %v995_v7 = vadd.f32 %v979_v34, %v895_v33 }
 0x124   : > { %v1011_v44 = vadd.f32 %v9132_v41, %v991_v42  ;;  %v1053_v42 = vsel %vm1045_vm0, %v9052_v13, 0.0 }
 0x125   : > { %v1015_v39 = vadd.f32 %v9132_v41, %v995_v7 }
 0x126   : > { %v914_v43 = vpop.permute.xlu1 %913  ;;  %v1027_v49 = vmax.f32 %v1011_v44, 0.0  ;;  %v1052_v44 = vsel %vm1045_vm0, %v9040_v10, 0.0 }
 0x127   : > { %v816_v22 = vpop.permute.xlu0 %815  ;;  %v976_v45 = vmul.f32 %v9128_v36, %v914_v43 }
 0x128   : > { %v892_v46 = vmul.f32 %v9126_v35, %v816_v22  ;;  %v9145_v55 = vadd.f32 %v1048_v51, %v1027_v49  ;;  %v1031_v22 = vmax.f32 %v1015_v39, 0.0 }
 0x129   : > { %v846_v38 = vpop.permute.xlu2 %845 }
 0x12a   : > { %v992_v48 = vadd.f32 %v976_v45, %v892_v46  ;;  %v898_v47 = vmul.f32 %v9126_v35, %v846_v38  ;;  %v9184_v49 = vadd.f32 %v1052_v44, %v1031_v22 }
 0x12c   : > { %v1012_v50 = vadd.f32 %v9132_v41, %v992_v48 }
 0x12e   : > { %v1028_v53 = vmax.f32 %v1012_v50, 0.0  ;;  %v922_v54 = vpop.permute.xlu1 %921 }
 0x12f   : > { %v978_v57 = vmul.f32 %v9128_v36, %v922_v54 }
 0x130   : > { %v9147_v56 = vadd.f32 %v1049_v1, %v1028_v53  ;;  %v918_v58 = vpop.permute.xlu0 %917 }
 0x131   : > { %v977_v60 = vmul.f32 %v9128_v36, %v918_v58  ;;  %v994_v2 = vadd.f32 %v978_v57, %v894_v52  ;;  %v851_v13 = vpop.permute.xlu2 %850 }
 0x132   : > { %v1128_v61 = vpack.c.bf16 %v9147_v56, %v9145_v55 }
 0x133   : > { %v993_v62 = vadd.f32 %v977_v60, %v893_v59  ;;  %v1014_v63 = vadd.f32 %v9132_v41, %v994_v2  ;;  %v1055_v2 = vsel %vm1045_vm0, %v9070_v17, 0.0 }
 0x134   : > { %1336 = vmatmul.bf16.vlgmr.msra.gmra.mxu0 %v1128_v61  ;;  %1385 = vmatmul.bf16.vlgmr.msra.gmra.mxu1 %v1128_v61 }
 0x135   : > { %1434 = vmatmul.bf16.vlgmr.msra.gmra.mxu2 %v1128_v61  ;;  %1483 = vmatmul.bf16.vlgmr.msra.gmra.mxu3 %v1128_v61  ;;  %v1013_v4 = vadd.f32 %v9132_v41, %v993_v62  ;;  %v1030_v11 = vmax.f32 %v1014_v63, 0.0 }
 0x137   : > { %v836_v8 = vpop.permute.xlu1 %835  ;;  %v1029_v0 = vmax.f32 %v1013_v4, 0.0  ;;  %v9162_v24 = vadd.f32 %v1051_v18, %v1030_v11 }
 0x138   : > { %v930_v27 = vpop.permute.xlu0 %929  ;;  %v896_v31 = vmul.f32 %v9126_v35, %v836_v8  ;;  %v899_v8 = vmul.f32 %v9126_v35, %v851_v13 }
 0x139   : > { %v9164_v30 = vadd.f32 %v1050_v14, %v1029_v0  ;;  %v980_v32 = vmul.f32 %v9128_v36, %v930_v27 }
 0x13a   : > { %v946_v59 = vpop.permute.xlu2 %945 }
 0x13b   : > { %v996_v3 = vadd.f32 %v980_v32, %v896_v31  ;;  %v1129_v26 = vpack.c.bf16 %v9162_v24, %v9164_v30  ;;  %v984_v62 = vmul.f32 %v9128_v36, %v946_v59 }
 0x13d   : > { %v1016_v37 = vadd.f32 %v9132_v41, %v996_v3 }
 0x13f   : > { %v841_v20 = vpop.permute.xlu1 %840  ;;  %v1032_v40 = vmax.f32 %v1016_v37, 0.0 }
 0x140   : > { %v934_v45 = vpop.permute.xlu0 %933  ;;  %v897_v50 = vmul.f32 %v9126_v35, %v841_v20 }
 0x141   : > { %v9180_v46 = vadd.f32 %v1053_v42, %v1032_v40  ;;  %v981_v51 = vmul.f32 %v9128_v36, %v934_v45 }
 0x143   : > { %10539 = vst [vmem:[#allocation37_spill] sm:$0xff] %v9180_v46  ;;  %v1130_v52 = vpack.c.bf16 %v9180_v46, %v9184_v49  ;;  %v997_v53 = vadd.f32 %v981_v51, %v897_v50  ;;  %v866_v28 = vpop.permute.xlu2 %865 }
 0x144   : > { %1341 = vmatmul.bf16.gmra.mxu0 %v1129_v26  ;;  %1390 = vmatmul.bf16.gmra.mxu1 %v1129_v26  ;;  %v902_v34 = vmul.f32 %v9126_v35, %v866_v28 }
 0x145   : > { %1439 = vmatmul.bf16.gmra.mxu2 %v1129_v26  ;;  %1488 = vmatmul.bf16.gmra.mxu3 %v1129_v26  ;;  %v1017_v54 = vadd.f32 %v9132_v41, %v997_v53 }
 0x147   : > { %v1033_v61 = vmax.f32 %v1017_v54, 0.0 }
 0x148   : > { %v938_v43 = vpop.permute.xlu1 %937 }
 0x149   : > { %v982_v48 = vmul.f32 %v9128_v36, %v938_v43  ;;  %v856_v60 = vpop.permute.xlu0 %855  ;;  %v9204_v0 = vadd.f32 %v1054_v5, %v1033_v61 }
 0x14a   : > { %v900_v63 = vmul.f32 %v9126_v35, %v856_v60 }
 0x14b   : > { %v998_v1 = vadd.f32 %v982_v48, %v898_v47  ;;  %10541 = vst [vmem:[#allocation39_spill] sm:$0xff] %v9204_v0  ;;  %v871_v39 = vpop.permute.xlu2 %870 }
 0x14c   : > { %v1000_v14 = vadd.f32 %v984_v62, %v900_v63  ;;  %v903_v48 = vmul.f32 %v9126_v35, %v871_v39 }
 0x14d   : > { %v1018_v10 = vadd.f32 %v9132_v41, %v998_v1 }
 0x14e   : > { %v1020_v6 = vadd.f32 %v9132_v41, %v1000_v14 }
 0x14f   : > { %v1034_v58 = vmax.f32 %v1018_v10, 0.0 }
 0x150   : > { %v942_v57 = vpop.permute.xlu1 %941  ;;  %v1036_v31 = vmax.f32 %v1020_v6, 0.0 }
 0x151   : > { %v9200_v4 = vadd.f32 %v1055_v2, %v1034_v58  ;;  %v983_v11 = vmul.f32 %v9128_v36, %v942_v57 }
 0x152   : > { %v9211_v33 = vadd.f32 %v9049_v12, %v1036_v31  ;;  %v950_v3 = vpop.permute.xlu0 %949 }
 0x153   : > { %10540 = vst [vmem:[#allocation38_spill] sm:$0xff] %v9200_v4  ;;  %v999_v18 = vadd.f32 %v983_v11, %v899_v8  ;;  %v1131_v17 = vpack.c.bf16 %v9200_v4, %v9204_v0  ;;  %v985_v38 = vmul.f32 %v9128_v36, %v950_v3 }
 0x154   : > { %1346 = vmatmul.bf16.gmra.mxu0 %v1130_v52  ;;  %1395 = vmatmul.bf16.gmra.mxu1 %v1130_v52  ;;  %10542 = vst [vmem:[#allocation40_spill] sm:$0xff] %v9211_v33  ;;  %v958_v47 = vpop.permute.xlu2 %957 }
 0x155   : > { %1444 = vmatmul.bf16.gmra.mxu2 %v1130_v52  ;;  %1493 = vmatmul.bf16.gmra.mxu3 %v1130_v52  ;;  %v1019_v16 = vadd.f32 %v9132_v41, %v999_v18  ;;  %v987_v51 = vmul.f32 %v9128_v36, %v958_v47 }
 0x157   : > { %v1035_v32 = vmax.f32 %v1019_v16, 0.0  ;;  %v1003_v57 = vadd.f32 %v987_v51, %v903_v48 }
 0x159   : > { %v861_v27 = vpop.permute.xlu1 %860  ;;  %v9215_v26 = vadd.f32 %v9037_v9, %v1035_v32  ;;  %v1023_v59 = vadd.f32 %v9132_v41, %v1003_v57 }
 0x15a   : > { %v901_v7 = vmul.f32 %v9126_v35, %v861_v27  ;;  %v962_v50 = vpop.permute.xlu0 %961 }
 0x15b   : > { %10543 = vst [vmem:[#allocation41_spill] sm:$0xff] %v9215_v26  ;;  %v1132_v12 = vpack.c.bf16 %v9211_v33, %v9215_v26  ;;  %v988_v53 = vmul.f32 %v9128_v36, %v962_v50  ;;  %v1039_v60 = vmax.f32 %v1023_v59, 0.0 }
 0x15c   : > { %v1001_v42 = vadd.f32 %v985_v38, %v901_v7 }
 0x15d   : > { %v886_v2 = vpop.permute.xlu2 %885  ;;  %v9242_v63 = vadd.f32 %v9114_v29, %v1039_v60 }
 0x15e   : > { %v1021_v9 = vadd.f32 %v9132_v41, %v1001_v42  ;;  %v906_v8 = vmul.f32 %v9126_v35, %v886_v2 }
 0x15f   : > { %10547 = vst [vmem:[#allocation45_spill] sm:$0xff] %v9242_v63 }
 0x160   : > { %v1037_v45 = vmax.f32 %v1021_v9, 0.0 }
 0x162   : > { %v954_v20 = vpop.permute.xlu1 %953  ;;  %v9230_v1 = vadd.f32 %v9062_v15, %v1037_v45  ;;  %v966_v5 = vpop.permute.xlu0 %965 }
 0x163   : > { %v986_v37 = vmul.f32 %v9128_v36, %v954_v20  ;;  %v989_v18 = vmul.f32 %v9128_v36, %v966_v5 }
 0x164   : > { %1351 = vmatmul.bf16.gmra.mxu0 %v1131_v17  ;;  %1400 = vmatmul.bf16.gmra.mxu1 %v1131_v17  ;;  %10545 = vst [vmem:[#allocation43_spill] sm:$0xff] %v9230_v1 }
 0x165   : > { %1449 = vmatmul.bf16.gmra.mxu2 %v1131_v17  ;;  %1498 = vmatmul.bf16.gmra.mxu3 %v1131_v17  ;;  %v1002_v40 = vadd.f32 %v986_v37, %v902_v34 }
 0x167   : > { %v1022_v43 = vadd.f32 %v9132_v41, %v1002_v40 }
 0x169   : > { %v1038_v44 = vmax.f32 %v1022_v43, 0.0 }
 0x16b   : > { %v876_v22 = vpop.permute.xlu1 %875  ;;  %v9227_v13 = vadd.f32 %v9077_v19, %v1038_v44 }
 0x16c   : > { %v904_v52 = vmul.f32 %v9126_v35, %v876_v22 }
 0x16d   : > { %10544 = vst [vmem:[#allocation42_spill] sm:$0xff] %v9227_v13  ;;  %v1133_v58 = vpack.c.bf16 %v9227_v13, %v9230_v1 }
 0x16e   : > { %v1004_v54 = vadd.f32 %v988_v53, %v904_v52 }
 0x170   : > { %v1024_v19 = vadd.f32 %v9132_v41, %v1004_v54 }
 0x172   : > { %v1040_v15 = vmax.f32 %v1024_v19, 0.0 }
 0x173   : > { %v881_v10 = vpop.permute.xlu1 %880 }
 0x174   : > { %1356 = vmatmul.bf16.gmra.mxu0 %v1132_v12  ;;  %1405 = vmatmul.bf16.gmra.mxu1 %v1132_v12  ;;  %v9239_v62 = vadd.f32 %v9088_v21, %v1040_v15  ;;  %v905_v14 = vmul.f32 %v9126_v35, %v881_v10 }
 0x175   : > { %1454 = vmatmul.bf16.gmra.mxu2 %v1132_v12  ;;  %1503 = vmatmul.bf16.gmra.mxu3 %v1132_v12 }
 0x176   : > { %10546 = vst [vmem:[#allocation44_spill] sm:$0xff] %v9239_v62  ;;  %v1134_v27 = vpack.c.bf16 %v9239_v62, %v9242_v63  ;;  %v1005_v6 = vadd.f32 %v989_v18, %v905_v14 }
 0x178   : > { %v1025_v29 = vadd.f32 %v9132_v41, %v1005_v6 }
 0x17a   : > { %v1041_v28 = vmax.f32 %v1025_v29, 0.0 }
 0x17c   : > { %v970_v61 = vpop.permute.xlu1 %969  ;;  %v9256_v35 = vadd.f32 %v9096_v23, %v1041_v28 }
 0x17d   : > { %v990_v11 = vmul.f32 %v9128_v36, %v970_v61 }
 0x17e   : > { %10549 = vst [vmem:[#allocation47_spill] sm:$0xff] %v9256_v35 }
 0x17f   : > { %v1006_v17 = vadd.f32 %v990_v11, %v906_v8 }
 0x181   : > { %v1026_v21 = vadd.f32 %v9132_v41, %v1006_v17 }
 0x183   : > { %v1042_v16 = vmax.f32 %v1026_v21, 0.0 }
 0x184   : > { %1361 = vmatmul.bf16.gmra.mxu0 %v1133_v58  ;;  %1410 = vmatmul.bf16.gmra.mxu1 %v1133_v58 }
 0x185   : > { %1459 = vmatmul.bf16.gmra.mxu2 %v1133_v58  ;;  %1508 = vmatmul.bf16.gmra.mxu3 %v1133_v58  ;;  %v9253_v31 = vadd.f32 %v9109_v25, %v1042_v16 }
 0x187   : > { %10548 = vst [vmem:[#allocation46_spill] sm:$0xff] %v9253_v31  ;;  %v1135_v36 = vpack.c.bf16 %v9253_v31, %v9256_v35 }
 0x194   : > { %1366 = vmatmul.bf16.gmra.mxu0 %v1134_v27  ;;  %1415 = vmatmul.bf16.gmra.mxu1 %v1134_v27 }
 0x195   : > { %1464 = vmatmul.bf16.gmra.mxu2 %v1134_v27  ;;  %1513 = vmatmul.bf16.gmra.mxu3 %v1134_v27 }
 0x1a4   : > { %1371 = vmatmul.bf16.gmra.mxu0 %v1135_v36  ;;  %1420 = vmatmul.bf16.gmra.mxu1 %v1135_v36 }
 0x1a5   : > { %1469 = vmatmul.bf16.gmra.mxu2 %v1135_v36  ;;  %1518 = vmatmul.bf16.gmra.mxu3 %v1135_v36 }
 0x1b1   : > { %v1337_v32 = vpop.f32.mrf.mxu0  ;;  %v1386_v34 = vpop.f32.mrf.mxu1 }
 0x1b2   : > { %v9260_v20 = vpack.c.bf16 %v1386_v34, %v1337_v32 }
 0x1b8   : > { %v9262_v41 = vpop.f32.mrf.mxu2 }
 0x1b9   : > { %v9264_v3 = vpop.f32.mrf.mxu0  ;;  %v9266_v25 = vpop.f32.mrf.mxu1 }
 0x1c0   : > { %v9268_v7 = vpop.f32.mrf.mxu2 }
 0x1c1   : > { %v1342_v23 = vpop.f32.mrf.mxu0  ;;  %v1391_v37 = vpop.f32.mrf.mxu1 }
 0x1c2   : > { %v9270_v38 = vpack.c.bf16 %v1391_v37, %v1342_v23 }
 0x1c8   : > { %v9272_v39 = vpop.f32.mrf.mxu2 }
 0x1c9   : > { %v9274_v40 = vpop.f32.mrf.mxu0  ;;  %v9276_v42 = vpop.f32.mrf.mxu1 }
 0x1d0   : > { %v9278_v12 = vpop.f32.mrf.mxu2 }
 0x1d1   : > { %v1347_v43 = vpop.f32.mrf.mxu0  ;;  %v1396_v9 = vpop.f32.mrf.mxu1 }
 0x1d2   : > { %v9280_v22 = vpack.c.bf16 %v1396_v9, %v1347_v43 }
 0x1d8   : > { %v9282_v44 = vpop.f32.mrf.mxu2 }
 0x1d9   : > { %v9284_v45 = vpop.f32.mrf.mxu0  ;;  %v9286_v47 = vpop.f32.mrf.mxu1 }
 0x1e0   : > { %v9288_v48 = vpop.f32.mrf.mxu2 }
 0x1e1   : > { %v1352_v50 = vpop.f32.mrf.mxu0  ;;  %v1401_v51 = vpop.f32.mrf.mxu1 }
 0x1e2   : > { %v9290_v52 = vpack.c.bf16 %v1401_v51, %v1352_v50 }
 0x1e8   : > { %v9292_v53 = vpop.f32.mrf.mxu2 }
 0x1e9   : > { %v1354_v10 = vpop.f32.mrf.mxu0  ;;  %v1403_v54 = vpop.f32.mrf.mxu1 }
 0x1f0   : > { %v9294_v57 = vpop.f32.mrf.mxu2 }
 0x1f1   : > { %v1357_v58 = vpop.f32.mrf.mxu0  ;;  %v1406_v19 = vpop.f32.mrf.mxu1 }
 0x1f2   : > { %v9296_v59 = vpack.c.bf16 %v1406_v19, %v1357_v58 }
 0x1f8   : > { %v9298_v15 = vpop.f32.mrf.mxu2 }
 0x1f9   : > { %v1359_v60 = vpop.f32.mrf.mxu0  ;;  %v1408_v2 = vpop.f32.mrf.mxu1 }
 0x200   : > { %v9300_v61 = vpop.f32.mrf.mxu2 }
 0x201   : > { %v1362_v5 = vpop.f32.mrf.mxu0  ;;  %v1411_v8 = vpop.f32.mrf.mxu1 }
 0x202   : > { %v1544_v4 = vpack.c.bf16 %v1411_v8, %v1362_v5  ;;  %v1538_v5 = vpack.c.bf16 %v1403_v54, %v1354_v10 }
 0x208   : > { %v9302_v11 = vpop.f32.mrf.mxu2 }
 0x209   : > { %v1364_v14 = vpop.f32.mrf.mxu0  ;;  %v1413_v18 = vpop.f32.mrf.mxu1 }
 0x20a   : > { %v1546_v62 = vpack.c.bf16 %v1413_v18, %v1364_v14  ;;  %v1785_v18 = vunpack.c.h.b16 %v1544_v4 }
 0x210   : > { %v9304_v17 = vpop.f32.mrf.mxu2 }
 0x211   : > { %v1367_v27 = vpop.f32.mrf.mxu0  ;;  %v1416_v6 = vpop.f32.mrf.mxu1  ;;  %v1547_v8 = vpack.c.bf16 %v9304_v17, %v9304_v17 }
 0x212   : > { %v1548_v51 = vpack.c.bf16 %v1416_v6, %v1367_v27 }
 0x213   : > { %v1788_v10 = vunpack.c.l.b16 %v1547_v8 }
 0x214   : > { %v1632_v0 = vunpack.c.l.b16 %v1548_v51  ;;  %v1789_v46 = vunpack.c.h.b16 %v1548_v51  ;;  %v1777_v51 = vunpack.c.h.b16 %v9290_v52 }
 0x218   : > { %v1465_v21 = vpop.f32.mrf.mxu2 }
 0x219   : > { %v1369_v29 = vpop.f32.mrf.mxu0  ;;  %v1418_v16 = vpop.f32.mrf.mxu1 }
 0x21a   : > { %v1550_v9 = vpack.c.bf16 %v1418_v16, %v1369_v29 }
 0x21c   : > { %v1633_v1 = vunpack.c.l.b16 %v1550_v9  ;;  %v1791_v33 = vunpack.c.h.b16 %v1550_v9  ;;  %v1541_v9 = vpack.c.bf16 %v9298_v15, %v9298_v15 }
 0x21e   : > { %v1642_v27 = vpack.c.b16 %v1633_v1, %v1632_v0  ;;  %v1809_v6 = vpack.c.b16 %v1791_v33, %v1789_v46  ;;  %v1545_v46 = vpack.c.bf16 %v9302_v11, %v9302_v11  ;;  %v1534_v1 = vpack.c.bf16 %v9286_v47, %v9284_v45 }
 0x21f   : > { %v1779_v11 = vunpack.c.h.b16 %v1538_v5  ;;  %v1530_v45 = vpack.c.bf16 %v9276_v42, %v9274_v40  ;;  %v1539_v47 = vpack.c.bf16 %v9294_v57, %v9294_v57  ;;  %v1526_v40 = vpack.c.bf16 %v9266_v25, %v9264_v3 }
 0x220   : > { %v1467_v28 = vpop.f32.mrf.mxu2  ;;  %v1775_v15 = vunpack.c.h.b16 %v1534_v1  ;;  %v1535_v42 = vpack.c.bf16 %v9288_v48, %v9288_v48  ;;  %v1531_v3 = vpack.c.bf16 %v9278_v12, %v9278_v12  ;;  %v1527_v12 = vpack.c.bf16 %v9268_v7, %v9268_v7 }
 0x221   : > { %v1372_v36 = vpop.f32.mrf.mxu0  ;;  %v1421_v32 = vpop.f32.mrf.mxu1  ;;  %v1551_v29 = vpack.c.bf16 %v1467_v28, %v1467_v28  ;;  %v1780_v57 = vunpack.c.l.b16 %v1539_v47  ;;  %v1621_v8 = vunpack.c.l.b16 %v1526_v40  ;;  %v7707_v47 = vld [vmem:[%s8982_s19 + $0x38] sm:$0xff] }
 0x222   : > { %v1552_v34 = vpack.c.bf16 %v1421_v32, %v1372_v36  ;;  %v1542_v32 = vpack.c.bf16 %v1408_v2, %v1359_v60  ;;  %v1776_v25 = vunpack.c.l.b16 %v1535_v42 }
 0x224   : > { %v1634_v58 = vunpack.c.l.b16 %v1552_v34  ;;  %v1793_v19 = vunpack.c.h.b16 %v1552_v34  ;;  %v1631_v34 = vunpack.c.l.b16 %v1546_v62  ;;  %v1629_v28 = vunpack.c.l.b16 %v1542_v32 }
 0x225   : > { %v1783_v0 = vunpack.c.h.b16 %v1542_v32  ;;  %v1625_v32 = vunpack.c.l.b16 %v1534_v1 }
 0x228   : > { %v1470_v23 = vpop.f32.mrf.mxu2 }
 0x229   : > { %v1374_v37 = vpop.f32.mrf.mxu0  ;;  %v1423_v43 = vpop.f32.mrf.mxu1  ;;  %v1553_v26 = vpack.c.bf16 %v1470_v23, %v1470_v23  ;;  %v1627_v23 = vunpack.c.l.b16 %v1538_v5 }
 0x22a   : > { %v1554_v50 = vpack.c.bf16 %v1423_v43, %v1374_v37  ;;  %v1787_v37 = vunpack.c.h.b16 %v1546_v62  ;;  %v1549_v43 = vpack.c.bf16 %v1465_v21, %v1465_v21  ;;  %v1543_v62 = vpack.c.bf16 %v9300_v61, %v9300_v61 }
 0x22b   : > { %v1794_v14 = vunpack.c.l.b16 %v1553_v26  ;;  %v1628_v26 = vunpack.c.l.b16 %v9296_v59 }
 0x22c   : > { %v1635_v31 = vunpack.c.l.b16 %v1554_v50  ;;  %v1795_v35 = vunpack.c.h.b16 %v1554_v50  ;;  %v1807_v2 = vpack.c.b16 %v1787_v37, %v1785_v18  ;;  %v1790_v33 = vunpack.c.l.b16 %v1549_v43 }
 0x22d   : > { %v1640_v17 = vpack.c.b16 %v1629_v28, %v1628_v26  ;;  %v1786_v50 = vunpack.c.l.b16 %v1545_v46  ;;  %v1784_v61 = vunpack.c.l.b16 %v1543_v62  ;;  %v1623_v43 = vunpack.c.l.b16 %v1530_v45  ;;  %v7700_v26 = vld [vmem:[%s8982_s19] sm:$0xff] }
 0x22e   : > { %v1643_v63 = vpack.c.b16 %v1635_v31, %v1634_v58  ;;  %v1811_v13 = vpack.c.b16 %v1795_v35, %v1793_v19  ;;  %v1630_v35 = vunpack.c.l.b16 %v1544_v4  ;;  %v1781_v4 = vunpack.c.h.b16 %v9296_v59 }
 0x22f   : > { %v1626_v59 = vunpack.c.l.b16 %v9290_v52  ;;  %v1808_v58 = vpack.c.b16 %v1788_v10, %v1786_v50  ;;  %v1624_v52 = vunpack.c.l.b16 %v9280_v22  ;;  %v7693_v10 = vld [vmem:[%s8976_s6 + $0x8] sm:$0xff] }
 0x230   : > { %v1472_v36 = vpop.f32.mrf.mxu2  ;;  %1652 = vmatpush.bf16.msrb.mxu0 %v1643_v63  ;;  %1829 = vmatpush.bf16.msrb.mxu1 %v1811_v13  ;;  %v1792_v63 = vunpack.c.l.b16 %v1551_v29  ;;  %v1641_v60 = vpack.c.b16 %v1631_v34, %v1630_v35  ;;  %v1805_v21 = vpack.c.b16 %v1783_v0, %v1781_v4  ;;  %v1537_v29 = vpack.c.bf16 %v9292_v53, %v9292_v53  ;;  %v7705_v50 = vld [vmem:[%s8982_s19 + $0x28] sm:$0xff] }
 0x231   : > { %v1555_v16 = vpack.c.bf16 %v1472_v36, %v1472_v36  ;;  %v1639_v19 = vpack.c.b16 %v1627_v23, %v1626_v59  ;;  %v1803_v36 = vpack.c.b16 %v1779_v11, %v1777_v51  ;;  %v1638_v34 = vpack.c.b16 %v1625_v32, %v1624_v52  ;;  %v7695_v23 = vld [vmem:[%s8976_s6 + $0x18] sm:$0xff]  ;;  %v7704_v11 = vld [vmem:[%s8982_s19 + $0x20] sm:$0xff]  ;;  %v7697_v59 = vld [vmem:[%s8976_s6 + $0x28] sm:$0xff] }
 0x232   : > { %v1810_v54 = vpack.c.b16 %v1792_v63, %v1790_v33  ;;  %v1771_v53 = vunpack.c.h.b16 %v1530_v45  ;;  %v1769_v35 = vunpack.c.h.b16 %v9270_v38  ;;  %v1767_v63 = vunpack.c.h.b16 %v1526_v40  ;;  %v7706_v51 = vld [vmem:[%s8982_s19 + $0x30] sm:$0xff] }
 0x233   : > { %v1796_v31 = vunpack.c.l.b16 %v1555_v16  ;;  %v1782_v16 = vunpack.c.l.b16 %v1541_v9  ;;  %v1525_v33 = vpack.c.bf16 %v9262_v41, %v9262_v41  ;;  %v1768_v4 = vunpack.c.l.b16 %v1527_v12  ;;  %v7701_v41 = vld [vmem:[%s8982_s19 + $0x8] sm:$0xff]  ;;  %v7696_v9 = vld [vmem:[%s8976_s6 + $0x20] sm:$0xff]  ;;  %v7698_v45 = vld [vmem:[%s8976_s6 + $0x30] sm:$0xff] }
 0x234   : > { %1653 = vmatpush.bf16.msrb.mxu0 %v1642_v27  ;;  %1830 = vmatpush.bf16.msrb.mxu1 %v1809_v6  ;;  %v1773_v27 = vunpack.c.h.b16 %v9280_v22  ;;  %v1622_v22 = vunpack.c.l.b16 %v9270_v38  ;;  %v1799_v5 = vpack.c.b16 %v1771_v53, %v1769_v35  ;;  %v1620_v38 = vunpack.c.l.b16 %v9260_v20 }
 0x235   : > { %v1812_v13 = vpack.c.b16 %v1796_v31, %v1794_v14  ;;  %v1806_v6 = vpack.c.b16 %v1784_v61, %v1782_v16  ;;  %v1533_v14 = vpack.c.bf16 %v9282_v44, %v9282_v44  ;;  %v1778_v31 = vunpack.c.l.b16 %v1537_v29  ;;  %v7699_v61 = vld [vmem:[%s8976_s6 + $0x38] sm:$0xff] }
 0x236   : > { %v1801_v37 = vpack.c.b16 %v1775_v15, %v1773_v27  ;;  %v1637_v18 = vpack.c.b16 %v1623_v43, %v1622_v22  ;;  %v1529_v44 = vpack.c.bf16 %v9272_v39, %v9272_v39  ;;  %v1636_v0 = vpack.c.b16 %v1621_v8, %v1620_v38 }
 0x237   : > { %1878 = vmatpush.bf16.msrb.mxu2 %v1812_v13  ;;  %v1804_v48 = vpack.c.b16 %v1780_v57, %v1778_v31  ;;  %v1774_v13 = vunpack.c.l.b16 %v1533_v14  ;;  %v1766_v7 = vunpack.c.l.b16 %v1525_v33 }
 0x238   : > { %1654 = vmatpush.bf16.msrb.mxu0 %v1641_v60  ;;  %1831 = vmatpush.bf16.msrb.mxu1 %v1807_v2  ;;  %v1765_v60 = vunpack.c.h.b16 %v9260_v20  ;;  %v1772_v2 = vunpack.c.l.b16 %v1531_v3  ;;  %v1770_v39 = vunpack.c.l.b16 %v1529_v44  ;;  %v7692_v20 = vld [vmem:[%s8976_s6] sm:$0xff] }
 0x239   : > { %v1802_v28 = vpack.c.b16 %v1776_v25, %v1774_v13  ;;  %v1798_v62 = vpack.c.b16 %v1768_v4, %v1766_v7 }
 0x23a   : > { %v1797_v46 = vpack.c.b16 %v1767_v63, %v1765_v60  ;;  %v1800_v1 = vpack.c.b16 %v1772_v2, %v1770_v39 }
 0x23b   : > { %1879 = vmatpush.bf16.msrb.mxu2 %v1810_v54  ;;  %v7702_v54 = vld [vmem:[%s8982_s19 + $0x10] sm:$0xff] }
 0x23c   : > { %1655 = vmatpush.bf16.msrb.mxu0 %v1640_v17  ;;  %1832 = vmatpush.bf16.msrb.mxu1 %v1805_v21  ;;  %v7694_v17 = vld [vmem:[%s8976_s6 + $0x10] sm:$0xff]  ;;  %v7703_v21 = vld [vmem:[%s8982_s19 + $0x18] sm:$0xff] }
 0x23f   : > { %1880 = vmatpush.bf16.msrb.mxu2 %v1808_v58 }
 0x240   : > { %1656 = vmatpush.bf16.msrb.mxu0 %v1639_v19  ;;  %1833 = vmatpush.bf16.msrb.mxu1 %v1803_v36 }
 0x243   : > { %1881 = vmatpush.bf16.msrb.mxu2 %v1806_v6 }
 0x244   : > { %1657 = vmatpush.bf16.msrb.mxu0 %v1638_v34  ;;  %1834 = vmatpush.bf16.msrb.mxu1 %v1801_v37 }
 0x247   : > { %1882 = vmatpush.bf16.msrb.mxu2 %v1804_v48 }
 0x248   : > { %1658 = vmatpush.bf16.msrb.mxu0 %v1637_v18  ;;  %1835 = vmatpush.bf16.msrb.mxu1 %v1799_v5 }
 0x24b   : > { %1883 = vmatpush.bf16.msrb.mxu2 %v1802_v28 }
 0x24c   : > { %1659 = vmatpush.bf16.msrb.mxu0 %v1636_v0  ;;  %1836 = vmatpush.bf16.msrb.mxu1 %v1797_v46 }
 0x24f   : > { %1884 = vmatpush.bf16.msrb.mxu2 %v1800_v1  ;;  %1660 = vmatmul.bf16.vlgmr.msrb.gmra.mxu0 %v7700_v26 }
 0x250   : > { %1837 = vmatmul.bf16.vlgmr.msrb.gmra.mxu1 %v7692_v20 }
 0x253   : > { %1885 = vmatpush.bf16.msrb.mxu2 %v1798_v62 }
 0x256   : > { %1886 = vmatmul.bf16.vlgmr.msrb.gmra.mxu2 %v7692_v20 }
 0x25f   : > { %1665 = vmatmul.bf16.gmra.mxu0 %v7701_v41 }
 0x260   : > { %1842 = vmatmul.bf16.gmra.mxu1 %v7693_v10 }
 0x266   : > { %1891 = vmatmul.bf16.gmra.mxu2 %v7693_v10 }
 0x26f   : > { %1670 = vmatmul.bf16.gmra.mxu0 %v7702_v54 }
 0x270   : > { %1847 = vmatmul.bf16.gmra.mxu1 %v7694_v17 }
 0x276   : > { %1896 = vmatmul.bf16.gmra.mxu2 %v7694_v17 }
 0x27f   : > { %1675 = vmatmul.bf16.gmra.mxu0 %v7703_v21 }
 0x280   : > { %1852 = vmatmul.bf16.gmra.mxu1 %v7695_v23 }
 0x286   : > { %1901 = vmatmul.bf16.gmra.mxu2 %v7695_v23 }
 0x28f   : > { %1680 = vmatmul.bf16.gmra.mxu0 %v7704_v11 }
 0x290   : > { %1857 = vmatmul.bf16.gmra.mxu1 %v7696_v9 }
 0x296   : > { %1906 = vmatmul.bf16.gmra.mxu2 %v7696_v9 }
 0x29f   : > { %1685 = vmatmul.bf16.gmra.mxu0 %v7705_v50 }
 0x2a0   : > { %1862 = vmatmul.bf16.gmra.mxu1 %v7697_v59 }
 0x2a6   : > { %1911 = vmatmul.bf16.gmra.mxu2 %v7697_v59 }
 0x2af   : > { %1690 = vmatmul.bf16.gmra.mxu0 %v7706_v51 }
 0x2b0   : > { %1867 = vmatmul.bf16.gmra.mxu1 %v7698_v45 }
 0x2b6   : > { %1916 = vmatmul.bf16.gmra.mxu2 %v7698_v45 }
 0x2bf   : > { %1695 = vmatmul.bf16.gmra.mxu0 %v7707_v47 }
 0x2c0   : > { %1872 = vmatmul.bf16.gmra.mxu1 %v7699_v61 }
 0x2c6   : > { %1921 = vmatmul.bf16.gmra.mxu2 %v7699_v61 }
 0x2cc   : > { %v1661_v58 = vpop.f32.mrf.mxu0 }
 0x2cd   : > { %v1838_v19 = vpop.f32.mrf.mxu1 }
 0x2ce   : > { %v9362_v36 = vmul.f32 %v1838_v19, %v1661_v58 }
 0x2d4   : > { %v1663_v32 = vpop.f32.mrf.mxu0 }
 0x2d5   : > { %v1840_v15 = vpop.f32.mrf.mxu1 }
 0x2d6   : > { %v1928_v17 = vmul.f32 %v1840_v15, %v1663_v32 }
 0x2d9   : > { %v9364_v13 = vpop.f32.mrf.mxu2 }
 0x2dc   : > { %v1666_v29 = vpop.f32.mrf.mxu0 }
 0x2dd   : > { %v1843_v16 = vpop.f32.mrf.mxu1 }
 0x2de   : > { %v1929_v52 = vmul.f32 %v1843_v16, %v1666_v29 }
 0x2e1   : > { %v9366_v2 = vpop.f32.mrf.mxu2 }
 0x2e4   : > { %v1668_v27 = vpop.f32.mrf.mxu0 }
 0x2e5   : > { %v1845_v40 = vpop.f32.mrf.mxu1 }
 0x2e6   : > { %v1930_v11 = vmul.f32 %v1845_v40, %v1668_v27 }
 0x2e9   : > { %v9368_v20 = vpop.f32.mrf.mxu2 }
 0x2ec   : > { %v1671_v42 = vpop.f32.mrf.mxu0 }
 0x2ed   : > { %v1848_v57 = vpop.f32.mrf.mxu1 }
 0x2ee   : > { %v1931_v6 = vmul.f32 %v1848_v57, %v1671_v42 }
 0x2f1   : > { %v9370_v54 = vpop.f32.mrf.mxu2 }
 0x2f4   : > { %v1673_v34 = vpop.f32.mrf.mxu0 }
 0x2f5   : > { %v1850_v37 = vpop.f32.mrf.mxu1 }
 0x2f6   : > { %v1932_v50 = vmul.f32 %v1850_v37, %v1673_v34 }
 0x2f9   : > { %v9372_v23 = vpop.f32.mrf.mxu2 }
 0x2fc   : > { %v1676_v43 = vpop.f32.mrf.mxu0 }
 0x2fd   : > { %v1853_v53 = vpop.f32.mrf.mxu1 }
 0x2fe   : > { %v1933_v14 = vmul.f32 %v1853_v53, %v1676_v43 }
 0x301   : > { %v9374_v9 = vpop.f32.mrf.mxu2 }
 0x304   : > { %v1678_v31 = vpop.f32.mrf.mxu0 }
 0x305   : > { %v1855_v22 = vpop.f32.mrf.mxu1 }
 0x306   : > { %v1934_v1 = vmul.f32 %v1855_v22, %v1678_v31 }
 0x309   : > { %v9376_v59 = vpop.f32.mrf.mxu2 }
 0x30c   : > { %v1681_v35 = vpop.f32.mrf.mxu0 }
 0x30d   : > { %v1858_v3 = vpop.f32.mrf.mxu1 }
 0x30e   : > { %v1935_v46 = vmul.f32 %v1858_v3, %v1681_v35 }
 0x311   : > { %v9379_v51 = vpop.f32.mrf.mxu2 }
 0x314   : > { %v1683_v25 = vpop.f32.mrf.mxu0 }
 0x315   : > { %v1860_v48 = vpop.f32.mrf.mxu1 }
 0x316   : > { %v1936_v41 = vmul.f32 %v1860_v48, %v1683_v25 }
 0x319   : > { %v1907_v45 = vpop.f32.mrf.mxu2 }
 0x31c   : > { %v1686_v18 = vpop.f32.mrf.mxu0 }
 0x31d   : > { %v1863_v5 = vpop.f32.mrf.mxu1 }
 0x31e   : > { %v1937_v8 = vmul.f32 %v1863_v5, %v1686_v18 }
 0x320   : > { %1963 = vadd.xlane.f32.xlu2 %v1937_v8 }
 0x321   : > { %v1909_v47 = vpop.f32.mrf.mxu2 }
 0x324   : > { %v1688_v63 = vpop.f32.mrf.mxu0 }
 0x325   : > { %v1865_v44 = vpop.f32.mrf.mxu1 }
 0x326   : > { %v1938_v21 = vmul.f32 %v1865_v44, %v1688_v63 }
 0x329   : > { %v1912_v61 = vpop.f32.mrf.mxu2 }
 0x32c   : > { %v1691_v38 = vpop.f32.mrf.mxu0 }
 0x32d   : > { %v1868_v60 = vpop.f32.mrf.mxu1 }
 0x32e   : > { %v1939_v12 = vmul.f32 %v1868_v60, %v1691_v38 }
 0x330   : > { %1967 = vadd.xlane.f32.xlu1 %v1939_v12 }
 0x331   : > { %v1914_v58 = vpop.f32.mrf.mxu2 }
 0x334   : > { %v1693_v28 = vpop.f32.mrf.mxu0 }
 0x335   : > { %v1870_v0 = vpop.f32.mrf.mxu1 }
 0x336   : > { %v1940_v33 = vmul.f32 %v1870_v0, %v1693_v28 }
 0x338   : > { %1959 = vadd.xlane.f32.xlu1 %v1935_v46  ;;  %1969 = vadd.xlane.f32.xlu2 %v1940_v33 }
 0x339   : > { %v1917_v19 = vpop.f32.mrf.mxu2 }
 0x33c   : > { %v1696_v39 = vpop.f32.mrf.mxu0 }
 0x33d   : > { %v1873_v26 = vpop.f32.mrf.mxu1 }
 0x33e   : > { %v1941_v4 = vmul.f32 %v1873_v26, %v1696_v39 }
 0x340   : > { %1957 = vadd.xlane.f32.xlu1 %v1934_v1  ;;  %1971 = vadd.xlane.f32.xlu2 %v1941_v4 }
 0x341   : > { %v1919_v15 = vpop.f32.mrf.mxu2 }
 0x344   : > { %v1698_v7 = vpop.f32.mrf.mxu0 }
 0x345   : > { %v1875_v62 = vpop.f32.mrf.mxu1 }
 0x346   : > { %v1942_v10 = vmul.f32 %v1875_v62, %v1698_v7 }
 0x348   : > { %1947 = vadd.xlane.f32.xlu1 %v1929_v52  ;;  %1961 = vadd.xlane.f32.xlu2 %v1936_v41  ;;  %v9381_v41 = vpop.f32.mrf.mxu3 }
 0x349   : > { %1973 = vadd.xlane.f32.xlu0 %v1942_v10  ;;  %v1922_v27 = vpop.f32.mrf.mxu2 }
 0x350   : > { %1945 = vadd.xlane.f32.xlu1 %v1928_v17  ;;  %1951 = vadd.xlane.f32.xlu2 %v1931_v6 }
 0x351   : > { %1965 = vadd.xlane.f32.xlu0 %v1938_v21 }
 0x358   : > { %1949 = vadd.xlane.f32.xlu2 %v1930_v11 }
 0x359   : > { %1955 = vadd.xlane.f32.xlu0 %v1933_v14  ;;  %v1924_v14 = vpop.f32.mrf.mxu2 }
 0x361   : > { %1953 = vadd.xlane.f32.xlu0 %v1932_v50 }
 0x369   : > { %1943 = vadd.xlane.f32.xlu0 %v9362_v36 }
 0x393   : > { %v1964_v32 = vpop.xlane.xlu2 %1963 }
 0x394   : > { %v2001_v3 = vmul.f32 0.01, %v1964_v32  ;;  %vm1985_vm5 = vcmp.gt.f32.partialorder %v1964_v32, 0.0 }
 0x396   : > { %v2017_v38 = vsel %vm1985_vm5, %v1964_v32, %v2001_v3 }
 0x397   : > { %v2033_v39 = vmul.f32 %v2017_v38, %v1912_v61 }
 0x3a3   : > { %v1968_v16 = vpop.xlane.xlu1 %1967 }
 0x3a4   : > { %v2003_v34 = vmul.f32 0.01, %v1968_v16  ;;  %vm1987_vm4 = vcmp.gt.f32.partialorder %v1968_v16, 0.0 }
 0x3a6   : > { %v2019_v25 = vsel %vm1987_vm4, %v1968_v16, %v2003_v34 }
 0x3a7   : > { %v2035_v44 = vmul.f32 %v2019_v25, %v1917_v19 }
 0x3ab   : > { %v1970_v29 = vpop.xlane.xlu2 %1969  ;;  %v1960_v40 = vpop.xlane.xlu1 %1959 }
 0x3ac   : > { %v2004_v57 = vmul.f32 0.01, %v1970_v29  ;;  %vm1988_vm2 = vcmp.gt.f32.partialorder %v1970_v29, 0.0  ;;  %v1999_v60 = vmul.f32 0.01, %v1960_v40  ;;  %vm1983_vm8 = vcmp.gt.f32.partialorder %v1960_v40, 0.0 }
 0x3ae   : > { %v2020_v53 = vsel %vm1988_vm2, %v1970_v29, %v2004_v57  ;;  %v2015_v4 = vsel %vm1983_vm8, %v1960_v40, %v1999_v60  ;;  %v6855_v60 = vld [vmem:[%s8984_s17 + $0x20] sm:$0xf] }
 0x3af   : > { %v2036_v5 = vmul.f32 %v2020_v53, %v1919_v15  ;;  %v2031_v21 = vmul.f32 %v2015_v4, %v1907_v45 }
 0x3b1   : > { %v2045_v0 = vpack.c.bf16 %v2036_v5, %v2035_v44  ;;  %v7709_v44 = vld [vmem:[%s8984_s17 + $0x14] sm:$0xf0] }
 0x3b3   : > { %v1972_v52 = vpop.xlane.xlu2 %1971  ;;  %v1958_v48 = vpop.xlane.xlu1 %1957 }
 0x3b4   : > { %v2005_v42 = vmul.f32 0.01, %v1972_v52  ;;  %vm1989_vm1 = vcmp.gt.f32.partialorder %v1972_v52, 0.0  ;;  %v1998_v1 = vmul.f32 0.01, %v1958_v48  ;;  %vm1982_vm9 = vcmp.gt.f32.partialorder %v1958_v48, 0.0 }
 0x3b6   : > { %v2021_v37 = vsel %vm1989_vm1, %v1972_v52, %v2005_v42  ;;  %v2014_v11 = vsel %vm1982_vm9, %v1958_v48, %v1998_v1  ;;  %v9385_v42 = vpop.f32.mrf.mxu3  ;;  %v6847_v48 = vld [vmem:[%s8984_s17] sm:$0xf] }
 0x3b7   : > { %v2037_v22 = vmul.f32 %v2021_v37, %v1922_v27  ;;  %v6863_v1 = vld [vmem:[%s8984_s17 + $0x40] sm:$0xf] }
 0x3bb   : > { %v1962_v6 = vpop.xlane.xlu2 %1961  ;;  %v1948_v10 = vpop.xlane.xlu1 %1947 }
 0x3bc   : > { %v1974_v36 = vpop.xlane.xlu0 %1973  ;;  %v2000_v8 = vmul.f32 0.01, %v1962_v6  ;;  %vm1984_vm6 = vcmp.gt.f32.partialorder %v1962_v6, 0.0  ;;  %v1993_v27 = vmul.f32 0.01, %v1948_v10  ;;  %vm1977_vm14 = vcmp.gt.f32.partialorder %v1948_v10, 0.0 }
 0x3bd   : > { %vm1990_vm3 = vcmp.gt.f32.partialorder %v1974_v36, 0.0  ;;  %v2006_v43 = vmul.f32 0.01, %v1974_v36 }
 0x3be   : > { %v2016_v46 = vsel %vm1984_vm6, %v1962_v6, %v2000_v8  ;;  %v2009_v34 = vsel %vm1977_vm14, %v1948_v10, %v1993_v27 }
 0x3bf   : > { %v2022_v31 = vsel %vm1990_vm3, %v1974_v36, %v2006_v43  ;;  %v2032_v62 = vmul.f32 %v2016_v46, %v1909_v47  ;;  %v6859_v46 = vld [vmem:[%s8984_s17 + $0x30] sm:$0xf] }
 0x3c0   : > { %v2038_v35 = vmul.f32 %v2022_v31, %v1924_v14  ;;  %v2025_v31 = vmul.f32 %v2009_v34, %v9368_v20 }
 0x3c1   : > { %v2043_v19 = vpack.c.bf16 %v2032_v62, %v2031_v21 }
 0x3c2   : > { %v2046_v18 = vpack.c.bf16 %v2038_v35, %v2037_v22 }
 0x3c3   : > { %v1952_v28 = vpop.xlane.xlu2 %1951  ;;  %v1946_v57 = vpop.xlane.xlu1 %1945 }
 0x3c4   : > { %2095 = vmatpush.bf16.msrb.mxu3 %v2046_v18  ;;  %v1966_v63 = vpop.xlane.xlu0 %1965  ;;  %v1995_v29 = vmul.f32 0.01, %v1952_v28  ;;  %vm1979_vm11 = vcmp.gt.f32.partialorder %v1952_v28, 0.0  ;;  %v1992_v37 = vmul.f32 0.01, %v1946_v57  ;;  %vm1976_vm15 = vcmp.gt.f32.partialorder %v1946_v57, 0.0 }
 0x3c5   : > { %vm1986_vm7 = vcmp.gt.f32.partialorder %v1966_v63, 0.0  ;;  %v2002_v12 = vmul.f32 0.01, %v1966_v63  ;;  %v7708_v18 = vld [vmem:[%s8984_s17 + $0x4] sm:$0xf0] }
 0x3c6   : > { %v2011_v45 = vsel %vm1979_vm11, %v1952_v28, %v1995_v29  ;;  %v2008_v22 = vsel %vm1976_vm15, %v1946_v57, %v1992_v37  ;;  %v9397_v20 = vor.u32 %v7708_v18, %v6847_v48  ;;  %v6871_v29 = vld [vmem:[%s8984_s17 + $0x60] sm:$0xf] }
 0x3c7   : > { %v2018_v33 = vsel %vm1986_vm7, %v1966_v63, %v2002_v12  ;;  %v6851_v63 = vld [vmem:[%s8984_s17 + $0x10] sm:$0xf]  ;;  %v7710_v12 = vld [vmem:[%s8984_s17 + $0x24] sm:$0xf0] }
 0x3c8   : > { %2096 = vmatpush.bf16.msrb.mxu3 %v2045_v0  ;;  %v2034_v26 = vmul.f32 %v2018_v33, %v1914_v58  ;;  %v2030_v58 = vmul.f32 %v2014_v11, %v9379_v51  ;;  %10550 = vst [vmem:[#allocation48_spill] sm:$0xff] %v9397_v20  ;;  %v9404_v38 = vor.u32 %v7709_v44, %v6851_v63  ;;  %v7711_v33 = vld [vmem:[%s8984_s17 + $0x34] sm:$0xf0]  ;;  %v6867_v11 = vld [vmem:[%s8984_s17 + $0x50] sm:$0xf] }
 0x3c9   : > { %v9413_v28 = vor.u32 %v7710_v12, %v6855_v60 }
 0x3ca   : > { %v2044_v7 = vpack.c.bf16 %v2034_v26, %v2033_v39  ;;  %10551 = vst [vmem:[#allocation49_spill] sm:$0xff] %v9404_v38  ;;  %v9422_v26 = vor.u32 %v7711_v33, %v6859_v46  ;;  %v7763_v46 = vld [vmem:[#allocation17 + $0x38] sm:$0xff] }
 0x3cb   : > { %v1950_v15 = vpop.xlane.xlu2 %1949  ;;  %10552 = vst [vmem:[#allocation50_spill] sm:$0xff] %v9413_v28  ;;  %2393 = vmatpush.bf16.msra.mxu1 %v7763_v46 }
 0x3cc   : > { %2097 = vmatpush.bf16.msrb.mxu3 %v2044_v7  ;;  %v1956_v17 = vpop.xlane.xlu0 %1955  ;;  %v1994_v16 = vmul.f32 0.01, %v1950_v15  ;;  %vm1978_vm12 = vcmp.gt.f32.partialorder %v1950_v15, 0.0  ;;  %10553 = vst [vmem:[#allocation51_spill] sm:$0xff] %v9422_v26  ;;  %v7712_v7 = vld [vmem:[%s8984_s17 + $0x44] sm:$0xf0] }
 0x3cd   : > { %vm1981_vm10 = vcmp.gt.f32.partialorder %v1956_v17, 0.0  ;;  %v1997_v50 = vmul.f32 0.01, %v1956_v17  ;;  %v9429_v62 = vor.u32 %v7712_v7, %v6863_v1  ;;  %v7762_v1 = vld [vmem:[#allocation17 + $0x30] sm:$0xff]  ;;  %v7761_v7 = vld [vmem:[#allocation17 + $0x28] sm:$0xff] }
 0x3ce   : > { %v2010_v6 = vsel %vm1978_vm12, %v1950_v15, %v1994_v16  ;;  %v7753_v15 = vld [vmem:[#allocation16 + $0x28] sm:$0xff]  ;;  %v7751_v16 = vld [vmem:[#allocation16 + $0x18] sm:$0xff] }
 0x3cf   : > { %v2013_v32 = vsel %vm1981_vm10, %v1956_v17, %v1997_v50  ;;  %v2026_v53 = vmul.f32 %v2010_v6, %v9370_v54  ;;  %v2024_v54 = vmul.f32 %v2008_v22, %v9366_v2  ;;  %10554 = vst [vmem:[#allocation52_spill] sm:$0xff] %v9429_v62  ;;  %v7755_v17 = vld [vmem:[#allocation16 + $0x38] sm:$0xff]  ;;  %v7713_v50 = vld [vmem:[%s8984_s17 + $0x54] sm:$0xf0]  ;;  %v6875_v6 = vld [vmem:[%s8984_s17 + $0x70] sm:$0xf]  ;;  %2394 = vmatpush.bf16.msra.mxu1 %v7762_v1 }
 0x3d0   : > { %2098 = vmatpush.bf16.msrb.mxu3 %v2043_v19  ;;  %v2029_v61 = vmul.f32 %v2013_v32, %v9376_v59  ;;  %v2027_v59 = vmul.f32 %v2011_v45, %v9372_v23  ;;  %2216 = vmatpush.bf16.msra.mxu0 %v7755_v17  ;;  %v9438_v19 = vor.u32 %v7713_v50, %v6867_v11  ;;  %v7754_v32 = vld [vmem:[#allocation16 + $0x30] sm:$0xff]  ;;  %v7760_v11 = vld [vmem:[#allocation17 + $0x20] sm:$0xff] }
 0x3d1   : > { %v2040_v23 = vpack.c.bf16 %v2026_v53, %v2025_v31  ;;  %v7750_v45 = vld [vmem:[#allocation16 + $0x10] sm:$0xff] }
 0x3d2   : > { %v2042_v47 = vpack.c.bf16 %v2030_v58, %v2029_v61  ;;  %10555 = vst [vmem:[#allocation53_spill] sm:$0xff] %v9438_v19  ;;  %v7752_v58 = vld [vmem:[#allocation16 + $0x20] sm:$0xff] }
 0x3d3   : > { %2395 = vmatpush.bf16.msra.mxu1 %v7761_v7 }
 0x3d4   : > { %2099 = vmatpush.bf16.msrb.mxu3 %v2042_v47  ;;  %v1954_v52 = vpop.xlane.xlu0 %1953  ;;  %2217 = vmatpush.bf16.msra.mxu0 %v7754_v32  ;;  %v7714_v47 = vld [vmem:[%s8984_s17 + $0x64] sm:$0xf0]  ;;  %v7759_v32 = vld [vmem:[#allocation17 + $0x18] sm:$0xff] }
 0x3d5   : > { %vm1980_vm13 = vcmp.gt.f32.partialorder %v1954_v52, 0.0  ;;  %v1996_v40 = vmul.f32 0.01, %v1954_v52 }
 0x3d7   : > { %v2012_v36 = vsel %vm1980_vm13, %v1954_v52, %v1996_v40  ;;  %v9445_v52 = vor.u32 %v7714_v47, %v6871_v29  ;;  %v7749_v40 = vld [vmem:[#allocation16 + $0x8] sm:$0xff]  ;;  %2396 = vmatpush.bf16.msra.mxu1 %v7760_v11 }
 0x3d8   : > { %v2028_v51 = vmul.f32 %v2012_v36, %v9374_v9  ;;  %v9391_v9 = vpop.f32.mrf.mxu3  ;;  %2218 = vmatpush.bf16.msra.mxu0 %v7753_v15  ;;  %v7715_v36 = vld [vmem:[%s8984_s17 + $0x74] sm:$0xf0]  ;;  %v7757_v47 = vld [vmem:[#allocation17 + $0x8] sm:$0xff] }
 0x3d9   : > { %10556 = vst [vmem:[#allocation54_spill] sm:$0xff] %v9445_v52 }
 0x3da   : > { %v2041_v43 = vpack.c.bf16 %v2028_v51, %v2027_v59  ;;  %v7748_v59 = vld [vmem:[#allocation16] sm:$0xff]  ;;  %v9454_v51 = vor.u32 %v7715_v36, %v6875_v6 }
 0x3db   : > { %2397 = vmatpush.bf16.msra.mxu1 %v7759_v32 }
 0x3dc   : > { %2100 = vmatpush.bf16.msrb.mxu3 %v2041_v43  ;;  %v1944_v14 = vpop.xlane.xlu0 %1943  ;;  %2219 = vmatpush.bf16.msra.mxu0 %v7752_v58  ;;  %10557 = vst [vmem:[#allocation55_spill] sm:$0xff] %v9454_v51  ;;  %v7758_v58 = vld [vmem:[#allocation17 + $0x10] sm:$0xff] }
 0x3dd   : > { %vm1975_vm0 = vcmp.gt.f32.partialorder %v1944_v14, 0.0  ;;  %v1991_v35 = vmul.f32 0.01, %v1944_v14 }
 0x3df   : > { %v2007_v3 = vsel %vm1975_vm0, %v1944_v14, %v1991_v35  ;;  %2398 = vmatpush.bf16.msra.mxu1 %v7758_v58 }
 0x3e0   : > { %2101 = vmatpush.bf16.msrb.mxu3 %v2040_v23  ;;  %v2023_v25 = vmul.f32 %v2007_v3, %v9364_v13  ;;  %v9400_v8 = vpop.f32.mrf.mxu3  ;;  %2220 = vmatpush.bf16.msra.mxu0 %v7751_v16  ;;  %v7756_v16 = vld [vmem:[#allocation17] sm:$0xff] }
 0x3e2   : > { %v2039_v5 = vpack.c.bf16 %v2024_v54, %v2023_v25 }
 0x3e3   : > { %2399 = vmatpush.bf16.msra.mxu1 %v7757_v47 }
 0x3e4   : > { %2102 = vmatpush.bf16.msrb.mxu3 %v2039_v5  ;;  %2221 = vmatpush.bf16.msra.mxu0 %v7750_v45 }
 0x3e7   : > { %2103 = vmatmul.bf16.vlgmr.msrb.gmra.mxu3 %v9397_v20  ;;  %2400 = vmatpush.bf16.msra.mxu1 %v7756_v16 }
 0x3e8   : > { %v9406_v13 = vpop.f32.mrf.mxu3  ;;  %2222 = vmatpush.bf16.msra.mxu0 %v7749_v40 }
 0x3ec   : > { %2223 = vmatpush.bf16.msra.mxu0 %v7748_v59  ;;  %v9465_v59 = vld [vmem:[%s10558_s10] ss:$0 sm:$0xff] }
 0x3f0   : > { %v9409_v2 = vpop.f32.mrf.mxu3 }
 0x3f7   : > { %2108 = vmatmul.bf16.gmra.mxu3 %v9404_v38 }
 0x3f8   : > { %v9416_v0 = vpop.f32.mrf.mxu3 }
 0x400   : > { %v9420_v39 = vpop.f32.mrf.mxu3 }
 0x407   : > { %2113 = vmatmul.bf16.gmra.mxu3 %v9413_v28 }
 0x408   : > { %v9425_v4 = vpop.f32.mrf.mxu3 }
 0x410   : > { %v9431_v10 = vpop.f32.mrf.mxu3 }
 0x417   : > { %2118 = vmatmul.bf16.gmra.mxu3 %v9422_v26 }
 0x418   : > { %v9434_v21 = vpop.f32.mrf.mxu3 }
 0x420   : > { %v9441_v61 = vpop.f32.mrf.mxu3 }
 0x427   : > { %2123 = vmatmul.bf16.gmra.mxu3 %v9429_v62 }
 0x428   : > { %v9447_v27 = vpop.f32.mrf.mxu3 }
 0x430   : > { %v9450_v57 = vpop.f32.mrf.mxu3 }
 0x437   : > { %2128 = vmatmul.bf16.gmra.mxu3 %v9438_v19 }
 0x438   : > { %v9457_v34 = vpop.f32.mrf.mxu3 }
 0x440   : > { %v9459_v37 = vpop.f32.mrf.mxu3 }
 0x447   : > { %2133 = vmatmul.bf16.gmra.mxu3 %v9445_v52 }
 0x457   : > { %2138 = vmatmul.bf16.gmra.mxu3 %v9454_v51 }
 0x46a   : > { %v2104_v43 = vpop.f32.mrf.mxu3 }
 0x472   : > { %v2106_v53 = vpop.f32.mrf.mxu3 }
 0x473   : > { %v2144_v14 = vpack.c.bf16 %v2106_v53, %v2104_v43 }
 0x475   : > { %2224 = vmatmul.bf16.vlgmr.msra.gmra.mxu0 %v2144_v14 }
 0x47a   : > { %v2109_v31 = vpop.f32.mrf.mxu3 }
 0x482   : > { %v2111_v22 = vpop.f32.mrf.mxu3 }
 0x483   : > { %v2145_v35 = vpack.c.bf16 %v2111_v22, %v2109_v31 }
 0x485   : > { %2229 = vmatmul.bf16.gmra.mxu0 %v2145_v35 }
 0x48a   : > { %v2114_v23 = vpop.f32.mrf.mxu3 }
 0x492   : > { %v2116_v3 = vpop.f32.mrf.mxu3 }
 0x493   : > { %v2146_v25 = vpack.c.bf16 %v2116_v3, %v2114_v23 }
 0x495   : > { %2234 = vmatmul.bf16.gmra.mxu0 %v2146_v25 }
 0x49a   : > { %v2119_v54 = vpop.f32.mrf.mxu3 }
 0x4a2   : > { %v2121_v48 = vpop.f32.mrf.mxu3 }
 0x4a3   : > { %v2147_v18 = vpack.c.bf16 %v2121_v48, %v2119_v54 }
 0x4a5   : > { %2239 = vmatmul.bf16.gmra.mxu0 %v2147_v18 }
 0x4aa   : > { %v2124_v5 = vpop.f32.mrf.mxu3 }
 0x4b2   : > { %v2126_v63 = vpop.f32.mrf.mxu3 }
 0x4b3   : > { %v2148_v44 = vpack.c.bf16 %v2126_v63, %v2124_v5 }
 0x4b5   : > { %2244 = vmatmul.bf16.gmra.mxu0 %v2148_v44 }
 0x4ba   : > { %v2129_v60 = vpop.f32.mrf.mxu3 }
 0x4c2   : > { %v2131_v12 = vpop.f32.mrf.mxu3 }
 0x4c3   : > { %v2149_v33 = vpack.c.bf16 %v2131_v12, %v2129_v60 }
 0x4c5   : > { %2249 = vmatmul.bf16.gmra.mxu0 %v2149_v33 }
 0x4ca   : > { %v2134_v17 = vpop.f32.mrf.mxu3 }
 0x4d2   : > { %v2136_v50 = vpop.f32.mrf.mxu3 }
 0x4d3   : > { %v2150_v15 = vpack.c.bf16 %v2136_v50, %v2134_v17 }
 0x4d5   : > { %2254 = vmatmul.bf16.gmra.mxu0 %v2150_v15 }
 0x4da   : > { %v2139_v29 = vpop.f32.mrf.mxu3 }
 0x4e2   : > { %v2141_v45 = vpop.f32.mrf.mxu3 }
 0x4e3   : > { %v2151_v40 = vpack.c.bf16 %v2141_v45, %v2139_v29 }
 0x4e5   : > { %2259 = vmatmul.bf16.gmra.mxu0 %v2151_v40 }
 0x4f2   : > { %v2225_v6 = vpop.f32.mrf.mxu0 }
 0x4f3   : > { %v2265_v36 = vadd.f32 %v2225_v6, %v9381_v41 }
 0x4f5   : > { %v2285_v53 = vadd.f32 %v9465_v59, %v2265_v36 }
 0x4f7   : > { %v2301_v22 = vmax.f32 %v2285_v53, 0.0 }
 0x4fa   : > { %v2227_v43 = vpop.f32.mrf.mxu0 }
 0x4fb   : > { %v2266_v14 = vadd.f32 %v2227_v43, %v9385_v42 }
 0x4fd   : > { %v2286_v31 = vadd.f32 %v9465_v59, %v2266_v14 }
 0x4ff   : > { %v2302_v35 = vmax.f32 %v2286_v31, 0.0 }
 0x501   : > { %v2317_v23 = vpack.c.bf16 %v2302_v35, %v2301_v22 }
 0x502   : > { %v2230_v3 = vpop.f32.mrf.mxu0 }
 0x503   : > { %2401 = vmatmul.bf16.vlgmr.msra.gmra.mxu1 %v2317_v23  ;;  %v2267_v25 = vadd.f32 %v2230_v3, %v9391_v9  ;;  %v7055_v23 = vld [vmem:[#allocation14 + $0x1e0] sm:$0xf]  ;;  %v7818_v3 = vld [vmem:[#allocation14 + $0x1ec] sm:$0xf0] }
 0x505   : > { %v2287_v54 = vadd.f32 %v9465_v59, %v2267_v25  ;;  %v7816_v25 = vld [vmem:[#allocation14 + $0x1e4] sm:$0xf] }
 0x507   : > { %v2303_v5 = vmax.f32 %v2287_v54, 0.0  ;;  %v7063_v54 = vld [vmem:[#allocation14 + $0x1e8] sm:$0xf] }
 0x50a   : > { %v2232_v41 = vpop.f32.mrf.mxu0 }
 0x50b   : > { %v2268_v48 = vadd.f32 %v2232_v41, %v9400_v8  ;;  %v7057_v41 = vld [vmem:[#allocation14 + $0x1f0] sm:$0xf0] }
 0x50d   : > { %v2288_v18 = vadd.f32 %v9465_v59, %v2268_v48  ;;  %v7819_v48 = vld [vmem:[#allocation14 + $0x1f4] sm:$0xf0] }
 0x50f   : > { %v2304_v63 = vmax.f32 %v2288_v18, 0.0 }
 0x511   : > { %v2318_v44 = vpack.c.bf16 %v2304_v63, %v2303_v5  ;;  %v7060_v63 = vor.u32 %v7816_v25, %v7057_v41  ;;  %v7805_v25 = vld [vmem:[#allocation14 + $0x18c] sm:$0xf] }
 0x512   : > { %v2235_v42 = vpop.f32.mrf.mxu0 }
 0x513   : > { %2406 = vmatmul.bf16.gmra.mxu1 %v2318_v44  ;;  %v2269_v60 = vadd.f32 %v2235_v42, %v9406_v13  ;;  %v7064_v44 = vor.u32 %v7819_v48, %v7063_v54  ;;  %v7817_v42 = vld [vmem:[#allocation14 + $0x1ec] sm:$0xf]  ;;  %2756 = vmatpush.bf16.msra.mxu3 %v7060_v63  ;;  %v7017_v54 = vld [vmem:[#allocation14 + $0x198] sm:$0xf0] }
 0x515   : > { %v2289_v46 = vadd.f32 %v9465_v59, %v2269_v60  ;;  %2805 = vmatpush.bf16.msrb.mxu0 %v7064_v44  ;;  %v6991_v44 = vld [vmem:[#allocation14 + $0x160] sm:$0xf] }
 0x517   : > { %v2305_v1 = vmax.f32 %v2289_v46, 0.0  ;;  %v7814_v46 = vld [vmem:[#allocation14 + $0x1cc] sm:$0xf0] }
 0x51a   : > { %v2237_v12 = vpop.f32.mrf.mxu0 }
 0x51b   : > { %v2270_v33 = vadd.f32 %v2237_v12, %v9409_v2 }
 0x51d   : > { %v2290_v9 = vadd.f32 %v9465_v59, %v2270_v33  ;;  %v7812_v33 = vld [vmem:[#allocation14 + $0x1c4] sm:$0xf] }
 0x51f   : > { %v2306_v7 = vmax.f32 %v2290_v9, 0.0 }
 0x521   : > { %v2319_v17 = vpack.c.bf16 %v2306_v7, %v2305_v1  ;;  %v7041_v7 = vld [vmem:[#allocation14 + $0x1d0] sm:$0xf0] }
 0x522   : > { %v2240_v8 = vpop.f32.mrf.mxu0 }
 0x523   : > { %2411 = vmatmul.bf16.gmra.mxu1 %v2319_v17  ;;  %v2271_v11 = vadd.f32 %v2240_v8, %v9416_v0  ;;  %v7047_v17 = vld [vmem:[#allocation14 + $0x1c8] sm:$0xf]  ;;  %v7815_v8 = vld [vmem:[#allocation14 + $0x1d4] sm:$0xf0] }
 0x525   : > { %v2291_v32 = vadd.f32 %v9465_v59, %v2271_v11  ;;  %v7044_v11 = vor.u32 %v7812_v33, %v7041_v7 }
 0x527   : > { %v2307_v58 = vmax.f32 %v2291_v32, 0.0  ;;  %v7813_v32 = vld [vmem:[#allocation14 + $0x1cc] sm:$0xf]  ;;  %2757 = vmatpush.bf16.msra.mxu3 %v7044_v11 }
 0x52a   : > { %v2242_v50 = vpop.f32.mrf.mxu0 }
 0x52b   : > { %v2272_v15 = vadd.f32 %v2242_v50, %v9420_v39  ;;  %v7048_v50 = vor.u32 %v7815_v8, %v7047_v17  ;;  %v7801_v17 = vld [vmem:[#allocation14 + $0x16c] sm:$0xf]  ;;  %v7001_v8 = vld [vmem:[#allocation14 + $0x178] sm:$0xf0] }
 0x52d   : > { %v2292_v13 = vadd.f32 %v9465_v59, %v2272_v15  ;;  %v7049_v15 = vld [vmem:[#allocation14 + $0x1d8] sm:$0xf0]  ;;  %2806 = vmatpush.bf16.msrb.mxu0 %v7048_v50  ;;  %v6975_v50 = vld [vmem:[#allocation14 + $0x140] sm:$0xf] }
 0x52f   : > { %v2308_v29 = vmax.f32 %v2292_v13, 0.0  ;;  %v7023_v13 = vld [vmem:[#allocation14 + $0x1a0] sm:$0xf] }
 0x531   : > { %v2320_v47 = vpack.c.bf16 %v2308_v29, %v2307_v58  ;;  %v7052_v58 = vor.u32 %v7813_v32, %v7049_v15  ;;  %v7810_v29 = vld [vmem:[#allocation14 + $0x1ac] sm:$0xf0]  ;;  %v7796_v15 = vld [vmem:[#allocation14 + $0x144] sm:$0xf] }
 0x532   : > { %v2245_v2 = vpop.f32.mrf.mxu0  ;;  %v7798_v32 = vld [vmem:[#allocation14 + $0x14c] sm:$0xf0] }
 0x533   : > { %2416 = vmatmul.bf16.gmra.mxu1 %v2320_v47  ;;  %v2273_v16 = vadd.f32 %v2245_v2, %v9425_v4  ;;  %v7808_v47 = vld [vmem:[#allocation14 + $0x1a4] sm:$0xf]  ;;  %v7025_v2 = vld [vmem:[#allocation14 + $0x1b0] sm:$0xf0] }
 0x535   : > { %v2293_v40 = vadd.f32 %v9465_v59, %v2273_v16  ;;  %v7024_v16 = vor.u32 %v7810_v29, %v7023_v13  ;;  %v6977_v29 = vld [vmem:[#allocation14 + $0x150] sm:$0xf0] }
 0x537   : > { %v2309_v36 = vmax.f32 %v2293_v40, 0.0  ;;  %v7031_v40 = vld [vmem:[#allocation14 + $0x1a8] sm:$0xf] }
 0x53a   : > { %v2247_v45 = vpop.f32.mrf.mxu0 }
 0x53b   : > { %v2274_v6 = vadd.f32 %v2247_v45, %v9431_v10  ;;  %v7056_v10 = vor.u32 %v7818_v3, %v7055_v23  ;;  %v7028_v45 = vor.u32 %v7808_v47, %v7025_v2  ;;  %v7015_v23 = vld [vmem:[#allocation14 + $0x188] sm:$0xf]  ;;  %v7807_v3 = vld [vmem:[#allocation14 + $0x194] sm:$0xf0] }
 0x53c   : > { %v7016_v41 = vor.u32 %v7807_v3, %v7015_v23  ;;  %v6983_v47 = vld [vmem:[#allocation14 + $0x148] sm:$0xf]  ;;  %v7799_v2 = vld [vmem:[#allocation14 + $0x154] sm:$0xf0]  ;;  %v7793_v3 = vld [vmem:[#allocation14 + $0x12c] sm:$0xf] }
 0x53d   : > { %v2294_v0 = vadd.f32 %v9465_v59, %v2274_v6  ;;  %2707 = vmatpush.bf16.msra.mxu2 %v7056_v10  ;;  %v7811_v6 = vld [vmem:[#allocation14 + $0x1b4] sm:$0xf0]  ;;  %2758 = vmatpush.bf16.msra.mxu3 %v7028_v45  ;;  %v6984_v45 = vor.u32 %v7799_v2, %v6983_v47 }
 0x53f   : > { %v2310_v43 = vmax.f32 %v2294_v0, 0.0  ;;  %v7809_v0 = vld [vmem:[#allocation14 + $0x1ac] sm:$0xf] }
 0x541   : > { %v2321_v53 = vpack.c.bf16 %v2310_v43, %v2309_v36  ;;  %v7032_v36 = vor.u32 %v7811_v6, %v7031_v40  ;;  %v7033_v43 = vld [vmem:[#allocation14 + $0x1b8] sm:$0xf0]  ;;  %v7797_v40 = vld [vmem:[#allocation14 + $0x14c] sm:$0xf] }
 0x542   : > { %v2250_v39 = vpop.f32.mrf.mxu0  ;;  %v6985_v6 = vld [vmem:[#allocation14 + $0x158] sm:$0xf0] }
 0x543   : > { %2421 = vmatmul.bf16.gmra.mxu1 %v2321_v53  ;;  %v2275_v14 = vadd.f32 %v2250_v39, %v9434_v21  ;;  %v7065_v21 = vld [vmem:[#allocation14 + $0x1f8] sm:$0xf0]  ;;  %v7007_v53 = vld [vmem:[#allocation14 + $0x180] sm:$0xf]  ;;  %v7806_v39 = vld [vmem:[#allocation14 + $0x18c] sm:$0xf0]  ;;  %2807 = vmatpush.bf16.msrb.mxu0 %v7032_v36 }
 0x544   : > { %v7068_v60 = vor.u32 %v7817_v42, %v7065_v21  ;;  %v7802_v42 = vld [vmem:[#allocation14 + $0x16c] sm:$0xf0]  ;;  %v7800_v21 = vld [vmem:[#allocation14 + $0x164] sm:$0xf]  ;;  %v6959_v36 = vld [vmem:[#allocation14 + $0x120] sm:$0xf] }
 0x545   : > { %v2295_v22 = vadd.f32 %v9465_v59, %v2275_v14 }
 0x546   : > { %2854 = vmatpush.bf16.msrb.mxu1 %v7068_v60  ;;  %v6992_v60 = vor.u32 %v7802_v42, %v6991_v44  ;;  %v7791_v44 = vld [vmem:[#allocation14 + $0x114] sm:$0xf0] }
 0x547   : > { %v2311_v18 = vmax.f32 %v2295_v22, 0.0  ;;  %v7804_v22 = vld [vmem:[#allocation14 + $0x184] sm:$0xf]  ;;  %2808 = vmatpush.bf16.msrb.mxu0 %v7016_v41  ;;  %v6943_v41 = vld [vmem:[#allocation14 + $0x100] sm:$0xf] }
 0x54a   : > { %v2252_v31 = vpop.f32.mrf.mxu0  ;;  %2855 = vmatpush.bf16.msrb.mxu1 %v7052_v58  ;;  %v6976_v58 = vor.u32 %v7798_v32, %v6975_v50 }
 0x54b   : > { %v2276_v35 = vadd.f32 %v2252_v31, %v9441_v61  ;;  %v7039_v61 = vld [vmem:[#allocation14 + $0x1c0] sm:$0xf]  ;;  %v7036_v31 = vor.u32 %v7809_v0, %v7033_v43  ;;  %v6988_v0 = vor.u32 %v7797_v40, %v6985_v6  ;;  %v7794_v43 = vld [vmem:[#allocation14 + $0x12c] sm:$0xf0] }
 0x54c   : > { %v7040_v1 = vor.u32 %v7814_v46, %v7039_v61  ;;  %v6999_v61 = vld [vmem:[#allocation14 + $0x168] sm:$0xf]  ;;  %v7803_v46 = vld [vmem:[#allocation14 + $0x174] sm:$0xf0] }
 0x54d   : > { %v2296_v4 = vadd.f32 %v9465_v59, %v2276_v35  ;;  %v7009_v35 = vld [vmem:[#allocation14 + $0x190] sm:$0xf0]  ;;  %v7000_v7 = vor.u32 %v7803_v46, %v6999_v61  ;;  %v6953_v61 = vld [vmem:[#allocation14 + $0x118] sm:$0xf0] }
 0x54e   : > { %2708 = vmatpush.bf16.msra.mxu2 %v7040_v1  ;;  %v7012_v10 = vor.u32 %v7804_v22, %v7009_v35  ;;  %2856 = vmatpush.bf16.msrb.mxu1 %v7036_v31  ;;  %v6967_v31 = vld [vmem:[#allocation14 + $0x128] sm:$0xf]  ;;  %v7795_v22 = vld [vmem:[#allocation14 + $0x134] sm:$0xf0] }
 0x54f   : > { %v2312_v5 = vmax.f32 %v2296_v4, 0.0  ;;  %v7008_v4 = vor.u32 %v7806_v39, %v7007_v53  ;;  %2809 = vmatpush.bf16.msrb.mxu0 %v7000_v7  ;;  %v7792_v53 = vld [vmem:[#allocation14 + $0x124] sm:$0xf]  ;;  %v6960_v39 = vor.u32 %v7794_v43, %v6959_v36  ;;  %v6968_v23 = vor.u32 %v7795_v22, %v6967_v31 }
 0x550   : > { %2759 = vmatpush.bf16.msra.mxu3 %v7012_v10 }
 0x551   : > { %v2322_v12 = vpack.c.bf16 %v2312_v5, %v2311_v18  ;;  %v7020_v18 = vor.u32 %v7805_v25, %v7017_v54  ;;  %v6969_v25 = vld [vmem:[#allocation14 + $0x138] sm:$0xf0]  ;;  %v7790_v54 = vld [vmem:[#allocation14 + $0x10c] sm:$0xf0] }
 0x552   : > { %v2255_v9 = vpop.f32.mrf.mxu0  ;;  %2709 = vmatpush.bf16.msra.mxu2 %v7024_v16  ;;  %v6980_v16 = vor.u32 %v7796_v15, %v6977_v29  ;;  %v6972_v10 = vor.u32 %v7793_v3, %v6969_v25 }
 0x553   : > { %2426 = vmatmul.bf16.gmra.mxu1 %v2322_v12  ;;  %v2277_v14 = vadd.f32 %v2255_v9, %v9447_v27  ;;  %v6993_v12 = vld [vmem:[#allocation14 + $0x170] sm:$0xf0]  ;;  %2810 = vmatpush.bf16.msrb.mxu0 %v6984_v45 }
 0x554   : > { %2857 = vmatpush.bf16.msrb.mxu1 %v7020_v18  ;;  %v6996_v1 = vor.u32 %v7800_v21, %v6993_v12  ;;  %v7789_v12 = vld [vmem:[#allocation14 + $0x10c] sm:$0xf] }
 0x555   : > { %v2297_v5 = vadd.f32 %v9465_v59, %v2277_v14  ;;  %v6961_v14 = vld [vmem:[#allocation14 + $0x130] sm:$0xf0]  ;;  %v6956_v46 = vor.u32 %v7789_v12, %v6953_v61 }
 0x556   : > { %2710 = vmatpush.bf16.msra.mxu2 %v7008_v4  ;;  %2760 = vmatpush.bf16.msra.mxu3 %v6996_v1  ;;  %v6964_v4 = vor.u32 %v7792_v53, %v6961_v14  ;;  %v10563_v14 = vld [vmem:[#allocation39_spill] sm:$0xff] }
 0x557   : > { %v2313_v33 = vmax.f32 %v2297_v5, 0.0  ;;  %2811 = vmatpush.bf16.msrb.mxu0 %v6968_v23  ;;  %v6944_v5 = vor.u32 %v7790_v54, %v6943_v41  ;;  %v10569_v54 = vld [vmem:[#allocation40_spill] sm:$0xff] }
 0x55a   : > { %v2257_v48 = vpop.f32.mrf.mxu0  ;;  %2711 = vmatpush.bf16.msra.mxu2 %v6992_v60  ;;  %2761 = vmatpush.bf16.msra.mxu3 %v6980_v16 }
 0x55b   : > { %v2278_v27 = vadd.f32 %v2257_v48, %v9450_v57  ;;  %v7004_v57 = vor.u32 %v7801_v17, %v7001_v8  ;;  %v7788_v48 = vld [vmem:[#allocation14 + $0x104] sm:$0xf] }
 0x55d   : > { %v2298_v63 = vadd.f32 %v9465_v59, %v2278_v27  ;;  %2858 = vmatpush.bf16.msrb.mxu1 %v7004_v57  ;;  %v6945_v27 = vld [vmem:[#allocation14 + $0x110] sm:$0xf0] }
 0x55e   : > { %2712 = vmatpush.bf16.msra.mxu2 %v6976_v58  ;;  %2762 = vmatpush.bf16.msra.mxu3 %v6964_v4  ;;  %v6948_v21 = vor.u32 %v7788_v48, %v6945_v27 }
 0x55f   : > { %v2314_v9 = vmax.f32 %v2298_v63, 0.0  ;;  %v6951_v63 = vld [vmem:[#allocation14 + $0x108] sm:$0xf] }
 0x560   : > { %v6952_v60 = vor.u32 %v7791_v44, %v6951_v63 }
 0x561   : > { %v2323_v11 = vpack.c.bf16 %v2314_v9, %v2313_v33  ;;  %2859 = vmatpush.bf16.msrb.mxu1 %v6988_v0 }
 0x562   : > { %v2260_v13 = vpop.f32.mrf.mxu0  ;;  %2713 = vmatpush.bf16.msra.mxu2 %v6960_v39  ;;  %2763 = vmatpush.bf16.msra.mxu3 %v6948_v21  ;;  %v10573_v21 = vld [vmem:[#allocation42_spill] sm:$0xff] }
 0x563   : > { %2431 = vmatmul.bf16.gmra.mxu1 %v2323_v11  ;;  %v2279_v35 = vadd.f32 %v2260_v13, %v9457_v34  ;;  %2812 = vmatpush.bf16.msrb.mxu0 %v6952_v60 }
 0x565   : > { %2860 = vmatpush.bf16.msrb.mxu1 %v6972_v10  ;;  %v2299_v42 = vadd.f32 %v9465_v59, %v2279_v35  ;;  %v10567_v10 = vld [vmem:[#allocation41_spill] sm:$0xff] }
 0x566   : > { %2714 = vmatpush.bf16.msra.mxu2 %v6944_v5 }
 0x567   : > { %v2315_v9 = vmax.f32 %v2299_v42, 0.0  ;;  %v10571_v42 = vld [vmem:[#allocation43_spill] sm:$0xff] }
 0x569   : > { %2861 = vmatpush.bf16.msrb.mxu1 %v6956_v46 }
 0x56a   : > { %v2262_v18 = vpop.f32.mrf.mxu0 }
 0x56b   : > { %v2280_v34 = vadd.f32 %v2262_v18, %v9459_v37  ;;  %v9501_v37 = vld [vmem:[%s10559_s0] ss:$0 sm:$0xff] }
 0x56d   : > { %v2300_v33 = vadd.f32 %v9465_v59, %v2280_v34 }
 0x56f   : > { %v2316_v1 = vmax.f32 %v2300_v33, 0.0 }
 0x571   : > { %v2324_v7 = vpack.c.bf16 %v2316_v1, %v2315_v9  ;;  %v10575_v1 = vld [vmem:[#allocation45_spill] sm:$0xff] }
 0x573   : > { %2436 = vmatmul.bf16.gmra.mxu1 %v2324_v7 }
 0x580   : > { %v2402_v17 = vpop.f32.mrf.mxu1 }
 0x581   : > { %v2403_v8 = vadd.f32 %v9501_v37, %v2402_v17  ;;  %v10577_v17 = vld [vmem:[#allocation44_spill] sm:$0xff] }
 0x583   : > { %v9506_v59 = vadd.f32 %v2403_v8, %v9145_v55 }
 0x588   : > { %v2404_v57 = vpop.f32.mrf.mxu1 }
 0x589   : > { %v2405_v11 = vadd.f32 %v9501_v37, %v2404_v57 }
 0x58b   : > { %v9509_v50 = vadd.f32 %v2405_v11, %v9147_v56 }
 0x58d   : > { %v2506_v32 = vpack.c.bf16 %v9509_v50, %v9506_v59 }
 0x58f   : > { %2715 = vmatmul.bf16.vlgmr.msra.gmra.mxu2 %v2506_v32  ;;  %2764 = vmatmul.bf16.vlgmr.msra.gmra.mxu3 %v2506_v32 }
 0x590   : > { %2813 = vmatmul.bf16.vlgmr.msrb.gmra.mxu0 %v2506_v32  ;;  %2862 = vmatmul.bf16.vlgmr.msrb.gmra.mxu1 %v2506_v32  ;;  %v2407_v15 = vpop.f32.mrf.mxu1 }
 0x591   : > { %v2408_v13 = vadd.f32 %v9501_v37, %v2407_v15 }
 0x593   : > { %v9516_v47 = vadd.f32 %v2408_v13, %v9164_v30  ;;  %v10561_v30 = vld [vmem:[#allocation37_spill] sm:$0xff] }
 0x598   : > { %v2409_v58 = vpop.f32.mrf.mxu1 }
 0x599   : > { %v2410_v29 = vadd.f32 %v9501_v37, %v2409_v58  ;;  %v10579_v58 = vld [vmem:[#allocation47_spill] sm:$0xff] }
 0x59b   : > { %v9519_v55 = vadd.f32 %v2410_v29, %v9162_v24 }
 0x59d   : > { %v2507_v56 = vpack.c.bf16 %v9519_v55, %v9516_v47 }
 0x59f   : > { %2720 = vmatmul.bf16.gmra.mxu2 %v2507_v56  ;;  %2769 = vmatmul.bf16.gmra.mxu3 %v2507_v56 }
 0x5a0   : > { %2818 = vmatmul.bf16.gmra.mxu0 %v2507_v56  ;;  %2867 = vmatmul.bf16.gmra.mxu1 %v2507_v56  ;;  %v2412_v2 = vpop.f32.mrf.mxu1  ;;  %v10581_v56 = vld [vmem:[#allocation46_spill] sm:$0xff] }
 0x5a1   : > { %v2413_v16 = vadd.f32 %v9501_v37, %v2412_v2 }
 0x5a3   : > { %v9526_v6 = vadd.f32 %v2413_v16, %v9184_v49  ;;  %v10565_v49 = vld [vmem:[#allocation38_spill] sm:$0xff] }
 0x5a5   : > { %10560 = vst [vmem:[#allocation56_spill] sm:$0xff] %v9526_v6 }
 0x5a8   : > { %v2414_v45 = vpop.f32.mrf.mxu1 }
 0x5a9   : > { %v2415_v40 = vadd.f32 %v9501_v37, %v2414_v45 }
 0x5ab   : > { %v9529_v0 = vadd.f32 %v2415_v40, %v10561_v30 }
 0x5ad   : > { %10562 = vst [vmem:[#allocation37_spill] sm:$0xff] %v9529_v0  ;;  %v2508_v24 = vpack.c.bf16 %v9529_v0, %v9526_v6 }
 0x5af   : > { %2725 = vmatmul.bf16.gmra.mxu2 %v2508_v24  ;;  %2774 = vmatmul.bf16.gmra.mxu3 %v2508_v24 }
 0x5b0   : > { %2823 = vmatmul.bf16.gmra.mxu0 %v2508_v24  ;;  %2872 = vmatmul.bf16.gmra.mxu1 %v2508_v24  ;;  %v2417_v36 = vpop.f32.mrf.mxu1 }
 0x5b1   : > { %v2418_v43 = vadd.f32 %v9501_v37, %v2417_v36 }
 0x5b3   : > { %v9536_v31 = vadd.f32 %v2418_v43, %v10563_v14 }
 0x5b5   : > { %10564 = vst [vmem:[#allocation39_spill] sm:$0xff] %v9536_v31 }
 0x5b8   : > { %v2419_v53 = vpop.f32.mrf.mxu1 }
 0x5b9   : > { %v2420_v39 = vadd.f32 %v9501_v37, %v2419_v53 }
 0x5bb   : > { %v9539_v22 = vadd.f32 %v2420_v39, %v10565_v49 }
 0x5bd   : > { %10566 = vst [vmem:[#allocation38_spill] sm:$0xff] %v9539_v22  ;;  %v2509_v35 = vpack.c.bf16 %v9539_v22, %v9536_v31 }
 0x5bf   : > { %2730 = vmatmul.bf16.gmra.mxu2 %v2509_v35  ;;  %2779 = vmatmul.bf16.gmra.mxu3 %v2509_v35 }
 0x5c0   : > { %2828 = vmatmul.bf16.gmra.mxu0 %v2509_v35  ;;  %2877 = vmatmul.bf16.gmra.mxu1 %v2509_v35  ;;  %v2422_v4 = vpop.f32.mrf.mxu1 }
 0x5c1   : > { %v2423_v23 = vadd.f32 %v9501_v37, %v2422_v4 }
 0x5c3   : > { %v9546_v41 = vadd.f32 %v2423_v23, %v10567_v10 }
 0x5c5   : > { %10568 = vst [vmem:[#allocation41_spill] sm:$0xff] %v9546_v41 }
 0x5c8   : > { %v2424_v3 = vpop.f32.mrf.mxu1 }
 0x5c9   : > { %v2425_v25 = vadd.f32 %v9501_v37, %v2424_v3 }
 0x5cb   : > { %v9549_v48 = vadd.f32 %v2425_v25, %v10569_v54 }
 0x5cd   : > { %10570 = vst [vmem:[#allocation40_spill] sm:$0xff] %v9549_v48  ;;  %v2510_v18 = vpack.c.bf16 %v9549_v48, %v9546_v41 }
 0x5cf   : > { %2735 = vmatmul.bf16.gmra.mxu2 %v2510_v18  ;;  %2784 = vmatmul.bf16.gmra.mxu3 %v2510_v18 }
 0x5d0   : > { %2833 = vmatmul.bf16.gmra.mxu0 %v2510_v18  ;;  %2882 = vmatmul.bf16.gmra.mxu1 %v2510_v18  ;;  %v2427_v5 = vpop.f32.mrf.mxu1 }
 0x5d1   : > { %v2428_v27 = vadd.f32 %v9501_v37, %v2427_v5 }
 0x5d3   : > { %v9556_v34 = vadd.f32 %v2428_v27, %v10571_v42 }
 0x5d5   : > { %10572 = vst [vmem:[#allocation43_spill] sm:$0xff] %v9556_v34 }
 0x5d8   : > { %v2429_v63 = vpop.f32.mrf.mxu1 }
 0x5d9   : > { %v2430_v44 = vadd.f32 %v9501_v37, %v2429_v63 }
 0x5db   : > { %v9559_v60 = vadd.f32 %v2430_v44, %v10573_v21 }
 0x5dd   : > { %10574 = vst [vmem:[#allocation42_spill] sm:$0xff] %v9559_v60  ;;  %v2511_v12 = vpack.c.bf16 %v9559_v60, %v9556_v34 }
 0x5df   : > { %2740 = vmatmul.bf16.gmra.mxu2 %v2511_v12  ;;  %2789 = vmatmul.bf16.gmra.mxu3 %v2511_v12 }
 0x5e0   : > { %2838 = vmatmul.bf16.gmra.mxu0 %v2511_v12  ;;  %2887 = vmatmul.bf16.gmra.mxu1 %v2511_v12  ;;  %v2432_v61 = vpop.f32.mrf.mxu1 }
 0x5e1   : > { %v2433_v46 = vadd.f32 %v9501_v37, %v2432_v61 }
 0x5e3   : > { %v9566_v7 = vadd.f32 %v2433_v46, %v10575_v1 }
 0x5e5   : > { %10576 = vst [vmem:[#allocation45_spill] sm:$0xff] %v9566_v7 }
 0x5e8   : > { %v2434_v33 = vpop.f32.mrf.mxu1 }
 0x5e9   : > { %v2435_v9 = vadd.f32 %v9501_v37, %v2434_v33 }
 0x5eb   : > { %v9569_v8 = vadd.f32 %v2435_v9, %v10577_v17 }
 0x5ed   : > { %10578 = vst [vmem:[#allocation44_spill] sm:$0xff] %v9569_v8  ;;  %v2512_v57 = vpack.c.bf16 %v9569_v8, %v9566_v7 }
 0x5ef   : > { %2745 = vmatmul.bf16.gmra.mxu2 %v2512_v57  ;;  %2794 = vmatmul.bf16.gmra.mxu3 %v2512_v57 }
 0x5f0   : > { %2843 = vmatmul.bf16.gmra.mxu0 %v2512_v57  ;;  %2892 = vmatmul.bf16.gmra.mxu1 %v2512_v57  ;;  %v2437_v11 = vpop.f32.mrf.mxu1 }
 0x5f1   : > { %v2438_v32 = vadd.f32 %v9501_v37, %v2437_v11 }
 0x5f3   : > { %v9576_v29 = vadd.f32 %v2438_v32, %v10579_v58 }
 0x5f5   : > { %10580 = vst [vmem:[#allocation47_spill] sm:$0xff] %v9576_v29 }
 0x5f8   : > { %v2439_v15 = vpop.f32.mrf.mxu1 }
 0x5f9   : > { %v2440_v13 = vadd.f32 %v9501_v37, %v2439_v15 }
 0x5fb   : > { %v9579_v2 = vadd.f32 %v2440_v13, %v10581_v56 }
 0x5fd   : > { %10582 = vst [vmem:[#allocation46_spill] sm:$0xff] %v9579_v2  ;;  %v2513_v16 = vpack.c.bf16 %v9579_v2, %v9576_v29 }
 0x5ff   : > { %2750 = vmatmul.bf16.gmra.mxu2 %v2513_v16  ;;  %2799 = vmatmul.bf16.gmra.mxu3 %v2513_v16 }
 0x600   : > { %2848 = vmatmul.bf16.gmra.mxu0 %v2513_v16  ;;  %2897 = vmatmul.bf16.gmra.mxu1 %v2513_v16 }
 0x60d   : > { %v9583_v45 = vpop.f32.mrf.mxu0 }
 0x612   : > { %v2716_v40 = vpop.f32.mrf.mxu2  ;;  %v2765_v30 = vpop.f32.mrf.mxu3 }
 0x613   : > { %v9585_v24 = vpack.c.bf16 %v2765_v30, %v2716_v40 }
 0x615   : > { %v9587_v37 = vpop.f32.mrf.mxu0 }
 0x61a   : > { %v9589_v36 = vpop.f32.mrf.mxu2  ;;  %v9591_v43 = vpop.f32.mrf.mxu3 }
 0x61d   : > { %v9593_v53 = vpop.f32.mrf.mxu0 }
 0x622   : > { %v2721_v39 = vpop.f32.mrf.mxu2  ;;  %v2770_v14 = vpop.f32.mrf.mxu3 }
 0x623   : > { %v9595_v49 = vpack.c.bf16 %v2770_v14, %v2721_v39 }
 0x625   : > { %v9597_v35 = vpop.f32.mrf.mxu0 }
 0x62a   : > { %v9599_v4 = vpop.f32.mrf.mxu2  ;;  %v9601_v23 = vpop.f32.mrf.mxu3 }
 0x62d   : > { %v9603_v3 = vpop.f32.mrf.mxu0 }
 0x632   : > { %v2726_v25 = vpop.f32.mrf.mxu2  ;;  %v2775_v10 = vpop.f32.mrf.mxu3 }
 0x633   : > { %v9605_v54 = vpack.c.bf16 %v2775_v10, %v2726_v25 }
 0x635   : > { %v9607_v18 = vpop.f32.mrf.mxu0 }
 0x63a   : > { %v9609_v5 = vpop.f32.mrf.mxu2  ;;  %v9611_v27 = vpop.f32.mrf.mxu3 }
 0x63d   : > { %v9613_v63 = vpop.f32.mrf.mxu0 }
 0x642   : > { %v2731_v44 = vpop.f32.mrf.mxu2  ;;  %v2780_v42 = vpop.f32.mrf.mxu3 }
 0x643   : > { %v9615_v21 = vpack.c.bf16 %v2780_v42, %v2731_v44 }
 0x645   : > { %v9617_v12 = vpop.f32.mrf.mxu0 }
 0x64a   : > { %v9619_v61 = vpop.f32.mrf.mxu2  ;;  %v9621_v46 = vpop.f32.mrf.mxu3 }
 0x64d   : > { %v9623_v33 = vpop.f32.mrf.mxu0 }
 0x652   : > { %v2736_v9 = vpop.f32.mrf.mxu2  ;;  %v2785_v1 = vpop.f32.mrf.mxu3 }
 0x653   : > { %v9625_v17 = vpack.c.bf16 %v2785_v1, %v2736_v9 }
 0x655   : > { %v2836_v57 = vpop.f32.mrf.mxu0 }
 0x65a   : > { %v2738_v11 = vpop.f32.mrf.mxu2  ;;  %v2787_v32 = vpop.f32.mrf.mxu3 }
 0x65d   : > { %v2839_v15 = vpop.f32.mrf.mxu0 }
 0x65e   : > { %v2924_v41 = vpack.c.bf16 %v2839_v15, %v2839_v15 }
 0x662   : > { %v2741_v13 = vpop.f32.mrf.mxu2  ;;  %v2790_v58 = vpop.f32.mrf.mxu3 }
 0x665   : > { %v2841_v56 = vpop.f32.mrf.mxu0 }
 0x666   : > { %v2926_v2 = vpack.c.bf16 %v2841_v56, %v2841_v56 }
 0x66a   : > { %v2743_v16 = vpop.f32.mrf.mxu2  ;;  %v2792_v40 = vpop.f32.mrf.mxu3 }
 0x66d   : > { %v2844_v30 = vpop.f32.mrf.mxu0 }
 0x66e   : > { %v2928_v26 = vpack.c.bf16 %v2844_v30, %v2844_v30  ;;  %v3167_v30 = vunpack.c.l.b16 %v2926_v2  ;;  %v2921_v2 = vpack.c.bf16 %v2787_v32, %v2738_v11  ;;  %v2917_v11 = vpack.c.bf16 %v9621_v46, %v9619_v61 }
 0x66f   : > { %v2913_v46 = vpack.c.bf16 %v9611_v27, %v9609_v5  ;;  %v2909_v27 = vpack.c.bf16 %v9601_v23, %v9599_v4  ;;  %v2905_v4 = vpack.c.bf16 %v9591_v43, %v9589_v36  ;;  %v2999_v43 = vunpack.c.l.b16 %v9585_v24 }
 0x670   : > { %v3169_v22 = vunpack.c.l.b16 %v2928_v26  ;;  %v2923_v26 = vpack.c.bf16 %v2790_v58, %v2741_v13  ;;  %v3008_v13 = vunpack.c.l.b16 %v2921_v2  ;;  %v3162_v58 = vunpack.c.h.b16 %v2921_v2 }
 0x671   : > { %v3148_v2 = vunpack.c.h.b16 %v9595_v49 }
 0x672   : > { %v2746_v39 = vpop.f32.mrf.mxu2  ;;  %v2795_v14 = vpop.f32.mrf.mxu3  ;;  %v3164_v15 = vunpack.c.h.b16 %v2923_v26 }
 0x673   : > { %v2927_v31 = vpack.c.bf16 %v2795_v14, %v2746_v39  ;;  %v3007_v39 = vunpack.c.l.b16 %v9625_v17  ;;  %v3160_v14 = vunpack.c.h.b16 %v9625_v17  ;;  %v3005_v17 = vunpack.c.l.b16 %v9615_v21 }
 0x675   : > { %v2846_v25 = vpop.f32.mrf.mxu0 }
 0x676   : > { %v2930_v19 = vpack.c.bf16 %v2846_v25, %v2846_v25 }
 0x678   : > { %v3171_v29 = vunpack.c.l.b16 %v2930_v19 }
 0x67a   : > { %v2748_v10 = vpop.f32.mrf.mxu2  ;;  %v2797_v44 = vpop.f32.mrf.mxu3 }
 0x67b   : > { %v2929_v34 = vpack.c.bf16 %v2797_v44, %v2748_v10  ;;  %v3006_v44 = vunpack.c.l.b16 %v2917_v11 }
 0x67d   : > { %v2849_v42 = vpop.f32.mrf.mxu0 }
 0x67e   : > { %v2932_v9 = vpack.c.bf16 %v2849_v42, %v2849_v42 }
 0x680   : > { %v3173_v28 = vunpack.c.l.b16 %v2932_v9  ;;  %v2925_v9 = vpack.c.bf16 %v2792_v40, %v2743_v16 }
 0x682   : > { %v2751_v51 = vpop.f32.mrf.mxu2  ;;  %v2800_v52 = vpop.f32.mrf.mxu3 }
 0x683   : > { %v2931_v20 = vpack.c.bf16 %v2800_v52, %v2751_v51  ;;  %v3012_v52 = vunpack.c.l.b16 %v2929_v34  ;;  %v3170_v51 = vunpack.c.h.b16 %v2929_v34  ;;  %v3166_v34 = vunpack.c.h.b16 %v2925_v9 }
 0x685   : > { %v2851_v1 = vpop.f32.mrf.mxu0  ;;  %v3013_v0 = vunpack.c.l.b16 %v2931_v20  ;;  %v3172_v42 = vunpack.c.h.b16 %v2931_v20  ;;  %v2918_v20 = vpack.c.bf16 %v9617_v12, %v9617_v12  ;;  %v3186_v16 = vpack.c.b16 %v3166_v34, %v3164_v15  ;;  %v7766_v15 = vld [vmem:[%s8976_s6 + $0x50] sm:$0xff] }
 0x686   : > { %v2934_v62 = vpack.c.bf16 %v2851_v1, %v2851_v1  ;;  %v2922_v1 = vpack.c.bf16 %v2836_v57, %v2836_v57  ;;  %v3009_v57 = vunpack.c.l.b16 %v2923_v26  ;;  %v3002_v26 = vunpack.c.l.b16 %v2909_v27 }
 0x687   : > { %v3159_v12 = vunpack.c.l.b16 %v2918_v20 }
 0x688   : > { %v3175_v38 = vunpack.c.l.b16 %v2934_v62  ;;  %v3189_v62 = vpack.c.b16 %v3171_v29, %v3169_v22  ;;  %v3010_v29 = vunpack.c.l.b16 %v2925_v9  ;;  %v3156_v9 = vunpack.c.h.b16 %v9615_v21 }
 0x689   : > { %v3003_v21 = vunpack.c.l.b16 %v9605_v54 }
 0x68a   : > { %v3191_v8 = vpack.c.b16 %v3175_v38, %v3173_v28  ;;  %v2753_v7 = vpop.f32.mrf.mxu2  ;;  %v2802_v60 = vpop.f32.mrf.mxu3  ;;  %v2920_v28 = vpack.c.bf16 %v9623_v33, %v9623_v33  ;;  %v2916_v33 = vpack.c.bf16 %v9613_v63, %v9613_v63  ;;  %v3020_v56 = vpack.c.b16 %v3010_v29, %v3009_v57  ;;  %v7765_v57 = vld [vmem:[%s8976_s6 + $0x48] sm:$0xff] }
 0x68b   : > { %v2933_v48 = vpack.c.bf16 %v2802_v60, %v2753_v7  ;;  %v3165_v60 = vunpack.c.l.b16 %v2924_v41  ;;  %v3011_v7 = vunpack.c.l.b16 %v2927_v31  ;;  %v2912_v63 = vpack.c.bf16 %v9603_v3, %v9603_v3 }
 0x68c   : > { %3257 = vmatpush.bf16.msra.mxu0 %v3191_v8  ;;  %v3168_v8 = vunpack.c.h.b16 %v2927_v31  ;;  %v3161_v41 = vunpack.c.l.b16 %v2920_v28  ;;  %v2914_v31 = vpack.c.bf16 %v9607_v18, %v9607_v18  ;;  %v3157_v40 = vunpack.c.l.b16 %v2916_v33 }
 0x68d   : > { %v3014_v6 = vunpack.c.l.b16 %v2933_v48  ;;  %v3174_v25 = vunpack.c.h.b16 %v2933_v48  ;;  %v3163_v48 = vunpack.c.l.b16 %v2922_v1  ;;  %v3187_v22 = vpack.c.b16 %v3167_v30, %v3165_v60 }
 0x68e   : > { %v2910_v18 = vpack.c.bf16 %v9597_v35, %v9597_v35  ;;  %v3155_v61 = vunpack.c.l.b16 %v2914_v31  ;;  %v3183_v10 = vpack.c.b16 %v3159_v12, %v3157_v40  ;;  %v3184_v3 = vpack.c.b16 %v3162_v58, %v3160_v14  ;;  %v7774_v31 = vld [vmem:[%s8982_s19 + $0x50] sm:$0xff]  ;;  %v7767_v12 = vld [vmem:[%s8976_s6 + $0x58] sm:$0xff]  ;;  %v7769_v58 = vld [vmem:[%s8976_s6 + $0x68] sm:$0xff] }
 0x68f   : > { %v3022_v19 = vpack.c.b16 %v3014_v6, %v3013_v0  ;;  %v3190_v38 = vpack.c.b16 %v3174_v25, %v3172_v42  ;;  %v3021_v6 = vpack.c.b16 %v3012_v52, %v3011_v7  ;;  %v3188_v0 = vpack.c.b16 %v3170_v51, %v3168_v8  ;;  %v7771_v40 = vld [vmem:[%s8976_s6 + $0x78] sm:$0xff] }
 0x690   : > { %3258 = vmatpush.bf16.msra.mxu0 %v3189_v62  ;;  %v3185_v32 = vpack.c.b16 %v3163_v48, %v3161_v41  ;;  %v3158_v42 = vunpack.c.h.b16 %v2917_v11  ;;  %v3019_v25 = vpack.c.b16 %v3008_v13, %v3007_v39  ;;  %v2908_v1 = vpack.c.bf16 %v9593_v53, %v9593_v53  ;;  %v7772_v41 = vld [vmem:[%s8982_s19 + $0x40] sm:$0xff]  ;;  %v7775_v11 = vld [vmem:[%s8982_s19 + $0x58] sm:$0xff] }
 0x691   : > { %3031 = vmatpush.bf16.msrb.mxu2 %v3022_v19  ;;  %3208 = vmatpush.bf16.msrb.mxu3 %v3190_v38  ;;  %v3153_v30 = vunpack.c.l.b16 %v2912_v63  ;;  %v2906_v35 = vpack.c.bf16 %v9587_v37, %v9587_v37  ;;  %v3151_v5 = vunpack.c.l.b16 %v2910_v18  ;;  %v3004_v52 = vunpack.c.l.b16 %v2913_v46  ;;  %v7776_v13 = vld [vmem:[%s8982_s19 + $0x60] sm:$0xff]  ;;  %v7778_v63 = vld [vmem:[%s8982_s19 + $0x70] sm:$0xff]  ;;  %v7779_v39 = vld [vmem:[%s8982_s19 + $0x78] sm:$0xff] }
 0x692   : > { %v3154_v51 = vunpack.c.h.b16 %v2913_v46  ;;  %v3018_v19 = vpack.c.b16 %v3006_v44, %v3005_v17  ;;  %v3182_v53 = vpack.c.b16 %v3158_v42, %v3156_v9  ;;  %v2904_v38 = vpack.c.bf16 %v9583_v45, %v9583_v45 }
 0x693   : > { %v3181_v62 = vpack.c.b16 %v3155_v61, %v3153_v30  ;;  %v3149_v28 = vunpack.c.l.b16 %v2908_v1  ;;  %v3152_v60 = vunpack.c.h.b16 %v9605_v54  ;;  %v3147_v37 = vunpack.c.l.b16 %v2906_v35 }
 0x694   : > { %3259 = vmatpush.bf16.msra.mxu0 %v3187_v22  ;;  %v3150_v7 = vunpack.c.h.b16 %v2909_v27  ;;  %v3017_v8 = vpack.c.b16 %v3004_v52, %v3003_v21  ;;  %v3145_v48 = vunpack.c.l.b16 %v2904_v38  ;;  %v3001_v45 = vunpack.c.l.b16 %v9595_v49 }
 0x695   : > { %3032 = vmatpush.bf16.msrb.mxu2 %v3021_v6  ;;  %3209 = vmatpush.bf16.msrb.mxu3 %v3188_v0  ;;  %v3179_v23 = vpack.c.b16 %v3151_v5, %v3149_v28  ;;  %v3180_v20 = vpack.c.b16 %v3154_v51, %v3152_v60  ;;  %v3000_v22 = vunpack.c.l.b16 %v2905_v4  ;;  %v3146_v29 = vunpack.c.h.b16 %v2905_v4  ;;  %v7764_v0 = vld [vmem:[%s8976_s6 + $0x40] sm:$0xff] }
 0x696   : > { %v3177_v54 = vpack.c.b16 %v3147_v37, %v3145_v48  ;;  %v3016_v34 = vpack.c.b16 %v3002_v26, %v3001_v45  ;;  %v3178_v36 = vpack.c.b16 %v3150_v7, %v3148_v2  ;;  %v3144_v6 = vunpack.c.h.b16 %v9585_v24  ;;  %v7773_v24 = vld [vmem:[%s8982_s19 + $0x48] sm:$0xff] }
 0x697   : > { %v3015_v49 = vpack.c.b16 %v3000_v22, %v2999_v43 }
 0x698   : > { %3260 = vmatpush.bf16.msra.mxu0 %v3185_v32  ;;  %v3176_v33 = vpack.c.b16 %v3146_v29, %v3144_v6  ;;  %v7768_v32 = vld [vmem:[%s8976_s6 + $0x60] sm:$0xff] }
 0x699   : > { %3033 = vmatpush.bf16.msrb.mxu2 %v3020_v56  ;;  %3210 = vmatpush.bf16.msrb.mxu3 %v3186_v16  ;;  %v7777_v56 = vld [vmem:[%s8982_s19 + $0x68] sm:$0xff]  ;;  %v7770_v16 = vld [vmem:[%s8976_s6 + $0x70] sm:$0xff] }
 0x69c   : > { %3261 = vmatpush.bf16.msra.mxu0 %v3183_v10 }
 0x69d   : > { %3034 = vmatpush.bf16.msrb.mxu2 %v3019_v25  ;;  %3211 = vmatpush.bf16.msrb.mxu3 %v3184_v3 }
 0x6a0   : > { %3262 = vmatpush.bf16.msra.mxu0 %v3181_v62 }
 0x6a1   : > { %3035 = vmatpush.bf16.msrb.mxu2 %v3018_v19  ;;  %3212 = vmatpush.bf16.msrb.mxu3 %v3182_v53 }
 0x6a4   : > { %3263 = vmatpush.bf16.msra.mxu0 %v3179_v23 }
 0x6a5   : > { %3036 = vmatpush.bf16.msrb.mxu2 %v3017_v8  ;;  %3213 = vmatpush.bf16.msrb.mxu3 %v3180_v20 }
 0x6a8   : > { %3264 = vmatpush.bf16.msra.mxu0 %v3177_v54 }
 0x6a9   : > { %3037 = vmatpush.bf16.msrb.mxu2 %v3016_v34  ;;  %3214 = vmatpush.bf16.msrb.mxu3 %v3178_v36 }
 0x6ab   : > { %3265 = vmatmul.bf16.vlgmr.msra.gmra.mxu0 %v7764_v0 }
 0x6ad   : > { %3038 = vmatpush.bf16.msrb.mxu2 %v3015_v49  ;;  %3215 = vmatpush.bf16.msrb.mxu3 %v3176_v33 }
 0x6b0   : > { %3039 = vmatmul.bf16.vlgmr.msrb.gmra.mxu2 %v7772_v41  ;;  %3216 = vmatmul.bf16.vlgmr.msrb.gmra.mxu3 %v7764_v0 }
 0x6bb   : > { %3270 = vmatmul.bf16.gmra.mxu0 %v7765_v57 }
 0x6c0   : > { %3044 = vmatmul.bf16.gmra.mxu2 %v7773_v24  ;;  %3221 = vmatmul.bf16.gmra.mxu3 %v7765_v57 }
 0x6cb   : > { %3275 = vmatmul.bf16.gmra.mxu0 %v7766_v15 }
 0x6d0   : > { %3049 = vmatmul.bf16.gmra.mxu2 %v7774_v31  ;;  %3226 = vmatmul.bf16.gmra.mxu3 %v7766_v15 }
 0x6db   : > { %3280 = vmatmul.bf16.gmra.mxu0 %v7767_v12 }
 0x6e0   : > { %3054 = vmatmul.bf16.gmra.mxu2 %v7775_v11  ;;  %3231 = vmatmul.bf16.gmra.mxu3 %v7767_v12 }
 0x6eb   : > { %3285 = vmatmul.bf16.gmra.mxu0 %v7768_v32 }
 0x6f0   : > { %3059 = vmatmul.bf16.gmra.mxu2 %v7776_v13  ;;  %3236 = vmatmul.bf16.gmra.mxu3 %v7768_v32 }
 0x6fb   : > { %3290 = vmatmul.bf16.gmra.mxu0 %v7769_v58 }
 0x700   : > { %3064 = vmatmul.bf16.gmra.mxu2 %v7777_v56  ;;  %3241 = vmatmul.bf16.gmra.mxu3 %v7769_v58 }
 0x70b   : > { %3295 = vmatmul.bf16.gmra.mxu0 %v7770_v16 }
 0x710   : > { %3069 = vmatmul.bf16.gmra.mxu2 %v7778_v63  ;;  %3246 = vmatmul.bf16.gmra.mxu3 %v7770_v16 }
 0x71b   : > { %3300 = vmatmul.bf16.gmra.mxu0 %v7771_v40 }
 0x720   : > { %3074 = vmatmul.bf16.gmra.mxu2 %v7779_v39  ;;  %3251 = vmatmul.bf16.gmra.mxu3 %v7771_v40 }
 0x728   : > { %v9681_v7 = vpop.f32.mrf.mxu0 }
 0x730   : > { %v9683_v45 = vpop.f32.mrf.mxu0 }
 0x733   : > { %v3040_v14 = vpop.f32.mrf.mxu2  ;;  %v3217_v18 = vpop.f32.mrf.mxu3 }
 0x734   : > { %v3306_v61 = vmul.f32 %v3217_v18, %v3040_v14 }
 0x738   : > { %v9685_v34 = vpop.f32.mrf.mxu0 }
 0x73b   : > { %v9679_v46 = vpop.f32.mrf.mxu2  ;;  %v3219_v10 = vpop.f32.mrf.mxu3 }
 0x73c   : > { %v3307_v32 = vmul.f32 %v3219_v10, %v9679_v46 }
 0x740   : > { %v9687_v24 = vpop.f32.mrf.mxu0 }
 0x743   : > { %v3045_v44 = vpop.f32.mrf.mxu2  ;;  %v3222_v42 = vpop.f32.mrf.mxu3 }
 0x744   : > { %v3308_v25 = vmul.f32 %v3222_v42, %v3045_v44 }
 0x748   : > { %v9689_v12 = vpop.f32.mrf.mxu0 }
 0x74b   : > { %v3047_v3 = vpop.f32.mrf.mxu2  ;;  %v3224_v1 = vpop.f32.mrf.mxu3 }
 0x74c   : > { %v3309_v13 = vmul.f32 %v3224_v1, %v3047_v3 }
 0x750   : > { %v9691_v11 = vpop.f32.mrf.mxu0 }
 0x753   : > { %v3050_v30 = vpop.f32.mrf.mxu2  ;;  %v3227_v17 = vpop.f32.mrf.mxu3 }
 0x754   : > { %v3310_v9 = vmul.f32 %v3227_v17, %v3050_v30 }
 0x758   : > { %v9694_v58 = vpop.f32.mrf.mxu0 }
 0x75b   : > { %v3052_v35 = vpop.f32.mrf.mxu2  ;;  %v3229_v5 = vpop.f32.mrf.mxu3 }
 0x75c   : > { %v3311_v0 = vmul.f32 %v3229_v5, %v3052_v35 }
 0x760   : > { %v9696_v56 = vpop.f32.mrf.mxu0 }
 0x763   : > { %v3055_v27 = vpop.f32.mrf.mxu2  ;;  %v3232_v62 = vpop.f32.mrf.mxu3 }
 0x764   : > { %v3312_v22 = vmul.f32 %v3232_v62, %v3055_v27 }
 0x768   : > { %v9698_v16 = vpop.f32.mrf.mxu0 }
 0x76b   : > { %v3057_v52 = vpop.f32.mrf.mxu2  ;;  %v3234_v51 = vpop.f32.mrf.mxu3 }
 0x76c   : > { %v3313_v15 = vmul.f32 %v3234_v51, %v3057_v52 }
 0x770   : > { %v3288_v63 = vpop.f32.mrf.mxu0 }
 0x773   : > { %v3060_v19 = vpop.f32.mrf.mxu2  ;;  %v3237_v53 = vpop.f32.mrf.mxu3 }
 0x774   : > { %v3314_v41 = vmul.f32 %v3237_v53, %v3060_v19 }
 0x778   : > { %v3291_v40 = vpop.f32.mrf.mxu0 }
 0x77b   : > { %v3062_v38 = vpop.f32.mrf.mxu2  ;;  %v3239_v28 = vpop.f32.mrf.mxu3 }
 0x77c   : > { %v3315_v31 = vmul.f32 %v3239_v28, %v3062_v38 }
 0x780   : > { %v3293_v39 = vpop.f32.mrf.mxu0 }
 0x783   : > { %v3065_v21 = vpop.f32.mrf.mxu2  ;;  %v3242_v60 = vpop.f32.mrf.mxu3 }
 0x784   : > { %v3316_v37 = vmul.f32 %v3242_v60, %v3065_v21  ;;  %v9700_v60 = vpop.f32.mrf.mxu1 }
 0x786   : > { %3342 = vadd.xlane.f32.xlu0 %v3316_v37 }
 0x788   : > { %v3296_v14 = vpop.f32.mrf.mxu0 }
 0x78b   : > { %v3067_v4 = vpop.f32.mrf.mxu2  ;;  %v3244_v23 = vpop.f32.mrf.mxu3 }
 0x78c   : > { %v3317_v26 = vmul.f32 %v3244_v23, %v3067_v4 }
 0x78e   : > { %3344 = vadd.xlane.f32.xlu1 %v3317_v26 }
 0x793   : > { %v3070_v8 = vpop.f32.mrf.mxu2  ;;  %v3247_v20 = vpop.f32.mrf.mxu3 }
 0x794   : > { %v3318_v48 = vmul.f32 %v3247_v20, %v3070_v8 }
 0x796   : > { %3346 = vadd.xlane.f32.xlu1 %v3318_v48 }
 0x79b   : > { %v3072_v2 = vpop.f32.mrf.mxu2  ;;  %v3249_v54 = vpop.f32.mrf.mxu3 }
 0x79c   : > { %v3319_v29 = vmul.f32 %v3249_v54, %v3072_v2 }
 0x79e   : > { %3334 = vadd.xlane.f32.xlu1 %v3312_v22  ;;  %3348 = vadd.xlane.f32.xlu2 %v3319_v29 }
 0x7a3   : > { %v3075_v36 = vpop.f32.mrf.mxu2  ;;  %v3252_v43 = vpop.f32.mrf.mxu3 }
 0x7a4   : > { %v3320_v6 = vmul.f32 %v3252_v43, %v3075_v36 }
 0x7a6   : > { %3332 = vadd.xlane.f32.xlu1 %v3311_v0  ;;  %3350 = vadd.xlane.f32.xlu2 %v3320_v6 }
 0x7ab   : > { %v3077_v49 = vpop.f32.mrf.mxu2  ;;  %v3254_v33 = vpop.f32.mrf.mxu3 }
 0x7ac   : > { %v3321_v57 = vmul.f32 %v3254_v33, %v3077_v49 }
 0x7ae   : > { %3322 = vadd.xlane.f32.xlu1 %v3306_v61  ;;  %3338 = vadd.xlane.f32.xlu2 %v3314_v41  ;;  %v3298_v61 = vpop.f32.mrf.mxu0 }
 0x7af   : > { %3352 = vadd.xlane.f32.xlu0 %v3321_v57 }
 0x7b6   : > { %3336 = vadd.xlane.f32.xlu2 %v3313_v15  ;;  %v3301_v46 = vpop.f32.mrf.mxu0 }
 0x7b7   : > { %3340 = vadd.xlane.f32.xlu0 %v3315_v31 }
 0x7be   : > { %3326 = vadd.xlane.f32.xlu2 %v3308_v25  ;;  %v3303_v51 = vpop.f32.mrf.mxu0 }
 0x7bf   : > { %3330 = vadd.xlane.f32.xlu0 %v3310_v9 }
 0x7c6   : > { %3324 = vadd.xlane.f32.xlu2 %v3307_v32  ;;  %v9702_v32 = vpop.f32.mrf.mxu1 }
 0x7c7   : > { %3328 = vadd.xlane.f32.xlu0 %v3309_v13 }
 0x7f9   : > { %v3343_v25 = vpop.xlane.xlu0 %3342 }
 0x7fa   : > { %v3380_v28 = vmul.f32 0.01, %v3343_v25  ;;  %vm3364_vm6 = vcmp.gt.f32.partialorder %v3343_v25, 0.0 }
 0x7fc   : > { %v3396_v48 = vsel %vm3364_vm6, %v3343_v25, %v3380_v28  ;;  %v7135_v28 = vld [vmem:[%s8984_s17 + $0x4] sm:$0xf] }
 0x7fd   : > { %v3412_v6 = vmul.f32 %v3396_v48, %v3291_v40 }
 0x801   : > { %v3345_v18 = vpop.xlane.xlu1 %3344 }
 0x802   : > { %v3381_v62 = vmul.f32 0.01, %v3345_v18  ;;  %vm3365_vm5 = vcmp.gt.f32.partialorder %v3345_v18, 0.0 }
 0x804   : > { %v3397_v23 = vsel %vm3365_vm5, %v3345_v18, %v3381_v62 }
 0x805   : > { %v3413_v22 = vmul.f32 %v3397_v23, %v3293_v39  ;;  %v7781_v23 = vld [vmem:[%s8984_s17 + $0x18] sm:$0xf0] }
 0x807   : > { %v3423_v57 = vpack.c.bf16 %v3413_v22, %v3412_v6  ;;  %v7147_v22 = vld [vmem:[%s8984_s17 + $0x34] sm:$0xf] }
 0x809   : > { %v3347_v30 = vpop.xlane.xlu1 %3346 }
 0x80a   : > { %v3382_v9 = vmul.f32 0.01, %v3347_v30  ;;  %vm3366_vm4 = vcmp.gt.f32.partialorder %v3347_v30, 0.0 }
 0x80c   : > { %v3398_v21 = vsel %vm3366_vm4, %v3347_v30, %v3382_v9 }
 0x80d   : > { %v3414_v8 = vmul.f32 %v3398_v21, %v3296_v14  ;;  %v7780_v21 = vld [vmem:[%s8984_s17 + $0x8] sm:$0xf0] }
 0x811   : > { %v3349_v44 = vpop.xlane.xlu2 %3348  ;;  %v3335_v27 = vpop.xlane.xlu1 %3334 }
 0x812   : > { %v3383_v3 = vmul.f32 0.01, %v3349_v44  ;;  %vm3367_vm2 = vcmp.gt.f32.partialorder %v3349_v44, 0.0  ;;  %v3376_v49 = vmul.f32 0.01, %v3335_v27  ;;  %vm3360_vm10 = vcmp.gt.f32.partialorder %v3335_v27, 0.0 }
 0x814   : > { %v3399_v52 = vsel %vm3367_vm2, %v3349_v44, %v3383_v3  ;;  %v3392_v14 = vsel %vm3360_vm10, %v3335_v27, %v3376_v49  ;;  %v7784_v49 = vld [vmem:[%s8984_s17 + $0x48] sm:$0xf0] }
 0x815   : > { %v3415_v37 = vmul.f32 %v3399_v52, %v3298_v61 }
 0x817   : > { %v3424_v29 = vpack.c.bf16 %v3415_v37, %v3414_v8  ;;  %v7143_v8 = vld [vmem:[%s8984_s17 + $0x24] sm:$0xf] }
 0x819   : > { %v3351_v42 = vpop.xlane.xlu2 %3350  ;;  %v3333_v0 = vpop.xlane.xlu1 %3332 }
 0x81a   : > { %v3384_v10 = vmul.f32 0.01, %v3351_v42  ;;  %vm3368_vm1 = vcmp.gt.f32.partialorder %v3351_v42, 0.0  ;;  %v3375_v18 = vmul.f32 0.01, %v3333_v0  ;;  %vm3359_vm12 = vcmp.gt.f32.partialorder %v3333_v0, 0.0 }
 0x81c   : > { %v3400_v35 = vsel %vm3368_vm1, %v3351_v42, %v3384_v10  ;;  %v3391_v25 = vsel %vm3359_vm12, %v3333_v0, %v3375_v18  ;;  %v7151_v0 = vld [vmem:[%s8984_s17 + $0x44] sm:$0xf]  ;;  %v7825_v18 = vld [vmem:[#allocation16 + $0x68] sm:$0xff] }
 0x81d   : > { %v3416_v53 = vmul.f32 %v3400_v35, %v3301_v46 }
 0x821   : > { %v3339_v1 = vpop.xlane.xlu2 %3338  ;;  %v3323_v46 = vpop.xlane.xlu1 %3322 }
 0x822   : > { %v3353_v17 = vpop.xlane.xlu0 %3352  ;;  %v3378_v2 = vmul.f32 0.01, %v3339_v1  ;;  %vm3362_vm8 = vcmp.gt.f32.partialorder %v3339_v1, 0.0  ;;  %vm3354_vm0 = vcmp.gt.f32.partialorder %v3323_v46, 0.0 }
 0x823   : > { %vm3369_vm3 = vcmp.gt.f32.partialorder %v3353_v17, 0.0  ;;  %v3385_v5 = vmul.f32 0.01, %v3353_v17 }
 0x824   : > { %v3394_v33 = vsel %vm3362_vm8, %v3339_v1, %v3378_v2  ;;  %v3407_v1 = vmul.f32 %v3391_v25, %v9691_v11  ;;  %v7822_v25 = vld [vmem:[#allocation16 + $0x50] sm:$0xff] }
 0x825   : > { %v3401_v19 = vsel %vm3369_vm3, %v3353_v17, %v3385_v5  ;;  %v3410_v13 = vmul.f32 %v3394_v33, %v9698_v16  ;;  %v9709_v5 = vpop.f32.mrf.mxu1  ;;  %v9751_v33 = vor.u32 %v7784_v49, %v7151_v0  ;;  %v7833_v49 = vld [vmem:[#allocation17 + $0x68] sm:$0xff] }
 0x826   : > { %v3417_v38 = vmul.f32 %v3401_v19, %v3303_v51 }
 0x827   : > { %10587 = vst [vmem:[#allocation61_spill] sm:$0xff] %v9751_v33 }
 0x828   : > { %v3425_v4 = vpack.c.bf16 %v3417_v38, %v3416_v53 }
 0x829   : > { %v3337_v26 = vpop.xlane.xlu2 %3336 }
 0x82a   : > { %3474 = vmatpush.bf16.msra.mxu1 %v3425_v4  ;;  %v3341_v20 = vpop.xlane.xlu0 %3340  ;;  %v3377_v36 = vmul.f32 0.01, %v3337_v26  ;;  %vm3361_vm9 = vcmp.gt.f32.partialorder %v3337_v26, 0.0  ;;  %v9717_v4 = vor.u32 %v7780_v21, %v7135_v28 }
 0x82b   : > { %vm3363_vm7 = vcmp.gt.f32.partialorder %v3341_v20, 0.0  ;;  %v3379_v54 = vmul.f32 0.01, %v3341_v20 }
 0x82c   : > { %v3393_v15 = vsel %vm3361_vm9, %v3337_v26, %v3377_v36  ;;  %10583 = vst [vmem:[#allocation57_spill] sm:$0xff] %v9717_v4 }
 0x82d   : > { %v3395_v43 = vsel %vm3363_vm7, %v3341_v20, %v3379_v54  ;;  %v3409_v61 = vmul.f32 %v3393_v15, %v9696_v56  ;;  %v3370_v56 = vmul.f32 0.01, %v3323_v46  ;;  %v7782_v20 = vld [vmem:[%s8984_s17 + $0x28] sm:$0xf0] }
 0x82e   : > { %3475 = vmatpush.bf16.msra.mxu1 %v3424_v29  ;;  %v3411_v41 = vmul.f32 %v3395_v43, %v3288_v63  ;;  %v3408_v63 = vmul.f32 %v3392_v14, %v9694_v58  ;;  %v9735_v2 = vor.u32 %v7782_v20, %v7143_v8  ;;  %v7783_v29 = vld [vmem:[%s8984_s17 + $0x38] sm:$0xf0] }
 0x82f   : > { %v3386_v51 = vsel %vm3354_vm0, %v3323_v46, %v3370_v56  ;;  %v9742_v36 = vor.u32 %v7783_v29, %v7147_v22  ;;  %v7821_v46 = vld [vmem:[#allocation16 + $0x48] sm:$0xff]  ;;  %v7835_v22 = vld [vmem:[#allocation17 + $0x78] sm:$0xff]  ;;  %v7834_v29 = vld [vmem:[#allocation17 + $0x70] sm:$0xff] }
 0x830   : > { %v3422_v44 = vpack.c.bf16 %v3411_v41, %v3410_v13  ;;  %v3421_v10 = vpack.c.bf16 %v3409_v61, %v3408_v63  ;;  %v3402_v38 = vmul.f32 %v3386_v51, %v9681_v7  ;;  %10585 = vst [vmem:[#allocation59_spill] sm:$0xff] %v9735_v2  ;;  %v7827_v41 = vld [vmem:[#allocation16 + $0x78] sm:$0xff]  ;;  %v7786_v63 = vld [vmem:[%s8984_s17 + $0x68] sm:$0xf0]  ;;  %3776 = vmatpush.bf16.msra.mxu3 %v7835_v22 }
 0x831   : > { %v3327_v31 = vpop.xlane.xlu2 %3326  ;;  %10586 = vst [vmem:[#allocation60_spill] sm:$0xff] %v9742_v36  ;;  %3596 = vmatpush.bf16.msra.mxu2 %v7827_v41  ;;  %v7785_v13 = vld [vmem:[%s8984_s17 + $0x58] sm:$0xf0]  ;;  %v7832_v41 = vld [vmem:[#allocation17 + $0x60] sm:$0xff] }
 0x832   : > { %3476 = vmatpush.bf16.msra.mxu1 %v3423_v57  ;;  %v3331_v39 = vpop.xlane.xlu0 %3330  ;;  %v3372_v30 = vmul.f32 0.01, %v3327_v31  ;;  %vm3356_vm13 = vcmp.gt.f32.partialorder %v3327_v31, 0.0  ;;  %v7826_v57 = vld [vmem:[#allocation16 + $0x70] sm:$0xff]  ;;  %v7823_v61 = vld [vmem:[#allocation16 + $0x58] sm:$0xff] }
 0x833   : > { %vm3358_vm11 = vcmp.gt.f32.partialorder %v3331_v39, 0.0  ;;  %v3374_v40 = vmul.f32 0.01, %v3331_v39 }
 0x834   : > { %v3388_v35 = vsel %vm3356_vm13, %v3327_v31, %v3372_v30  ;;  %v7155_v31 = vld [vmem:[%s8984_s17 + $0x54] sm:$0xf]  ;;  %3777 = vmatpush.bf16.msra.mxu3 %v7834_v29 }
 0x835   : > { %v3390_v42 = vsel %vm3358_vm11, %v3331_v39, %v3374_v40  ;;  %v3404_v52 = vmul.f32 %v3388_v35, %v9685_v34  ;;  %v9719_v34 = vpop.f32.mrf.mxu1  ;;  %3597 = vmatpush.bf16.msra.mxu2 %v7826_v57  ;;  %v9758_v39 = vor.u32 %v7785_v13, %v7155_v31  ;;  %v7824_v40 = vld [vmem:[#allocation16 + $0x60] sm:$0xff]  ;;  %v7831_v13 = vld [vmem:[#allocation17 + $0x58] sm:$0xff] }
 0x836   : > { %3477 = vmatpush.bf16.msra.mxu1 %v3422_v44  ;;  %v3406_v16 = vmul.f32 %v3390_v42, %v9689_v12  ;;  %v7159_v42 = vld [vmem:[%s8984_s17 + $0x64] sm:$0xf] }
 0x837   : > { %10588 = vst [vmem:[#allocation62_spill] sm:$0xff] %v9758_v39  ;;  %v9767_v30 = vor.u32 %v7786_v63, %v7159_v42 }
 0x838   : > { %v3420_v27 = vpack.c.bf16 %v3407_v1, %v3406_v16  ;;  %v7787_v1 = vld [vmem:[%s8984_s17 + $0x78] sm:$0xf0]  ;;  %3778 = vmatpush.bf16.msra.mxu3 %v7833_v49 }
 0x839   : > { %v3325_v3 = vpop.xlane.xlu2 %3324  ;;  %3598 = vmatpush.bf16.msra.mxu2 %v7825_v18  ;;  %10589 = vst [vmem:[#allocation63_spill] sm:$0xff] %v9767_v30 }
 0x83a   : > { %vm3355_vm14 = vcmp.gt.f32.partialorder %v3325_v3, 0.0  ;;  %v3371_v17 = vmul.f32 0.01, %v3325_v3  ;;  %3478 = vmatpush.bf16.msra.mxu1 %v3421_v10  ;;  %v3329_v9 = vpop.xlane.xlu0 %3328  ;;  %v7820_v10 = vld [vmem:[#allocation16 + $0x40] sm:$0xff] }
 0x83b   : > { %vm3357_vm15 = vcmp.gt.f32.partialorder %v3329_v9, 0.0  ;;  %v3373_v58 = vmul.f32 0.01, %v3329_v9 }
 0x83c   : > { %v3387_v62 = vsel %vm3355_vm14, %v3325_v3, %v3371_v17  ;;  %v7163_v3 = vld [vmem:[%s8984_s17 + $0x74] sm:$0xf]  ;;  %3779 = vmatpush.bf16.msra.mxu3 %v7832_v41 }
 0x83d   : > { %v3389_v12 = vsel %vm3357_vm15, %v3329_v9, %v3373_v58  ;;  %v3403_v19 = vmul.f32 %v3387_v62, %v9683_v45  ;;  %v7139_v45 = vld [vmem:[%s8984_s17 + $0x14] sm:$0xf]  ;;  %3599 = vmatpush.bf16.msra.mxu2 %v7824_v40  ;;  %v9776_v9 = vor.u32 %v7787_v1, %v7163_v3  ;;  %v9785_v3 = vld [vmem:[%s10558_s10 + $0x1] ss:$0 sm:$0xff]  ;;  %s6652_s17 = sshll.u32 %s8965_s18, 5 }
 0x83e   : > { %v3405_v11 = vmul.f32 %v3389_v12, %v9687_v24  ;;  %3479 = vmatpush.bf16.msra.mxu1 %v3420_v27  ;;  %v9722_v24 = vpop.f32.mrf.mxu1  ;;  %v9726_v7 = vor.u32 %v7781_v23, %v7139_v45  ;;  %v7830_v40 = vld [vmem:[#allocation17 + $0x50] sm:$0xff]  ;;  %s790_s1 = scalar_lea.vmem [#allocation22], %s6652_s17 }
 0x83f   : > { %v3418_v37 = vpack.c.bf16 %v3403_v19, %v3402_v38  ;;  %10590 = vst [vmem:[#allocation64_spill] sm:$0xff] %v9776_v9  ;;  %s6398_s15 = sshll.u32 %s790_s1, 4  ;;  %s6399_s15 = int_to_ptr.vmem [resolvable:$true] %s6398_s15 }
 0x840   : > { %v3419_v53 = vpack.c.bf16 %v3405_v11, %v3404_v52  ;;  %10584 = vst [vmem:[#allocation58_spill] sm:$0xff] %v9726_v7  ;;  %3780 = vmatpush.bf16.msra.mxu3 %v7831_v13 }
 0x841   : > { %3600 = vmatpush.bf16.msra.mxu2 %v7823_v61  ;;  %v7829_v61 = vld [vmem:[#allocation17 + $0x48] sm:$0xff] }
 0x842   : > { %3480 = vmatpush.bf16.msra.mxu1 %v3419_v53 }
 0x844   : > { %3781 = vmatpush.bf16.msra.mxu3 %v7830_v40 }
 0x845   : > { %3601 = vmatpush.bf16.msra.mxu2 %v7822_v25  ;;  %v7828_v25 = vld [vmem:[#allocation17 + $0x40] sm:$0xff] }
 0x846   : > { %3481 = vmatpush.bf16.msra.mxu1 %v3418_v37  ;;  %v9729_v26 = vpop.f32.mrf.mxu1 }
 0x848   : > { %3782 = vmatpush.bf16.msra.mxu3 %v7829_v61 }
 0x849   : > { %3482 = vmatmul.bf16.vlgmr.msra.gmra.mxu1 %v9717_v4  ;;  %3602 = vmatpush.bf16.msra.mxu2 %v7821_v46 }
 0x84c   : > { %3783 = vmatpush.bf16.msra.mxu3 %v7828_v25 }
 0x84d   : > { %3603 = vmatpush.bf16.msra.mxu2 %v7820_v10 }
 0x84e   : > { %v9733_v48 = vpop.f32.mrf.mxu1 }
 0x856   : > { %v9738_v54 = vpop.f32.mrf.mxu1 }
 0x859   : > { %3487 = vmatmul.bf16.gmra.mxu1 %v9726_v7 }
 0x85e   : > { %v9744_v43 = vpop.f32.mrf.mxu1 }
 0x866   : > { %v9747_v6 = vpop.f32.mrf.mxu1 }
 0x869   : > { %3492 = vmatmul.bf16.gmra.mxu1 %v9735_v2 }
 0x86e   : > { %v9754_v15 = vpop.f32.mrf.mxu1 }
 0x876   : > { %v9760_v14 = vpop.f32.mrf.mxu1 }
 0x879   : > { %3497 = vmatmul.bf16.gmra.mxu1 %v9742_v36 }
 0x87e   : > { %v9763_v44 = vpop.f32.mrf.mxu1 }
 0x886   : > { %v9770_v16 = vpop.f32.mrf.mxu1 }
 0x889   : > { %3502 = vmatmul.bf16.gmra.mxu1 %v9751_v33 }
 0x88e   : > { %v9774_v17 = vpop.f32.mrf.mxu1 }
 0x896   : > { %v9779_v56 = vpop.f32.mrf.mxu1 }
 0x899   : > { %3507 = vmatmul.bf16.gmra.mxu1 %v9758_v39 }
 0x8a9   : > { %3512 = vmatmul.bf16.gmra.mxu1 %v9767_v30 }
 0x8b9   : > { %3517 = vmatmul.bf16.gmra.mxu1 %v9776_v9 }
 0x8c6   : > { %v3483_v35 = vpop.f32.mrf.mxu1 }
 0x8ce   : > { %v3485_v58 = vpop.f32.mrf.mxu1 }
 0x8cf   : > { %v3523_v27 = vpack.c.bf16 %v3485_v58, %v3483_v35 }
 0x8d1   : > { %3604 = vmatmul.bf16.vlgmr.msra.gmra.mxu2 %v3523_v27 }
 0x8d6   : > { %v3488_v62 = vpop.f32.mrf.mxu1 }
 0x8de   : > { %v3490_v12 = vpop.f32.mrf.mxu1 }
 0x8df   : > { %v3524_v52 = vpack.c.bf16 %v3490_v12, %v3488_v62 }
 0x8e1   : > { %3609 = vmatmul.bf16.gmra.mxu2 %v3524_v52 }
 0x8e6   : > { %v3493_v11 = vpop.f32.mrf.mxu1 }
 0x8ee   : > { %v3495_v51 = vpop.f32.mrf.mxu1 }
 0x8ef   : > { %v3525_v19 = vpack.c.bf16 %v3495_v51, %v3493_v11 }
 0x8f1   : > { %3614 = vmatmul.bf16.gmra.mxu2 %v3525_v19 }
 0x8f6   : > { %v3498_v53 = vpop.f32.mrf.mxu1 }
 0x8fe   : > { %v3500_v38 = vpop.f32.mrf.mxu1 }
 0x8ff   : > { %v3526_v28 = vpack.c.bf16 %v3500_v38, %v3498_v53 }
 0x901   : > { %3619 = vmatmul.bf16.gmra.mxu2 %v3526_v28 }
 0x906   : > { %v3503_v21 = vpop.f32.mrf.mxu1 }
 0x90e   : > { %v3505_v37 = vpop.f32.mrf.mxu1 }
 0x90f   : > { %v3527_v45 = vpack.c.bf16 %v3505_v37, %v3503_v21 }
 0x911   : > { %3624 = vmatmul.bf16.gmra.mxu2 %v3527_v45 }
 0x916   : > { %v3508_v23 = vpop.f32.mrf.mxu1 }
 0x91e   : > { %v3510_v8 = vpop.f32.mrf.mxu1 }
 0x91f   : > { %v3528_v20 = vpack.c.bf16 %v3510_v8, %v3508_v23 }
 0x921   : > { %3629 = vmatmul.bf16.gmra.mxu2 %v3528_v20 }
 0x926   : > { %v3513_v0 = vpop.f32.mrf.mxu1 }
 0x92e   : > { %v3515_v57 = vpop.f32.mrf.mxu1 }
 0x92f   : > { %v3529_v31 = vpack.c.bf16 %v3515_v57, %v3513_v0 }
 0x931   : > { %3634 = vmatmul.bf16.gmra.mxu2 %v3529_v31 }
 0x936   : > { %v3518_v18 = vpop.f32.mrf.mxu1 }
 0x93e   : > { %v3520_v42 = vpop.f32.mrf.mxu1 }
 0x93f   : > { %v3530_v63 = vpack.c.bf16 %v3520_v42, %v3518_v18 }
 0x941   : > { %3639 = vmatmul.bf16.gmra.mxu2 %v3530_v63 }
 0x954   : > { %v3605_v46 = vpop.f32.mrf.mxu2 }
 0x955   : > { %v3645_v10 = vadd.f32 %v3605_v46, %v9700_v60 }
 0x957   : > { %v3666_v35 = vadd.f32 %v9785_v3, %v3645_v10 }
 0x959   : > { %v3682_v62 = vmax.f32 %v3666_v35, 0.0 }
 0x95c   : > { %v3607_v1 = vpop.f32.mrf.mxu2 }
 0x95d   : > { %v3646_v58 = vadd.f32 %v3607_v1, %v9702_v32 }
 0x95f   : > { %v3667_v27 = vadd.f32 %v9785_v3, %v3646_v58 }
 0x961   : > { %v3683_v12 = vmax.f32 %v3667_v27, 0.0 }
 0x963   : > { %v3698_v52 = vpack.c.bf16 %v3683_v12, %v3682_v62 }
 0x964   : > { %v3610_v11 = vpop.f32.mrf.mxu2 }
 0x965   : > { %3784 = vmatmul.bf16.vlgmr.msra.gmra.mxu3 %v3698_v52  ;;  %v3647_v51 = vadd.f32 %v3610_v11, %v9709_v5 }
 0x967   : > { %v3668_v19 = vadd.f32 %v9785_v3, %v3647_v51  ;;  %v7345_v51 = vld [vmem:[#allocation14 + $0x2e0] sm:$0xf] }
 0x969   : > { %v3684_v28 = vmax.f32 %v3668_v19, 0.0  ;;  %v7864_v19 = vld [vmem:[#allocation14 + $0x2e4] sm:$0xf] }
 0x96c   : > { %v3612_v60 = vpop.f32.mrf.mxu2 }
 0x96d   : > { %v3648_v53 = vadd.f32 %v3612_v60, %v9719_v34  ;;  %v7866_v60 = vld [vmem:[#allocation14 + $0x2ec] sm:$0xf0] }
 0x96f   : > { %v3669_v38 = vadd.f32 %v9785_v3, %v3648_v53  ;;  %v7346_v53 = vor.u32 %v7866_v60, %v7345_v51  ;;  %v7307_v51 = vld [vmem:[#allocation14 + $0x298] sm:$0xf0] }
 0x971   : > { %v3685_v21 = vmax.f32 %v3669_v38, 0.0  ;;  %v7347_v38 = vld [vmem:[#allocation14 + $0x2f0] sm:$0xf0]  ;;  %4042 = vmatpush.bf16.msrb.mxu0 %v7346_v53 }
 0x973   : > { %v3699_v37 = vpack.c.bf16 %v3685_v21, %v3684_v28  ;;  %v7353_v28 = vld [vmem:[#allocation14 + $0x2e8] sm:$0xf]  ;;  %v7867_v21 = vld [vmem:[#allocation14 + $0x2f4] sm:$0xf0] }
 0x974   : > { %v3615_v32 = vpop.f32.mrf.mxu2 }
 0x975   : > { %3789 = vmatmul.bf16.gmra.mxu3 %v3699_v37  ;;  %v3649_v45 = vadd.f32 %v3615_v32, %v9722_v24  ;;  %v7354_v37 = vor.u32 %v7867_v21, %v7353_v28  ;;  %v7865_v32 = vld [vmem:[#allocation14 + $0x2ec] sm:$0xf] }
 0x977   : > { %v3670_v8 = vadd.f32 %v9785_v3, %v3649_v45  ;;  %v7355_v45 = vld [vmem:[#allocation14 + $0x2f8] sm:$0xf0]  ;;  %4140 = vmatpush.bf16.msrb.mxu2 %v7354_v37  ;;  %v7281_v37 = vld [vmem:[#allocation14 + $0x260] sm:$0xf] }
 0x979   : > { %v3686_v22 = vmax.f32 %v3670_v8, 0.0  ;;  %v7358_v8 = vor.u32 %v7865_v32, %v7355_v45  ;;  %v7850_v32 = vld [vmem:[#allocation14 + $0x26c] sm:$0xf0]  ;;  %v7848_v45 = vld [vmem:[#allocation14 + $0x264] sm:$0xf] }
 0x97b   : > { %4189 = vmatpush.bf16.msrb.mxu3 %v7358_v8  ;;  %v7289_v8 = vld [vmem:[#allocation14 + $0x268] sm:$0xf] }
 0x97c   : > { %v3617_v23 = vpop.f32.mrf.mxu2 }
 0x97d   : > { %v3650_v20 = vadd.f32 %v3617_v23, %v9729_v26  ;;  %v7329_v23 = vld [vmem:[#allocation14 + $0x2c0] sm:$0xf] }
 0x97f   : > { %v3671_v5 = vadd.f32 %v9785_v3, %v3650_v20  ;;  %v7862_v20 = vld [vmem:[#allocation14 + $0x2cc] sm:$0xf0] }
 0x981   : > { %v3687_v29 = vmax.f32 %v3671_v5, 0.0  ;;  %v7860_v5 = vld [vmem:[#allocation14 + $0x2c4] sm:$0xf] }
 0x983   : > { %v3700_v0 = vpack.c.bf16 %v3687_v29, %v3686_v22  ;;  %v7331_v22 = vld [vmem:[#allocation14 + $0x2d0] sm:$0xf0]  ;;  %v7330_v29 = vor.u32 %v7862_v20, %v7329_v23  ;;  %v7282_v23 = vor.u32 %v7850_v32, %v7281_v37  ;;  %v7851_v20 = vld [vmem:[#allocation14 + $0x274] sm:$0xf0]  ;;  %v7837_v37 = vld [vmem:[#allocation14 + $0x20c] sm:$0xf] }
 0x984   : > { %v3620_v34 = vpop.f32.mrf.mxu2  ;;  %v7243_v32 = vld [vmem:[#allocation14 + $0x218] sm:$0xf0] }
 0x985   : > { %3794 = vmatmul.bf16.gmra.mxu3 %v3700_v0  ;;  %v3651_v49 = vadd.f32 %v3620_v34, %v9733_v48  ;;  %v7334_v0 = vor.u32 %v7860_v5, %v7331_v22  ;;  %v7337_v34 = vld [vmem:[#allocation14 + $0x2c8] sm:$0xf]  ;;  %4043 = vmatpush.bf16.msrb.mxu0 %v7330_v29  ;;  %v7290_v22 = vor.u32 %v7851_v20, %v7289_v8  ;;  %v7849_v29 = vld [vmem:[#allocation14 + $0x26c] sm:$0xf]  ;;  %v9821_v8 = vld [vmem:[%s10559_s0 + $0x1] ss:$0 sm:$0xff] }
 0x987   : > { %v3672_v57 = vadd.f32 %v9785_v3, %v3651_v49  ;;  %v7863_v49 = vld [vmem:[#allocation14 + $0x2d4] sm:$0xf0] }
 0x989   : > { %v3688_v13 = vmax.f32 %v3672_v57, 0.0  ;;  %v7861_v57 = vld [vmem:[#allocation14 + $0x2cc] sm:$0xf] }
 0x98c   : > { %v3622_v41 = vpop.f32.mrf.mxu2 }
 0x98d   : > { %v3652_v31 = vadd.f32 %v3622_v41, %v9738_v54  ;;  %v7338_v41 = vor.u32 %v7863_v49, %v7337_v34 }
 0x98f   : > { %v3673_v24 = vadd.f32 %v9785_v3, %v3652_v31  ;;  %v7339_v31 = vld [vmem:[#allocation14 + $0x2d8] sm:$0xf0]  ;;  %4141 = vmatpush.bf16.msrb.mxu2 %v7338_v41  ;;  %v7265_v41 = vld [vmem:[#allocation14 + $0x240] sm:$0xf] }
 0x991   : > { %v3689_v18 = vmax.f32 %v3673_v24, 0.0  ;;  %v7313_v24 = vld [vmem:[#allocation14 + $0x2a0] sm:$0xf] }
 0x993   : > { %v3701_v40 = vpack.c.bf16 %v3689_v18, %v3688_v13  ;;  %v7342_v13 = vor.u32 %v7861_v57, %v7339_v31  ;;  %v7858_v18 = vld [vmem:[#allocation14 + $0x2ac] sm:$0xf0] }
 0x994   : > { %v3625_v26 = vpop.f32.mrf.mxu2  ;;  %v7846_v57 = vld [vmem:[#allocation14 + $0x24c] sm:$0xf0] }
 0x995   : > { %3799 = vmatmul.bf16.gmra.mxu3 %v3701_v40  ;;  %v3653_v61 = vadd.f32 %v3625_v26, %v9744_v43  ;;  %v7856_v40 = vld [vmem:[#allocation14 + $0x2a4] sm:$0xf]  ;;  %v7266_v31 = vor.u32 %v7846_v57, %v7265_v41 }
 0x996   : > { %4190 = vmatpush.bf16.msrb.mxu3 %v7342_v13  ;;  %v7267_v13 = vld [vmem:[#allocation14 + $0x250] sm:$0xf0] }
 0x997   : > { %v3674_v63 = vadd.f32 %v9785_v3, %v3653_v61 }
 0x999   : > { %v3690_v46 = vmax.f32 %v3674_v63, 0.0  ;;  %v7321_v63 = vld [vmem:[#allocation14 + $0x2a8] sm:$0xf] }
 0x99c   : > { %v3627_v42 = vpop.f32.mrf.mxu2 }
 0x99d   : > { %v3654_v25 = vadd.f32 %v3627_v42, %v9747_v6  ;;  %v7314_v42 = vor.u32 %v7858_v18, %v7313_v24  ;;  %v7844_v24 = vld [vmem:[#allocation14 + $0x244] sm:$0xf]  ;;  %v7273_v18 = vld [vmem:[#allocation14 + $0x248] sm:$0xf] }
 0x99f   : > { %v3675_v48 = vadd.f32 %v9785_v3, %v3654_v25  ;;  %v7859_v25 = vld [vmem:[#allocation14 + $0x2b4] sm:$0xf0]  ;;  %4044 = vmatpush.bf16.msrb.mxu0 %v7314_v42 }
 0x9a1   : > { %v3691_v10 = vmax.f32 %v3675_v48, 0.0  ;;  %v7857_v48 = vld [vmem:[#allocation14 + $0x2ac] sm:$0xf] }
 0x9a3   : > { %v3702_v1 = vpack.c.bf16 %v3691_v10, %v3690_v46 }
 0x9a4   : > { %v3630_v54 = vpop.f32.mrf.mxu2 }
 0x9a5   : > { %3804 = vmatmul.bf16.gmra.mxu3 %v3702_v1  ;;  %v3655_v35 = vadd.f32 %v3630_v54, %v9754_v15  ;;  %v7350_v15 = vor.u32 %v7864_v19, %v7347_v38  ;;  %v7322_v1 = vor.u32 %v7859_v25, %v7321_v63  ;;  %v7323_v54 = vld [vmem:[#allocation14 + $0x2b8] sm:$0xf0] }
 0x9a7   : > { %v3676_v27 = vadd.f32 %v9785_v3, %v3655_v35  ;;  %4091 = vmatpush.bf16.msrb.mxu1 %v7350_v15  ;;  %v7297_v35 = vld [vmem:[#allocation14 + $0x280] sm:$0xf]  ;;  %4142 = vmatpush.bf16.msrb.mxu2 %v7322_v1  ;;  %v7840_v1 = vld [vmem:[#allocation14 + $0x224] sm:$0xf] }
 0x9a9   : > { %v3692_v12 = vmax.f32 %v3676_v27, 0.0  ;;  %v7326_v27 = vor.u32 %v7857_v48, %v7323_v54 }
 0x9ab   : > { %4092 = vmatpush.bf16.msrb.mxu1 %v7334_v0  ;;  %4191 = vmatpush.bf16.msrb.mxu3 %v7326_v27  ;;  %v7291_v0 = vld [vmem:[#allocation14 + $0x278] sm:$0xf0]  ;;  %v7843_v27 = vld [vmem:[#allocation14 + $0x234] sm:$0xf0] }
 0x9ac   : > { %v3632_v58 = vpop.f32.mrf.mxu2  ;;  %v7294_v34 = vor.u32 %v7849_v29, %v7291_v0 }
 0x9ad   : > { %v3656_v62 = vadd.f32 %v3632_v58, %v9760_v14  ;;  %v7854_v58 = vld [vmem:[#allocation14 + $0x28c] sm:$0xf0] }
 0x9ae   : > { %v7298_v60 = vor.u32 %v7854_v58, %v7297_v35  ;;  %v7251_v35 = vld [vmem:[#allocation14 + $0x230] sm:$0xf0]  ;;  %v7257_v58 = vld [vmem:[#allocation14 + $0x228] sm:$0xf] }
 0x9af   : > { %v3677_v43 = vadd.f32 %v9785_v3, %v3656_v62  ;;  %v7852_v62 = vld [vmem:[#allocation14 + $0x284] sm:$0xf] }
 0x9b0   : > { %4045 = vmatpush.bf16.msrb.mxu0 %v7298_v60  ;;  %v7233_v60 = vld [vmem:[#allocation14 + $0x200] sm:$0xf] }
 0x9b1   : > { %v3693_v52 = vmax.f32 %v3677_v43, 0.0  ;;  %v7299_v43 = vld [vmem:[#allocation14 + $0x290] sm:$0xf0] }
 0x9b2   : > { %v7302_v53 = vor.u32 %v7852_v62, %v7299_v43  ;;  %v7254_v43 = vor.u32 %v7840_v1, %v7251_v35  ;;  %v10596_v1 = vld [vmem:[#allocation38_spill] sm:$0xff] }
 0x9b3   : > { %v3703_v11 = vpack.c.bf16 %v3693_v52, %v3692_v12  ;;  %v7305_v12 = vld [vmem:[#allocation14 + $0x288] sm:$0xf] }
 0x9b4   : > { %v3635_v6 = vpop.f32.mrf.mxu2  ;;  %4046 = vmatpush.bf16.msrb.mxu0 %v7282_v23  ;;  %v7246_v23 = vor.u32 %v7837_v37, %v7243_v32 }
 0x9b5   : > { %3809 = vmatmul.bf16.gmra.mxu3 %v3703_v11  ;;  %v3657_v14 = vadd.f32 %v3635_v6, %v9763_v44  ;;  %v7315_v44 = vld [vmem:[#allocation14 + $0x2b0] sm:$0xf0]  ;;  %v7855_v11 = vld [vmem:[#allocation14 + $0x294] sm:$0xf0]  ;;  %v7853_v6 = vld [vmem:[#allocation14 + $0x28c] sm:$0xf] }
 0x9b6   : > { %v7318_v10 = vor.u32 %v7856_v40, %v7315_v44  ;;  %v7306_v38 = vor.u32 %v7855_v11, %v7305_v12  ;;  %v7310_v28 = vor.u32 %v7853_v6, %v7307_v51  ;;  %v7270_v40 = vor.u32 %v7844_v24, %v7267_v13  ;;  %v7847_v44 = vld [vmem:[#allocation14 + $0x254] sm:$0xf0]  ;;  %v7259_v11 = vld [vmem:[#allocation14 + $0x238] sm:$0xf0] }
 0x9b7   : > { %v3678_v26 = vadd.f32 %v9785_v3, %v3657_v14  ;;  %v7283_v14 = vld [vmem:[#allocation14 + $0x270] sm:$0xf0]  ;;  %v7274_v63 = vor.u32 %v7847_v44, %v7273_v18  ;;  %v7258_v12 = vor.u32 %v7843_v27, %v7257_v58 }
 0x9b8   : > { %4093 = vmatpush.bf16.msrb.mxu1 %v7318_v10  ;;  %4143 = vmatpush.bf16.msrb.mxu2 %v7306_v38  ;;  %v7286_v5 = vor.u32 %v7848_v45, %v7283_v14  ;;  %v7842_v10 = vld [vmem:[#allocation14 + $0x22c] sm:$0xf0]  ;;  %v7235_v38 = vld [vmem:[#allocation14 + $0x210] sm:$0xf0] }
 0x9b9   : > { %4192 = vmatpush.bf16.msrb.mxu3 %v7310_v28  ;;  %4047 = vmatpush.bf16.msrb.mxu0 %v7266_v31  ;;  %v7241_v28 = vld [vmem:[#allocation14 + $0x208] sm:$0xf] }
 0x9bc   : > { %v3637_v61 = vpop.f32.mrf.mxu2  ;;  %4094 = vmatpush.bf16.msrb.mxu1 %v7302_v53  ;;  %4144 = vmatpush.bf16.msrb.mxu2 %v7290_v22  ;;  %v7836_v53 = vld [vmem:[#allocation14 + $0x204] sm:$0xf] }
 0x9bd   : > { %v3658_v46 = vadd.f32 %v3637_v61, %v9770_v16  ;;  %v3694_v16 = vmax.f32 %v3678_v26, 0.0  ;;  %4193 = vmatpush.bf16.msrb.mxu3 %v7294_v34  ;;  %v7845_v26 = vld [vmem:[#allocation14 + $0x24c] sm:$0xf]  ;;  %v7275_v61 = vld [vmem:[#allocation14 + $0x258] sm:$0xf0] }
 0x9be   : > { %v7278_v25 = vor.u32 %v7845_v26, %v7275_v61  ;;  %v10591_v26 = vld [vmem:[#allocation56_spill] sm:$0xff] }
 0x9bf   : > { %v3679_v52 = vadd.f32 %v9785_v3, %v3658_v46  ;;  %v7249_v46 = vld [vmem:[#allocation14 + $0x220] sm:$0xf] }
 0x9c0   : > { %4095 = vmatpush.bf16.msrb.mxu1 %v7286_v5  ;;  %4145 = vmatpush.bf16.msrb.mxu2 %v7274_v63  ;;  %v7250_v54 = vor.u32 %v7842_v10, %v7249_v46  ;;  %v10594_v46 = vld [vmem:[#allocation39_spill] sm:$0xff] }
 0x9c1   : > { %v3695_v19 = vmax.f32 %v3679_v52, 0.0  ;;  %4194 = vmatpush.bf16.msrb.mxu3 %v7278_v25  ;;  %v7841_v52 = vld [vmem:[#allocation14 + $0x22c] sm:$0xf] }
 0x9c2   : > { %4048 = vmatpush.bf16.msrb.mxu0 %v7250_v54  ;;  %v7262_v6 = vor.u32 %v7841_v52, %v7259_v11  ;;  %v10600_v11 = vld [vmem:[#allocation40_spill] sm:$0xff] }
 0x9c3   : > { %v3704_v21 = vpack.c.bf16 %v3695_v19, %v3694_v16  ;;  %v7838_v16 = vld [vmem:[#allocation14 + $0x20c] sm:$0xf0] }
 0x9c4   : > { %v3640_v15 = vpop.f32.mrf.mxu2  ;;  %4096 = vmatpush.bf16.msrb.mxu1 %v7270_v40  ;;  %4146 = vmatpush.bf16.msrb.mxu2 %v7258_v12  ;;  %v7234_v19 = vor.u32 %v7838_v16, %v7233_v60  ;;  %v10598_v12 = vld [vmem:[#allocation41_spill] sm:$0xff] }
 0x9c5   : > { %3814 = vmatmul.bf16.gmra.mxu3 %v3704_v21  ;;  %v3659_v49 = vadd.f32 %v3640_v15, %v9774_v17  ;;  %v7238_v15 = vor.u32 %v7836_v53, %v7235_v38  ;;  %v10602_v53 = vld [vmem:[#allocation43_spill] sm:$0xff] }
 0x9c6   : > { %4195 = vmatpush.bf16.msrb.mxu3 %v7262_v6  ;;  %4049 = vmatpush.bf16.msrb.mxu0 %v7234_v19 }
 0x9c7   : > { %v3680_v48 = vadd.f32 %v9785_v3, %v3659_v49 }
 0x9c8   : > { %4097 = vmatpush.bf16.msrb.mxu1 %v7254_v43 }
 0x9c9   : > { %v3696_v51 = vmax.f32 %v3680_v48, 0.0 }
 0x9ca   : > { %4196 = vmatpush.bf16.msrb.mxu3 %v7246_v23  ;;  %v10606_v23 = vld [vmem:[#allocation45_spill] sm:$0xff] }
 0x9cc   : > { %v3642_v42 = vpop.f32.mrf.mxu2  ;;  %4098 = vmatpush.bf16.msrb.mxu1 %v7238_v15 }
 0x9cd   : > { %v3660_v17 = vadd.f32 %v3642_v42, %v9779_v56 }
 0x9cf   : > { %v3681_v62 = vadd.f32 %v9785_v3, %v3660_v17  ;;  %v7839_v3 = vld [vmem:[#allocation14 + $0x214] sm:$0xf0] }
 0x9d0   : > { %v7242_v45 = vor.u32 %v7839_v3, %v7241_v28  ;;  %v10604_v28 = vld [vmem:[#allocation42_spill] sm:$0xff] }
 0x9d1   : > { %v3697_v56 = vmax.f32 %v3681_v62, 0.0 }
 0x9d2   : > { %4147 = vmatpush.bf16.msrb.mxu2 %v7242_v45 }
 0x9d3   : > { %v3705_v21 = vpack.c.bf16 %v3697_v56, %v3696_v51 }
 0x9d5   : > { %3819 = vmatmul.bf16.gmra.mxu3 %v3705_v21 }
 0x9e8   : > { %v3785_v14 = vpop.f32.mrf.mxu3 }
 0x9e9   : > { %v3786_v20 = vadd.f32 %v9821_v8, %v3785_v14 }
 0x9eb   : > { %v9826_v29 = vadd.f32 %v3786_v20, %v9506_v59  ;;  %v10608_v20 = vld [vmem:[#allocation44_spill] sm:$0xff] }
 0x9f0   : > { %v3787_v5 = vpop.f32.mrf.mxu3 }
 0x9f1   : > { %v3788_v22 = vadd.f32 %v9821_v8, %v3787_v5 }
 0x9f3   : > { %v9829_v0 = vadd.f32 %v3788_v22, %v9509_v50 }
 0x9f5   : > { %v3841_v34 = vpack.c.bf16 %v9829_v0, %v9826_v29 }
 0x9f7   : > { %4050 = vmatmul.bf16.vlgmr.msrb.gmra.mxu0 %v3841_v34  ;;  %4099 = vmatmul.bf16.vlgmr.msrb.gmra.mxu1 %v3841_v34 }
 0x9f8   : > { %4148 = vmatmul.bf16.vlgmr.msrb.gmra.mxu2 %v3841_v34  ;;  %4197 = vmatmul.bf16.vlgmr.msrb.gmra.mxu3 %v3841_v34  ;;  %v3790_v49 = vpop.f32.mrf.mxu3 }
 0x9f9   : > { %v3791_v41 = vadd.f32 %v9821_v8, %v3790_v49 }
 0x9fb   : > { %v9836_v24 = vadd.f32 %v3791_v41, %v9516_v47  ;;  %v10592_v47 = vld [vmem:[#allocation37_spill] sm:$0xff] }
 0xa00   : > { %v3792_v57 = vpop.f32.mrf.mxu3 }
 0xa01   : > { %v3793_v31 = vadd.f32 %v9821_v8, %v3792_v57 }
 0xa03   : > { %v9839_v59 = vadd.f32 %v3793_v31, %v9519_v55  ;;  %v10610_v31 = vld [vmem:[#allocation47_spill] sm:$0xff] }
 0xa05   : > { %v3842_v50 = vpack.c.bf16 %v9839_v59, %v9836_v24 }
 0xa07   : > { %4055 = vmatmul.bf16.gmra.mxu0 %v3842_v50  ;;  %4104 = vmatmul.bf16.gmra.mxu1 %v3842_v50 }
 0xa08   : > { %4153 = vmatmul.bf16.gmra.mxu2 %v3842_v50  ;;  %4202 = vmatmul.bf16.gmra.mxu3 %v3842_v50  ;;  %v3795_v13 = vpop.f32.mrf.mxu3 }
 0xa09   : > { %v3796_v18 = vadd.f32 %v9821_v8, %v3795_v13  ;;  %v10612_v13 = vld [vmem:[#allocation46_spill] sm:$0xff] }
 0xa0b   : > { %v9846_v61 = vadd.f32 %v3796_v18, %v10591_v26 }
 0xa10   : > { %v3797_v40 = vpop.f32.mrf.mxu3 }
 0xa11   : > { %v3798_v44 = vadd.f32 %v9821_v8, %v3797_v40 }
 0xa13   : > { %v9849_v42 = vadd.f32 %v3798_v44, %v10592_v47 }
 0xa15   : > { %10593 = vst [vmem:[#allocation56_spill] sm:$0xff] %v9849_v42  ;;  %v3843_v55 = vpack.c.bf16 %v9849_v42, %v9846_v61 }
 0xa17   : > { %4060 = vmatmul.bf16.gmra.mxu0 %v3843_v55  ;;  %4109 = vmatmul.bf16.gmra.mxu1 %v3843_v55 }
 0xa18   : > { %4158 = vmatmul.bf16.gmra.mxu2 %v3843_v55  ;;  %4207 = vmatmul.bf16.gmra.mxu3 %v3843_v55  ;;  %v3800_v63 = vpop.f32.mrf.mxu3 }
 0xa19   : > { %v3801_v25 = vadd.f32 %v9821_v8, %v3800_v63 }
 0xa1b   : > { %v9856_v10 = vadd.f32 %v3801_v25, %v10594_v46 }
 0xa1d   : > { %10595 = vst [vmem:[#allocation37_spill] sm:$0xff] %v9856_v10 }
 0xa20   : > { %v3802_v48 = vpop.f32.mrf.mxu3 }
 0xa21   : > { %v3803_v17 = vadd.f32 %v9821_v8, %v3802_v48 }
 0xa23   : > { %v9859_v54 = vadd.f32 %v3803_v17, %v10596_v1 }
 0xa25   : > { %10597 = vst [vmem:[#allocation39_spill] sm:$0xff] %v9859_v54  ;;  %v3844_v35 = vpack.c.bf16 %v9859_v54, %v9856_v10 }
 0xa27   : > { %4065 = vmatmul.bf16.gmra.mxu0 %v3844_v35  ;;  %4114 = vmatmul.bf16.gmra.mxu1 %v3844_v35 }
 0xa28   : > { %4163 = vmatmul.bf16.gmra.mxu2 %v3844_v35  ;;  %4212 = vmatmul.bf16.gmra.mxu3 %v3844_v35  ;;  %v3805_v58 = vpop.f32.mrf.mxu3 }
 0xa29   : > { %v3806_v27 = vadd.f32 %v9821_v8, %v3805_v58 }
 0xa2b   : > { %v9866_v52 = vadd.f32 %v3806_v27, %v10598_v12 }
 0xa2d   : > { %10599 = vst [vmem:[#allocation38_spill] sm:$0xff] %v9866_v52 }
 0xa30   : > { %v3807_v62 = vpop.f32.mrf.mxu3 }
 0xa31   : > { %v3808_v43 = vadd.f32 %v9821_v8, %v3807_v62 }
 0xa33   : > { %v9869_v6 = vadd.f32 %v3808_v43, %v10600_v11 }
 0xa35   : > { %10601 = vst [vmem:[#allocation41_spill] sm:$0xff] %v9869_v6  ;;  %v3845_v51 = vpack.c.bf16 %v9869_v6, %v9866_v52 }
 0xa37   : > { %4070 = vmatmul.bf16.gmra.mxu0 %v3845_v51  ;;  %4119 = vmatmul.bf16.gmra.mxu1 %v3845_v51 }
 0xa38   : > { %4168 = vmatmul.bf16.gmra.mxu2 %v3845_v51  ;;  %4217 = vmatmul.bf16.gmra.mxu3 %v3845_v51  ;;  %v3810_v56 = vpop.f32.mrf.mxu3 }
 0xa39   : > { %v3811_v60 = vadd.f32 %v9821_v8, %v3810_v56 }
 0xa3b   : > { %v9876_v38 = vadd.f32 %v3811_v60, %v10602_v53 }
 0xa3d   : > { %10603 = vst [vmem:[#allocation40_spill] sm:$0xff] %v9876_v38 }
 0xa40   : > { %v3812_v16 = vpop.f32.mrf.mxu3 }
 0xa41   : > { %v3813_v19 = vadd.f32 %v9821_v8, %v3812_v16 }
 0xa43   : > { %v9879_v21 = vadd.f32 %v3813_v19, %v10604_v28 }
 0xa45   : > { %10605 = vst [vmem:[#allocation43_spill] sm:$0xff] %v9879_v21  ;;  %v3846_v15 = vpack.c.bf16 %v9879_v21, %v9876_v38 }
 0xa47   : > { %4075 = vmatmul.bf16.gmra.mxu0 %v3846_v15  ;;  %4124 = vmatmul.bf16.gmra.mxu1 %v3846_v15 }
 0xa48   : > { %4173 = vmatmul.bf16.gmra.mxu2 %v3846_v15  ;;  %4222 = vmatmul.bf16.gmra.mxu3 %v3846_v15  ;;  %v3815_v3 = vpop.f32.mrf.mxu3 }
 0xa49   : > { %v3816_v37 = vadd.f32 %v9821_v8, %v3815_v3 }
 0xa4b   : > { %v9886_v14 = vadd.f32 %v3816_v37, %v10606_v23 }
 0xa4d   : > { %10607 = vst [vmem:[#allocation42_spill] sm:$0xff] %v9886_v14 }
 0xa50   : > { %v3817_v32 = vpop.f32.mrf.mxu3 }
 0xa51   : > { %v3818_v45 = vadd.f32 %v9821_v8, %v3817_v32 }
 0xa53   : > { %v9889_v5 = vadd.f32 %v3818_v45, %v10608_v20 }
 0xa55   : > { %10609 = vst [vmem:[#allocation45_spill] sm:$0xff] %v9889_v5  ;;  %v3847_v22 = vpack.c.bf16 %v9889_v5, %v9886_v14 }
 0xa57   : > { %4080 = vmatmul.bf16.gmra.mxu0 %v3847_v22  ;;  %4129 = vmatmul.bf16.gmra.mxu1 %v3847_v22 }
 0xa58   : > { %4178 = vmatmul.bf16.gmra.mxu2 %v3847_v22  ;;  %4227 = vmatmul.bf16.gmra.mxu3 %v3847_v22  ;;  %v3820_v34 = vpop.f32.mrf.mxu3 }
 0xa59   : > { %v3821_v49 = vadd.f32 %v9821_v8, %v3820_v34 }
 0xa5b   : > { %v9896_v50 = vadd.f32 %v3821_v49, %v10610_v31 }
 0xa5d   : > { %10611 = vst [vmem:[#allocation44_spill] sm:$0xff] %v9896_v50 }
 0xa60   : > { %v3822_v41 = vpop.f32.mrf.mxu3 }
 0xa61   : > { %v3823_v57 = vadd.f32 %v9821_v8, %v3822_v41 }
 0xa63   : > { %v9899_v18 = vadd.f32 %v3823_v57, %v10612_v13 }
 0xa65   : > { %10613 = vst [vmem:[#allocation47_spill] sm:$0xff] %v9899_v18  ;;  %v3848_v40 = vpack.c.bf16 %v9899_v18, %v9896_v50 }
 0xa67   : > { %4085 = vmatmul.bf16.gmra.mxu0 %v3848_v40  ;;  %4134 = vmatmul.bf16.gmra.mxu1 %v3848_v40 }
 0xa68   : > { %4183 = vmatmul.bf16.gmra.mxu2 %v3848_v40  ;;  %4232 = vmatmul.bf16.gmra.mxu3 %v3848_v40 }
 0xa74   : > { %v4051_v44 = vpop.f32.mrf.mxu0  ;;  %v4100_v26 = vpop.f32.mrf.mxu1 }
 0xa75   : > { %v9903_v47 = vpack.c.bf16 %v4100_v26, %v4051_v44 }
 0xa7b   : > { %v9905_v55 = vpop.f32.mrf.mxu2 }
 0xa7c   : > { %v9907_v8 = vpop.f32.mrf.mxu0  ;;  %v9909_v63 = vpop.f32.mrf.mxu1 }
 0xa83   : > { %v9911_v25 = vpop.f32.mrf.mxu2 }
 0xa84   : > { %v4056_v48 = vpop.f32.mrf.mxu0  ;;  %v4105_v17 = vpop.f32.mrf.mxu1 }
 0xa85   : > { %v9913_v46 = vpack.c.bf16 %v4105_v17, %v4056_v48 }
 0xa8b   : > { %v9915_v1 = vpop.f32.mrf.mxu2 }
 0xa8c   : > { %v9917_v35 = vpop.f32.mrf.mxu0  ;;  %v9919_v58 = vpop.f32.mrf.mxu1 }
 0xa93   : > { %v9921_v27 = vpop.f32.mrf.mxu2 }
 0xa94   : > { %v4061_v62 = vpop.f32.mrf.mxu0  ;;  %v4110_v43 = vpop.f32.mrf.mxu1 }
 0xa95   : > { %v9923_v12 = vpack.c.bf16 %v4110_v43, %v4061_v62 }
 0xa9b   : > { %v9925_v11 = vpop.f32.mrf.mxu2 }
 0xa9c   : > { %v9927_v51 = vpop.f32.mrf.mxu0  ;;  %v9929_v56 = vpop.f32.mrf.mxu1 }
 0xaa3   : > { %v9931_v60 = vpop.f32.mrf.mxu2 }
 0xaa4   : > { %v4066_v16 = vpop.f32.mrf.mxu0  ;;  %v4115_v19 = vpop.f32.mrf.mxu1 }
 0xaa5   : > { %v9933_v53 = vpack.c.bf16 %v4115_v19, %v4066_v16 }
 0xaab   : > { %v9935_v28 = vpop.f32.mrf.mxu2 }
 0xaac   : > { %v4068_v15 = vpop.f32.mrf.mxu0  ;;  %v4117_v3 = vpop.f32.mrf.mxu1 }
 0xab3   : > { %v9937_v37 = vpop.f32.mrf.mxu2 }
 0xab4   : > { %v4071_v32 = vpop.f32.mrf.mxu0  ;;  %v4120_v45 = vpop.f32.mrf.mxu1 }
 0xab5   : > { %v9939_v23 = vpack.c.bf16 %v4120_v45, %v4071_v32 }
 0xabb   : > { %v9941_v20 = vpop.f32.mrf.mxu2 }
 0xabc   : > { %v4073_v22 = vpop.f32.mrf.mxu0  ;;  %v4122_v34 = vpop.f32.mrf.mxu1 }
 0xac3   : > { %v9943_v49 = vpop.f32.mrf.mxu2 }
 0xac4   : > { %v4076_v41 = vpop.f32.mrf.mxu0  ;;  %v4125_v57 = vpop.f32.mrf.mxu1 }
 0xac5   : > { %v4258_v54 = vpack.c.bf16 %v4125_v57, %v4076_v41 }
 0xacb   : > { %v9945_v31 = vpop.f32.mrf.mxu2 }
 0xacc   : > { %v4078_v13 = vpop.f32.mrf.mxu0  ;;  %v4127_v40 = vpop.f32.mrf.mxu1 }
 0xacd   : > { %v4260_v5 = vpack.c.bf16 %v4127_v40, %v4078_v13 }
 0xad3   : > { %v9947_v44 = vpop.f32.mrf.mxu2 }
 0xad4   : > { %v4081_v26 = vpop.f32.mrf.mxu0  ;;  %v4130_v48 = vpop.f32.mrf.mxu1 }
 0xad5   : > { %v4262_v2 = vpack.c.bf16 %v4130_v48, %v4081_v26  ;;  %v4405_v26 = vunpack.c.h.b16 %v4260_v5 }
 0xad7   : > { %v4298_v10 = vunpack.c.l.b16 %v4262_v2  ;;  %v4407_v42 = vunpack.c.h.b16 %v4262_v2  ;;  %v4261_v2 = vpack.c.bf16 %v9947_v44, %v9947_v44 }
 0xadb   : > { %v4179_v17 = vpop.f32.mrf.mxu2 }
 0xadc   : > { %v4083_v62 = vpop.f32.mrf.mxu0  ;;  %v4132_v43 = vpop.f32.mrf.mxu1 }
 0xadd   : > { %v4264_v33 = vpack.c.bf16 %v4132_v43, %v4083_v62 }
 0xadf   : > { %v4299_v14 = vunpack.c.l.b16 %v4264_v33  ;;  %v4409_v21 = vunpack.c.h.b16 %v4264_v33  ;;  %v4296_v33 = vunpack.c.l.b16 %v4258_v54 }
 0xae1   : > { %v4308_v48 = vpack.c.b16 %v4299_v14, %v4298_v10  ;;  %v4427_v43 = vpack.c.b16 %v4409_v21, %v4407_v42  ;;  %v4259_v42 = vpack.c.bf16 %v9945_v31, %v9945_v31  ;;  %v4248_v21 = vpack.c.bf16 %v9929_v56, %v9927_v51 }
 0xae2   : > { %v4257_v14 = vpack.c.bf16 %v9943_v49, %v9943_v49  ;;  %v4255_v31 = vpack.c.bf16 %v9941_v20, %v9941_v20  ;;  %v4244_v51 = vpack.c.bf16 %v9919_v58, %v9917_v35  ;;  %v4253_v56 = vpack.c.bf16 %v9937_v37, %v9937_v37 }
 0xae3   : > { %v4181_v16 = vpop.f32.mrf.mxu2  ;;  %v4404_v44 = vunpack.c.l.b16 %v4259_v42  ;;  %v4240_v35 = vpack.c.bf16 %v9909_v63, %v9907_v8  ;;  %v4249_v58 = vpack.c.bf16 %v9931_v60, %v9931_v60  ;;  %v4245_v8 = vpack.c.bf16 %v9921_v27, %v9921_v27 }
 0xae4   : > { %v4086_v19 = vpop.f32.mrf.mxu0  ;;  %v4135_v32 = vpop.f32.mrf.mxu1  ;;  %v4265_v62 = vpack.c.bf16 %v4181_v16, %v4181_v16  ;;  %v4402_v49 = vunpack.c.l.b16 %v4257_v14  ;;  %v4398_v37 = vunpack.c.l.b16 %v4253_v56  ;;  %v4241_v27 = vpack.c.bf16 %v9911_v25, %v9911_v25  ;;  %v8148_v25 = vld [vmem:[%s8982_s19] sm:$0xff]  ;;  %v8162_v56 = vld [vmem:[%s8982_s19 + $0x38] sm:$0xff] }
 0xae5   : > { %v4266_v45 = vpack.c.bf16 %v4135_v32, %v4086_v19  ;;  %v4256_v32 = vpack.c.bf16 %v4122_v34, %v4073_v22  ;;  %v4394_v63 = vunpack.c.l.b16 %v4249_v58 }
 0xae7   : > { %v4300_v7 = vunpack.c.l.b16 %v4266_v45  ;;  %v4411_v4 = vunpack.c.h.b16 %v4266_v45  ;;  %v4291_v45 = vunpack.c.l.b16 %v4248_v21 }
 0xaeb   : > { %v4184_v9 = vpop.f32.mrf.mxu2 }
 0xaec   : > { %v4088_v30 = vpop.f32.mrf.mxu0  ;;  %v4137_v39 = vpop.f32.mrf.mxu1  ;;  %v4267_v52 = vpack.c.bf16 %v4184_v9, %v4184_v9  ;;  %v4410_v9 = vunpack.c.l.b16 %v4265_v62  ;;  %v4251_v62 = vpack.c.bf16 %v9935_v28, %v9935_v28 }
 0xaed   : > { %v4268_v36 = vpack.c.bf16 %v4137_v39, %v4088_v30  ;;  %v4297_v30 = vunpack.c.l.b16 %v4260_v5  ;;  %v4406_v5 = vunpack.c.l.b16 %v4261_v2 }
 0xaee   : > { %v4412_v13 = vunpack.c.l.b16 %v4267_v52  ;;  %v4294_v52 = vunpack.c.l.b16 %v9939_v23 }
 0xaef   : > { %v4301_v18 = vunpack.c.l.b16 %v4268_v36  ;;  %v4413_v50 = vunpack.c.h.b16 %v4268_v36  ;;  %v4263_v36 = vpack.c.bf16 %v4179_v17, %v4179_v17  ;;  %v4395_v17 = vunpack.c.h.b16 %v9933_v53 }
 0xaf0   : > { %v4426_v16 = vpack.c.b16 %v4406_v5, %v4404_v44  ;;  %v8151_v5 = vld [vmem:[%s8976_s6 + $0x8] sm:$0xff] }
 0xaf1   : > { %v4309_v38 = vpack.c.b16 %v4301_v18, %v4300_v7  ;;  %v4429_v6 = vpack.c.b16 %v4413_v50, %v4411_v4  ;;  %v4403_v7 = vunpack.c.h.b16 %v4258_v54  ;;  %v4252_v4 = vpack.c.bf16 %v4117_v3, %v4068_v15  ;;  %v8158_v44 = vld [vmem:[%s8982_s19 + $0x28] sm:$0xff] }
 0xaf2   : > { %v4401_v50 = vunpack.c.h.b16 %v4256_v32  ;;  %v4307_v18 = vpack.c.b16 %v4297_v30, %v4296_v33  ;;  %v4408_v10 = vunpack.c.l.b16 %v4263_v36  ;;  %v4399_v54 = vunpack.c.h.b16 %v9939_v23 }
 0xaf3   : > { %v4186_v19 = vpop.f32.mrf.mxu2  ;;  %4318 = vmatpush.bf16.msra.mxu0 %v4309_v38  ;;  %4447 = vmatpush.bf16.msra.mxu1 %v4429_v6  ;;  %v4295_v38 = vunpack.c.l.b16 %v4256_v32  ;;  %v4425_v22 = vpack.c.b16 %v4405_v26, %v4403_v7  ;;  %v4293_v3 = vunpack.c.l.b16 %v4252_v4  ;;  %v4397_v34 = vunpack.c.h.b16 %v4252_v4 }
 0xaf4   : > { %v4269_v39 = vpack.c.bf16 %v4186_v19, %v4186_v19  ;;  %v4428_v15 = vpack.c.b16 %v4410_v9, %v4408_v10  ;;  %v4423_v57 = vpack.c.b16 %v4401_v50, %v4399_v54  ;;  %v4292_v23 = vunpack.c.l.b16 %v9933_v53 }
 0xaf5   : > { %v4306_v41 = vpack.c.b16 %v4295_v38, %v4294_v52  ;;  %v4393_v19 = vunpack.c.h.b16 %v4248_v21  ;;  %v4421_v20 = vpack.c.b16 %v4397_v34, %v4395_v17  ;;  %v4290_v53 = vunpack.c.l.b16 %v9923_v12  ;;  %v8149_v21 = vld [vmem:[%s8976_s6] sm:$0xff]  ;;  %v8154_v34 = vld [vmem:[%s8982_s19 + $0x18] sm:$0xff]  ;;  %v8160_v17 = vld [vmem:[%s8982_s19 + $0x30] sm:$0xff] }
 0xaf6   : > { %v4414_v40 = vunpack.c.l.b16 %v4269_v39  ;;  %v4305_v32 = vpack.c.b16 %v4293_v3, %v4292_v23  ;;  %v4400_v39 = vunpack.c.l.b16 %v4255_v31  ;;  %v4391_v30 = vunpack.c.h.b16 %v9923_v12  ;;  %v8153_v3 = vld [vmem:[%s8976_s6 + $0x10] sm:$0xff]  ;;  %v8157_v31 = vld [vmem:[%s8976_s6 + $0x20] sm:$0xff]  ;;  %v8159_v23 = vld [vmem:[%s8976_s6 + $0x28] sm:$0xff] }
 0xaf7   : > { %4319 = vmatpush.bf16.msra.mxu0 %v4308_v48  ;;  %4448 = vmatpush.bf16.msra.mxu1 %v4427_v43  ;;  %v4289_v48 = vunpack.c.l.b16 %v4244_v51  ;;  %v4389_v43 = vunpack.c.h.b16 %v4244_v51  ;;  %v4304_v36 = vpack.c.b16 %v4291_v45, %v4290_v53  ;;  %v4288_v12 = vunpack.c.l.b16 %v9913_v46  ;;  %v8161_v51 = vld [vmem:[%s8976_s6 + $0x30] sm:$0xff] }
 0xaf8   : > { %v4430_v6 = vpack.c.b16 %v4414_v40, %v4412_v13  ;;  %v4424_v26 = vpack.c.b16 %v4402_v49, %v4400_v39  ;;  %v4419_v28 = vpack.c.b16 %v4393_v19, %v4391_v30  ;;  %v4247_v13 = vpack.c.bf16 %v9925_v11, %v9925_v11  ;;  %v8163_v49 = vld [vmem:[%s8976_s6 + $0x38] sm:$0xff] }
 0xaf9   : > { %v4396_v40 = vunpack.c.l.b16 %v4251_v62  ;;  %v4387_v33 = vunpack.c.h.b16 %v9913_v46  ;;  %v4287_v7 = vunpack.c.l.b16 %v4240_v35  ;;  %v4385_v4 = vunpack.c.h.b16 %v4240_v35 }
 0xafa   : > { %4496 = vmatpush.bf16.msra.mxu2 %v4430_v6  ;;  %v4303_v2 = vpack.c.b16 %v4289_v48, %v4288_v12  ;;  %v4243_v11 = vpack.c.bf16 %v9915_v1, %v9915_v1  ;;  %v4392_v6 = vunpack.c.l.b16 %v4247_v13  ;;  %v4286_v38 = vunpack.c.l.b16 %v9903_v47 }
 0xafb   : > { %4320 = vmatpush.bf16.msra.mxu0 %v4307_v18  ;;  %4449 = vmatpush.bf16.msra.mxu1 %v4425_v22  ;;  %v4422_v60 = vpack.c.b16 %v4398_v37, %v4396_v40  ;;  %v4417_v9 = vpack.c.b16 %v4389_v43, %v4387_v33  ;;  %v4383_v46 = vunpack.c.h.b16 %v9903_v47  ;;  %v4390_v50 = vunpack.c.l.b16 %v4245_v8 }
 0xafc   : > { %v4420_v18 = vpack.c.b16 %v4394_v63, %v4392_v6  ;;  %v4302_v22 = vpack.c.b16 %v4287_v7, %v4286_v38  ;;  %v4239_v1 = vpack.c.bf16 %v9905_v55, %v9905_v55  ;;  %v4388_v10 = vunpack.c.l.b16 %v4243_v11  ;;  %v8150_v55 = vld [vmem:[%s8982_s19 + $0x8] sm:$0xff] }
 0xafd   : > { %v4415_v42 = vpack.c.b16 %v4385_v4, %v4383_v46  ;;  %v4386_v47 = vunpack.c.l.b16 %v4241_v27 }
 0xafe   : > { %4497 = vmatpush.bf16.msra.mxu2 %v4428_v15  ;;  %v4418_v52 = vpack.c.b16 %v4390_v50, %v4388_v10  ;;  %v4384_v54 = vunpack.c.l.b16 %v4239_v1  ;;  %v8152_v15 = vld [vmem:[%s8982_s19 + $0x10] sm:$0xff] }
 0xaff   : > { %4321 = vmatpush.bf16.msra.mxu0 %v4306_v41  ;;  %4450 = vmatpush.bf16.msra.mxu1 %v4423_v57  ;;  %v8155_v41 = vld [vmem:[%s8976_s6 + $0x18] sm:$0xff]  ;;  %v8156_v57 = vld [vmem:[%s8982_s19 + $0x20] sm:$0xff] }
 0xb00   : > { %v4416_v14 = vpack.c.b16 %v4386_v47, %v4384_v54 }
 0xb02   : > { %4498 = vmatpush.bf16.msra.mxu2 %v4426_v16 }
 0xb03   : > { %4322 = vmatpush.bf16.msra.mxu0 %v4305_v32  ;;  %4451 = vmatpush.bf16.msra.mxu1 %v4421_v20 }
 0xb06   : > { %4499 = vmatpush.bf16.msra.mxu2 %v4424_v26 }
 0xb07   : > { %4323 = vmatpush.bf16.msra.mxu0 %v4304_v36  ;;  %4452 = vmatpush.bf16.msra.mxu1 %v4419_v28 }
 0xb0a   : > { %4500 = vmatpush.bf16.msra.mxu2 %v4422_v60 }
 0xb0b   : > { %4324 = vmatpush.bf16.msra.mxu0 %v4303_v2  ;;  %4453 = vmatpush.bf16.msra.mxu1 %v4417_v9 }
 0xb0e   : > { %4501 = vmatpush.bf16.msra.mxu2 %v4420_v18 }
 0xb0f   : > { %4325 = vmatpush.bf16.msra.mxu0 %v4302_v22  ;;  %4454 = vmatpush.bf16.msra.mxu1 %v4415_v42 }
 0xb12   : > { %4502 = vmatpush.bf16.msra.mxu2 %v4418_v52  ;;  %4326 = vmatmul.bf16.vlgmr.msra.gmra.mxu0 %v8148_v25 }
 0xb13   : > { %4455 = vmatmul.bf16.vlgmr.msra.gmra.mxu1 %v8149_v21 }
 0xb16   : > { %4503 = vmatpush.bf16.msra.mxu2 %v4416_v14 }
 0xb19   : > { %4504 = vmatmul.bf16.vlgmr.msra.gmra.mxu2 %v8149_v21 }
 0xb22   : > { %4331 = vmatmul.bf16.gmra.mxu0 %v8150_v55 }
 0xb23   : > { %4460 = vmatmul.bf16.gmra.mxu1 %v8151_v5 }
 0xb29   : > { %4509 = vmatmul.bf16.gmra.mxu2 %v8151_v5 }
 0xb32   : > { %4336 = vmatmul.bf16.gmra.mxu0 %v8152_v15 }
 0xb33   : > { %4465 = vmatmul.bf16.gmra.mxu1 %v8153_v3 }
 0xb39   : > { %4514 = vmatmul.bf16.gmra.mxu2 %v8153_v3 }
 0xb42   : > { %4341 = vmatmul.bf16.gmra.mxu0 %v8154_v34 }
 0xb43   : > { %4470 = vmatmul.bf16.gmra.mxu1 %v8155_v41 }
 0xb49   : > { %4519 = vmatmul.bf16.gmra.mxu2 %v8155_v41 }
 0xb52   : > { %4346 = vmatmul.bf16.gmra.mxu0 %v8156_v57 }
 0xb53   : > { %4475 = vmatmul.bf16.gmra.mxu1 %v8157_v31 }
 0xb59   : > { %4524 = vmatmul.bf16.gmra.mxu2 %v8157_v31 }
 0xb62   : > { %4351 = vmatmul.bf16.gmra.mxu0 %v8158_v44 }
 0xb63   : > { %4480 = vmatmul.bf16.gmra.mxu1 %v8159_v23 }
 0xb69   : > { %4529 = vmatmul.bf16.gmra.mxu2 %v8159_v23 }
 0xb72   : > { %4356 = vmatmul.bf16.gmra.mxu0 %v8160_v17 }
 0xb73   : > { %4485 = vmatmul.bf16.gmra.mxu1 %v8161_v51 }
 0xb79   : > { %4534 = vmatmul.bf16.gmra.mxu2 %v8161_v51 }
 0xb82   : > { %4361 = vmatmul.bf16.gmra.mxu0 %v8162_v56 }
 0xb83   : > { %4490 = vmatmul.bf16.gmra.mxu1 %v8163_v49 }
 0xb89   : > { %4539 = vmatmul.bf16.gmra.mxu2 %v8163_v49 }
 0xb8f   : > { %v4327_v16 = vpop.f32.mrf.mxu0 }
 0xb90   : > { %v4456_v45 = vpop.f32.mrf.mxu1 }
 0xb91   : > { %v4545_v19 = vmul.f32 %v4456_v45, %v4327_v16 }
 0xb97   : > { %v10005_v32 = vpop.f32.mrf.mxu0 }
 0xb98   : > { %v4458_v20 = vpop.f32.mrf.mxu1 }
 0xb99   : > { %v4546_v31 = vmul.f32 %v4458_v20, %v10005_v32 }
 0xb9c   : > { %v10007_v6 = vpop.f32.mrf.mxu2 }
 0xb9f   : > { %v4332_v62 = vpop.f32.mrf.mxu0 }
 0xba0   : > { %v4461_v39 = vpop.f32.mrf.mxu1 }
 0xba1   : > { %v4547_v53 = vmul.f32 %v4461_v39, %v4332_v62 }
 0xba4   : > { %v10009_v50 = vpop.f32.mrf.mxu2 }
 0xba7   : > { %v4334_v30 = vpop.f32.mrf.mxu0 }
 0xba8   : > { %v4463_v35 = vpop.f32.mrf.mxu1 }
 0xba9   : > { %v4548_v44 = vmul.f32 %v4463_v35, %v4334_v30 }
 0xbac   : > { %v10011_v52 = vpop.f32.mrf.mxu2 }
 0xbaf   : > { %v4337_v58 = vpop.f32.mrf.mxu0 }
 0xbb0   : > { %v4466_v37 = vpop.f32.mrf.mxu1 }
 0xbb1   : > { %v4549_v26 = vmul.f32 %v4466_v37, %v4337_v58 }
 0xbb4   : > { %v10013_v15 = vpop.f32.mrf.mxu2 }
 0xbb7   : > { %v4339_v48 = vpop.f32.mrf.mxu0 }
 0xbb8   : > { %v4468_v43 = vpop.f32.mrf.mxu1 }
 0xbb9   : > { %v4550_v25 = vmul.f32 %v4468_v43, %v4339_v48 }
 0xbbc   : > { %v10015_v41 = vpop.f32.mrf.mxu2 }
 0xbbf   : > { %v4342_v36 = vpop.f32.mrf.mxu0 }
 0xbc0   : > { %v4471_v28 = vpop.f32.mrf.mxu1 }
 0xbc1   : > { %v4551_v42 = vmul.f32 %v4471_v28, %v4342_v36 }
 0xbc4   : > { %v10017_v57 = vpop.f32.mrf.mxu2 }
 0xbc7   : > { %v4344_v13 = vpop.f32.mrf.mxu0 }
 0xbc8   : > { %v4473_v40 = vpop.f32.mrf.mxu1 }
 0xbc9   : > { %v4552_v3 = vmul.f32 %v4473_v40, %v4344_v13 }
 0xbcc   : > { %v10020_v23 = vpop.f32.mrf.mxu2 }
 0xbcf   : > { %v4347_v12 = vpop.f32.mrf.mxu0 }
 0xbd0   : > { %v4476_v33 = vpop.f32.mrf.mxu1 }
 0xbd1   : > { %v4553_v55 = vmul.f32 %v4476_v33, %v4347_v12 }
 0xbd4   : > { %v10022_v17 = vpop.f32.mrf.mxu2 }
 0xbd7   : > { %v4349_v8 = vpop.f32.mrf.mxu0 }
 0xbd8   : > { %v4478_v63 = vpop.f32.mrf.mxu1 }
 0xbd9   : > { %v4554_v34 = vmul.f32 %v4478_v63, %v4349_v8 }
 0xbdc   : > { %v4525_v51 = vpop.f32.mrf.mxu2 }
 0xbdf   : > { %v4352_v60 = vpop.f32.mrf.mxu0 }
 0xbe0   : > { %v4481_v7 = vpop.f32.mrf.mxu1 }
 0xbe1   : > { %v4555_v4 = vmul.f32 %v4481_v7, %v4352_v60 }
 0xbe3   : > { %4581 = vadd.xlane.f32.xlu1 %v4555_v4 }
 0xbe4   : > { %v4527_v56 = vpop.f32.mrf.mxu2 }
 0xbe7   : > { %v4354_v2 = vpop.f32.mrf.mxu0 }
 0xbe8   : > { %v4483_v9 = vpop.f32.mrf.mxu1 }
 0xbe9   : > { %v4556_v11 = vmul.f32 %v4483_v9, %v4354_v2 }
 0xbeb   : > { %4583 = vadd.xlane.f32.xlu2 %v4556_v11 }
 0xbec   : > { %v4530_v49 = vpop.f32.mrf.mxu2 }
 0xbef   : > { %v4357_v38 = vpop.f32.mrf.mxu0 }
 0xbf0   : > { %v4486_v46 = vpop.f32.mrf.mxu1 }
 0xbf1   : > { %v4557_v27 = vmul.f32 %v4486_v46, %v4357_v38 }
 0xbf3   : > { %4585 = vadd.xlane.f32.xlu2 %v4557_v27 }
 0xbf4   : > { %v4532_v16 = vpop.f32.mrf.mxu2 }
 0xbf7   : > { %v4359_v18 = vpop.f32.mrf.mxu0 }
 0xbf8   : > { %v4488_v22 = vpop.f32.mrf.mxu1 }
 0xbf9   : > { %v4558_v1 = vmul.f32 %v4488_v22, %v4359_v18 }
 0xbfb   : > { %4573 = vadd.xlane.f32.xlu2 %v4551_v42  ;;  %4587 = vadd.xlane.f32.xlu0 %v4558_v1 }
 0xbfc   : > { %v4535_v45 = vpop.f32.mrf.mxu2 }
 0xbff   : > { %v4362_v10 = vpop.f32.mrf.mxu0 }
 0xc00   : > { %v4491_v47 = vpop.f32.mrf.mxu1 }
 0xc01   : > { %v4559_v54 = vmul.f32 %v4491_v47, %v4362_v10 }
 0xc03   : > { %4571 = vadd.xlane.f32.xlu2 %v4550_v25  ;;  %4589 = vadd.xlane.f32.xlu0 %v4559_v54  ;;  %v10024_v54 = vpop.f32.mrf.mxu3 }
 0xc04   : > { %v4537_v62 = vpop.f32.mrf.mxu2 }
 0xc07   : > { %v4364_v21 = vpop.f32.mrf.mxu0 }
 0xc08   : > { %v4493_v14 = vpop.f32.mrf.mxu1 }
 0xc09   : > { %v4560_v5 = vmul.f32 %v4493_v14, %v4364_v21 }
 0xc0b   : > { %4561 = vadd.xlane.f32.xlu2 %v4545_v19  ;;  %4577 = vadd.xlane.f32.xlu0 %v4553_v55 }
 0xc0c   : > { %4591 = vadd.xlane.f32.xlu1 %v4560_v5 }
 0xc13   : > { %4575 = vadd.xlane.f32.xlu0 %v4552_v3 }
 0xc14   : > { %4579 = vadd.xlane.f32.xlu1 %v4554_v34 }
 0xc1b   : > { %4565 = vadd.xlane.f32.xlu0 %v4547_v53 }
 0xc1c   : > { %4569 = vadd.xlane.f32.xlu1 %v4549_v26  ;;  %v4540_v26 = vpop.f32.mrf.mxu2 }
 0xc23   : > { %4563 = vadd.xlane.f32.xlu0 %v4546_v31 }
 0xc24   : > { %4567 = vadd.xlane.f32.xlu1 %v4548_v44  ;;  %v4542_v12 = vpop.f32.mrf.mxu2 }
 0xc56   : > { %v4582_v58 = vpop.xlane.xlu1 %4581 }
 0xc57   : > { %v4619_v60 = vmul.f32 0.01, %v4582_v58  ;;  %vm4603_vm6 = vcmp.gt.f32.partialorder %v4582_v58, 0.0 }
 0xc59   : > { %v4635_v27 = vsel %vm4603_vm6, %v4582_v58, %v4619_v60 }
 0xc5a   : > { %v4651_v25 = vmul.f32 %v4635_v27, %v4530_v49 }
 0xc5e   : > { %v4584_v19 = vpop.xlane.xlu2 %4583 }
 0xc5f   : > { %v4620_v13 = vmul.f32 0.01, %v4584_v19  ;;  %vm4604_vm5 = vcmp.gt.f32.partialorder %v4584_v19, 0.0 }
 0xc61   : > { %v4636_v9 = vsel %vm4604_vm5, %v4584_v19, %v4620_v13 }
 0xc62   : > { %v4652_v42 = vmul.f32 %v4636_v9, %v4532_v16 }
 0xc64   : > { %v4662_v3 = vpack.c.bf16 %v4652_v42, %v4651_v25 }
 0xc66   : > { %v4586_v37 = vpop.xlane.xlu2 %4585 }
 0xc67   : > { %v4621_v48 = vmul.f32 0.01, %v4586_v37  ;;  %vm4605_vm4 = vcmp.gt.f32.partialorder %v4586_v37, 0.0 }
 0xc69   : > { %v4637_v7 = vsel %vm4605_vm4, %v4586_v37, %v4621_v48 }
 0xc6a   : > { %v4653_v38 = vmul.f32 %v4637_v7, %v4535_v45 }
 0xc6e   : > { %v4588_v39 = vpop.xlane.xlu0 %4587  ;;  %v4574_v28 = vpop.xlane.xlu2 %4573 }
 0xc6f   : > { %v4622_v20 = vmul.f32 0.01, %v4588_v39  ;;  %vm4606_vm2 = vcmp.gt.f32.partialorder %v4588_v39, 0.0  ;;  %v4615_v14 = vmul.f32 0.01, %v4574_v28  ;;  %vm4599_vm10 = vcmp.gt.f32.partialorder %v4574_v28, 0.0 }
 0xc71   : > { %v4638_v40 = vsel %vm4606_vm2, %v4588_v39, %v4622_v20  ;;  %v4631_v45 = vsel %vm4599_vm10, %v4574_v28, %v4615_v14  ;;  %v7871_v14 = vld [vmem:[#allocation16 + $0x98] sm:$0xff] }
 0xc72   : > { %v4654_v4 = vmul.f32 %v4638_v40, %v4537_v62  ;;  %v4647_v58 = vmul.f32 %v4631_v45, %v10020_v23 }
 0xc74   : > { %v4663_v1 = vpack.c.bf16 %v4654_v4, %v4653_v38  ;;  %v10614_v4 = vld [vmem:[#allocation48_spill] sm:$0xff] }
 0xc76   : > { %v4590_v53 = vpop.xlane.xlu0 %4589  ;;  %v4572_v21 = vpop.xlane.xlu2 %4571 }
 0xc77   : > { %v4623_v32 = vmul.f32 0.01, %v4590_v53  ;;  %vm4607_vm1 = vcmp.gt.f32.partialorder %v4590_v53, 0.0  ;;  %v4614_v19 = vmul.f32 0.01, %v4572_v21  ;;  %vm4598_vm12 = vcmp.gt.f32.partialorder %v4572_v21, 0.0 }
 0xc79   : > { %v4639_v43 = vsel %vm4607_vm1, %v4590_v53, %v4623_v32  ;;  %v4630_v37 = vsel %vm4598_vm12, %v4572_v21, %v4614_v19  ;;  %v7872_v21 = vld [vmem:[#allocation16 + $0xa0] sm:$0xff] }
 0xc7a   : > { %v4655_v8 = vmul.f32 %v4639_v43, %v4540_v26  ;;  %v10028_v26 = vpop.f32.mrf.mxu3 }
 0xc7e   : > { %v4578_v30 = vpop.xlane.xlu0 %4577  ;;  %v4562_v32 = vpop.xlane.xlu2 %4561 }
 0xc7f   : > { %v4592_v35 = vpop.xlane.xlu1 %4591  ;;  %v4617_v18 = vmul.f32 0.01, %v4578_v30  ;;  %vm4601_vm8 = vcmp.gt.f32.partialorder %v4578_v30, 0.0  ;;  %v4609_v43 = vmul.f32 0.01, %v4562_v32  ;;  %vm4593_vm0 = vcmp.gt.f32.partialorder %v4562_v32, 0.0 }
 0xc80   : > { %vm4608_vm3 = vcmp.gt.f32.partialorder %v4592_v35, 0.0  ;;  %v4624_v36 = vmul.f32 0.01, %v4592_v35 }
 0xc81   : > { %v4633_v55 = vsel %vm4601_vm8, %v4578_v30, %v4617_v18  ;;  %v10618_v18 = vld [vmem:[#allocation52_spill] sm:$0xff] }
 0xc82   : > { %v4640_v33 = vsel %vm4608_vm3, %v4592_v35, %v4624_v36  ;;  %v4649_v44 = vmul.f32 %v4633_v55, %v4525_v51  ;;  %v4646_v35 = vmul.f32 %v4630_v37, %v10017_v57 }
 0xc83   : > { %v4656_v63 = vmul.f32 %v4640_v33, %v4542_v12  ;;  %v4625_v33 = vsel %vm4593_vm0, %v4562_v32, %v4609_v43 }
 0xc84   : > { %v4641_v60 = vmul.f32 %v4625_v33, %v10007_v6  ;;  %v10617_v6 = vld [vmem:[#allocation51_spill] sm:$0xff]  ;;  %v7880_v33 = vld [vmem:[#allocation17 + $0xa0] sm:$0xff] }
 0xc85   : > { %v4664_v2 = vpack.c.bf16 %v4656_v63, %v4655_v8  ;;  %v10035_v63 = vpop.f32.mrf.mxu3 }
 0xc86   : > { %v4576_v11 = vpop.xlane.xlu0 %4575 }
 0xc87   : > { %4665 = vmatpush.bf16.msra.mxu3 %v4664_v2  ;;  %v4580_v46 = vpop.xlane.xlu1 %4579  ;;  %v4616_v10 = vmul.f32 0.01, %v4576_v11  ;;  %vm4600_vm9 = vcmp.gt.f32.partialorder %v4576_v11, 0.0 }
 0xc88   : > { %vm4602_vm7 = vcmp.gt.f32.partialorder %v4580_v46, 0.0  ;;  %v4618_v22 = vmul.f32 0.01, %v4580_v46 }
 0xc89   : > { %v4632_v34 = vsel %vm4600_vm9, %v4576_v11, %v4616_v10  ;;  %v10616_v11 = vld [vmem:[#allocation50_spill] sm:$0xff]  ;;  %v7874_v10 = vld [vmem:[#allocation16 + $0xb0] sm:$0xff] }
 0xc8a   : > { %v4634_v47 = vsel %vm4602_vm7, %v4580_v46, %v4618_v22  ;;  %v4648_v49 = vmul.f32 %v4632_v34, %v10022_v17  ;;  %v7875_v22 = vld [vmem:[#allocation16 + $0xb8] sm:$0xff]  ;;  %v7869_v34 = vld [vmem:[#allocation16 + $0x88] sm:$0xff] }
 0xc8b   : > { %4666 = vmatpush.bf16.msra.mxu3 %v4663_v1  ;;  %v4650_v5 = vmul.f32 %v4634_v47, %v4527_v56  ;;  %4787 = vmatpush.bf16.msrb.mxu0 %v7875_v22  ;;  %v10619_v1 = vld [vmem:[#allocation53_spill] sm:$0xff]  ;;  %v7873_v47 = vld [vmem:[#allocation16 + $0xa8] sm:$0xff] }
 0xc8c   : > { %v4660_v20 = vpack.c.bf16 %v4648_v49, %v4647_v58 }
 0xc8d   : > { %v4661_v39 = vpack.c.bf16 %v4650_v5, %v4649_v44  ;;  %v10039_v2 = vpop.f32.mrf.mxu3  ;;  %v10620_v5 = vld [vmem:[#allocation54_spill] sm:$0xff]  ;;  %v7868_v44 = vld [vmem:[#allocation16 + $0x80] sm:$0xff] }
 0xc8e   : > { %v4566_v31 = vpop.xlane.xlu0 %4565 }
 0xc8f   : > { %4667 = vmatpush.bf16.msra.mxu3 %v4662_v3  ;;  %v4570_v16 = vpop.xlane.xlu1 %4569  ;;  %v4611_v56 = vmul.f32 0.01, %v4566_v31  ;;  %vm4595_vm13 = vcmp.gt.f32.partialorder %v4566_v31, 0.0  ;;  %4788 = vmatpush.bf16.msrb.mxu0 %v7874_v10  ;;  %v7870_v3 = vld [vmem:[#allocation16 + $0x90] sm:$0xff]  ;;  %v10076_v10 = vld [vmem:[%s10558_s10 + $0x2] ss:$0 sm:$0xff] }
 0xc90   : > { %vm4597_vm11 = vcmp.gt.f32.partialorder %v4570_v16, 0.0  ;;  %v4613_v62 = vmul.f32 0.01, %v4570_v16 }
 0xc91   : > { %v4627_v36 = vsel %vm4595_vm13, %v4566_v31, %v4611_v56 }
 0xc92   : > { %v4629_v53 = vsel %vm4597_vm11, %v4570_v16, %v4613_v62  ;;  %v4643_v12 = vmul.f32 %v4627_v36, %v10011_v52  ;;  %v10615_v52 = vld [vmem:[#allocation49_spill] sm:$0xff]  ;;  %v10621_v16 = vld [vmem:[#allocation55_spill] sm:$0xff] }
 0xc93   : > { %4668 = vmatpush.bf16.msra.mxu3 %v4661_v39  ;;  %v4645_v51 = vmul.f32 %v4629_v53, %v10015_v41  ;;  %4789 = vmatpush.bf16.msrb.mxu0 %v7873_v47 }
 0xc95   : > { %v4659_v28 = vpack.c.bf16 %v4646_v35, %v4645_v51  ;;  %v10041_v9 = vpop.f32.mrf.mxu3 }
 0xc96   : > { %v4564_v30 = vpop.xlane.xlu0 %4563 }
 0xc97   : > { %vm4594_vm14 = vcmp.gt.f32.partialorder %v4564_v30, 0.0  ;;  %v4610_v48 = vmul.f32 0.01, %v4564_v30  ;;  %4669 = vmatpush.bf16.msra.mxu3 %v4660_v20  ;;  %v4568_v17 = vpop.xlane.xlu1 %4567  ;;  %4790 = vmatpush.bf16.msrb.mxu0 %v7872_v21 }
 0xc98   : > { %vm4596_vm15 = vcmp.gt.f32.partialorder %v4568_v17, 0.0  ;;  %v4612_v23 = vmul.f32 0.01, %v4568_v17 }
 0xc99   : > { %v4626_v13 = vsel %vm4594_vm14, %v4564_v30, %v4610_v48 }
 0xc9a   : > { %v4628_v40 = vsel %vm4596_vm15, %v4568_v17, %v4612_v23  ;;  %v4642_v57 = vmul.f32 %v4626_v13, %v10009_v50 }
 0xc9b   : > { %v4644_v41 = vmul.f32 %v4628_v40, %v10013_v15  ;;  %4670 = vmatpush.bf16.msra.mxu3 %v4659_v28  ;;  %4791 = vmatpush.bf16.msrb.mxu0 %v7871_v14  ;;  %v7883_v28 = vld [vmem:[#allocation17 + $0xb8] sm:$0xff]  ;;  %v7882_v40 = vld [vmem:[#allocation17 + $0xb0] sm:$0xff] }
 0xc9c   : > { %v4657_v7 = vpack.c.bf16 %v4642_v57, %v4641_v60  ;;  %4967 = vmatpush.bf16.msrb.mxu1 %v7883_v28 }
 0xc9d   : > { %v4658_v8 = vpack.c.bf16 %v4644_v41, %v4643_v12  ;;  %v10044_v15 = vpop.f32.mrf.mxu3  ;;  %v7881_v12 = vld [vmem:[#allocation17 + $0xa8] sm:$0xff] }
 0xc9f   : > { %4671 = vmatpush.bf16.msra.mxu3 %v4658_v8  ;;  %4792 = vmatpush.bf16.msrb.mxu0 %v7870_v3  ;;  %v7879_v8 = vld [vmem:[#allocation17 + $0x98] sm:$0xff] }
 0xca0   : > { %4968 = vmatpush.bf16.msrb.mxu1 %v7882_v40 }
 0xca3   : > { %4672 = vmatpush.bf16.msra.mxu3 %v4657_v7  ;;  %4793 = vmatpush.bf16.msrb.mxu0 %v7869_v34  ;;  %v7878_v7 = vld [vmem:[#allocation17 + $0x90] sm:$0xff] }
 0xca4   : > { %4969 = vmatpush.bf16.msrb.mxu1 %v7881_v12 }
 0xca5   : > { %v10047_v50 = vpop.f32.mrf.mxu3 }
 0xca6   : > { %4673 = vmatmul.bf16.vlgmr.msra.gmra.mxu3 %v10614_v4 }
 0xca7   : > { %4794 = vmatpush.bf16.msrb.mxu0 %v7868_v44 }
 0xca8   : > { %4970 = vmatpush.bf16.msrb.mxu1 %v7880_v33 }
 0xcac   : > { %4971 = vmatpush.bf16.msrb.mxu1 %v7879_v8 }
 0xcad   : > { %v10049_v38 = vpop.f32.mrf.mxu3 }
 0xcb0   : > { %4972 = vmatpush.bf16.msrb.mxu1 %v7878_v7 }
 0xcb5   : > { %v10052_v46 = vpop.f32.mrf.mxu3 }
 0xcb6   : > { %4678 = vmatmul.bf16.gmra.mxu3 %v10615_v52  ;;  %v7877_v52 = vld [vmem:[#allocation17 + $0x88] sm:$0xff] }
 0xcb7   : > { %4973 = vmatpush.bf16.msrb.mxu1 %v7877_v52 }
 0xcbd   : > { %v10054_v27 = vpop.f32.mrf.mxu3 }
 0xcc5   : > { %v10057_v42 = vpop.f32.mrf.mxu3 }
 0xcc6   : > { %4683 = vmatmul.bf16.gmra.mxu3 %v10616_v11  ;;  %v7876_v11 = vld [vmem:[#allocation17 + $0x80] sm:$0xff] }
 0xcc7   : > { %4974 = vmatpush.bf16.msrb.mxu1 %v7876_v11 }
 0xccd   : > { %v10060_v25 = vpop.f32.mrf.mxu3 }
 0xcd5   : > { %v10062_v55 = vpop.f32.mrf.mxu3 }
 0xcd6   : > { %4688 = vmatmul.bf16.gmra.mxu3 %v10617_v6 }
 0xcdd   : > { %v10065_v31 = vpop.f32.mrf.mxu3 }
 0xce5   : > { %v10068_v45 = vpop.f32.mrf.mxu3 }
 0xce6   : > { %4693 = vmatmul.bf16.gmra.mxu3 %v10618_v18 }
 0xced   : > { %v10070_v19 = vpop.f32.mrf.mxu3 }
 0xcf6   : > { %4698 = vmatmul.bf16.gmra.mxu3 %v10619_v1 }
 0xd06   : > { %4703 = vmatmul.bf16.gmra.mxu3 %v10620_v5 }
 0xd16   : > { %4708 = vmatmul.bf16.gmra.mxu3 %v10621_v16 }
 0xd29   : > { %v4674_v62 = vpop.f32.mrf.mxu3 }
 0xd31   : > { %v4676_v49 = vpop.f32.mrf.mxu3 }
 0xd32   : > { %v4714_v39 = vpack.c.bf16 %v4676_v49, %v4674_v62 }
 0xd34   : > { %4795 = vmatmul.bf16.vlgmr.msrb.gmra.mxu0 %v4714_v39 }
 0xd39   : > { %v4679_v53 = vpop.f32.mrf.mxu3 }
 0xd41   : > { %v4681_v58 = vpop.f32.mrf.mxu3 }
 0xd42   : > { %v4715_v37 = vpack.c.bf16 %v4681_v58, %v4679_v53 }
 0xd44   : > { %4800 = vmatmul.bf16.gmra.mxu0 %v4715_v37 }
 0xd49   : > { %v4684_v56 = vpop.f32.mrf.mxu3 }
 0xd51   : > { %v4686_v32 = vpop.f32.mrf.mxu3 }
 0xd52   : > { %v4716_v51 = vpack.c.bf16 %v4686_v32, %v4684_v56 }
 0xd54   : > { %4805 = vmatmul.bf16.gmra.mxu0 %v4716_v51 }
 0xd59   : > { %v4689_v20 = vpop.f32.mrf.mxu3 }
 0xd61   : > { %v4691_v30 = vpop.f32.mrf.mxu3 }
 0xd62   : > { %v4717_v35 = vpack.c.bf16 %v4691_v30, %v4689_v20 }
 0xd64   : > { %4810 = vmatmul.bf16.gmra.mxu0 %v4717_v35 }
 0xd69   : > { %v4694_v48 = vpop.f32.mrf.mxu3 }
 0xd71   : > { %v4696_v17 = vpop.f32.mrf.mxu3 }
 0xd72   : > { %v4718_v43 = vpack.c.bf16 %v4696_v17, %v4694_v48 }
 0xd74   : > { %4815 = vmatmul.bf16.gmra.mxu0 %v4718_v43 }
 0xd79   : > { %v4699_v36 = vpop.f32.mrf.mxu3 }
 0xd81   : > { %v4701_v23 = vpop.f32.mrf.mxu3 }
 0xd82   : > { %v4719_v13 = vpack.c.bf16 %v4701_v23, %v4699_v36 }
 0xd84   : > { %4820 = vmatmul.bf16.gmra.mxu0 %v4719_v13 }
 0xd89   : > { %v4704_v41 = vpop.f32.mrf.mxu3 }
 0xd91   : > { %v4706_v57 = vpop.f32.mrf.mxu3 }
 0xd92   : > { %v4720_v60 = vpack.c.bf16 %v4706_v57, %v4704_v41 }
 0xd94   : > { %4825 = vmatmul.bf16.gmra.mxu0 %v4720_v60 }
 0xd99   : > { %v4709_v4 = vpop.f32.mrf.mxu3 }
 0xda1   : > { %v4711_v6 = vpop.f32.mrf.mxu3 }
 0xda2   : > { %v4721_v18 = vpack.c.bf16 %v4711_v6, %v4709_v4 }
 0xda4   : > { %4830 = vmatmul.bf16.gmra.mxu0 %v4721_v18 }
 0xdb1   : > { %v4796_v22 = vpop.f32.mrf.mxu0 }
 0xdb2   : > { %v4836_v1 = vadd.f32 %v4796_v22, %v10024_v54  ;;  %v7539_v22 = vld [vmem:[#allocation14 + $0x3e0] sm:$0xf] }
 0xdb4   : > { %v4857_v21 = vadd.f32 %v10076_v10, %v4836_v1  ;;  %v7914_v1 = vld [vmem:[#allocation14 + $0x3ec] sm:$0xf0] }
 0xdb6   : > { %v4873_v3 = vmax.f32 %v4857_v21, 0.0  ;;  %v7541_v21 = vld [vmem:[#allocation14 + $0x3f0] sm:$0xf0] }
 0xdb9   : > { %v4798_v47 = vpop.f32.mrf.mxu0 }
 0xdba   : > { %v4837_v14 = vadd.f32 %v4798_v47, %v10028_v26  ;;  %v7912_v47 = vld [vmem:[#allocation14 + $0x3e4] sm:$0xf] }
 0xdbc   : > { %v4858_v5 = vadd.f32 %v10076_v10, %v4837_v14  ;;  %v7547_v14 = vld [vmem:[#allocation14 + $0x3e8] sm:$0xf] }
 0xdbe   : > { %v4874_v34 = vmax.f32 %v4858_v5, 0.0  ;;  %v7915_v5 = vld [vmem:[#allocation14 + $0x3f4] sm:$0xf0] }
 0xdc0   : > { %v4889_v44 = vpack.c.bf16 %v4874_v34, %v4873_v3 }
 0xdc1   : > { %v4801_v16 = vpop.f32.mrf.mxu0 }
 0xdc2   : > { %4975 = vmatmul.bf16.vlgmr.msrb.gmra.mxu1 %v4889_v44  ;;  %v4838_v62 = vadd.f32 %v4801_v16, %v10035_v63  ;;  %v7544_v44 = vor.u32 %v7912_v47, %v7541_v21  ;;  %v7548_v16 = vor.u32 %v7915_v5, %v7547_v14  ;;  %v7475_v47 = vld [vmem:[#allocation14 + $0x360] sm:$0xf]  ;;  %v7896_v21 = vld [vmem:[#allocation14 + $0x364] sm:$0xf]  ;;  %v7477_v5 = vld [vmem:[#allocation14 + $0x370] sm:$0xf0] }
 0xdc4   : > { %v4859_v49 = vadd.f32 %v10076_v10, %v4838_v62  ;;  %v7913_v62 = vld [vmem:[#allocation14 + $0x3ec] sm:$0xf]  ;;  %5282 = vmatpush.bf16.msrb.mxu3 %v7544_v44  ;;  %5331 = vmatpush.bf16.msra.mxu0 %v7548_v16 }
 0xdc6   : > { %v4875_v58 = vmax.f32 %v4859_v49, 0.0 }
 0xdc9   : > { %v4803_v54 = vpop.f32.mrf.mxu0 }
 0xdca   : > { %v4839_v39 = vadd.f32 %v4803_v54, %v10039_v2 }
 0xdcc   : > { %v4860_v53 = vadd.f32 %v10076_v10, %v4839_v39  ;;  %v7910_v39 = vld [vmem:[#allocation14 + $0x3cc] sm:$0xf0] }
 0xdce   : > { %v4876_v37 = vmax.f32 %v4860_v53, 0.0  ;;  %v7908_v53 = vld [vmem:[#allocation14 + $0x3c4] sm:$0xf] }
 0xdd0   : > { %v4890_v56 = vpack.c.bf16 %v4876_v37, %v4875_v58 }
 0xdd1   : > { %v4806_v26 = vpop.f32.mrf.mxu0 }
 0xdd2   : > { %4980 = vmatmul.bf16.gmra.mxu1 %v4890_v56  ;;  %v4840_v32 = vadd.f32 %v4806_v26, %v10041_v9  ;;  %v7525_v56 = vld [vmem:[#allocation14 + $0x3d0] sm:$0xf0]  ;;  %v7531_v26 = vld [vmem:[#allocation14 + $0x3c8] sm:$0xf] }
 0xdd4   : > { %v4861_v20 = vadd.f32 %v10076_v10, %v4840_v32  ;;  %v7911_v32 = vld [vmem:[#allocation14 + $0x3d4] sm:$0xf0] }
 0xdd6   : > { %v4877_v35 = vmax.f32 %v4861_v20, 0.0  ;;  %v7532_v20 = vor.u32 %v7911_v32, %v7531_v26  ;;  %v7461_v26 = vld [vmem:[#allocation14 + $0x350] sm:$0xf0]  ;;  %v7467_v32 = vld [vmem:[#allocation14 + $0x348] sm:$0xf] }
 0xdd8   : > { %5332 = vmatpush.bf16.msra.mxu0 %v7532_v20 }
 0xdd9   : > { %v4808_v51 = vpop.f32.mrf.mxu0 }
 0xdda   : > { %v4841_v30 = vadd.f32 %v4808_v51, %v10044_v15  ;;  %v7528_v51 = vor.u32 %v7908_v53, %v7525_v56  ;;  %v7894_v53 = vld [vmem:[#allocation14 + $0x34c] sm:$0xf0] }
 0xddc   : > { %v4862_v63 = vadd.f32 %v10076_v10, %v4841_v30  ;;  %v7909_v30 = vld [vmem:[#allocation14 + $0x3cc] sm:$0xf]  ;;  %5283 = vmatpush.bf16.msrb.mxu3 %v7528_v51  ;;  %v7895_v51 = vld [vmem:[#allocation14 + $0x354] sm:$0xf0] }
 0xdde   : > { %v4878_v48 = vmax.f32 %v4862_v63, 0.0  ;;  %v7533_v63 = vld [vmem:[#allocation14 + $0x3d8] sm:$0xf0] }
 0xde0   : > { %v4891_v17 = vpack.c.bf16 %v4878_v48, %v4877_v35  ;;  %v7507_v35 = vld [vmem:[#allocation14 + $0x3a0] sm:$0xf]  ;;  %v7536_v48 = vor.u32 %v7909_v30, %v7533_v63  ;;  %v7468_v30 = vor.u32 %v7895_v51, %v7467_v32  ;;  %v7893_v63 = vld [vmem:[#allocation14 + $0x34c] sm:$0xf] }
 0xde1   : > { %v4811_v2 = vpop.f32.mrf.mxu0 }
 0xde2   : > { %4985 = vmatmul.bf16.gmra.mxu1 %v4891_v17  ;;  %v4842_v43 = vadd.f32 %v4811_v2, %v10047_v50  ;;  %v7906_v17 = vld [vmem:[#allocation14 + $0x3ac] sm:$0xf0]  ;;  %v7904_v2 = vld [vmem:[#allocation14 + $0x3a4] sm:$0xf] }
 0xde4   : > { %v4863_v23 = vadd.f32 %v10076_v10, %v4842_v43  ;;  %v7509_v43 = vld [vmem:[#allocation14 + $0x3b0] sm:$0xf0] }
 0xde6   : > { %v4879_v13 = vmax.f32 %v4863_v23, 0.0  ;;  %v7512_v23 = vor.u32 %v7904_v2, %v7509_v43  ;;  %v7890_v2 = vld [vmem:[#allocation14 + $0x32c] sm:$0xf0]  ;;  %v7888_v43 = vld [vmem:[#allocation14 + $0x324] sm:$0xf] }
 0xde8   : > { %5284 = vmatpush.bf16.msrb.mxu3 %v7512_v23  ;;  %v7445_v23 = vld [vmem:[#allocation14 + $0x330] sm:$0xf0] }
 0xde9   : > { %v4813_v36 = vpop.f32.mrf.mxu0 }
 0xdea   : > { %v4843_v28 = vadd.f32 %v4813_v36, %v10049_v38  ;;  %v7508_v36 = vor.u32 %v7906_v17, %v7507_v35  ;;  %v7469_v35 = vld [vmem:[#allocation14 + $0x358] sm:$0xf0]  ;;  %v7443_v17 = vld [vmem:[#allocation14 + $0x320] sm:$0xf] }
 0xdec   : > { %v4864_v9 = vadd.f32 %v10076_v10, %v4843_v28  ;;  %v7515_v28 = vld [vmem:[#allocation14 + $0x3a8] sm:$0xf] }
 0xdee   : > { %v4880_v40 = vmax.f32 %v4864_v9, 0.0  ;;  %v7907_v9 = vld [vmem:[#allocation14 + $0x3b4] sm:$0xf0] }
 0xdf0   : > { %v4892_v12 = vpack.c.bf16 %v4880_v40, %v4879_v13  ;;  %v7905_v13 = vld [vmem:[#allocation14 + $0x3ac] sm:$0xf]  ;;  %v7516_v40 = vor.u32 %v7907_v9, %v7515_v28  ;;  %v7451_v28 = vld [vmem:[#allocation14 + $0x328] sm:$0xf]  ;;  %v7891_v9 = vld [vmem:[#allocation14 + $0x334] sm:$0xf0] }
 0xdf1   : > { %v4816_v15 = vpop.f32.mrf.mxu0 }
 0xdf2   : > { %4990 = vmatmul.bf16.gmra.mxu1 %v4892_v12  ;;  %v4844_v41 = vadd.f32 %v4816_v15, %v10052_v46  ;;  %v7517_v12 = vld [vmem:[#allocation14 + $0x3b8] sm:$0xf0]  ;;  %v7491_v15 = vld [vmem:[#allocation14 + $0x380] sm:$0xf]  ;;  %5333 = vmatpush.bf16.msra.mxu0 %v7516_v40  ;;  %v7448_v40 = vor.u32 %v7888_v43, %v7445_v23  ;;  %v10625_v23 = vld [vmem:[#allocation38_spill] sm:$0xff] }
 0xdf4   : > { %v4865_v57 = vadd.f32 %v10076_v10, %v4844_v41  ;;  %v7902_v41 = vld [vmem:[#allocation14 + $0x38c] sm:$0xf0] }
 0xdf6   : > { %v4881_v60 = vmax.f32 %v4865_v57, 0.0  ;;  %v7520_v57 = vor.u32 %v7905_v13, %v7517_v12  ;;  %v7452_v12 = vor.u32 %v7891_v9, %v7451_v28  ;;  %v10626_v9 = vld [vmem:[#allocation41_spill] sm:$0xff] }
 0xdf9   : > { %v4818_v33 = vpop.f32.mrf.mxu0 }
 0xdfa   : > { %v4845_v8 = vadd.f32 %v4818_v33, %v10054_v27  ;;  %v7540_v27 = vor.u32 %v7914_v1, %v7539_v22 }
 0xdfc   : > { %v4866_v50 = vadd.f32 %v10076_v10, %v4845_v8  ;;  %5233 = vmatpush.bf16.msrb.mxu2 %v7540_v27  ;;  %v7900_v8 = vld [vmem:[#allocation14 + $0x384] sm:$0xf]  ;;  %v7898_v27 = vld [vmem:[#allocation14 + $0x36c] sm:$0xf0] }
 0xdfd   : > { %v7476_v14 = vor.u32 %v7898_v27, %v7475_v47 }
 0xdfe   : > { %v4882_v7 = vmax.f32 %v4866_v50, 0.0  ;;  %v7493_v50 = vld [vmem:[#allocation14 + $0x390] sm:$0xf0] }
 0xe00   : > { %v4893_v4 = vpack.c.bf16 %v4882_v7, %v4881_v60  ;;  %v7492_v60 = vor.u32 %v7902_v41, %v7491_v15  ;;  %v7499_v7 = vld [vmem:[#allocation14 + $0x388] sm:$0xf]  ;;  %v7889_v15 = vld [vmem:[#allocation14 + $0x32c] sm:$0xf]  ;;  %v7453_v41 = vld [vmem:[#allocation14 + $0x338] sm:$0xf0] }
 0xe01   : > { %v4821_v38 = vpop.f32.mrf.mxu0 }
 0xe02   : > { %4995 = vmatmul.bf16.gmra.mxu1 %v4893_v4  ;;  %v4846_v52 = vadd.f32 %v4821_v38, %v10057_v42  ;;  %v7549_v42 = vld [vmem:[#allocation14 + $0x3f8] sm:$0xf0]  ;;  %v7903_v4 = vld [vmem:[#allocation14 + $0x394] sm:$0xf0]  ;;  %v7901_v38 = vld [vmem:[#allocation14 + $0x38c] sm:$0xf] }
 0xe03   : > { %v7552_v54 = vor.u32 %v7913_v62, %v7549_v42  ;;  %v7480_v62 = vor.u32 %v7896_v21, %v7477_v5 }
 0xe04   : > { %v4867_v6 = vadd.f32 %v10076_v10, %v4846_v52  ;;  %v7496_v52 = vor.u32 %v7900_v8, %v7493_v50  ;;  %v7886_v8 = vld [vmem:[#allocation14 + $0x30c] sm:$0xf0]  ;;  %v7884_v50 = vld [vmem:[#allocation14 + $0x304] sm:$0xf] }
 0xe05   : > { %5380 = vmatpush.bf16.msra.mxu1 %v7552_v54  ;;  %v7897_v54 = vld [vmem:[#allocation14 + $0x36c] sm:$0xf] }
 0xe06   : > { %v4883_v3 = vmax.f32 %v4867_v6, 0.0  ;;  %v7501_v6 = vld [vmem:[#allocation14 + $0x398] sm:$0xf0]  ;;  %5285 = vmatpush.bf16.msrb.mxu3 %v7496_v52  ;;  %v7887_v52 = vld [vmem:[#allocation14 + $0x314] sm:$0xf0] }
 0xe09   : > { %v4823_v11 = vpop.f32.mrf.mxu0  ;;  %5381 = vmatpush.bf16.msra.mxu1 %v7536_v48  ;;  %v7472_v48 = vor.u32 %v7893_v63, %v7469_v35  ;;  %v10624_v35 = vld [vmem:[#allocation39_spill] sm:$0xff] }
 0xe0a   : > { %v4847_v18 = vadd.f32 %v4823_v11, %v10060_v25  ;;  %v7523_v25 = vld [vmem:[#allocation14 + $0x3c0] sm:$0xf]  ;;  %v7500_v11 = vor.u32 %v7903_v4, %v7499_v7  ;;  %5286 = vmatpush.bf16.msrb.mxu3 %v7480_v62  ;;  %v7429_v4 = vld [vmem:[#allocation14 + $0x310] sm:$0xf0] }
 0xe0b   : > { %v7524_v37 = vor.u32 %v7910_v39, %v7523_v25  ;;  %v7459_v39 = vld [vmem:[#allocation14 + $0x340] sm:$0xf] }
 0xe0c   : > { %v4868_v46 = vadd.f32 %v10076_v10, %v4847_v18  ;;  %5334 = vmatpush.bf16.msra.mxu0 %v7500_v11  ;;  %v7460_v56 = vor.u32 %v7894_v53, %v7459_v39 }
 0xe0d   : > { %5234 = vmatpush.bf16.msrb.mxu2 %v7524_v37  ;;  %5382 = vmatpush.bf16.msra.mxu1 %v7520_v57  ;;  %v7427_v57 = vld [vmem:[#allocation14 + $0x300] sm:$0xf] }
 0xe0e   : > { %v4884_v34 = vmax.f32 %v4868_v46, 0.0  ;;  %v7504_v46 = vor.u32 %v7901_v38, %v7501_v6  ;;  %v7428_v7 = vor.u32 %v7886_v8, %v7427_v57  ;;  %v7435_v38 = vld [vmem:[#allocation14 + $0x308] sm:$0xf]  ;;  %v7432_v6 = vor.u32 %v7884_v50, %v7429_v4  ;;  %v10627_v57 = vld [vmem:[#allocation40_spill] sm:$0xff]  ;;  %v10628_v50 = vld [vmem:[#allocation43_spill] sm:$0xff] }
 0xe10   : > { %v4894_v49 = vpack.c.bf16 %v4884_v34, %v4883_v3  ;;  %v7483_v3 = vld [vmem:[#allocation14 + $0x368] sm:$0xf]  ;;  %v7899_v34 = vld [vmem:[#allocation14 + $0x374] sm:$0xf0] }
 0xe11   : > { %v4826_v58 = vpop.f32.mrf.mxu0  ;;  %5235 = vmatpush.bf16.msrb.mxu2 %v7508_v36  ;;  %5383 = vmatpush.bf16.msra.mxu1 %v7504_v46  ;;  %v7484_v42 = vor.u32 %v7899_v34, %v7483_v3  ;;  %v7444_v36 = vor.u32 %v7890_v2, %v7443_v17  ;;  %v7885_v46 = vld [vmem:[#allocation14 + $0x30c] sm:$0xf] }
 0xe12   : > { %5000 = vmatmul.bf16.gmra.mxu1 %v4894_v49  ;;  %v4848_v33 = vadd.f32 %v4826_v58, %v10062_v55  ;;  %v7485_v49 = vld [vmem:[#allocation14 + $0x378] sm:$0xf0]  ;;  %v7892_v58 = vld [vmem:[#allocation14 + $0x344] sm:$0xf] }
 0xe13   : > { %5335 = vmatpush.bf16.msra.mxu0 %v7484_v42  ;;  %v7464_v20 = vor.u32 %v7892_v58, %v7461_v26 }
 0xe14   : > { %v4869_v22 = vadd.f32 %v10076_v10, %v4848_v33  ;;  %v7456_v33 = vor.u32 %v7889_v15, %v7453_v41 }
 0xe15   : > { %5236 = vmatpush.bf16.msrb.mxu2 %v7492_v60  ;;  %5287 = vmatpush.bf16.msrb.mxu3 %v7464_v20 }
 0xe16   : > { %v4885_v44 = vmax.f32 %v4869_v22, 0.0  ;;  %v7437_v22 = vld [vmem:[#allocation14 + $0x318] sm:$0xf0] }
 0xe17   : > { %5336 = vmatpush.bf16.msra.mxu0 %v7468_v30  ;;  %v10623_v30 = vld [vmem:[#allocation37_spill] sm:$0xff] }
 0xe19   : > { %v4828_v18 = vpop.f32.mrf.mxu0  ;;  %5237 = vmatpush.bf16.msrb.mxu2 %v7476_v14  ;;  %5288 = vmatpush.bf16.msrb.mxu3 %v7448_v40 }
 0xe1a   : > { %v4849_v55 = vadd.f32 %v4828_v18, %v10065_v31  ;;  %v7488_v31 = vor.u32 %v7897_v54, %v7485_v49  ;;  %v7436_v18 = vor.u32 %v7887_v52, %v7435_v38 }
 0xe1b   : > { %5337 = vmatpush.bf16.msra.mxu0 %v7452_v12 }
 0xe1c   : > { %v4870_v1 = vadd.f32 %v10076_v10, %v4849_v55  ;;  %5384 = vmatpush.bf16.msra.mxu1 %v7488_v31  ;;  %v7440_v55 = vor.u32 %v7885_v46, %v7437_v22 }
 0xe1d   : > { %5238 = vmatpush.bf16.msrb.mxu2 %v7460_v56  ;;  %5289 = vmatpush.bf16.msrb.mxu3 %v7432_v6  ;;  %v10622_v56 = vld [vmem:[#allocation56_spill] sm:$0xff] }
 0xe1e   : > { %v4886_v16 = vmax.f32 %v4870_v1, 0.0 }
 0xe1f   : > { %5338 = vmatpush.bf16.msra.mxu0 %v7436_v18  ;;  %v10630_v18 = vld [vmem:[#allocation45_spill] sm:$0xff] }
 0xe20   : > { %v4895_v25 = vpack.c.bf16 %v4886_v16, %v4885_v44  ;;  %5385 = vmatpush.bf16.msra.mxu1 %v7472_v48 }
 0xe21   : > { %v4831_v37 = vpop.f32.mrf.mxu0  ;;  %5239 = vmatpush.bf16.msrb.mxu2 %v7444_v36 }
 0xe22   : > { %5005 = vmatmul.bf16.gmra.mxu1 %v4895_v25  ;;  %v4850_v13 = vadd.f32 %v4831_v37, %v10068_v45 }
 0xe24   : > { %5386 = vmatpush.bf16.msra.mxu1 %v7456_v33  ;;  %v4871_v11 = vadd.f32 %v10076_v10, %v4850_v13 }
 0xe25   : > { %5240 = vmatpush.bf16.msrb.mxu2 %v7428_v7 }
 0xe26   : > { %v4887_v47 = vmax.f32 %v4871_v11, 0.0 }
 0xe28   : > { %5387 = vmatpush.bf16.msra.mxu1 %v7440_v55 }
 0xe29   : > { %v4833_v60 = vpop.f32.mrf.mxu0 }
 0xe2a   : > { %v4851_v45 = vadd.f32 %v4833_v60, %v10070_v19  ;;  %v10112_v19 = vld [vmem:[%s10559_s0 + $0x2] ss:$0 sm:$0xff] }
 0xe2c   : > { %v4872_v1 = vadd.f32 %v10076_v10, %v4851_v45  ;;  %v10629_v45 = vld [vmem:[#allocation42_spill] sm:$0xff] }
 0xe2e   : > { %v4888_v27 = vmax.f32 %v4872_v1, 0.0 }
 0xe30   : > { %v4896_v21 = vpack.c.bf16 %v4888_v27, %v4887_v47 }
 0xe32   : > { %5010 = vmatmul.bf16.gmra.mxu1 %v4896_v21  ;;  %v10631_v21 = vld [vmem:[#allocation44_spill] sm:$0xff] }
 0xe3f   : > { %v4976_v14 = vpop.f32.mrf.mxu1 }
 0xe40   : > { %v4977_v5 = vadd.f32 %v10112_v19, %v4976_v14 }
 0xe42   : > { %v5016_v10 = vadd.f32 %v4977_v5, %v9826_v29  ;;  %v10632_v5 = vld [vmem:[#allocation47_spill] sm:$0xff] }
 0xe47   : > { %v4978_v3 = vpop.f32.mrf.mxu1 }
 0xe48   : > { %v4979_v34 = vadd.f32 %v10112_v19, %v4978_v3 }
 0xe4a   : > { %v5017_v44 = vadd.f32 %v4979_v34, %v9829_v0 }
 0xe4c   : > { %v5032_v16 = vpack.c.bf16 %v5017_v44, %v5016_v10 }
 0xe4e   : > { %5241 = vmatmul.bf16.vlgmr.msrb.gmra.mxu2 %v5032_v16  ;;  %5290 = vmatmul.bf16.vlgmr.msrb.gmra.mxu3 %v5032_v16 }
 0xe4f   : > { %5339 = vmatmul.bf16.vlgmr.msra.gmra.mxu0 %v5032_v16  ;;  %5388 = vmatmul.bf16.vlgmr.msra.gmra.mxu1 %v5032_v16  ;;  %v4981_v62 = vpop.f32.mrf.mxu1 }
 0xe50   : > { %v4982_v42 = vadd.f32 %v10112_v19, %v4981_v62 }
 0xe52   : > { %v5018_v31 = vadd.f32 %v4982_v42, %v9836_v24 }
 0xe57   : > { %v4983_v54 = vpop.f32.mrf.mxu1 }
 0xe58   : > { %v4984_v49 = vadd.f32 %v10112_v19, %v4983_v54 }
 0xe5a   : > { %v5019_v25 = vadd.f32 %v4984_v49, %v9839_v59 }
 0xe5c   : > { %v5033_v39 = vpack.c.bf16 %v5019_v25, %v5018_v31 }
 0xe5e   : > { %5246 = vmatmul.bf16.gmra.mxu2 %v5033_v39  ;;  %5295 = vmatmul.bf16.gmra.mxu3 %v5033_v39 }
 0xe5f   : > { %5344 = vmatmul.bf16.gmra.mxu0 %v5033_v39  ;;  %5393 = vmatmul.bf16.gmra.mxu1 %v5033_v39  ;;  %v4986_v29 = vpop.f32.mrf.mxu1 }
 0xe60   : > { %v4987_v0 = vadd.f32 %v10112_v19, %v4986_v29 }
 0xe62   : > { %v5020_v37 = vadd.f32 %v4987_v0, %v9846_v61 }
 0xe67   : > { %v4988_v53 = vpop.f32.mrf.mxu1 }
 0xe68   : > { %v4989_v58 = vadd.f32 %v10112_v19, %v4988_v53 }
 0xe6a   : > { %v5021_v26 = vadd.f32 %v4989_v58, %v10622_v56 }
 0xe6c   : > { %v5034_v32 = vpack.c.bf16 %v5021_v26, %v5020_v37 }
 0xe6e   : > { %5251 = vmatmul.bf16.gmra.mxu2 %v5034_v32  ;;  %5300 = vmatmul.bf16.gmra.mxu3 %v5034_v32 }
 0xe6f   : > { %5349 = vmatmul.bf16.gmra.mxu0 %v5034_v32  ;;  %5398 = vmatmul.bf16.gmra.mxu1 %v5034_v32  ;;  %v4991_v24 = vpop.f32.mrf.mxu1 }
 0xe70   : > { %v4992_v59 = vadd.f32 %v10112_v19, %v4991_v24 }
 0xe72   : > { %v5022_v63 = vadd.f32 %v4992_v59, %v10623_v30 }
 0xe77   : > { %v4993_v51 = vpop.f32.mrf.mxu1 }
 0xe78   : > { %v4994_v20 = vadd.f32 %v10112_v19, %v4993_v51 }
 0xe7a   : > { %v5023_v48 = vadd.f32 %v4994_v20, %v10624_v35 }
 0xe7c   : > { %v5035_v17 = vpack.c.bf16 %v5023_v48, %v5022_v63 }
 0xe7e   : > { %5256 = vmatmul.bf16.gmra.mxu2 %v5035_v17  ;;  %5305 = vmatmul.bf16.gmra.mxu3 %v5035_v17 }
 0xe7f   : > { %5354 = vmatmul.bf16.gmra.mxu0 %v5035_v17  ;;  %5403 = vmatmul.bf16.gmra.mxu1 %v5035_v17  ;;  %v4996_v61 = vpop.f32.mrf.mxu1 }
 0xe80   : > { %v4997_v2 = vadd.f32 %v10112_v19, %v4996_v61 }
 0xe82   : > { %v5024_v28 = vadd.f32 %v4997_v2, %v10625_v23 }
 0xe87   : > { %v4998_v43 = vpop.f32.mrf.mxu1 }
 0xe88   : > { %v4999_v36 = vadd.f32 %v10112_v19, %v4998_v43 }
 0xe8a   : > { %v5025_v13 = vadd.f32 %v4999_v36, %v10626_v9 }
 0xe8c   : > { %v5036_v40 = vpack.c.bf16 %v5025_v13, %v5024_v28 }
 0xe8e   : > { %5261 = vmatmul.bf16.gmra.mxu2 %v5036_v40  ;;  %5310 = vmatmul.bf16.gmra.mxu3 %v5036_v40 }
 0xe8f   : > { %5359 = vmatmul.bf16.gmra.mxu0 %v5036_v40  ;;  %5408 = vmatmul.bf16.gmra.mxu1 %v5036_v40  ;;  %v5001_v12 = vpop.f32.mrf.mxu1 }
 0xe90   : > { %v5002_v15 = vadd.f32 %v10112_v19, %v5001_v12 }
 0xe92   : > { %v5026_v8 = vadd.f32 %v5002_v15, %v10627_v57 }
 0xe97   : > { %v5003_v41 = vpop.f32.mrf.mxu1 }
 0xe98   : > { %v5004_v33 = vadd.f32 %v10112_v19, %v5003_v41 }
 0xe9a   : > { %v5027_v60 = vadd.f32 %v5004_v33, %v10628_v50 }
 0xe9c   : > { %v5037_v7 = vpack.c.bf16 %v5027_v60, %v5026_v8 }
 0xe9e   : > { %5266 = vmatmul.bf16.gmra.mxu2 %v5037_v7  ;;  %5315 = vmatmul.bf16.gmra.mxu3 %v5037_v7 }
 0xe9f   : > { %5364 = vmatmul.bf16.gmra.mxu0 %v5037_v7  ;;  %5413 = vmatmul.bf16.gmra.mxu1 %v5037_v7  ;;  %v5006_v4 = vpop.f32.mrf.mxu1 }
 0xea0   : > { %v5007_v38 = vadd.f32 %v10112_v19, %v5006_v4 }
 0xea2   : > { %v10141_v6 = vadd.f32 %v5007_v38, %v10629_v45 }
 0xea7   : > { %v5008_v52 = vpop.f32.mrf.mxu1 }
 0xea8   : > { %v5009_v11 = vadd.f32 %v10112_v19, %v5008_v52 }
 0xeaa   : > { %v10144_v46 = vadd.f32 %v5009_v11, %v10630_v18 }
 0xeac   : > { %v5038_v22 = vpack.c.bf16 %v10144_v46, %v10141_v6 }
 0xeae   : > { %5271 = vmatmul.bf16.gmra.mxu2 %v5038_v22  ;;  %5320 = vmatmul.bf16.gmra.mxu3 %v5038_v22 }
 0xeaf   : > { %5369 = vmatmul.bf16.gmra.mxu0 %v5038_v22  ;;  %5418 = vmatmul.bf16.gmra.mxu1 %v5038_v22  ;;  %v5011_v55 = vpop.f32.mrf.mxu1 }
 0xeb0   : > { %v5012_v1 = vadd.f32 %v10112_v19, %v5011_v55 }
 0xeb2   : > { %v10151_v14 = vadd.f32 %v5012_v1, %v10631_v21 }
 0xeb7   : > { %v5013_v47 = vpop.f32.mrf.mxu1 }
 0xeb8   : > { %v5014_v27 = vadd.f32 %v10112_v19, %v5013_v47 }
 0xeba   : > { %v10154_v3 = vadd.f32 %v5014_v27, %v10632_v5 }
 0xebc   : > { %v5039_v34 = vpack.c.bf16 %v10154_v3, %v10151_v14 }
 0xebe   : > { %5276 = vmatmul.bf16.gmra.mxu2 %v5039_v34  ;;  %5325 = vmatmul.bf16.gmra.mxu3 %v5039_v34 }
 0xebf   : > { %5374 = vmatmul.bf16.gmra.mxu0 %v5039_v34  ;;  %5423 = vmatmul.bf16.gmra.mxu1 %v5039_v34 }
 0xecc   : > { %v10158_v10 = vpop.f32.mrf.mxu0 }
 0xed1   : > { %v5242_v44 = vpop.f32.mrf.mxu2  ;;  %v5291_v16 = vpop.f32.mrf.mxu3 }
 0xed2   : > { %v10160_v62 = vpack.c.bf16 %v5291_v16, %v5242_v44 }
 0xed4   : > { %v10162_v19 = vpop.f32.mrf.mxu0 }
 0xed9   : > { %v10164_v42 = vpop.f32.mrf.mxu2  ;;  %v10166_v54 = vpop.f32.mrf.mxu3 }
 0xedc   : > { %v10168_v49 = vpop.f32.mrf.mxu0 }
 0xee1   : > { %v5247_v31 = vpop.f32.mrf.mxu2  ;;  %v5296_v25 = vpop.f32.mrf.mxu3 }
 0xee2   : > { %v10170_v39 = vpack.c.bf16 %v5296_v25, %v5247_v31 }
 0xee4   : > { %v10172_v29 = vpop.f32.mrf.mxu0 }
 0xee9   : > { %v10174_v0 = vpop.f32.mrf.mxu2  ;;  %v10176_v53 = vpop.f32.mrf.mxu3 }
 0xeec   : > { %v10178_v58 = vpop.f32.mrf.mxu0 }
 0xef1   : > { %v5252_v37 = vpop.f32.mrf.mxu2  ;;  %v5301_v56 = vpop.f32.mrf.mxu3 }
 0xef2   : > { %v10180_v26 = vpack.c.bf16 %v5301_v56, %v5252_v37 }
 0xef4   : > { %v10182_v32 = vpop.f32.mrf.mxu0 }
 0xef9   : > { %v10184_v24 = vpop.f32.mrf.mxu2  ;;  %v10186_v59 = vpop.f32.mrf.mxu3 }
 0xefc   : > { %v10188_v51 = vpop.f32.mrf.mxu0 }
 0xf01   : > { %v5257_v20 = vpop.f32.mrf.mxu2  ;;  %v5306_v30 = vpop.f32.mrf.mxu3 }
 0xf02   : > { %v10190_v63 = vpack.c.bf16 %v5306_v30, %v5257_v20 }
 0xf04   : > { %v10192_v35 = vpop.f32.mrf.mxu0 }
 0xf09   : > { %v10194_v48 = vpop.f32.mrf.mxu2  ;;  %v10196_v17 = vpop.f32.mrf.mxu3 }
 0xf0c   : > { %v10198_v61 = vpop.f32.mrf.mxu0 }
 0xf11   : > { %v5262_v2 = vpop.f32.mrf.mxu2  ;;  %v5311_v43 = vpop.f32.mrf.mxu3 }
 0xf12   : > { %v10200_v36 = vpack.c.bf16 %v5311_v43, %v5262_v2 }
 0xf14   : > { %v5362_v23 = vpop.f32.mrf.mxu0 }
 0xf19   : > { %v5264_v28 = vpop.f32.mrf.mxu2  ;;  %v5313_v9 = vpop.f32.mrf.mxu3 }
 0xf1c   : > { %v5365_v13 = vpop.f32.mrf.mxu0 }
 0xf1d   : > { %v5450_v56 = vpack.c.bf16 %v5365_v13, %v5365_v13 }
 0xf21   : > { %v5267_v40 = vpop.f32.mrf.mxu2  ;;  %v5316_v12 = vpop.f32.mrf.mxu3 }
 0xf22   : > { %v5449_v13 = vpack.c.bf16 %v5316_v12, %v5267_v40 }
 0xf24   : > { %v5367_v15 = vpop.f32.mrf.mxu0  ;;  %v5487_v40 = vunpack.c.l.b16 %v5449_v13  ;;  %v5594_v12 = vunpack.c.h.b16 %v5449_v13 }
 0xf25   : > { %v5452_v5 = vpack.c.bf16 %v5367_v15, %v5367_v15 }
 0xf29   : > { %v5269_v41 = vpop.f32.mrf.mxu2  ;;  %v5318_v33 = vpop.f32.mrf.mxu3 }
 0xf2c   : > { %v5370_v57 = vpop.f32.mrf.mxu0 }
 0xf2d   : > { %v5454_v1 = vpack.c.bf16 %v5370_v57, %v5370_v57  ;;  %v5597_v57 = vunpack.c.l.b16 %v5452_v5 }
 0xf2f   : > { %v5599_v20 = vunpack.c.l.b16 %v5454_v1 }
 0xf31   : > { %v5272_v8 = vpop.f32.mrf.mxu2  ;;  %v5321_v50 = vpop.f32.mrf.mxu3 }
 0xf32   : > { %v5453_v30 = vpack.c.bf16 %v5321_v50, %v5272_v8 }
 0xf34   : > { %v5372_v60 = vpop.f32.mrf.mxu0  ;;  %v5489_v8 = vunpack.c.l.b16 %v5453_v30  ;;  %v5598_v50 = vunpack.c.h.b16 %v5453_v30  ;;  %v5590_v30 = vunpack.c.h.b16 %v10200_v36 }
 0xf35   : > { %v5456_v22 = vpack.c.bf16 %v5372_v60, %v5372_v60 }
 0xf37   : > { %v5601_v34 = vunpack.c.l.b16 %v5456_v22 }
 0xf39   : > { %v5274_v7 = vpop.f32.mrf.mxu2  ;;  %v5323_v4 = vpop.f32.mrf.mxu3 }
 0xf3a   : > { %v5455_v25 = vpack.c.bf16 %v5323_v4, %v5274_v7  ;;  %v5446_v7 = vpack.c.bf16 %v10198_v61, %v10198_v61  ;;  %v5595_v4 = vunpack.c.l.b16 %v5450_v56  ;;  %v5442_v61 = vpack.c.bf16 %v10188_v51, %v10188_v51 }
 0xf3b   : > { %v5438_v51 = vpack.c.bf16 %v10178_v58, %v10178_v58 }
 0xf3c   : > { %v5375_v38 = vpop.f32.mrf.mxu0  ;;  %v5600_v15 = vunpack.c.h.b16 %v5455_v25  ;;  %v5587_v56 = vunpack.c.l.b16 %v5442_v61  ;;  %v8164_v61 = vld [vmem:[%s8976_s6 + $0x40] sm:$0xff] }
 0xf3d   : > { %v5458_v45 = vpack.c.bf16 %v5375_v38, %v5375_v38 }
 0xf3e   : > { %v5618_v5 = vpack.c.b16 %v5600_v15, %v5598_v50 }
 0xf3f   : > { %v5603_v47 = vunpack.c.l.b16 %v5458_v45  ;;  %v5451_v45 = vpack.c.bf16 %v5318_v33, %v5269_v41  ;;  %v5447_v41 = vpack.c.bf16 %v5313_v9, %v5264_v28  ;;  %v5617_v33 = vpack.c.b16 %v5597_v57, %v5595_v4 }
 0xf40   : > { %v5443_v28 = vpack.c.bf16 %v10196_v17, %v10194_v48  ;;  %v5439_v17 = vpack.c.bf16 %v10186_v59, %v10184_v24  ;;  %v5583_v57 = vunpack.c.l.b16 %v5438_v51  ;;  %v5435_v59 = vpack.c.bf16 %v10176_v53, %v10174_v0  ;;  %v8177_v51 = vld [vmem:[%s8982_s19 + $0x70] sm:$0xff] }
 0xf41   : > { %v5277_v52 = vpop.f32.mrf.mxu2  ;;  %v5326_v11 = vpop.f32.mrf.mxu3  ;;  %v5582_v4 = vunpack.c.h.b16 %v10180_v26  ;;  %v5431_v0 = vpack.c.bf16 %v10166_v54, %v10164_v42  ;;  %v5477_v54 = vunpack.c.l.b16 %v10160_v62 }
 0xf42   : > { %v5457_v21 = vpack.c.bf16 %v5326_v11, %v5277_v52  ;;  %v5490_v52 = vunpack.c.l.b16 %v5455_v25  ;;  %v5584_v15 = vunpack.c.h.b16 %v5439_v17  ;;  %v5480_v13 = vunpack.c.l.b16 %v5435_v59 }
 0xf44   : > { %v5377_v18 = vpop.f32.mrf.mxu0  ;;  %v5491_v2 = vunpack.c.l.b16 %v5457_v21  ;;  %v5602_v43 = vunpack.c.h.b16 %v5457_v21  ;;  %v5499_v21 = vpack.c.b16 %v5490_v52, %v5489_v8  ;;  %v5482_v52 = vunpack.c.l.b16 %v5439_v17 }
 0xf45   : > { %v5460_v55 = vpack.c.bf16 %v5377_v18, %v5377_v18  ;;  %v5448_v18 = vpack.c.bf16 %v5362_v23, %v5362_v23  ;;  %v5444_v23 = vpack.c.bf16 %v10192_v35, %v10192_v35  ;;  %v5580_v8 = vunpack.c.h.b16 %v5435_v59 }
 0xf47   : > { %v5605_v27 = vunpack.c.l.b16 %v5460_v55  ;;  %v5619_v55 = vpack.c.b16 %v5601_v34, %v5599_v20  ;;  %v5593_v1 = vunpack.c.l.b16 %v5448_v18  ;;  %v5591_v34 = vunpack.c.l.b16 %v5446_v7 }
 0xf48   : > { %v5589_v35 = vunpack.c.l.b16 %v5444_v23  ;;  %v5485_v20 = vunpack.c.l.b16 %v10200_v36  ;;  %v5434_v18 = vpack.c.bf16 %v10168_v49, %v10168_v49  ;;  %v5483_v36 = vunpack.c.l.b16 %v10190_v63 }
 0xf49   : > { %v5621_v44 = vpack.c.b16 %v5605_v27, %v5603_v47  ;;  %v5279_v16 = vpop.f32.mrf.mxu2  ;;  %v5328_v31 = vpop.f32.mrf.mxu3  ;;  %v5488_v47 = vunpack.c.l.b16 %v5451_v45  ;;  %v5596_v27 = vunpack.c.h.b16 %v5451_v45  ;;  %v5615_v9 = vpack.c.b16 %v5593_v1, %v5591_v34  ;;  %v8165_v34 = vld [vmem:[%s8982_s19 + $0x40] sm:$0xff] }
 0xf4a   : > { %v5459_v37 = vpack.c.bf16 %v5328_v31, %v5279_v16  ;;  %v5486_v16 = vunpack.c.l.b16 %v5447_v41  ;;  %v5592_v31 = vunpack.c.h.b16 %v5447_v41  ;;  %v5586_v45 = vunpack.c.h.b16 %v10190_v63 }
 0xf4b   : > { %5687 = vmatpush.bf16.msrb.mxu0 %v5621_v44  ;;  %v5440_v44 = vpack.c.bf16 %v10182_v32, %v10182_v32  ;;  %v5498_v25 = vpack.c.b16 %v5488_v47, %v5487_v40  ;;  %v5436_v32 = vpack.c.bf16 %v10172_v29, %v10172_v29  ;;  %v5432_v29 = vpack.c.bf16 %v10162_v19, %v10162_v19  ;;  %v8166_v40 = vld [vmem:[%s8976_s6 + $0x48] sm:$0xff] }
 0xf4c   : > { %v5492_v38 = vunpack.c.l.b16 %v5459_v37  ;;  %v5604_v60 = vunpack.c.h.b16 %v5459_v37  ;;  %v5616_v37 = vpack.c.b16 %v5596_v27, %v5594_v12  ;;  %v5614_v58 = vpack.c.b16 %v5592_v31, %v5590_v30  ;;  %v8168_v12 = vld [vmem:[%s8976_s6 + $0x50] sm:$0xff]  ;;  %v8174_v31 = vld [vmem:[%s8976_s6 + $0x68] sm:$0xff] }
 0xf4d   : > { %v5585_v48 = vunpack.c.l.b16 %v5440_v44  ;;  %v5581_v24 = vunpack.c.l.b16 %v5436_v32  ;;  %v5579_v7 = vunpack.c.l.b16 %v5434_v18  ;;  %v5481_v63 = vunpack.c.l.b16 %v10180_v26  ;;  %v8169_v44 = vld [vmem:[%s8982_s19 + $0x50] sm:$0xff] }
 0xf4e   : > { %v5500_v11 = vpack.c.b16 %v5492_v38, %v5491_v2  ;;  %v5620_v22 = vpack.c.b16 %v5604_v60, %v5602_v43  ;;  %v5613_v2 = vpack.c.b16 %v5589_v35, %v5587_v56  ;;  %v5484_v43 = vunpack.c.l.b16 %v5443_v28  ;;  %v8170_v35 = vld [vmem:[%s8976_s6 + $0x58] sm:$0xff] }
 0xf4f   : > { %5688 = vmatpush.bf16.msrb.mxu0 %v5619_v55  ;;  %v5588_v38 = vunpack.c.h.b16 %v5443_v28  ;;  %v5497_v60 = vpack.c.b16 %v5486_v16, %v5485_v20  ;;  %v5611_v55 = vpack.c.b16 %v5585_v48, %v5583_v57  ;;  %v5577_v19 = vunpack.c.l.b16 %v5432_v29  ;;  %v8171_v28 = vld [vmem:[%s8982_s19 + $0x58] sm:$0xff]  ;;  %v8173_v16 = vld [vmem:[%s8982_s19 + $0x60] sm:$0xff] }
 0xf50   : > { %5509 = vmatpush.bf16.msra.mxu2 %v5500_v11  ;;  %5638 = vmatpush.bf16.msra.mxu3 %v5620_v22  ;;  %v5496_v11 = vpack.c.b16 %v5484_v43, %v5483_v36  ;;  %v5430_v22 = vpack.c.bf16 %v10158_v10, %v10158_v10  ;;  %v5609_v53 = vpack.c.b16 %v5581_v24, %v5579_v7  ;;  %v5479_v10 = vunpack.c.l.b16 %v10170_v39  ;;  %v8178_v56 = vld [vmem:[%s8976_s6 + $0x78] sm:$0xff] }
 0xf51   : > { %v5612_v49 = vpack.c.b16 %v5588_v38, %v5586_v45  ;;  %v5495_v50 = vpack.c.b16 %v5482_v52, %v5481_v63  ;;  %v5610_v23 = vpack.c.b16 %v5584_v15, %v5582_v4  ;;  %v5578_v41 = vunpack.c.h.b16 %v10170_v39  ;;  %v8179_v20 = vld [vmem:[%s8982_s19 + $0x78] sm:$0xff] }
 0xf52   : > { %v5575_v1 = vunpack.c.l.b16 %v5430_v22  ;;  %v5576_v47 = vunpack.c.h.b16 %v5431_v0  ;;  %v5494_v27 = vpack.c.b16 %v5480_v13, %v5479_v10 }
 0xf53   : > { %5689 = vmatpush.bf16.msrb.mxu0 %v5617_v33  ;;  %v5478_v33 = vunpack.c.l.b16 %v5431_v0  ;;  %v5608_v42 = vpack.c.b16 %v5580_v8, %v5578_v41 }
 0xf54   : > { %5510 = vmatpush.bf16.msra.mxu2 %v5499_v21  ;;  %5639 = vmatpush.bf16.msra.mxu3 %v5618_v5  ;;  %v5607_v26 = vpack.c.b16 %v5577_v19, %v5575_v1  ;;  %v5574_v21 = vunpack.c.h.b16 %v10160_v62  ;;  %v8167_v62 = vld [vmem:[%s8982_s19 + $0x48] sm:$0xff] }
 0xf55   : > { %v5493_v5 = vpack.c.b16 %v5478_v33, %v5477_v54 }
 0xf56   : > { %v5606_v39 = vpack.c.b16 %v5576_v47, %v5574_v21 }
 0xf57   : > { %5690 = vmatpush.bf16.msrb.mxu0 %v5615_v9  ;;  %v8172_v9 = vld [vmem:[%s8976_s6 + $0x60] sm:$0xff] }
 0xf58   : > { %5511 = vmatpush.bf16.msra.mxu2 %v5498_v25  ;;  %5640 = vmatpush.bf16.msra.mxu3 %v5616_v37  ;;  %v8175_v25 = vld [vmem:[%s8982_s19 + $0x68] sm:$0xff]  ;;  %v8176_v37 = vld [vmem:[%s8976_s6 + $0x70] sm:$0xff]  ;;  %s8560_s6 = scalar_lea.hbm %s10644_s5, 64 }
 0xf59   : > { %p8562_p9 = scmp.lt.s32.totalorder %s8560_s6, %s8556_s26 }
 0xf5b   : > { %5691 = vmatpush.bf16.msrb.mxu0 %v5613_v2  ;;  %p8563_p13 = por %p8562_p9, %p8561_p7 }
 0xf5c   : > { %5512 = vmatpush.bf16.msra.mxu2 %v5497_v60  ;;  %5641 = vmatpush.bf16.msra.mxu3 %v5614_v58 }
 0xf5d   : > { %p8564_p0 = pnand %p8563_p13, %p8559_p3 }
 0xf5f   : > { %5692 = vmatpush.bf16.msrb.mxu0 %v5611_v55 }
 0xf60   : > { %5513 = vmatpush.bf16.msra.mxu2 %v5496_v11  ;;  %5642 = vmatpush.bf16.msra.mxu3 %v5612_v49 }
 0xf63   : > { %5693 = vmatpush.bf16.msrb.mxu0 %v5609_v53 }
 0xf64   : > { %5514 = vmatpush.bf16.msra.mxu2 %v5495_v50  ;;  %5643 = vmatpush.bf16.msra.mxu3 %v5610_v23 }
 0xf67   : > { %5694 = vmatpush.bf16.msrb.mxu0 %v5607_v26 }
 0xf68   : > { %5515 = vmatpush.bf16.msra.mxu2 %v5494_v27  ;;  %5644 = vmatpush.bf16.msra.mxu3 %v5608_v42 }
 0xf6a   : > { %5695 = vmatmul.bf16.vlgmr.msrb.gmra.mxu0 %v8164_v61 }
 0xf6c   : > { %5516 = vmatpush.bf16.msra.mxu2 %v5493_v5  ;;  %5645 = vmatpush.bf16.msra.mxu3 %v5606_v39 }
 0xf6f   : > { %5517 = vmatmul.bf16.vlgmr.msra.gmra.mxu2 %v8165_v34  ;;  %5646 = vmatmul.bf16.vlgmr.msra.gmra.mxu3 %v8164_v61 }
 0xf7a   : > { %5700 = vmatmul.bf16.gmra.mxu0 %v8166_v40 }
 0xf7f   : > { %5522 = vmatmul.bf16.gmra.mxu2 %v8167_v62  ;;  %5651 = vmatmul.bf16.gmra.mxu3 %v8166_v40 }
 0xf8a   : > { %5705 = vmatmul.bf16.gmra.mxu0 %v8168_v12 }
 0xf8f   : > { %5527 = vmatmul.bf16.gmra.mxu2 %v8169_v44  ;;  %5656 = vmatmul.bf16.gmra.mxu3 %v8168_v12 }
 0xf9a   : > { %5710 = vmatmul.bf16.gmra.mxu0 %v8170_v35 }
 0xf9f   : > { %5532 = vmatmul.bf16.gmra.mxu2 %v8171_v28  ;;  %5661 = vmatmul.bf16.gmra.mxu3 %v8170_v35 }
 0xfaa   : > { %5715 = vmatmul.bf16.gmra.mxu0 %v8172_v9 }
 0xfaf   : > { %5537 = vmatmul.bf16.gmra.mxu2 %v8173_v16  ;;  %5666 = vmatmul.bf16.gmra.mxu3 %v8172_v9 }
 0xfba   : > { %5720 = vmatmul.bf16.gmra.mxu0 %v8174_v31 }
 0xfbf   : > { %5542 = vmatmul.bf16.gmra.mxu2 %v8175_v25  ;;  %5671 = vmatmul.bf16.gmra.mxu3 %v8174_v31 }
 0xfca   : > { %5725 = vmatmul.bf16.gmra.mxu0 %v8176_v37 }
 0xfcf   : > { %5547 = vmatmul.bf16.gmra.mxu2 %v8177_v51  ;;  %5676 = vmatmul.bf16.gmra.mxu3 %v8176_v37 }
 0xfda   : > { %5730 = vmatmul.bf16.gmra.mxu0 %v8178_v56 }
 0xfdf   : > { %5552 = vmatmul.bf16.gmra.mxu2 %v8179_v20  ;;  %5681 = vmatmul.bf16.gmra.mxu3 %v8178_v56 }
 0xfe7   : > { %v10256_v8 = vpop.f32.mrf.mxu0 }
 0xfef   : > { %v10258_v10 = vpop.f32.mrf.mxu0 }
 0xff2   : > { %v5518_v30 = vpop.f32.mrf.mxu2  ;;  %v5647_v32 = vpop.f32.mrf.mxu3 }
 0xff3   : > { %v5736_v48 = vmul.f32 %v5647_v32, %v5518_v30 }
 0xff7   : > { %v10260_v27 = vpop.f32.mrf.mxu0 }
 0xffa   : > { %v10254_v17 = vpop.f32.mrf.mxu2  ;;  %v5649_v2 = vpop.f32.mrf.mxu3 }
 0xffb   : > { %v5737_v9 = vmul.f32 %v5649_v2, %v10254_v17 }
 0xfff   : > { %v10262_v62 = vpop.f32.mrf.mxu0 }
0x1002   : > { %v5523_v43 = vpop.f32.mrf.mxu2  ;;  %v5652_v38 = vpop.f32.mrf.mxu3 }
0x1003   : > { %v5738_v60 = vmul.f32 %v5652_v38, %v5523_v43 }
0x1007   : > { %v10264_v35 = vpop.f32.mrf.mxu0 }
0x100a   : > { %v5525_v58 = vpop.f32.mrf.mxu2  ;;  %v5654_v18 = vpop.f32.mrf.mxu3 }
0x100b   : > { %v5739_v16 = vmul.f32 %v5654_v18, %v5525_v58 }
0x100f   : > { %v10266_v28 = vpop.f32.mrf.mxu0 }
0x1012   : > { %v5528_v57 = vpop.f32.mrf.mxu2  ;;  %v5657_v36 = vpop.f32.mrf.mxu3 }
0x1013   : > { %v5740_v45 = vmul.f32 %v5657_v36, %v5528_v57 }
0x1017   : > { %v10269_v31 = vpop.f32.mrf.mxu0 }
0x101a   : > { %v5530_v29 = vpop.f32.mrf.mxu2  ;;  %v5659_v24 = vpop.f32.mrf.mxu3 }
0x101b   : > { %v5741_v5 = vmul.f32 %v5659_v24, %v5530_v29 }
0x101f   : > { %v10271_v25 = vpop.f32.mrf.mxu0 }
0x1022   : > { %v5533_v59 = vpop.f32.mrf.mxu2  ;;  %v5662_v55 = vpop.f32.mrf.mxu3 }
0x1023   : > { %v5742_v33 = vmul.f32 %v5662_v55, %v5533_v59 }
0x1027   : > { %v10273_v37 = vpop.f32.mrf.mxu0 }
0x102a   : > { %v5535_v52 = vpop.f32.mrf.mxu2  ;;  %v5664_v15 = vpop.f32.mrf.mxu3 }
0x102b   : > { %v5743_v12 = vmul.f32 %v5664_v15, %v5535_v52 }
0x102f   : > { %v5718_v51 = vpop.f32.mrf.mxu0 }
0x1032   : > { %v5538_v11 = vpop.f32.mrf.mxu2  ;;  %v5667_v49 = vpop.f32.mrf.mxu3 }
0x1033   : > { %v5744_v34 = vmul.f32 %v5667_v49, %v5538_v11 }
0x1037   : > { %v5721_v56 = vpop.f32.mrf.mxu0 }
0x103a   : > { %v5540_v22 = vpop.f32.mrf.mxu2  ;;  %v5669_v7 = vpop.f32.mrf.mxu3 }
0x103b   : > { %v5745_v44 = vmul.f32 %v5669_v7, %v5540_v22 }
0x103f   : > { %v5723_v20 = vpop.f32.mrf.mxu0 }
0x1042   : > { %v5543_v63 = vpop.f32.mrf.mxu2  ;;  %v5672_v4 = vpop.f32.mrf.mxu3 }
0x1043   : > { %v5746_v19 = vmul.f32 %v5672_v4, %v5543_v63  ;;  %v10275_v4 = vpop.f32.mrf.mxu1 }
0x1045   : > { %5772 = vadd.xlane.f32.xlu2 %v5746_v19 }
0x1047   : > { %v5726_v30 = vpop.f32.mrf.mxu0 }
0x104a   : > { %v5545_v0 = vpop.f32.mrf.mxu2  ;;  %v5674_v53 = vpop.f32.mrf.mxu3 }
0x104b   : > { %v5747_v13 = vmul.f32 %v5674_v53, %v5545_v0 }
0x104d   : > { %5774 = vadd.xlane.f32.xlu0 %v5747_v13 }
0x1052   : > { %v5548_v50 = vpop.f32.mrf.mxu2  ;;  %v5677_v23 = vpop.f32.mrf.mxu3 }
0x1053   : > { %v5748_v1 = vmul.f32 %v5677_v23, %v5548_v50 }
0x1055   : > { %5776 = vadd.xlane.f32.xlu0 %v5748_v1 }
0x105a   : > { %v5550_v41 = vpop.f32.mrf.mxu2  ;;  %v5679_v26 = vpop.f32.mrf.mxu3 }
0x105b   : > { %v5749_v47 = vmul.f32 %v5679_v26, %v5550_v41 }
0x105d   : > { %5764 = vadd.xlane.f32.xlu0 %v5742_v33  ;;  %5778 = vadd.xlane.f32.xlu1 %v5749_v47 }
0x1062   : > { %v5553_v42 = vpop.f32.mrf.mxu2  ;;  %v5682_v54 = vpop.f32.mrf.mxu3 }
0x1063   : > { %v5750_v21 = vmul.f32 %v5682_v54, %v5553_v42 }
0x1065   : > { %5762 = vadd.xlane.f32.xlu0 %v5741_v5  ;;  %5780 = vadd.xlane.f32.xlu1 %v5750_v21 }
0x106a   : > { %v5555_v39 = vpop.f32.mrf.mxu2  ;;  %v5684_v61 = vpop.f32.mrf.mxu3 }
0x106b   : > { %v5751_v40 = vmul.f32 %v5684_v61, %v5555_v39 }
0x106d   : > { %5752 = vadd.xlane.f32.xlu0 %v5736_v48  ;;  %5768 = vadd.xlane.f32.xlu1 %v5744_v34  ;;  %v5728_v48 = vpop.f32.mrf.mxu0 }
0x106e   : > { %5782 = vadd.xlane.f32.xlu2 %v5751_v40 }
0x1075   : > { %5766 = vadd.xlane.f32.xlu1 %v5743_v12  ;;  %v5731_v17 = vpop.f32.mrf.mxu0 }
0x1076   : > { %5770 = vadd.xlane.f32.xlu2 %v5745_v44 }
0x107d   : > { %5756 = vadd.xlane.f32.xlu1 %v5738_v60  ;;  %v5733_v15 = vpop.f32.mrf.mxu0 }
0x107e   : > { %5760 = vadd.xlane.f32.xlu2 %v5740_v45 }
0x1085   : > { %5754 = vadd.xlane.f32.xlu1 %v5737_v9  ;;  %v10277_v9 = vpop.f32.mrf.mxu1 }
0x1086   : > { %5758 = vadd.xlane.f32.xlu2 %v5739_v16 }
0x10b8   : > { %v5773_v60 = vpop.xlane.xlu2 %5772 }
0x10b9   : > { %v5810_v7 = vmul.f32 0.01, %v5773_v60  ;;  %vm5794_vm6 = vcmp.gt.f32.partialorder %v5773_v60, 0.0 }
0x10bb   : > { %v5826_v1 = vsel %vm5794_vm6, %v5773_v60, %v5810_v7 }
0x10bc   : > { %v5842_v21 = vmul.f32 %v5826_v1, %v5721_v56  ;;  %v10637_v1 = vld [vmem:[#allocation61_spill] sm:$0xff] }
0x10c0   : > { %v5775_v32 = vpop.xlane.xlu0 %5774 }
0x10c1   : > { %v5811_v55 = vmul.f32 0.01, %v5775_v32  ;;  %vm5795_vm5 = vcmp.gt.f32.partialorder %v5775_v32, 0.0 }
0x10c3   : > { %v5827_v53 = vsel %vm5795_vm5, %v5775_v32, %v5811_v55 }
0x10c4   : > { %v5843_v33 = vmul.f32 %v5827_v53, %v5723_v20  ;;  %v10634_v53 = vld [vmem:[#allocation58_spill] sm:$0xff] }
0x10c6   : > { %v5853_v40 = vpack.c.bf16 %v5843_v33, %v5842_v21  ;;  %v7920_v21 = vld [vmem:[#allocation16 + $0xe0] sm:$0xff] }
0x10c8   : > { %v5777_v57 = vpop.xlane.xlu0 %5776 }
0x10c9   : > { %v5812_v45 = vmul.f32 0.01, %v5777_v57  ;;  %vm5796_vm4 = vcmp.gt.f32.partialorder %v5777_v57, 0.0 }
0x10cb   : > { %v5828_v63 = vsel %vm5796_vm4, %v5777_v57, %v5812_v45 }
0x10cc   : > { %v5844_v50 = vmul.f32 %v5828_v63, %v5726_v30 }
0x10d0   : > { %v5779_v43 = vpop.xlane.xlu1 %5778  ;;  %v5765_v59 = vpop.xlane.xlu0 %5764 }
0x10d1   : > { %v5813_v58 = vmul.f32 0.01, %v5779_v43  ;;  %vm5797_vm2 = vcmp.gt.f32.partialorder %v5779_v43, 0.0  ;;  %v5806_v39 = vmul.f32 0.01, %v5765_v59  ;;  %vm5790_vm10 = vcmp.gt.f32.partialorder %v5765_v59, 0.0 }
0x10d3   : > { %v5829_v52 = vsel %vm5797_vm2, %v5779_v43, %v5813_v58  ;;  %v5822_v30 = vsel %vm5790_vm10, %v5765_v59, %v5806_v39 }
0x10d4   : > { %v5845_v19 = vmul.f32 %v5829_v52, %v5728_v48 }
0x10d6   : > { %v5854_v47 = vpack.c.bf16 %v5845_v19, %v5844_v50  ;;  %v10633_v19 = vld [vmem:[#allocation57_spill] sm:$0xff]  ;;  %v10636_v50 = vld [vmem:[#allocation60_spill] sm:$0xff] }
0x10d8   : > { %v5781_v38 = vpop.xlane.xlu1 %5780  ;;  %v5763_v5 = vpop.xlane.xlu0 %5762 }
0x10d9   : > { %v5814_v2 = vmul.f32 0.01, %v5781_v38  ;;  %vm5798_vm1 = vcmp.gt.f32.partialorder %v5781_v38, 0.0  ;;  %v5805_v32 = vmul.f32 0.01, %v5763_v5  ;;  %vm5789_vm12 = vcmp.gt.f32.partialorder %v5763_v5, 0.0 }
0x10db   : > { %v5830_v29 = vsel %vm5798_vm1, %v5781_v38, %v5814_v2  ;;  %v5821_v60 = vsel %vm5789_vm12, %v5763_v5, %v5805_v32  ;;  %v7919_v5 = vld [vmem:[#allocation16 + $0xd8] sm:$0xff] }
0x10dc   : > { %v5846_v49 = vmul.f32 %v5830_v29, %v5731_v17 }
0x10e0   : > { %v5769_v18 = vpop.xlane.xlu1 %5768  ;;  %v5753_v17 = vpop.xlane.xlu0 %5752 }
0x10e1   : > { %v5783_v36 = vpop.xlane.xlu2 %5782  ;;  %v5808_v41 = vmul.f32 0.01, %v5769_v18  ;;  %vm5792_vm8 = vcmp.gt.f32.partialorder %v5769_v18, 0.0  ;;  %vm5784_vm0 = vcmp.gt.f32.partialorder %v5753_v17, 0.0 }
0x10e2   : > { %vm5799_vm3 = vcmp.gt.f32.partialorder %v5783_v36, 0.0  ;;  %v5815_v24 = vmul.f32 0.01, %v5783_v36 }
0x10e3   : > { %v5824_v61 = vsel %vm5792_vm8, %v5769_v18, %v5808_v41  ;;  %v5837_v18 = vmul.f32 %v5821_v60, %v10266_v28  ;;  %v7923_v41 = vld [vmem:[#allocation16 + $0xf8] sm:$0xff] }
0x10e4   : > { %v5831_v11 = vsel %vm5799_vm3, %v5783_v36, %v5815_v24  ;;  %v5840_v16 = vmul.f32 %v5824_v61, %v10273_v37  ;;  %5978 = vmatpush.bf16.msrb.mxu2 %v7923_v41  ;;  %v7918_v61 = vld [vmem:[#allocation16 + $0xd0] sm:$0xff] }
0x10e5   : > { %v5847_v22 = vmul.f32 %v5831_v11, %v5733_v15 }
0x10e7   : > { %v5855_v0 = vpack.c.bf16 %v5847_v22, %v5846_v49 }
0x10e8   : > { %v5767_v13 = vpop.xlane.xlu1 %5766 }
0x10e9   : > { %5856 = vmatpush.bf16.msrb.mxu1 %v5855_v0  ;;  %v5771_v23 = vpop.xlane.xlu2 %5770  ;;  %v5807_v42 = vmul.f32 0.01, %v5767_v13  ;;  %vm5791_vm9 = vcmp.gt.f32.partialorder %v5767_v13, 0.0 }
0x10ea   : > { %vm5793_vm7 = vcmp.gt.f32.partialorder %v5771_v23, 0.0  ;;  %v5809_v26 = vmul.f32 0.01, %v5771_v23 }
0x10eb   : > { %v5823_v12 = vsel %vm5791_vm9, %v5767_v13, %v5807_v42  ;;  %v10635_v13 = vld [vmem:[#allocation59_spill] sm:$0xff]  ;;  %v7921_v42 = vld [vmem:[#allocation16 + $0xe8] sm:$0xff] }
0x10ec   : > { %v5825_v54 = vsel %vm5793_vm7, %v5771_v23, %v5809_v26  ;;  %v5839_v48 = vmul.f32 %v5823_v12, %v10271_v25  ;;  %v5800_v25 = vmul.f32 0.01, %v5753_v17  ;;  %v7922_v26 = vld [vmem:[#allocation16 + $0xf0] sm:$0xff] }
0x10ed   : > { %5857 = vmatpush.bf16.msrb.mxu1 %v5854_v47  ;;  %v5841_v34 = vmul.f32 %v5825_v54, %v5718_v51  ;;  %v5838_v51 = vmul.f32 %v5822_v30, %v10269_v31  ;;  %v10284_v31 = vpop.f32.mrf.mxu1  ;;  %5979 = vmatpush.bf16.msrb.mxu2 %v7922_v26  ;;  %v10638_v54 = vld [vmem:[#allocation62_spill] sm:$0xff]  ;;  %v10328_v26 = vld [vmem:[%s10558_s10 + $0x3] ss:$0 sm:$0xff] }
0x10ee   : > { %v5816_v28 = vsel %vm5784_vm0, %v5753_v17, %v5800_v25 }
0x10ef   : > { %v5852_v43 = vpack.c.bf16 %v5841_v34, %v5840_v16  ;;  %v5851_v2 = vpack.c.bf16 %v5839_v48, %v5838_v51  ;;  %v5832_v22 = vmul.f32 %v5816_v28, %v10256_v8  ;;  %v7917_v34 = vld [vmem:[#allocation16 + $0xc8] sm:$0xff] }
0x10f0   : > { %v5757_v44 = vpop.xlane.xlu1 %5756 }
0x10f1   : > { %5858 = vmatpush.bf16.msrb.mxu1 %v5853_v40  ;;  %v5761_v20 = vpop.xlane.xlu2 %5760  ;;  %v5802_v57 = vmul.f32 0.01, %v5757_v44  ;;  %vm5786_vm13 = vcmp.gt.f32.partialorder %v5757_v44, 0.0  ;;  %5980 = vmatpush.bf16.msrb.mxu2 %v7921_v42  ;;  %v10639_v40 = vld [vmem:[#allocation63_spill] sm:$0xff] }
0x10f2   : > { %vm5788_vm11 = vcmp.gt.f32.partialorder %v5761_v20, 0.0  ;;  %v5804_v56 = vmul.f32 0.01, %v5761_v20 }
0x10f3   : > { %v5818_v29 = vsel %vm5786_vm13, %v5757_v44, %v5802_v57  ;;  %v7916_v44 = vld [vmem:[#allocation16 + $0xc0] sm:$0xff] }
0x10f4   : > { %v5820_v38 = vsel %vm5788_vm11, %v5761_v20, %v5804_v56  ;;  %v10640_v20 = vld [vmem:[#allocation64_spill] sm:$0xff] }
0x10f5   : > { %5859 = vmatpush.bf16.msrb.mxu1 %v5852_v43  ;;  %v5836_v37 = vmul.f32 %v5820_v38, %v10264_v35  ;;  %v5834_v35 = vmul.f32 %v5818_v29, %v10260_v27  ;;  %v10290_v63 = vpop.f32.mrf.mxu1  ;;  %5981 = vmatpush.bf16.msrb.mxu2 %v7920_v21 }
0x10f7   : > { %v5850_v59 = vpack.c.bf16 %v5837_v18, %v5836_v37 }
0x10f8   : > { %v5755_v58 = vpop.xlane.xlu1 %5754 }
0x10f9   : > { %vm5785_vm14 = vcmp.gt.f32.partialorder %v5755_v58, 0.0  ;;  %v5801_v36 = vmul.f32 0.01, %v5755_v58  ;;  %5860 = vmatpush.bf16.msrb.mxu1 %v5851_v2  ;;  %v5759_v45 = vpop.xlane.xlu2 %5758  ;;  %5982 = vmatpush.bf16.msrb.mxu2 %v7919_v5 }
0x10fa   : > { %vm5787_vm15 = vcmp.gt.f32.partialorder %v5759_v45, 0.0  ;;  %v5803_v24 = vmul.f32 0.01, %v5759_v45 }
0x10fb   : > { %v5817_v55 = vsel %vm5785_vm14, %v5755_v58, %v5801_v36 }
0x10fc   : > { %v5819_v52 = vsel %vm5787_vm15, %v5759_v45, %v5803_v24  ;;  %v5833_v11 = vmul.f32 %v5817_v55, %v10258_v10  ;;  %v7930_v55 = vld [vmem:[#allocation17 + $0xf0] sm:$0xff] }
0x10fd   : > { %v5835_v15 = vmul.f32 %v5819_v52, %v10262_v62  ;;  %5861 = vmatpush.bf16.msrb.mxu1 %v5850_v59  ;;  %v10293_v0 = vpop.f32.mrf.mxu1  ;;  %5983 = vmatpush.bf16.msrb.mxu2 %v7918_v61  ;;  %v7931_v59 = vld [vmem:[#allocation17 + $0xf8] sm:$0xff] }
0x10fe   : > { %v5848_v7 = vpack.c.bf16 %v5833_v11, %v5832_v22  ;;  %6158 = vmatpush.bf16.msrb.mxu3 %v7931_v59 }
0x10ff   : > { %v5849_v49 = vpack.c.bf16 %v5835_v15, %v5834_v35  ;;  %v7929_v35 = vld [vmem:[#allocation17 + $0xe8] sm:$0xff]  ;;  %v7928_v15 = vld [vmem:[#allocation17 + $0xe0] sm:$0xff] }
0x1101   : > { %5862 = vmatpush.bf16.msrb.mxu1 %v5849_v49  ;;  %5984 = vmatpush.bf16.msrb.mxu2 %v7917_v34  ;;  %v7927_v49 = vld [vmem:[#allocation17 + $0xd8] sm:$0xff] }
0x1102   : > { %6159 = vmatpush.bf16.msrb.mxu3 %v7930_v55 }
0x1105   : > { %5863 = vmatpush.bf16.msrb.mxu1 %v5848_v7  ;;  %v10296_v27 = vpop.f32.mrf.mxu1  ;;  %5985 = vmatpush.bf16.msrb.mxu2 %v7916_v44  ;;  %v7926_v7 = vld [vmem:[#allocation17 + $0xd0] sm:$0xff] }
0x1106   : > { %6160 = vmatpush.bf16.msrb.mxu3 %v7929_v35 }
0x1108   : > { %5864 = vmatmul.bf16.vlgmr.msrb.gmra.mxu1 %v10633_v19  ;;  %v7925_v19 = vld [vmem:[#allocation17 + $0xc8] sm:$0xff] }
0x110a   : > { %6161 = vmatpush.bf16.msrb.mxu3 %v7928_v15 }
0x110d   : > { %v10298_v62 = vpop.f32.mrf.mxu1 }
0x110e   : > { %6162 = vmatpush.bf16.msrb.mxu3 %v7927_v49 }
0x1112   : > { %6163 = vmatpush.bf16.msrb.mxu3 %v7926_v7 }
0x1115   : > { %v10301_v10 = vpop.f32.mrf.mxu1 }
0x1116   : > { %6164 = vmatpush.bf16.msrb.mxu3 %v7925_v19 }
0x1118   : > { %5869 = vmatmul.bf16.gmra.mxu1 %v10634_v53 }
0x111d   : > { %v10303_v8 = vpop.f32.mrf.mxu1 }
0x1125   : > { %v10306_v23 = vpop.f32.mrf.mxu1 }
0x1128   : > { %5874 = vmatmul.bf16.gmra.mxu1 %v10635_v13 }
0x112d   : > { %v10309_v33 = vpop.f32.mrf.mxu1 }
0x1135   : > { %v10311_v47 = vpop.f32.mrf.mxu1 }
0x1138   : > { %5879 = vmatmul.bf16.gmra.mxu1 %v10636_v50  ;;  %v7924_v50 = vld [vmem:[#allocation17 + $0xc0] sm:$0xff] }
0x1139   : > { %6165 = vmatpush.bf16.msrb.mxu3 %v7924_v50 }
0x113d   : > { %v10314_v39 = vpop.f32.mrf.mxu1 }
0x1145   : > { %v10317_v12 = vpop.f32.mrf.mxu1 }
0x1148   : > { %5884 = vmatmul.bf16.gmra.mxu1 %v10637_v1 }
0x114d   : > { %v10319_v16 = vpop.f32.mrf.mxu1 }
0x1155   : > { %v10322_v30 = vpop.f32.mrf.mxu1 }
0x1158   : > { %5889 = vmatmul.bf16.gmra.mxu1 %v10638_v54 }
0x1168   : > { %5894 = vmatmul.bf16.gmra.mxu1 %v10639_v40 }
0x1178   : > { %5899 = vmatmul.bf16.gmra.mxu1 %v10640_v20 }
0x1185   : > { %v5865_v32 = vpop.f32.mrf.mxu1 }
0x118d   : > { %v5867_v56 = vpop.f32.mrf.mxu1 }
0x118e   : > { %v5905_v48 = vpack.c.bf16 %v5867_v56, %v5865_v32 }
0x1190   : > { %5986 = vmatmul.bf16.vlgmr.msrb.gmra.mxu2 %v5905_v48 }
0x1195   : > { %v5870_v43 = vpop.f32.mrf.mxu1 }
0x119d   : > { %v5872_v38 = vpop.f32.mrf.mxu1 }
0x119e   : > { %v5906_v51 = vpack.c.bf16 %v5872_v38, %v5870_v43 }
0x11a0   : > { %5991 = vmatmul.bf16.gmra.mxu2 %v5906_v51 }
0x11a5   : > { %v5875_v60 = vpop.f32.mrf.mxu1 }
0x11ad   : > { %v5877_v57 = vpop.f32.mrf.mxu1 }
0x11ae   : > { %v5907_v17 = vpack.c.bf16 %v5877_v57, %v5875_v60 }
0x11b0   : > { %5996 = vmatmul.bf16.gmra.mxu2 %v5907_v17 }
0x11b5   : > { %v5880_v37 = vpop.f32.mrf.mxu1 }
0x11bd   : > { %v5882_v2 = vpop.f32.mrf.mxu1 }
0x11be   : > { %v5908_v58 = vpack.c.bf16 %v5882_v2, %v5880_v37 }
0x11c0   : > { %6001 = vmatmul.bf16.gmra.mxu2 %v5908_v58 }
0x11c5   : > { %v5885_v18 = vpop.f32.mrf.mxu1 }
0x11cd   : > { %v5887_v36 = vpop.f32.mrf.mxu1 }
0x11ce   : > { %v5909_v45 = vpack.c.bf16 %v5887_v36, %v5885_v18 }
0x11d0   : > { %6006 = vmatmul.bf16.gmra.mxu2 %v5909_v45 }
0x11d5   : > { %v5890_v25 = vpop.f32.mrf.mxu1 }
0x11dd   : > { %v5892_v29 = vpop.f32.mrf.mxu1 }
0x11de   : > { %v5910_v24 = vpack.c.bf16 %v5892_v29, %v5890_v25 }
0x11e0   : > { %6011 = vmatmul.bf16.gmra.mxu2 %v5910_v24 }
0x11e5   : > { %v5895_v52 = vpop.f32.mrf.mxu1 }
0x11ed   : > { %v5897_v28 = vpop.f32.mrf.mxu1 }
0x11ee   : > { %v5911_v11 = vpack.c.bf16 %v5897_v28, %v5895_v52 }
0x11f0   : > { %6016 = vmatmul.bf16.gmra.mxu2 %v5911_v11 }
0x11f5   : > { %v5900_v22 = vpop.f32.mrf.mxu1 }
0x11fd   : > { %v5902_v53 = vpop.f32.mrf.mxu1 }
0x11fe   : > { %v5912_v13 = vpack.c.bf16 %v5902_v53, %v5900_v22 }
0x1200   : > { %6021 = vmatmul.bf16.gmra.mxu2 %v5912_v13 }
0x1213   : > { %v5987_v1 = vpop.f32.mrf.mxu2 }
0x1214   : > { %v6027_v41 = vadd.f32 %v5987_v1, %v10275_v4 }
0x1216   : > { %v6048_v54 = vadd.f32 %v10328_v26, %v6027_v41 }
0x1218   : > { %v6064_v61 = vmax.f32 %v6048_v54, 0.0 }
0x121b   : > { %v5989_v42 = vpop.f32.mrf.mxu2 }
0x121c   : > { %v6028_v21 = vadd.f32 %v5989_v42, %v10277_v9 }
0x121e   : > { %v6049_v5 = vadd.f32 %v10328_v26, %v6028_v21 }
0x1220   : > { %v6065_v34 = vmax.f32 %v6049_v5, 0.0 }
0x1222   : > { %v6080_v40 = vpack.c.bf16 %v6065_v34, %v6064_v61 }
0x1223   : > { %v5992_v44 = vpop.f32.mrf.mxu2 }
0x1224   : > { %6166 = vmatmul.bf16.vlgmr.msrb.gmra.mxu3 %v6080_v40  ;;  %v6029_v20 = vadd.f32 %v5992_v44, %v10284_v31 }
0x1226   : > { %v6050_v32 = vadd.f32 %v10328_v26, %v6029_v20 }
0x1228   : > { %v6066_v43 = vmax.f32 %v6050_v32, 0.0 }
0x122b   : > { %v5994_v4 = vpop.f32.mrf.mxu2 }
0x122c   : > { %v6030_v56 = vadd.f32 %v5994_v4, %v10290_v63 }
0x122e   : > { %v6051_v48 = vadd.f32 %v10328_v26, %v6030_v56 }
0x1230   : > { %v6067_v38 = vmax.f32 %v6051_v48, 0.0 }
0x1232   : > { %v6081_v51 = vpack.c.bf16 %v6067_v38, %v6066_v43 }
0x1233   : > { %v5997_v9 = vpop.f32.mrf.mxu2 }
0x1234   : > { %6169 = vmatmul.bf16.gmra.mxu3 %v6081_v51  ;;  %v6031_v60 = vadd.f32 %v5997_v9, %v10293_v0 }
0x1236   : > { %v6052_v17 = vadd.f32 %v10328_v26, %v6031_v60 }
0x1238   : > { %v6068_v2 = vmax.f32 %v6052_v17, 0.0  ;;  %v7939_v17 = vld [vmem:[#allocation19 + $0x38] sm:$0xff] }
0x1239   : > { %6269 = vmatpush.bf16.msra.mxu0 %v7939_v17  ;;  %7949 = vmatpush.bf16.msra.mxu2 %v7939_v17 }
0x123b   : > { %v5999_v57 = vpop.f32.mrf.mxu2 }
0x123c   : > { %v6032_v37 = vadd.f32 %v5999_v57, %v10296_v27 }
0x123e   : > { %v6053_v31 = vadd.f32 %v10328_v26, %v6032_v37 }
0x1240   : > { %v6069_v58 = vmax.f32 %v6053_v31, 0.0 }
0x1242   : > { %v6082_v18 = vpack.c.bf16 %v6069_v58, %v6068_v2  ;;  %v7935_v2 = vld [vmem:[#allocation19 + $0x18] sm:$0xff] }
0x1243   : > { %v6002_v63 = vpop.f32.mrf.mxu2 }
0x1244   : > { %6172 = vmatmul.bf16.gmra.mxu3 %v6082_v18  ;;  %v6033_v36 = vadd.f32 %v6002_v63, %v10298_v62  ;;  %v7934_v18 = vld [vmem:[#allocation19 + $0x10] sm:$0xff]  ;;  %v7933_v63 = vld [vmem:[#allocation19 + $0x8] sm:$0xff] }
0x1246   : > { %v6054_v25 = vadd.f32 %v10328_v26, %v6033_v36 }
0x1248   : > { %v6070_v24 = vmax.f32 %v6054_v25, 0.0 }
0x124b   : > { %v6004_v45 = vpop.f32.mrf.mxu2 }
0x124c   : > { %v6034_v29 = vadd.f32 %v6004_v45, %v10301_v10  ;;  %v7932_v45 = vld [vmem:[#allocation19] sm:$0xff] }
0x124e   : > { %v6055_v0 = vadd.f32 %v10328_v26, %v6034_v29 }
0x1250   : > { %v6071_v59 = vmax.f32 %v6055_v0, 0.0  ;;  %v7947_v0 = vld [vmem:[#allocation20 + $0x38] sm:$0xff] }
0x1251   : > { %6362 = vmatpush.bf16.msra.mxu1 %v7947_v0  ;;  %7957 = vmatpush.bf16.msra.mxu3 %v7947_v0 }
0x1252   : > { %v6083_v55 = vpack.c.bf16 %v6071_v59, %v6070_v24  ;;  %v7946_v59 = vld [vmem:[#allocation20 + $0x30] sm:$0xff] }
0x1253   : > { %v6007_v27 = vpop.f32.mrf.mxu2 }
0x1254   : > { %6175 = vmatmul.bf16.gmra.mxu3 %v6083_v55  ;;  %v6035_v52 = vadd.f32 %v6007_v27, %v10303_v8  ;;  %v8145_v55 = vld [vmem:[%s10559_s0 + $0x3] ss:$0 sm:$0xff]  ;;  %v7945_v27 = vld [vmem:[#allocation20 + $0x28] sm:$0xff] }
0x1255   : > { %6363 = vmatpush.bf16.msra.mxu1 %v7946_v59  ;;  %7958 = vmatpush.bf16.msra.mxu3 %v7946_v59 }
0x1256   : > { %v6056_v15 = vadd.f32 %v10328_v26, %v6035_v52 }
0x1258   : > { %v6072_v11 = vmax.f32 %v6056_v15, 0.0 }
0x1259   : > { %6364 = vmatpush.bf16.msra.mxu1 %v7945_v27  ;;  %7959 = vmatpush.bf16.msra.mxu3 %v7945_v27 }
0x125b   : > { %v6009_v35 = vpop.f32.mrf.mxu2 }
0x125c   : > { %v6036_v28 = vadd.f32 %v6009_v35, %v10306_v23 }
0x125e   : > { %v6057_v62 = vadd.f32 %v10328_v26, %v6036_v28  ;;  %v7944_v28 = vld [vmem:[#allocation20 + $0x20] sm:$0xff] }
0x125f   : > { %6365 = vmatpush.bf16.msra.mxu1 %v7944_v28  ;;  %7960 = vmatpush.bf16.msra.mxu3 %v7944_v28 }
0x1260   : > { %v6073_v49 = vmax.f32 %v6057_v62, 0.0 }
0x1262   : > { %v6084_v22 = vpack.c.bf16 %v6073_v49, %v6072_v11 }
0x1263   : > { %v6012_v10 = vpop.f32.mrf.mxu2 }
0x1264   : > { %6178 = vmatmul.bf16.gmra.mxu3 %v6084_v22  ;;  %v6037_v7 = vadd.f32 %v6012_v10, %v10309_v33 }
0x1266   : > { %v6058_v53 = vadd.f32 %v10328_v26, %v6037_v7 }
0x1268   : > { %v6074_v50 = vmax.f32 %v6058_v53, 0.0 }
0x126b   : > { %v6014_v19 = vpop.f32.mrf.mxu2 }
0x126c   : > { %v6038_v13 = vadd.f32 %v6014_v19, %v10311_v47 }
0x126e   : > { %v6059_v8 = vadd.f32 %v10328_v26, %v6038_v13 }
0x1270   : > { %v6075_v1 = vmax.f32 %v6059_v8, 0.0 }
0x1272   : > { %v6085_v41 = vpack.c.bf16 %v6075_v1, %v6074_v50  ;;  %v7943_v50 = vld [vmem:[#allocation20 + $0x18] sm:$0xff]  ;;  %v7940_v1 = vld [vmem:[#allocation20] sm:$0xff] }
0x1273   : > { %v6017_v23 = vpop.f32.mrf.mxu2  ;;  %6366 = vmatpush.bf16.msra.mxu1 %v7943_v50  ;;  %7961 = vmatpush.bf16.msra.mxu3 %v7943_v50 }
0x1274   : > { %6181 = vmatmul.bf16.gmra.mxu3 %v6085_v41  ;;  %v6039_v42 = vadd.f32 %v6017_v23, %v10314_v39 }
0x1276   : > { %v6060_v21 = vadd.f32 %v10328_v26, %v6039_v42 }
0x1278   : > { %v6076_v61 = vmax.f32 %v6060_v21, 0.0 }
0x127b   : > { %v6019_v54 = vpop.f32.mrf.mxu2 }
0x127c   : > { %v6040_v5 = vadd.f32 %v6019_v54, %v10317_v12 }
0x127e   : > { %v6061_v33 = vadd.f32 %v10328_v26, %v6040_v5 }
0x1280   : > { %v6077_v34 = vmax.f32 %v6061_v33, 0.0 }
0x1282   : > { %v6086_v40 = vpack.c.bf16 %v6077_v34, %v6076_v61 }
0x1283   : > { %v6022_v47 = vpop.f32.mrf.mxu2 }
0x1284   : > { %6184 = vmatmul.bf16.gmra.mxu3 %v6086_v40  ;;  %v6041_v44 = vadd.f32 %v6022_v47, %v10319_v16  ;;  %v7938_v16 = vld [vmem:[#allocation19 + $0x30] sm:$0xff] }
0x1285   : > { %6270 = vmatpush.bf16.msra.mxu0 %v7938_v16  ;;  %7950 = vmatpush.bf16.msra.mxu2 %v7938_v16 }
0x1286   : > { %v6062_v4 = vadd.f32 %v10328_v26, %v6041_v44 }
0x1288   : > { %v6078_v56 = vmax.f32 %v6062_v4, 0.0  ;;  %v8147_v4 = vld [vmem:[%s10642_s9] ss:$0 sm:$0xff] }
0x128b   : > { %v6024_v20 = vpop.f32.mrf.mxu2 }
0x128c   : > { %v6042_v32 = vadd.f32 %v6024_v20, %v10322_v30  ;;  %v7937_v30 = vld [vmem:[#allocation19 + $0x28] sm:$0xff] }
0x128d   : > { %6271 = vmatpush.bf16.msra.mxu0 %v7937_v30  ;;  %7951 = vmatpush.bf16.msra.mxu2 %v7937_v30 }
0x128e   : > { %v6063_v39 = vadd.f32 %v10328_v26, %v6042_v32  ;;  %v7936_v26 = vld [vmem:[#allocation19 + $0x20] sm:$0xff] }
0x1290   : > { %v6079_v48 = vmax.f32 %v6063_v39, 0.0 }
0x1291   : > { %6272 = vmatpush.bf16.msra.mxu0 %v7936_v26  ;;  %7952 = vmatpush.bf16.msra.mxu2 %v7936_v26 }
0x1292   : > { %v6087_v43 = vpack.c.bf16 %v6079_v48, %v6078_v56 }
0x1294   : > { %6189 = vmatmul.bf16.gmra.mxu3 %v6087_v43 }
0x1295   : > { %6273 = vmatpush.bf16.msra.mxu0 %v7935_v2  ;;  %7953 = vmatpush.bf16.msra.mxu2 %v7935_v2 }
0x1299   : > { %6274 = vmatpush.bf16.msra.mxu0 %v7934_v18  ;;  %7954 = vmatpush.bf16.msra.mxu2 %v7934_v18 }
0x129d   : > { %6275 = vmatpush.bf16.msra.mxu0 %v7933_v63  ;;  %7955 = vmatpush.bf16.msra.mxu2 %v7933_v63 }
0x12a1   : > { %6276 = vmatpush.bf16.msra.mxu0 %v7932_v45  ;;  %7956 = vmatpush.bf16.msra.mxu2 %v7932_v45 }
0x12a7   : > { %v6167_v12 = vpop.f32.mrf.mxu3 }
0x12af   : > { %v6168_v38 = vpop.f32.mrf.mxu3 }
0x12b7   : > { %v6170_v51 = vpop.f32.mrf.mxu3 }
0x12bf   : > { %v6171_v9 = vpop.f32.mrf.mxu3 }
0x12c7   : > { %v6173_v60 = vpop.f32.mrf.mxu3 }
0x12cf   : > { %v6174_v57 = vpop.f32.mrf.mxu3 }
0x12d7   : > { %v6176_v37 = vpop.f32.mrf.mxu3 }
0x12df   : > { %v6177_v31 = vpop.f32.mrf.mxu3 }
0x12e7   : > { %v6179_v58 = vpop.f32.mrf.mxu3 }
0x12ef   : > { %v6180_v36 = vpop.f32.mrf.mxu3 }
0x12f7   : > { %v6182_v25 = vpop.f32.mrf.mxu3 }
0x12ff   : > { %v6183_v29 = vpop.f32.mrf.mxu3 }
0x1307   : > { %v6185_v24 = vpop.f32.mrf.mxu3 }
0x1308   : > { %v6186_v52 = vadd.f32 %v8145_v55, %v6185_v24 }
0x130a   : > { %v6195_v62 = vadd.f32 %v6186_v52, %v10141_v6  ;;  %v7942_v6 = vld [vmem:[#allocation20 + $0x10] sm:$0xff] }
0x130b   : > { %6367 = vmatpush.bf16.msra.mxu1 %v7942_v6  ;;  %7962 = vmatpush.bf16.msra.mxu3 %v7942_v6 }
0x130f   : > { %v6187_v35 = vpop.f32.mrf.mxu3 }
0x1310   : > { %v6188_v15 = vadd.f32 %v8145_v55, %v6187_v35 }
0x1312   : > { %v6196_v11 = vadd.f32 %v6188_v15, %v10144_v46  ;;  %v7941_v46 = vld [vmem:[#allocation20 + $0x8] sm:$0xff] }
0x1313   : > { %6368 = vmatpush.bf16.msra.mxu1 %v7941_v46  ;;  %7963 = vmatpush.bf16.msra.mxu3 %v7941_v46 }
0x1314   : > { %v6199_v49 = vpack.c.bf16 %v6196_v11, %v6195_v62 }
0x1316   : > { %6277 = vmatmul.bf16.vlgmr.msra.gmra.mxu0 %v6199_v49 }
0x1317   : > { %v6190_v22 = vpop.f32.mrf.mxu3  ;;  %6369 = vmatpush.bf16.msra.mxu1 %v7940_v1  ;;  %7964 = vmatpush.bf16.msra.mxu3 %v7940_v1 }
0x1318   : > { %v6191_v10 = vadd.f32 %v8145_v55, %v6190_v22 }
0x131a   : > { %v6197_v53 = vadd.f32 %v6191_v10, %v10151_v14  ;;  %v8146_v14 = vld [vmem:[%s10641_s11] ss:$0 sm:$0xff] }
0x131f   : > { %v6192_v7 = vpop.f32.mrf.mxu3 }
0x1320   : > { %v6193_v19 = vadd.f32 %v8145_v55, %v6192_v7 }
0x1322   : > { %v6198_v13 = vadd.f32 %v6193_v19, %v10154_v3 }
0x1324   : > { %v6200_v8 = vpack.c.bf16 %v6198_v13, %v6197_v53 }
0x1326   : > { %6282 = vmatmul.bf16.vlgmr.msra.gmra.mxu2 %v6200_v8 }
0x1393   : > { %v6278_v41 = vpop.f32.mrf.mxu0 }
0x1394   : > { %v6279_v3 = vadd.f32 %v8146_v14, %v6278_v41 }
0x1396   : > { %v6288_v54 = vmax.f32 %v6279_v3, 0.0 }
0x139b   : > { %v6280_v23 = vpop.f32.mrf.mxu0 }
0x139c   : > { %v6281_v42 = vadd.f32 %v8146_v14, %v6280_v23 }
0x139e   : > { %v6289_v21 = vmax.f32 %v6281_v42, 0.0 }
0x13a0   : > { %v6292_v5 = vpack.c.bf16 %v6289_v21, %v6288_v54 }
0x13a2   : > { %6370 = vmatmul.bf16.vlgmr.msra.gmra.mxu1 %v6292_v5 }
0x13a9   : > { %v6283_v33 = vpop.f32.mrf.mxu2 }
0x13aa   : > { %v6284_v61 = vadd.f32 %v8146_v14, %v6283_v33 }
0x13ac   : > { %v6290_v47 = vmax.f32 %v6284_v61, 0.0 }
0x13b1   : > { %v6285_v34 = vpop.f32.mrf.mxu2 }
0x13b2   : > { %v6286_v40 = vadd.f32 %v8146_v14, %v6285_v34 }
0x13b4   : > { %v6291_v44 = vmax.f32 %v6286_v40, 0.0 }
0x13b6   : > { %v6293_v20 = vpack.c.bf16 %v6291_v44, %v6290_v47 }
0x13b8   : > { %6375 = vmatmul.bf16.vlgmr.msra.gmra.mxu3 %v6293_v20 }
0x141f   : > { %v6371_v32 = vpop.f32.mrf.mxu1 }
0x1420   : > { %v6372_v39 = vadd.f32 %v8147_v4, %v6371_v32 }
0x1422   : > { %6381 = vst [vmem:[%s790_s1] sm:$0xff] %v6372_v39 }
0x1427   : > { %v6373_v56 = vpop.f32.mrf.mxu1 }
0x1428   : > { %v6374_v48 = vadd.f32 %v8147_v4, %v6373_v56 }
0x142a   : > { %6382 = vst [vmem:[%s790_s1 + $0x8] sm:$0xff] %v6374_v48 }
0x143b   : > { %v6376_v43 = vpop.f32.mrf.mxu3 }
0x143c   : > { %v6377_v12 = vadd.f32 %v8147_v4, %v6376_v43 }
0x143e   : > { %6383 = vst [vmem:[%s790_s1 + $0x10] sm:$0xff] %v6377_v12 }
0x1443   : > { %v6378_v38 = vpop.f32.mrf.mxu3 }
0x1444   : > { %v6379_v51 = vadd.f32 %v8147_v4, %v6378_v38 }
0x1446   : > { %6384 = vst [vmem:[%s790_s1 + $0x18] sm:$0xff] %v6379_v51 }
0x1447   : > { %8567 = shalt.err (!%p8564_p0)
}
0x1448   : > { %s8652_s18 = smov 128   ;;  %s8653_s17 = smov 8  }
0x1449   : > { %8005 = dma.vmem_to_hbm [thread:$0]  (%p8825_p5), %s6399_s15, 512, %s6401_s16, %s6386_s4, %s8652_s18, %s8652_s18, %s8653_s17  }
0x144a PF: > { %s10645_s30 = sld [smem:[#allocation32_spill]]  ;;  %p10647_p2 = scmp.ge.s32.totalorder %s8634_s24, 2 }
0x144c   : > { %p8046_p12 = pnand %p10647_p2, %p8829_p4 }
0x144e   : > { %p8047_p1 = pneg %p8046_p12 }
0x1450   : > { %s6415_s9 = sand.u32 1, %s10645_s30  }
0x1451   : > { %s6416_s1 = scalar_lea.sflag [#allocation4], %s6415_s9 }
0x1452   : > { %8617 = dma.done.wait (%p8047_p1), %s6416_s1, 512  }
0x1453   : > { %8619 = vsyncadd (%p8047_p1), %s6416_s1, 4294966784  ;;  %s10648_s24 = sld [smem:[#allocation33_spill]]  ;;  %s10650_s21 = smov %s8626_s22 }
0x1454   : > { %s10649_s7 = sld [smem:[#allocation34_spill]]  ;;  %s10651_s22 = smov %s8630_s23 }
0x1459   : > { %p39_p8 = scmp.ge.s32.totalorder %s10648_s24, 4  }
0x145a   : > { %s10652_s23 = smov %s10649_s7 }
0x145b   :  { %41 = sbr.rel (!%p39_p8) target bundleno = 27 (0x1b), region = 213 }
0x1460   :  { %6422 = vsyncpa [#allocation3], 1 }
0x1461   :  { %6424 = vsyncpa [#allocation3 + $0x1], 1 }
0x1462   :  { %6425 = vsyncpa [#allocation6], 1 }
0x1463   :  { %6427 = vsyncpa [#allocation6 + $0x1], 1 }
0x1464   :  { %6428 = vsyncpa [#allocation9], 1 }
0x1465   :  { %6430 = vsyncpa [#allocation9 + $0x1], 1 }
0x1466   :  { %6431 = vsyncpa [#allocation12], 1 }
0x1467   :  { %6432 = vsyncpa [#allocation15], 1 }
0x1468   :  { %6433 = vsyncpa [#allocation18], 1 }
0x1469   :  { %6434 = vsyncpa [#allocation21], 1 }
0x146a   :  { %6435 = vsyncpa [#allocation4], 1 }
0x146b   :  { %6437 = vsyncpa [#allocation4 + $0x1], 1 }

</bundles_post_ra>
